<compile_context>
chip_gen: v7x
topology: tpu7x:2x2x1
jax: 0.10.0
libtpu: 0.0.40
codegen_flags: <defaults>
</compile_context>

<pallas_src>
import functools

import jax
import jax.numpy as jnp
from jax.experimental import pallas as pl
from jax.experimental.pallas import tpu as pltpu


def attention_kernel(hdec_ref, henc_ref, mask_ref,
                     wenc_ref, benc_ref, wdec_ref, bdec_ref,
                     res_ref, prob_ref, *, compute_dtype):
    # Per-tile shapes:
    #   hdec (TB, ddec)  henc (TB, S, denc)  mask (TB, S)
    #   wenc (datt, denc) [PyTorch W_enc layout]   benc (1, datt)
    #   wdec (ddec, datt) [pre-transposed]         bdec (1, datt)
    he_f32 = henc_ref[...].astype(jnp.float32)                      # (TB, S, denc)

    # Decoder projection on the MXU (bf16 inputs, f32 accumulation).
    wh_dec = (jnp.dot(hdec_ref[...].astype(compute_dtype),
                      wdec_ref[...].astype(compute_dtype),
                      preferred_element_type=jnp.float32)
              + bdec_ref[...].astype(jnp.float32))                  # (TB, datt)

    # Fold W_enc into the (tiny) decoder side instead of projecting h_enc:
    #   u[b,:] = W_enc^T wh_dec[b,:]   (TB, denc)
    #   c[b]   = b_enc . wh_dec[b,:]   (TB, 1)
    u = jnp.dot(wh_dec.astype(compute_dtype),
                wenc_ref[...].astype(compute_dtype),
                preferred_element_type=jnp.float32)                 # (TB, denc)
    c = jnp.sum(wh_dec * benc_ref[...].astype(jnp.float32),
                axis=-1, keepdims=True)                             # (TB, 1)

    # Lane-dense (TB, S) scores: f32 VPU multiply + lane reduction over denc.
    scores = jnp.sum(he_f32 * u[:, None, :], axis=-1)               # (TB, S)
    scores = scores + c + mask_ref[...].astype(jnp.float32)

    # Softmax over encoder time (f32 throughout; exp goes to the EUP).
    m = jnp.max(scores, axis=-1, keepdims=True)
    p = jnp.exp(scores - m)
    probs = p / jnp.sum(p, axis=-1, keepdims=True)                  # (TB, S)

    # context[b,:] = sum_s prob[b,s] * h_enc[b,s,:]
    ctx = jnp.einsum('bks,bsd->bkd',
                     probs[:, None, :].astype(compute_dtype),
                     he_f32.astype(compute_dtype),
                     preferred_element_type=jnp.float32)            # (TB, 1, denc)

    # TODO(synk): nn.Dropout on att_result omitted (p=0.0 default => identity);
    #             a training variant would use pltpu.prng_seed/prng_random_bits.
    res_ref[...] = ctx[:, 0, :].astype(res_ref.dtype)
    prob_ref[...] = probs.astype(prob_ref.dtype)


def _pick_block_b(batch):
    if batch <= 8:
        return batch
    for cand in (128, 64, 32, 16, 8):
        if cand <= batch and batch % cand == 0:
            return cand
    return batch  # no multiple-of-8 divisor: fall back to one full-batch block


def attention_forward(h_dec, h_enc, params, h_enc_mask=None, *,
                      block_b=None, compute_dtype=jnp.bfloat16):
    """h_dec: (B, ddec); h_enc: (S, B, denc); h_enc_mask: optional (S, B).

    Returns (att_result (B, denc), att_prob (B, S)).
    Implements the default forward path (topk=1, flatten_enc_states=False).
    """
    B, ddec = h_dec.shape
    S, B2, denc = h_enc.shape
    assert B2 == B, "h_enc must be (seq, batch, denc)"
    wenc_t, b_enc, wdec_t, b_dec = params
    datt = wenc_t.shape[1]

    if block_b is None:
        block_b = _pick_block_b(B)
    assert B % block_b == 0, "block_b must divide the batch size"
    grid = (B // block_b,)

    # Layout plumbing in plain XLA: batch-major activations so the kernel sees
    # lane-dense (block_b, S, denc) / (block_b, S) tiles and outputs.
    h_enc_bsd = jnp.transpose(h_enc, (1, 0, 2))                     # (B, S, denc)
    if h_enc_mask is None:
        mask_bs = jnp.zeros((B, S), jnp.float32)
    else:
        mask_bs = jnp.transpose(h_enc_mask, (1, 0)).astype(jnp.float32)
    wenc = jnp.transpose(wenc_t, (1, 0))                            # (datt, denc)

    kernel = functools.partial(attention_kernel, compute_dtype=compute_dtype)

    def _nbytes(a):
        return a.size * a.dtype.itemsize

    cost = pl.CostEstimate(
        flops=int(2 * B * ddec * datt + 2 * B * datt * denc
                  + 4 * B * S * denc + 4 * B * S),
        transcendentals=int(B * S),
        bytes_accessed=int(_nbytes(h_dec) + _nbytes(h_enc_bsd) + _nbytes(mask_bs)
                           + _nbytes(wenc) + _nbytes(b_enc)
                           + _nbytes(wdec_t) + _nbytes(b_dec)
                           + B * denc * 4 + B * S * 4),
    )

    grid_spec = pltpu.PrefetchScalarGridSpec(
        num_scalar_prefetch=0,
        grid=grid,
        in_specs=[
            pl.BlockSpec((block_b, ddec), lambda i: (i, 0)),        # h_dec
            pl.BlockSpec((block_b, S, denc), lambda i: (i, 0, 0)),  # h_enc (B,S,D)
            pl.BlockSpec((block_b, S), lambda i: (i, 0)),           # mask
            pl.BlockSpec((datt, denc), lambda i: (0, 0)),           # W_enc (out,in)
            pl.BlockSpec((1, datt), lambda i: (0, 0)),              # b_enc
            pl.BlockSpec((ddec, datt), lambda i: (0, 0)),           # W_dec^T
            pl.BlockSpec((1, datt), lambda i: (0, 0)),              # b_dec
        ],
        out_specs=(
            pl.BlockSpec((block_b, denc), lambda i: (i, 0)),        # att_result
            pl.BlockSpec((block_b, S), lambda i: (i, 0)),           # att_prob
        ),
    )

    att_result, att_prob = pl.pallas_call(
        kernel,
        out_shape=(jax.ShapeDtypeStruct((B, denc), h_enc.dtype),
                   jax.ShapeDtypeStruct((B, S), jnp.float32)),
        grid_spec=grid_spec,
        compiler_params=pltpu.CompilerParams(
            dimension_semantics=("parallel",)),
        cost_estimate=cost,
    )(h_dec, h_enc_bsd, mask_bs, wenc, b_enc, wdec_t, b_dec)
    return att_result, att_prob


def init_attention_params(key, denc, ddec, datt, init_range=0.1,
                          dtype=jnp.float32):
    """Mirrors Attention.init_weights('uniform'): W ~ U(-r, r), b = 0.
    nn.Linear stores weight as (out, in) and computes x @ W.T; we store the
    already-transposed (in, out) matrices."""
    k_enc, k_dec = jax.random.split(key)
    wenc_t = jax.random.uniform(k_enc, (denc, datt), dtype, -init_range, init_range)
    wdec_t = jax.random.uniform(k_dec, (ddec, datt), dtype, -init_range, init_range)
    b_enc = jnp.zeros((1, datt), dtype)
    b_dec = jnp.zeros((1, datt), dtype)
    return (wenc_t, b_enc, wdec_t, b_dec)


def attention_reference(h_dec, h_enc, params, h_enc_mask=None):
    """Pure-JAX f32 reference of the module's default forward path."""
    wenc_t, b_enc, wdec_t, b_dec = params
    wh_enc = jnp.einsum('sbd,da->bsa', h_enc, wenc_t) + b_enc       # (B,S,datt)
    wh_dec = h_dec @ wdec_t + b_dec                                  # (B,datt)
    scores = jnp.einsum('bsa,ba->bs', wh_enc, wh_dec)                # (B,S)
    if h_enc_mask is not None:
        scores = scores + h_enc_mask.T
    probs = jax.nn.softmax(scores, axis=1)
    ctx = jnp.einsum('bs,sbd->bd', probs, h_enc)                     # (B,denc)
    return ctx, probs


def attention_reference_mirrored(h_dec, h_enc, params, h_enc_mask,
                                 compute_dtype):
    """Reference applying the exact same casts and reassociated compute order
    as the kernel (tight numerical check of the bf16-matmul-input path)."""
    wenc_t, b_enc, wdec_t, b_dec = params
    he = jnp.transpose(h_enc, (1, 0, 2)).astype(jnp.float32)         # (B,S,denc)
    wh_dec = (jnp.dot(h_dec.astype(compute_dtype),
                      wdec_t.astype(compute_dtype),
                      preferred_element_type=jnp.float32)
              + b_dec.astype(jnp.float32))                           # (B,datt)
    u = jnp.dot(wh_dec.astype(compute_dtype),
                wenc_t.T.astype(compute_dtype),
                preferred_element_type=jnp.float32)                  # (B,denc)
    c = jnp.sum(wh_dec * b_enc.astype(jnp.float32), axis=-1, keepdims=True)
    scores = jnp.sum(he * u[:, None, :], axis=-1) + c
    if h_enc_mask is not None:
        scores = scores + h_enc_mask.T.astype(jnp.float32)
    m = jnp.max(scores, axis=-1, keepdims=True)
    p = jnp.exp(scores - m)
    probs = p / jnp.sum(p, axis=-1, keepdims=True)
    ctx = jnp.einsum('bs,bsd->bd', probs.astype(compute_dtype),
                     he.astype(compute_dtype),
                     preferred_element_type=jnp.float32)
    return ctx, probs


if __name__ == "__main__":
    B, S = 16, 128
    denc, ddec, datt = 64, 48, 64

    key = jax.random.PRNGKey(0)
    k_dec, k_enc, k_mask, k_par = jax.random.split(key, 4)

    h_dec = jax.random.normal(k_dec, (B, ddec), jnp.float32)
    h_enc = jax.random.normal(k_enc, (S, B, denc), jnp.float32)
    # Additive mask in the module's (S, B) layout: ~25% positions masked out.
    keep = jax.random.bernoulli(k_mask, 0.75, (S, B))
    h_enc_mask = jnp.where(keep, 0.0, -1e9).astype(jnp.float32)
    params = init_attention_params(k_par, denc, ddec, datt)

    # Kernel (bf16 matmul inputs, f32 accumulation/softmax), batch grid of 2.
    att_result, att_prob = attention_forward(
        h_dec, h_enc, params, h_enc_mask,
        block_b=8, compute_dtype=jnp.bfloat16)
    att_result, att_prob = jax.block_until_ready((att_result, att_prob))

    assert att_result.shape == (B, denc)
    assert att_prob.shape == (B, S)

    # 1) Tight check against a reference that mirrors the kernel's casts/order.
    mres, mprob = attention_reference_mirrored(
        h_dec, h_enc, params, h_enc_mask, jnp.bfloat16)
    assert jnp.allclose(att_result, mres, atol=2e-3, rtol=2e-3)
    assert jnp.allclose(att_prob, mprob, atol=2e-3, rtol=2e-3)

    # 2) Loose check against the pure-f32 module semantics.
    fres, fprob = attention_reference(h_dec, h_enc, params, h_enc_mask)
    assert jnp.allclose(att_result, fres, atol=7.5e-2, rtol=5e-2)
    assert jnp.allclose(att_prob, fprob, atol=2e-2, rtol=5e-2)

    print("KERNEL_OK")
</pallas_src>

<mosaic_0001>
module attributes {stable_mosaic.version = 11 : i64} {
  func.func @attention_kernel(%arg0: i32, %arg1: memref<8x48xf32, #tpu.memory_space<vmem>>, %arg2: memref<8x128x64xf32, #tpu.memory_space<vmem>>, %arg3: memref<8x128xf32, #tpu.memory_space<vmem>>, %arg4: memref<64x64xf32, #tpu.memory_space<vmem>>, %arg5: memref<1x64xf32, #tpu.memory_space<vmem>>, %arg6: memref<48x64xf32, #tpu.memory_space<vmem>>, %arg7: memref<1x64xf32, #tpu.memory_space<vmem>>, %arg8: memref<8x64xf32, #tpu.memory_space<vmem>>, %arg9: memref<8x128xf32, #tpu.memory_space<vmem>>) attributes {dimension_semantics = [#tpu.dimension_semantics<parallel>], iteration_bounds = array<i64: 2>, scalar_prefetch = 0 : i64, scratch_operands = 0 : i64, tpu.core_type = #tpu.core_type<tc>, window_params = [{transform_indices = @transform_0, window_bounds = array<i64: 8, 48>}, {transform_indices = @transform_1, window_bounds = array<i64: 8, 128, 64>}, {transform_indices = @transform_2, window_bounds = array<i64: 8, 128>}, {pipeline_mode = #tpu.pipeline_mode<synchronous>, transform_indices = @transform_3, window_bounds = array<i64: 64, 64>}, {pipeline_mode = #tpu.pipeline_mode<synchronous>, transform_indices = @transform_4, window_bounds = array<i64: 1, 64>}, {pipeline_mode = #tpu.pipeline_mode<synchronous>, transform_indices = @transform_5, window_bounds = array<i64: 48, 64>}, {pipeline_mode = #tpu.pipeline_mode<synchronous>, transform_indices = @transform_6, window_bounds = array<i64: 1, 64>}, {transform_indices = @transform_7, window_bounds = array<i64: 8, 64>}, {transform_indices = @transform_8, window_bounds = array<i64: 8, 128>}]} {
    %c0 = arith.constant 0 : index
    %c0_0 = arith.constant 0 : index
    %c0_1 = arith.constant 0 : index
    %0 = vector.load %arg2[%c0, %c0_0, %c0_1] : memref<8x128x64xf32, #tpu.memory_space<vmem>>, vector<8x128x64xf32>
    %c0_2 = arith.constant 0 : index
    %c0_3 = arith.constant 0 : index
    %1 = vector.load %arg1[%c0_2, %c0_3] : memref<8x48xf32, #tpu.memory_space<vmem>>, vector<8x48xf32>
    %2 = arith.truncf %1 : vector<8x48xf32> to vector<8x48xbf16>
    %c0_4 = arith.constant 0 : index
    %c0_5 = arith.constant 0 : index
    %3 = vector.load %arg6[%c0_4, %c0_5] : memref<48x64xf32, #tpu.memory_space<vmem>>, vector<48x64xf32>
    %4 = arith.truncf %3 : vector<48x64xf32> to vector<48x64xbf16>
    %cst = arith.constant dense<0.000000e+00> : vector<8x64xf32>
    %5 = tpu.matmul %2, %4, %cst {dimension_numbers = #tpu.dot_dimension_numbers<[1], [0], [0], [1], [0, 0, 1, 1], [], []>} : vector<8x48xbf16>, vector<48x64xbf16>, vector<8x64xf32> -> vector<8x64xf32>
    %c0_6 = arith.constant 0 : index
    %c0_7 = arith.constant 0 : index
    %6 = vector.load %arg7[%c0_6, %c0_7] : memref<1x64xf32, #tpu.memory_space<vmem>>, vector<1x64xf32>
    %7 = vector.broadcast %6 : vector<1x64xf32> to vector<8x64xf32>
    %8 = arith.addf %5, %7 : vector<8x64xf32>
    %9 = arith.truncf %8 : vector<8x64xf32> to vector<8x64xbf16>
    %c0_8 = arith.constant 0 : index
    %c0_9 = arith.constant 0 : index
    %10 = vector.load %arg4[%c0_8, %c0_9] : memref<64x64xf32, #tpu.memory_space<vmem>>, vector<64x64xf32>
    %11 = arith.truncf %10 : vector<64x64xf32> to vector<64x64xbf16>
    %cst_10 = arith.constant dense<0.000000e+00> : vector<8x64xf32>
    %12 = tpu.matmul %9, %11, %cst_10 {dimension_numbers = #tpu.dot_dimension_numbers<[1], [0], [0], [1], [0, 0, 1, 1], [], []>} : vector<8x64xbf16>, vector<64x64xbf16>, vector<8x64xf32> -> vector<8x64xf32>
    %c0_11 = arith.constant 0 : index
    %c0_12 = arith.constant 0 : index
    %13 = vector.load %arg5[%c0_11, %c0_12] : memref<1x64xf32, #tpu.memory_space<vmem>>, vector<1x64xf32>
    %14 = vector.broadcast %13 : vector<1x64xf32> to vector<8x64xf32>
    %15 = arith.mulf %8, %14 : vector<8x64xf32>
    %cst_13 = arith.constant dense<0.000000e+00> : vector<8xf32>
    %16 = vector.multi_reduction <add>, %15, %cst_13 [1] : vector<8x64xf32> to vector<8xf32>
    %17 = vector.shape_cast %16 : vector<8xf32> to vector<8x1xf32>
    %18 = vector.shape_cast %12 : vector<8x64xf32> to vector<8x1x64xf32>
    %19 = vector.broadcast %18 : vector<8x1x64xf32> to vector<8x128x64xf32>
    %20 = arith.mulf %0, %19 : vector<8x128x64xf32>
    %cst_14 = arith.constant dense<0.000000e+00> : vector<8x128xf32>
    %21 = vector.multi_reduction <add>, %20, %cst_14 [2] : vector<8x128x64xf32> to vector<8x128xf32>
    %22 = vector.broadcast %17 : vector<8x1xf32> to vector<8x128xf32>
    %23 = arith.addf %21, %22 : vector<8x128xf32>
    %c0_15 = arith.constant 0 : index
    %c0_16 = arith.constant 0 : index
    %24 = vector.load %arg3[%c0_15, %c0_16] : memref<8x128xf32, #tpu.memory_space<vmem>>, vector<8x128xf32>
    %25 = arith.addf %23, %24 : vector<8x128xf32>
    %cst_17 = arith.constant dense<0xFF800000> : vector<8xf32>
    %26 = vector.multi_reduction <maximumf>, %25, %cst_17 [1] : vector<8x128xf32> to vector<8xf32>
    %27 = vector.shape_cast %26 : vector<8xf32> to vector<8x1xf32>
    %28 = vector.broadcast %27 : vector<8x1xf32> to vector<8x128xf32>
    %29 = arith.subf %25, %28 : vector<8x128xf32>
    %30 = math.exp %29 : vector<8x128xf32>
    %cst_18 = arith.constant dense<0.000000e+00> : vector<8xf32>
    %31 = vector.multi_reduction <add>, %30, %cst_18 [1] : vector<8x128xf32> to vector<8xf32>
    %32 = vector.shape_cast %31 : vector<8xf32> to vector<8x1xf32>
    %33 = vector.broadcast %32 : vector<8x1xf32> to vector<8x128xf32>
    %34 = arith.divf %30, %33 : vector<8x128xf32>
    %35 = vector.shape_cast %34 : vector<8x128xf32> to vector<8x1x128xf32>
    %36 = arith.truncf %35 : vector<8x1x128xf32> to vector<8x1x128xbf16>
    %37 = arith.truncf %0 : vector<8x128x64xf32> to vector<8x128x64xbf16>
    "tpu.trace_start"() <{level = 10 : i32, message = "bks,bsd->bkd"}> : () -> ()
    %cst_19 = arith.constant dense<0.000000e+00> : vector<8x1x64xf32>
    %38 = tpu.matmul %36, %37, %cst_19 {dimension_numbers = #tpu.dot_dimension_numbers<[2], [1], [1], [2], [0, 0, 0, 1, 1, 2], [0], [0]>} : vector<8x1x128xbf16>, vector<8x128x64xbf16>, vector<8x1x64xf32> -> vector<8x1x64xf32>
    "tpu.trace_stop"() : () -> ()
    %39 = vector.shape_cast %38 : vector<8x1x64xf32> to vector<8x64xf32>
    %c0_20 = arith.constant 0 : index
    %c0_21 = arith.constant 0 : index
    %40 = vector.load %arg8[%c0_20, %c0_21] : memref<8x64xf32, #tpu.memory_space<vmem>>, vector<8x64xf32>
    tpu.vector_store %arg8[%c0_20, %c0_21], %39 {strides = array<i32>} : memref<8x64xf32, #tpu.memory_space<vmem>>, vector<8x64xf32>,
    %c0_22 = arith.constant 0 : index
    %c0_23 = arith.constant 0 : index
    %41 = vector.load %arg9[%c0_22, %c0_23] : memref<8x128xf32, #tpu.memory_space<vmem>>, vector<8x128xf32>
    tpu.vector_store %arg9[%c0_22, %c0_23], %34 {strides = array<i32>} : memref<8x128xf32, #tpu.memory_space<vmem>>, vector<8x128xf32>,
    return
  }
  func.func @transform_0(%arg0: i32) -> (i32, i32) {
    %c0_i32 = arith.constant 0 : i32
    %c0_i32_0 = arith.constant 0 : i32
    return %arg0, %c0_i32 : i32, i32
  }
  func.func @transform_1(%arg0: i32) -> (i32, i32, i32) {
    %c0_i32 = arith.constant 0 : i32
    %c0_i32_0 = arith.constant 0 : i32
    %c0_i32_1 = arith.constant 0 : i32
    return %arg0, %c0_i32, %c0_i32_0 : i32, i32, i32
  }
  func.func @transform_2(%arg0: i32) -> (i32, i32) {
    %c0_i32 = arith.constant 0 : i32
    %c0_i32_0 = arith.constant 0 : i32
    return %arg0, %c0_i32 : i32, i32
  }
  func.func @transform_3(%arg0: i32) -> (i32, i32) {
    %c0_i32 = arith.constant 0 : i32
    %c0_i32_0 = arith.constant 0 : i32
    %c0_i32_1 = arith.constant 0 : i32
    return %c0_i32, %c0_i32_0 : i32, i32
  }
  func.func @transform_4(%arg0: i32) -> (i32, i32) {
    %c0_i32 = arith.constant 0 : i32
    %c0_i32_0 = arith.constant 0 : i32
    %c0_i32_1 = arith.constant 0 : i32
    return %c0_i32, %c0_i32_0 : i32, i32
  }
  func.func @transform_5(%arg0: i32) -> (i32, i32) {
    %c0_i32 = arith.constant 0 : i32
    %c0_i32_0 = arith.constant 0 : i32
    %c0_i32_1 = arith.constant 0 : i32
    return %c0_i32, %c0_i32_0 : i32, i32
  }
  func.func @transform_6(%arg0: i32) -> (i32, i32) {
    %c0_i32 = arith.constant 0 : i32
    %c0_i32_0 = arith.constant 0 : i32
    %c0_i32_1 = arith.constant 0 : i32
    return %c0_i32, %c0_i32_0 : i32, i32
  }
  func.func @transform_7(%arg0: i32) -> (i32, i32) {
    %c0_i32 = arith.constant 0 : i32
    %c0_i32_0 = arith.constant 0 : i32
    return %arg0, %c0_i32 : i32, i32
  }
  func.func @transform_8(%arg0: i32) -> (i32, i32) {
    %c0_i32 = arith.constant 0 : i32
    %c0_i32_0 = arith.constant 0 : i32
    return %arg0, %c0_i32 : i32, i32
  }
}

</mosaic_0001>

<bundles_post_ra>
// kernel: tpu_custom_call.1
= control target key start
LH: loop header
LB: loop body
LE: loop exit
PB: predicated region body
PF: predicated region fallthrough
CT: control target
= control target key end

     0   :  { %14 = vsyncpa [#allocation3], 0  ;;  %s15440_s0 = inlined_call_operand.vmem [shape: f32[16,48], index: 0, kind: input, shape index: {}]   ;;  %s15441_s1 = inlined_call_operand.vmem [shape: f32[16,128,64], index: 1, kind: input, shape index: {}]   ;;  %s15442_s2 = inlined_call_operand.vmem [shape: f32[16,128], index: 2, kind: input, shape index: {}]   ;;  %s15443_s3 = inlined_call_operand.vmem [shape: f32[64,64], index: 3, kind: input, shape index: {}]   ;;  %s15444_s4 = inlined_call_operand.vmem [shape: f32[1,64], index: 4, kind: input, shape index: {}]   ;;  %s15445_s5 = inlined_call_operand.vmem [shape: f32[48,64], index: 5, kind: input, shape index: {}]   ;;  %s15446_s6 = inlined_call_operand.vmem [shape: f32[1,64], index: 6, kind: input, shape index: {}]   ;;  %s15447_s7 = inlined_call_operand.hbm [shape: f32[16,64], index: 7, kind: output, shape index: {0}]   ;;  %s15448_s8 = inlined_call_operand.hbm [shape: f32[16,128], index: 8, kind: output, shape index: {1}]  }
   0x1   :  { %16 = vsyncpa [#allocation3 + $0x1], 0 }
   0x2   :  { %17 = vsyncpa [#allocation5], 0 }
   0x3   :  { %19 = vsyncpa [#allocation5 + $0x1], 0  ;;  %s8888_s27 = smov 0   ;;  %s8890_s28 = smov 0  }
   0x4   :  { %s8892_s29 = smov 0   ;;  %s8894_s30 = smov 0  }
   0x5 LB: > { %s8909_s9 = sadd.s32 4294967295, %s8835_s30   ;;  %s8123_s10 = sadd.s32 4294967294, %s8835_s30   ;;  %s8835_s30 = sphi %s8894_s30, %s17726_s30   ;;  %s8831_s29 = sphi %s8892_s29, %s17725_s29   ;;  %s8827_s28 = sphi %s8890_s28, %s17724_s28   ;;  %s8823_s27 = sphi %s8888_s27, %s17723_s27  }
   0x6   : > { %s8913_s11 = sadd.s32 1, %s8835_s30   ;;  %s194_s12 = sadd.s32 1, %s8831_s29 }
   0x7   : > { %s191_s13 = ssub.s32 %s8835_s30, %s8913_s11  ;;  %p204_p0 = scmp.ne.s32.totalorder %s8831_s29, %s8827_s28 }
   0x8   : > { %p192_p1 = scmp.eq.s32.totalorder %s191_s13, 0  ;;  %p205_p2 = scmp.eq.s32.totalorder %s8909_s9, 1 }
   0x9   : > { %p210_p3 = scmp.ne.s32.totalorder %s8827_s28, %s8823_s27  ;;  %p211_p4 = scmp.eq.s32.totalorder %s8123_s10, 1 }
   0xa   : > { %s8924_s14 = scalar_select %p192_p1, %s8831_s29, %s194_s12  }
   0xb   : > { %p8926_p5 = por %p205_p2, %p204_p0  ;;  %p8930_p6 = por %p211_p4, %p210_p3 }
   0xc   : > { %p8126_p7 = scmp.ge.s32.totalorder %s8835_s30, 1  ;;  %p291_p8 = scmp.lt.s32.totalorder %s8835_s30, 3 }
   0xe   : > { %p292_p9 = pnand %p8126_p7, %p291_p8 }
  0x10   : > { %295 = sbr.rel (%p292_p9) target bundleno = 2619 (0xa3b), region = 48 }
  0x17   : > { %v485_v0 = vld [vmem:[%s15445_s5] sm:$0xff]  ;;  %v486_v1 = vld [vmem:[%s15445_s5 + $0x8] sm:$0xff]  ;;  %v487_v2 = vld [vmem:[%s15445_s5 + $0x10] sm:$0xff]  ;;  %p339_p10 = scmp.lt.s32.totalorder %s8909_s9, 1  ;;  %v15449_v3 = vlaneseq  ;;  %v15458_v4 = vmov 0.0   ;;  %vm15706_vm0 = vmmov 0  }
  0x18   : > { %8226 = vmatprep.subr.bf16.mxu0 %v15458_v4  ;;  %v491_v5 = vpack.c.bf16 %v486_v1, %v485_v0  ;;  %v488_v6 = vld [vmem:[%s15445_s5 + $0x18] sm:$0xff]  ;;  %8232 = vmatprep.mubr.msk.bf16.mxu0 %vm15706_vm0, %v15458_v4  ;;  %v489_v9 = vld [vmem:[%s15445_s5 + $0x20] sm:$0xff]  ;;  %v490_v10 = vld [vmem:[%s15445_s5 + $0x28] sm:$0xff]  ;;  %vm501_vm1 = vcmask 392192   ;;  %vm15705_vm2 = vcmask 523264   ;;  %s8130_s19 = sshll.u32 %s8909_s9, 3 }
  0x19   : > { %s340_s25 = scalar_select %p339_p10, %s8909_s9, 1  ;;  %v8954_v7 = vshrl.u32 %v15449_v3, 7  ;;  %8236 = vmatprep.subr.bf16.mxu1 %v15458_v4  ;;  %8244 = vmatprep.mubr.msk.bf16.mxu1 %vm15706_vm0, %v15458_v4  ;;  %v492_v8 = vpack.c.bf16 %v488_v6, %v487_v2  ;;  %v493_v13 = vpack.c.bf16 %v490_v10, %v489_v9  ;;  %v546_v19 = vld [vmem:[%s15443_s3] sm:$0xff]  ;;  %v547_v20 = vld [vmem:[%s15443_s3 + $0x8] sm:$0xff]  ;;  %v548_v21 = vld [vmem:[%s15443_s3 + $0x10] sm:$0xff]  ;;  %vm2701_vm3 = vcmask 130112  }
  0x1a   : > { %8227 = vmatpush3.bf16.msra.mxu0 %v491_v5  ;;  %v554_v22 = vpack.c.bf16 %v547_v20, %v546_v19  ;;  %v549_v23 = vld [vmem:[%s15443_s3 + $0x18] sm:$0xff]  ;;  %v550_v26 = vld [vmem:[%s15443_s3 + $0x20] sm:$0xff]  ;;  %v551_v27 = vld [vmem:[%s15443_s3 + $0x28] sm:$0xff]  ;;  %p344_p11 = scmp.lt.s32.totalorder %s8130_s19, 15  ;;  %vm2708_vm4 = vcmask 195712   ;;  %vm2715_vm5 = vcmask 261312  }
  0x1b   : > { %15982 = vst [vmem:[#allocation8_spill] sm:$0xff] %v8954_v7  ;;  %8228 = vmatprep.subr.bf16.mxu0 %v15458_v4  ;;  %s8129_s17 = sshll.u32 %s340_s25, 3  ;;  %v8967_v11 = vsub.s32 0, %v8954_v7  ;;  %v8987_v17 = vsub.s32 1, %v8954_v7  ;;  %v555_v24 = vpack.c.bf16 %v549_v23, %v548_v21  ;;  %v9004_v25 = vsub.s32 2, %v8954_v7  ;;  %v552_v31 = vld [vmem:[%s15443_s3 + $0x30] sm:$0xff] }
  0x1c   : > { %s342_s20 = scalar_lea.vmem %s15440_s0, %s8129_s17  ;;  %s8975_s23 = scalar_lea.vmem %s15442_s2, %s8129_s17  ;;  %8237 = vmatpush3.bf16.msra.mxu1 %v554_v22  ;;  %v556_v28 = vpack.c.bf16 %v551_v27, %v550_v26  ;;  %v9018_v30 = vsub.s32 3, %v8954_v7  ;;  %v553_v32 = vld [vmem:[%s15443_s3 + $0x38] sm:$0xff]  ;;  %v9030_v35 = vsub.s32 4, %v8954_v7  ;;  %v9035_v37 = vsub.s32 5, %v8954_v7  ;;  %v8134_v39 = vld [vmem:[%s15446_s6] ss:$0 sm:$0xff] }
  0x1d   : > { %15983 = vst [vmem:[#allocation9_spill] sm:$0xff] %v8967_v11  ;;  %v8978_v12 = vld [vmem:[%s8975_s23] sm:$0xff]  ;;  %15984 = vst [vmem:[#allocation10_spill] sm:$0xff] %v8987_v17  ;;  %8238 = vmatprep.subr.bf16.mxu1 %v15458_v4  ;;  %v557_v34 = vpack.c.bf16 %v553_v32, %v552_v31  ;;  %s17728_s19 = smov (!%p344_p11, %s8130_s19), 15  ;;  %vm15857_vm6 = vcmask 326912   ;;  %vm15708_vm7 = vcmask 392512  }
  0x1e   : > { %8229 = vmatpush3.bf16.msra.mxu0 %v492_v8  ;;  %v483_v14 = vld [vmem:[%s342_s20] sm:$0xff]  ;;  %v1389_v15 = vrot.slane %v8978_v12, %v8967_v11  ;;  %v1456_v18 = vrot.slane %v8978_v12, %v8987_v17  ;;  %15985 = vst [vmem:[#allocation11_spill] sm:$0xff] %v9004_v25  ;;  %v1523_v29 = vrot.slane %v8978_v12, %v9004_v25  ;;  %15986 = vst [vmem:[#allocation12_spill] sm:$0xff] %v9018_v30  ;;  %s8144_s20 = sshll.u32 %s17728_s19, 7  ;;  %vm15709_vm8 = vcmask 458112   ;;  %s15979_s26 = sshll.u32 %s8909_s9, 7 }
  0x1f   : > { %8230 = vmatprep.subr.bf16.mxu0 %v15458_v4  ;;  %v484_v16 = vpack.c.bf16 %v483_v14, %v483_v14  ;;  %v1590_v33 = vrot.slane %v8978_v12, %v9018_v30  ;;  %15987 = vst [vmem:[#allocation13_spill] sm:$0xff] %v9030_v35  ;;  %v1657_v36 = vrot.slane %v8978_v12, %v9030_v35  ;;  %15988 = vst [vmem:[#allocation14_spill] sm:$0xff] %v9035_v37  ;;  %v8137_v41 = vld [vmem:[%s15444_s4] ss:$0 sm:$0xff]  ;;  %s9076_s24 = scalar_lea.vmem %s15441_s1, %s8144_s20  ;;  %vm2743_vm9 = vcmask 523712   ;;  %s15283_s18 = scalar_lea.hbm %s15447_s7, %s15979_s26 }
  0x20   : > { %1395 = vbcast.lane.b32.xlu0 %v1389_v15, 264  ;;  %1391 = vbcast.lane.b32.xlu1 %v1389_v15, 256  ;;  %v9039_v38 = vrot.slane %v8978_v12, %v9035_v37  ;;  %v9079_v53 = vld [vmem:[%s9076_s24 + $0x8] sm:$0xff]  ;;  %v9082_v54 = vld [vmem:[%s9076_s24] sm:$0xff]  ;;  %v9091_v58 = vld [vmem:[%s9076_s24 + $0x10] sm:$0xff]  ;;  %vm15712_vm10 = vcmask 589312  }
  0x21   : > { %8239 = vmatpush3.bf16.msra.mxu1 %v555_v24  ;;  %v5191_v55 = vpack.c.bf16 %v9079_v53, %v9082_v54  ;;  %v9094_v59 = vld [vmem:[%s9076_s24 + $0x18] sm:$0xff]  ;;  %v9104_v63 = vld [vmem:[%s9076_s24 + $0x20] sm:$0xff]  ;;  %v9107_v0 = vld [vmem:[%s9076_s24 + $0x28] sm:$0xff]  ;;  %vm15711_vm11 = vcmask 654912   ;;  %vm15710_vm12 = vcmask 720512   ;;  %vm2771_vm13 = vcmask 786112  }
  0x22   : > { %8231 = vmatpush3.bf16.msra.mxu0 %v493_v13  ;;  %8240 = vmatprep.subr.bf16.mxu1 %v15458_v4  ;;  %15989 = vst [vmem:[#allocation15_spill] sm:$0xff] %v9039_v38  ;;  %v5192_v60 = vpack.c.bf16 %v9094_v59, %v9091_v58  ;;  %v5193_v1 = vpack.c.bf16 %v9107_v0, %v9104_v63  ;;  %v9113_v2 = vld [vmem:[%s9076_s24 + $0x30] sm:$0xff]  ;;  %v9116_v5 = vld [vmem:[%s9076_s24 + $0x38] sm:$0xff]  ;;  %v9126_v10 = vld [vmem:[%s9076_s24 + $0x40] sm:$0xff]  ;;  %vm2778_vm14 = vcmask 851712   ;;  %vm2785_vm15 = vcmask 917312  }
  0x23   : > { %8248 = vmatprep.subr.bf16.mxu0 %v15458_v4  ;;  %v5194_v6 = vpack.c.bf16 %v9116_v5, %v9113_v2  ;;  %v9129_v12 = vld [vmem:[%s9076_s24 + $0x48] sm:$0xff]  ;;  %v9148_v20 = vld [vmem:[%s9076_s24 + $0x60] sm:$0xff]  ;;  %v9161_v26 = vld [vmem:[%s9076_s24 + $0x70] sm:$0xff]  ;;  %s8841_s21 = smov [#allocation2]  }
  0x24   : > { %1411 = vbcast.lane.b32.xlu0 %v1389_v15, 296  ;;  %1399 = vbcast.lane.b32.xlu1 %v1389_v15, 272  ;;  %v5195_v13 = vpack.c.bf16 %v9129_v12, %v9126_v10  ;;  %v9151_v21 = vld [vmem:[%s9076_s24 + $0x68] sm:$0xff]  ;;  %v9164_v27 = vld [vmem:[%s9076_s24 + $0x78] sm:$0xff]  ;;  %v9247_v37 = vld [vmem:[%s9076_s24 + $0xe0] sm:$0xff]  ;;  %s8745_s22 = sshll.u32 %s8841_s21, 4  ;;  %s8746_s22 = int_to_ptr.vmem [resolvable:$false] %s8745_s22 }
  0x25   : > { %8233 = vmatmul.mubr.msk.bf16.vlgmr.msra.gmra.mrb[0].mxu0 %vm501_vm1, %v484_v16  ;;  %8241 = vmatpush3.bf16.msra.mxu1 %v556_v28  ;;  %v9139_v16 = vld [vmem:[%s9076_s24 + $0x50] sm:$0xff]  ;;  %v5197_v22 = vpack.c.bf16 %v9151_v21, %v9148_v20  ;;  %v5198_v28 = vpack.c.bf16 %v9164_v27, %v9161_v26  ;;  %v9174_v32 = vld [vmem:[%s9076_s24 + $0x88] sm:$0xff]  ;;  %v9253_v35 = vld [vmem:[%s9076_s24 + $0xf8] sm:$0xff]  ;;  %vm2792_vm1 = vcmask 982912  }
  0x26   : > { %8264 = vmatprep.mubr.msk.bf16.mxu0 %vm15706_vm0, %v15458_v4  ;;  %8242 = vmatprep.subr.bf16.mxu1 %v15458_v4  ;;  %v9244_v3 = vld [vmem:[%s9076_s24 + $0xe8] sm:$0xff]  ;;  %v9256_v30 = vld [vmem:[%s9076_s24 + $0xf0] sm:$0xff] }
  0x27   : > { %8249 = vmatpush3.bf16.msra.mxu0 %v5191_v55  ;;  %v9212_v55 = vld [vmem:[%s9076_s24 + $0xb0] sm:$0xff] }
  0x28   : > { %1419 = vbcast.lane.b32.xlu0 %v1389_v15, 312  ;;  %1403 = vbcast.lane.b32.xlu1 %v1389_v15, 280 }
  0x29   : > { %8243 = vmatpush3.bf16.msra.mxu1 %v557_v34  ;;  %8250 = vmatprep.subr.bf16.mxu0 %v15458_v4 }
  0x2a   : > { %8268 = vmatprep.subr.bf16.mxu1 %v15458_v4 }
  0x2b   : > { %8251 = vmatpush3.bf16.msra.mxu0 %v5192_v60 }
  0x2c   : > { %1427 = vbcast.lane.b32.xlu0 %v1389_v15, 328  ;;  %1407 = vbcast.lane.b32.xlu1 %v1389_v15, 288 }
  0x2d   : > { %8252 = vmatprep.subr.bf16.mxu0 %v15458_v4 }
  0x2f   : > { %8253 = vmatpush3.bf16.msra.mxu0 %v5193_v1  ;;  %v9218_v1 = vld [vmem:[%s9076_s24 + $0xc8] sm:$0xff] }
  0x30   : > { %1435 = vbcast.lane.b32.xlu0 %v1389_v15, 344  ;;  %1415 = vbcast.lane.b32.xlu1 %v1389_v15, 304 }
  0x31   : > { %8254 = vmatprep.subr.bf16.mxu0 %v15458_v4 }
  0x33   : > { %8255 = vmatpush3.bf16.msra.mxu0 %v5194_v6  ;;  %v9221_v6 = vld [vmem:[%s9076_s24 + $0xc0] sm:$0xff] }
  0x34   : > { %1443 = vbcast.lane.b32.xlu0 %v1389_v15, 360  ;;  %1423 = vbcast.lane.b32.xlu1 %v1389_v15, 320 }
  0x35   : > { %8256 = vmatprep.subr.bf16.mxu0 %v15458_v4 }
  0x37   : > { %8257 = vmatpush3.bf16.msra.mxu0 %v5195_v13  ;;  %v5203_v13 = vpack.c.bf16 %v9218_v1, %v9221_v6 }
  0x38   : > { %1451 = vbcast.lane.b32.xlu0 %v1389_v15, 376  ;;  %1431 = vbcast.lane.b32.xlu1 %v1389_v15, 336 }
  0x39   : > { %8258 = vmatprep.subr.bf16.mxu0 %v15458_v4 }
  0x3c   : > { %1462 = vbcast.lane.b32.xlu0 %v1456_v18, 264  ;;  %1439 = vbcast.lane.b32.xlu1 %v1389_v15, 352 }
  0x40   : > { %1470 = vbcast.lane.b32.xlu0 %v1456_v18, 280  ;;  %1447 = vbcast.lane.b32.xlu1 %v1389_v15, 368 }
  0x44   : > { %1478 = vbcast.lane.b32.xlu0 %v1456_v18, 296  ;;  %1458 = vbcast.lane.b32.xlu1 %v1456_v18, 256 }
  0x48   : > { %1486 = vbcast.lane.b32.xlu0 %v1456_v18, 312  ;;  %1466 = vbcast.lane.b32.xlu1 %v1456_v18, 272 }
  0x4c   : > { %1494 = vbcast.lane.b32.xlu0 %v1456_v18, 328  ;;  %1474 = vbcast.lane.b32.xlu1 %v1456_v18, 288 }
  0x50   : > { %1502 = vbcast.lane.b32.xlu0 %v1456_v18, 344  ;;  %1482 = vbcast.lane.b32.xlu1 %v1456_v18, 304 }
  0x54   : > { %1510 = vbcast.lane.b32.xlu0 %v1456_v18, 360  ;;  %1490 = vbcast.lane.b32.xlu1 %v1456_v18, 320 }
  0x58   : > { %1518 = vbcast.lane.b32.xlu0 %v1456_v18, 376  ;;  %1498 = vbcast.lane.b32.xlu1 %v1456_v18, 336 }
  0x5c   : > { %1529 = vbcast.lane.b32.xlu0 %v1523_v29, 264  ;;  %1506 = vbcast.lane.b32.xlu1 %v1456_v18, 352 }
  0x60   : > { %1537 = vbcast.lane.b32.xlu0 %v1523_v29, 280  ;;  %1514 = vbcast.lane.b32.xlu1 %v1456_v18, 368  ;;  %v9142_v18 = vld [vmem:[%s9076_s24 + $0x58] sm:$0xff] }
  0x61   : > { %v5196_v19 = vpack.c.bf16 %v9142_v18, %v9139_v16 }
  0x63   : > { %8259 = vmatpush3.bf16.msra.mxu0 %v5196_v19 }
  0x64   : > { %1545 = vbcast.lane.b32.xlu0 %v1523_v29, 296  ;;  %1525 = vbcast.lane.b32.xlu1 %v1523_v29, 256 }
  0x65   : > { %8260 = vmatprep.subr.bf16.mxu0 %v15458_v4 }
  0x67   : > { %8261 = vmatpush3.bf16.msra.mxu0 %v5197_v22 }
  0x68   : > { %1553 = vbcast.lane.b32.xlu0 %v1523_v29, 312  ;;  %1533 = vbcast.lane.b32.xlu1 %v1523_v29, 272 }
  0x69   : > { %8262 = vmatprep.subr.bf16.mxu0 %v15458_v4 }
  0x6b   : > { %8263 = vmatpush3.bf16.msra.mxu0 %v5198_v28  ;;  %v9231_v28 = vld [vmem:[%s9076_s24 + $0xd8] sm:$0xff] }
  0x6c   : > { %1561 = vbcast.lane.b32.xlu0 %v1523_v29, 328  ;;  %1541 = vbcast.lane.b32.xlu1 %v1523_v29, 288 }
  0x6d   : > { %8288 = vmatprep.subr.bf16.mxu0 %v15458_v4 }
  0x70   : > { %1569 = vbcast.lane.b32.xlu0 %v1523_v29, 344  ;;  %1549 = vbcast.lane.b32.xlu1 %v1523_v29, 304 }
  0x74   : > { %1577 = vbcast.lane.b32.xlu0 %v1523_v29, 360  ;;  %1557 = vbcast.lane.b32.xlu1 %v1523_v29, 320 }
  0x78   : > { %1585 = vbcast.lane.b32.xlu0 %v1523_v29, 376  ;;  %1565 = vbcast.lane.b32.xlu1 %v1523_v29, 336 }
  0x7c   : > { %1596 = vbcast.lane.b32.xlu0 %v1590_v33, 264  ;;  %1573 = vbcast.lane.b32.xlu1 %v1523_v29, 352 }
  0x80   : > { %1604 = vbcast.lane.b32.xlu0 %v1590_v33, 280  ;;  %1581 = vbcast.lane.b32.xlu1 %v1523_v29, 368 }
  0x84   : > { %1612 = vbcast.lane.b32.xlu0 %v1590_v33, 296  ;;  %1592 = vbcast.lane.b32.xlu1 %v1590_v33, 256 }
  0x88   : > { %1620 = vbcast.lane.b32.xlu0 %v1590_v33, 312  ;;  %1600 = vbcast.lane.b32.xlu1 %v1590_v33, 272 }
  0x8c   : > { %1628 = vbcast.lane.b32.xlu0 %v1590_v33, 328  ;;  %1608 = vbcast.lane.b32.xlu1 %v1590_v33, 288 }
  0x90   : > { %1636 = vbcast.lane.b32.xlu0 %v1590_v33, 344  ;;  %1616 = vbcast.lane.b32.xlu1 %v1590_v33, 304 }
  0x92   : > { %v9064_v49 = vpop.permute.xlu1 %1391  ;;  %v9069_v51 = vpop.permute.xlu0 %1395 }
  0x93   : > { %15990 = vst [vmem:[#allocation16_spill] sm:$0xff] %v9064_v49  ;;  %15992 = vst [vmem:[#allocation18_spill] sm:$0xff] %v9069_v51  ;;  %v9379_v49 = vld [vmem:[%s9076_s24 + $0x268] sm:$0xff] }
  0x94   : > { %1644 = vbcast.lane.b32.xlu0 %v1590_v33, 360  ;;  %1624 = vbcast.lane.b32.xlu1 %v1590_v33, 320  ;;  %16052 = vst [vmem:[#allocation78_spill] sm:$0xff] %v9379_v49 }
  0x96   : > { %v9066_v50 = vpop.permute.xlu1 %1399  ;;  %v9086_v56 = vpop.permute.xlu0 %1411 }
  0x97   : > { %15991 = vst [vmem:[#allocation17_spill] sm:$0xff] %v9066_v50  ;;  %15994 = vst [vmem:[#allocation20_spill] sm:$0xff] %v9086_v56 }
  0x98   : > { %1652 = vbcast.lane.b32.xlu0 %v1590_v33, 376  ;;  %1632 = vbcast.lane.b32.xlu1 %v1590_v33, 336 }
  0x9a   : > { %v9071_v52 = vpop.permute.xlu1 %1403  ;;  %v9099_v61 = vpop.permute.xlu0 %1419 }
  0x9b   : > { %15993 = vst [vmem:[#allocation19_spill] sm:$0xff] %v9071_v52  ;;  %15996 = vst [vmem:[#allocation22_spill] sm:$0xff] %v9099_v61 }
  0x9c   : > { %1663 = vbcast.lane.b32.xlu0 %v1657_v36, 264  ;;  %1640 = vbcast.lane.b32.xlu1 %v1590_v33, 352 }
  0x9e   : > { %v9088_v57 = vpop.permute.xlu1 %1407  ;;  %v9121_v8 = vpop.permute.xlu0 %1427 }
  0x9f   : > { %15995 = vst [vmem:[#allocation21_spill] sm:$0xff] %v9088_v57  ;;  %15998 = vst [vmem:[#allocation24_spill] sm:$0xff] %v9121_v8 }
  0xa0   : > { %1671 = vbcast.lane.b32.xlu0 %v1657_v36, 280  ;;  %1648 = vbcast.lane.b32.xlu1 %v1590_v33, 368  ;;  %v9177_v33 = vld [vmem:[%s9076_s24 + $0x80] sm:$0xff] }
  0xa1   : > { %v5199_v34 = vpack.c.bf16 %v9174_v32, %v9177_v33 }
  0xa2   : > { %v9101_v62 = vpop.permute.xlu1 %1415  ;;  %v9134_v14 = vpop.permute.xlu0 %1435 }
  0xa3   : > { %15997 = vst [vmem:[#allocation23_spill] sm:$0xff] %v9101_v62  ;;  %16000 = vst [vmem:[#allocation26_spill] sm:$0xff] %v9134_v14  ;;  %v9343_v14 = vld [vmem:[%s9076_s24 + $0x238] sm:$0xff]  ;;  %v9355_v62 = vld [vmem:[%s9076_s24 + $0x248] sm:$0xff] }
  0xa4   : > { %1679 = vbcast.lane.b32.xlu0 %v1657_v36, 296  ;;  %1659 = vbcast.lane.b32.xlu1 %v1657_v36, 256  ;;  %16042 = vst [vmem:[#allocation68_spill] sm:$0xff] %v9343_v14  ;;  %16046 = vst [vmem:[#allocation72_spill] sm:$0xff] %v9355_v62 }
  0xa6   : > { %v9123_v9 = vpop.permute.xlu1 %1423  ;;  %v9156_v23 = vpop.permute.xlu0 %1443 }
  0xa7   : > { %15999 = vst [vmem:[#allocation25_spill] sm:$0xff] %v9123_v9  ;;  %16002 = vst [vmem:[#allocation28_spill] sm:$0xff] %v9156_v23  ;;  %v9335_v23 = vld [vmem:[%s9076_s24 + $0x228] sm:$0xff]  ;;  %v9346_v9 = vld [vmem:[%s9076_s24 + $0x230] sm:$0xff] }
  0xa8   : > { %1687 = vbcast.lane.b32.xlu0 %v1657_v36, 312  ;;  %1667 = vbcast.lane.b32.xlu1 %v1657_v36, 272  ;;  %16040 = vst [vmem:[#allocation66_spill] sm:$0xff] %v9335_v23  ;;  %16043 = vst [vmem:[#allocation69_spill] sm:$0xff] %v9346_v9 }
  0xaa   : > { %v9136_v15 = vpop.permute.xlu1 %1431  ;;  %v9169_v29 = vpop.permute.xlu0 %1451 }
  0xab   : > { %16001 = vst [vmem:[#allocation27_spill] sm:$0xff] %v9136_v15  ;;  %16004 = vst [vmem:[#allocation30_spill] sm:$0xff] %v9169_v29  ;;  %v9326_v29 = vld [vmem:[%s9076_s24 + $0x210] sm:$0xff] }
  0xac   : > { %1695 = vbcast.lane.b32.xlu0 %v1657_v36, 328  ;;  %1675 = vbcast.lane.b32.xlu1 %v1657_v36, 288  ;;  %16037 = vst [vmem:[#allocation63_spill] sm:$0xff] %v9326_v29 }
  0xae   : > { %v9158_v24 = vpop.permute.xlu1 %1439 }
  0xaf   : > { %16003 = vst [vmem:[#allocation29_spill] sm:$0xff] %v9158_v24 }
  0xb0   : > { %1703 = vbcast.lane.b32.xlu0 %v1657_v36, 344  ;;  %1683 = vbcast.lane.b32.xlu1 %v1657_v36, 304 }
  0xb2   : > { %v9171_v31 = vpop.permute.xlu1 %1447 }
  0xb3   : > { %16005 = vst [vmem:[#allocation31_spill] sm:$0xff] %v9171_v31 }
  0xb4   : > { %1711 = vbcast.lane.b32.xlu0 %v1657_v36, 360  ;;  %1691 = vbcast.lane.b32.xlu1 %v1657_v36, 320 }
  0xb8   : > { %1719 = vbcast.lane.b32.xlu0 %v1657_v36, 376  ;;  %1699 = vbcast.lane.b32.xlu1 %v1657_v36, 336 }
  0xbc   : > { %1730 = vbcast.lane.b32.xlu0 %v9039_v38, 264  ;;  %1707 = vbcast.lane.b32.xlu1 %v1657_v36, 352 }
  0xc0   : > { %1738 = vbcast.lane.b32.xlu0 %v9039_v38, 280  ;;  %1715 = vbcast.lane.b32.xlu1 %v1657_v36, 368  ;;  %v9183_v36 = vld [vmem:[%s9076_s24 + $0x98] sm:$0xff] }
  0xc4   : > { %1746 = vbcast.lane.b32.xlu0 %v9039_v38, 296  ;;  %1726 = vbcast.lane.b32.xlu1 %v9039_v38, 256 }
  0xc8   : > { %1754 = vbcast.lane.b32.xlu0 %v9039_v38, 312  ;;  %1734 = vbcast.lane.b32.xlu1 %v9039_v38, 272 }
  0xcc   : > { %1762 = vbcast.lane.b32.xlu0 %v9039_v38, 328  ;;  %1742 = vbcast.lane.b32.xlu1 %v9039_v38, 288 }
  0xd0   : > { %1770 = vbcast.lane.b32.xlu0 %v9039_v38, 344  ;;  %1750 = vbcast.lane.b32.xlu1 %v9039_v38, 304 }
  0xd4   : > { %1758 = vbcast.lane.b32.xlu1 %v9039_v38, 320 }
  0xd8   : > { %1766 = vbcast.lane.b32.xlu1 %v9039_v38, 336 }
  0xdc   : > { %1774 = vbcast.lane.b32.xlu1 %v9039_v38, 352 }
  0xf8   : > { %v539_v40 = vpop.f32.mrb[0].mxu0 }
  0xf9   : > { %v540_v42 = vadd.f32 %v8134_v39, %v539_v40  ;;  %v8234_v43 = vpop.f32.mrb[1].mxu0  ;;  %v9186_v39 = vld [vmem:[%s9076_s24 + $0x90] sm:$0xff] }
  0xfa   : > { %v542_v44 = vpop.f32.mrb[2].mxu0  ;;  %v5200_v40 = vpack.c.bf16 %v9183_v36, %v9186_v39  ;;  %v9196_v43 = vld [vmem:[%s9076_s24 + $0xa8] sm:$0xff] }
  0xfb   : > { %v545_v45 = vpack.c.bf16 %v540_v42, %v540_v42  ;;  %v8235_v46 = vpop.f32.mrb[3].mxu0  ;;  %v609_v47 = vmul.f32 %v8137_v41, %v540_v42  ;;  %v9191_v41 = vpop.permute.xlu0 %1462  ;;  %v9199_v44 = vld [vmem:[%s9076_s24 + $0xa0] sm:$0xff] }
  0xfc   : > { %16006 = vst [vmem:[#allocation32_spill] sm:$0xff] %v9191_v41  ;;  %v9193_v42 = vpop.permute.xlu1 %1458  ;;  %v9314_v41 = vld [vmem:[%s9076_s24 + $0x200] sm:$0xff] }
  0xfd   : > { %8245 = vmatmul.mubr.msk.bf16.vlgmr.msra.gmra.mrb[0].mxu1 %vm15705_vm2, %v545_v45  ;;  %v610_v48 = vsel %vm15705_vm2, %v609_v47, 0.0  ;;  %16007 = vst [vmem:[#allocation33_spill] sm:$0xff] %v9193_v42  ;;  %v5201_v45 = vpack.c.bf16 %v9196_v43, %v9199_v44  ;;  %v9306_v42 = vld [vmem:[%s9076_s24 + $0x170] sm:$0xff]  ;;  %16033 = vst [vmem:[#allocation59_spill] sm:$0xff] %v9314_v41 }
  0xfe   : > { %611 = vadd.xlane.f32.xlu0 %v610_v48  ;;  %8284 = vmatprep.mubr.msk.bf16.mxu1 %vm15706_vm0, %v15458_v4  ;;  %v9209_v48 = vld [vmem:[%s9076_s24 + $0xb8] sm:$0xff]  ;;  %16031 = vst [vmem:[#allocation57_spill] sm:$0xff] %v9306_v42  ;;  %vm15713_vm0 = vcmask 1041409  }
  0xff   : > { %8269 = vmatpush3.bf16.msra.mxu1 %v5199_v34  ;;  %v9204_v46 = vpop.permute.xlu0 %1470  ;;  %v5202_v60 = vpack.c.bf16 %v9209_v48, %v9212_v55  ;;  %v9234_v34 = vld [vmem:[%s9076_s24 + $0xd0] sm:$0xff] }
 0x100   : > { %8270 = vmatprep.subr.bf16.mxu1 %v15458_v4  ;;  %16008 = vst [vmem:[#allocation34_spill] sm:$0xff] %v9204_v46  ;;  %v9206_v47 = vpop.permute.xlu1 %1466 }
 0x101   : > { %16009 = vst [vmem:[#allocation35_spill] sm:$0xff] %v9206_v47 }
 0x103   : > { %8271 = vmatpush3.bf16.msra.mxu1 %v5200_v40  ;;  %v9226_v19 = vpop.permute.xlu0 %1478  ;;  %v5204_v40 = vpack.c.bf16 %v9231_v28, %v9234_v34 }
 0x104   : > { %8272 = vmatprep.subr.bf16.mxu1 %v15458_v4  ;;  %16010 = vst [vmem:[#allocation36_spill] sm:$0xff] %v9226_v19  ;;  %v9228_v22 = vpop.permute.xlu1 %1474 }
 0x105   : > { %16011 = vst [vmem:[#allocation37_spill] sm:$0xff] %v9228_v22 }
 0x107   : > { %8273 = vmatpush3.bf16.msra.mxu1 %v5201_v45  ;;  %v9239_v45 = vpop.permute.xlu0 %1486 }
 0x108   : > { %8274 = vmatprep.subr.bf16.mxu1 %v15458_v4  ;;  %16012 = vst [vmem:[#allocation38_spill] sm:$0xff] %v9239_v45 }
 0x10b   : > { %8275 = vmatpush3.bf16.msra.mxu1 %v5202_v60  ;;  %v9241_v60 = vpop.permute.xlu1 %1482  ;;  %v9261_v25 = vpop.permute.xlu0 %1494 }
 0x10c   : > { %8276 = vmatprep.subr.bf16.mxu1 %v15458_v4  ;;  %16013 = vst [vmem:[#allocation39_spill] sm:$0xff] %v9241_v60  ;;  %16014 = vst [vmem:[#allocation40_spill] sm:$0xff] %v9261_v25 }
 0x10f   : > { %8277 = vmatpush3.bf16.msra.mxu1 %v5203_v13  ;;  %v5205_v13 = vpack.c.bf16 %v9244_v3, %v9247_v37  ;;  %v9263_v60 = vpop.permute.xlu1 %1490 }
 0x110   : > { %8278 = vmatprep.subr.bf16.mxu1 %v15458_v4  ;;  %16015 = vst [vmem:[#allocation41_spill] sm:$0xff] %v9263_v60  ;;  %v9279_v60 = vld [vmem:[%s9076_s24 + $0x158] sm:$0xff] }
 0x111   : > { %16022 = vst [vmem:[#allocation48_spill] sm:$0xff] %v9279_v60 }
 0x113   : > { %8279 = vmatpush3.bf16.msra.mxu1 %v5204_v40  ;;  %v5206_v40 = vpack.c.bf16 %v9253_v35, %v9256_v30  ;;  %v9268_v45 = vpop.permute.xlu1 %1498 }
 0x114   : > { %8280 = vmatprep.subr.bf16.mxu1 %v15458_v4  ;;  %16017 = vst [vmem:[#allocation43_spill] sm:$0xff] %v9268_v45 }
 0x117   : > { %8281 = vmatpush3.bf16.msra.mxu1 %v5205_v13  ;;  %v9266_v13 = vpop.permute.xlu0 %1502  ;;  %v9272_v19 = vpop.permute.xlu1 %1506 }
 0x118   : > { %8282 = vmatprep.subr.bf16.mxu1 %v15458_v4  ;;  %16016 = vst [vmem:[#allocation42_spill] sm:$0xff] %v9266_v13  ;;  %16019 = vst [vmem:[#allocation45_spill] sm:$0xff] %v9272_v19  ;;  %v9291_v19 = vld [vmem:[%s9076_s24 + $0x168] sm:$0xff]  ;;  %v9294_v13 = vld [vmem:[%s9076_s24 + $0x160] sm:$0xff] }
 0x119   : > { %16026 = vst [vmem:[#allocation52_spill] sm:$0xff] %v9291_v19  ;;  %16027 = vst [vmem:[#allocation53_spill] sm:$0xff] %v9294_v13 }
 0x11b   : > { %8283 = vmatpush3.bf16.msra.mxu1 %v5206_v40  ;;  %v9270_v22 = vpop.permute.xlu0 %1510  ;;  %v9276_v25 = vpop.permute.xlu1 %1514  ;;  %v9282_v40 = vld [vmem:[%s9076_s24 + $0x150] sm:$0xff] }
 0x11c   : > { %8308 = vmatprep.subr.bf16.mxu1 %v15458_v4  ;;  %16018 = vst [vmem:[#allocation44_spill] sm:$0xff] %v9270_v22  ;;  %16021 = vst [vmem:[#allocation47_spill] sm:$0xff] %v9276_v25  ;;  %v9303_v4 = vld [vmem:[%s9076_s24 + $0x178] sm:$0xff]  ;;  %v9338_v25 = vld [vmem:[%s9076_s24 + $0x220] sm:$0xff] }
 0x11d   : > { %16023 = vst [vmem:[#allocation49_spill] sm:$0xff] %v9282_v40  ;;  %16030 = vst [vmem:[#allocation56_spill] sm:$0xff] %v9303_v4 }
 0x11e   : > { %16041 = vst [vmem:[#allocation67_spill] sm:$0xff] %v9338_v25 }
 0x11f   : > { %v9274_v47 = vpop.permute.xlu0 %1518  ;;  %v9288_v22 = vpop.permute.xlu1 %1525 }
 0x120   : > { %16020 = vst [vmem:[#allocation46_spill] sm:$0xff] %v9274_v47  ;;  %16025 = vst [vmem:[#allocation51_spill] sm:$0xff] %v9288_v22 }
 0x123   : > { %v9286_v45 = vpop.permute.xlu0 %1529  ;;  %v9300_v46 = vpop.permute.xlu1 %1533 }
 0x124   : > { %16024 = vst [vmem:[#allocation50_spill] sm:$0xff] %v9286_v45  ;;  %16029 = vst [vmem:[#allocation55_spill] sm:$0xff] %v9300_v46  ;;  %v9311_v45 = vld [vmem:[%s9076_s24 + $0x208] sm:$0xff]  ;;  %v9323_v46 = vld [vmem:[%s9076_s24 + $0x218] sm:$0xff] }
 0x125   : > { %16032 = vst [vmem:[#allocation58_spill] sm:$0xff] %v9311_v45  ;;  %16036 = vst [vmem:[#allocation62_spill] sm:$0xff] %v9323_v46 }
 0x127   : > { %v9298_v47 = vpop.permute.xlu0 %1537  ;;  %v9320_v31 = vpop.permute.xlu1 %1541 }
 0x128   : > { %16028 = vst [vmem:[#allocation54_spill] sm:$0xff] %v9298_v47  ;;  %16035 = vst [vmem:[#allocation61_spill] sm:$0xff] %v9320_v31  ;;  %v9358_v31 = vld [vmem:[%s9076_s24 + $0x240] sm:$0xff] }
 0x129   : > { %16047 = vst [vmem:[#allocation73_spill] sm:$0xff] %v9358_v31 }
 0x12b   : > { %v9318_v47 = vpop.permute.xlu0 %1545  ;;  %v9332_v24 = vpop.permute.xlu1 %1549 }
 0x12c   : > { %16034 = vst [vmem:[#allocation60_spill] sm:$0xff] %v9318_v47  ;;  %16039 = vst [vmem:[#allocation65_spill] sm:$0xff] %v9332_v24  ;;  %v8839_v47 = vmov 1966171168  }
 0x12d   : > { %v616_v15 = vunpack.c.l.s4 %v8839_v47 }
 0x12f   : > { %v9330_v17 = vpop.permute.xlu0 %1553  ;;  %v9352_v24 = vpop.permute.xlu1 %1557  ;;  %v617_v8 = vunpack.c.0.s8 %v616_v15 }
 0x130   : > { %16038 = vst [vmem:[#allocation64_spill] sm:$0xff] %v9330_v17  ;;  %16045 = vst [vmem:[#allocation71_spill] sm:$0xff] %v9352_v24  ;;  %v9373_v24 = vld [vmem:[%s9076_s24 + $0x250] sm:$0xff] }
 0x131   : > { %v9363_v61 = vsub.s32 %v617_v8, %v8954_v7  ;;  %16051 = vst [vmem:[#allocation77_spill] sm:$0xff] %v9373_v24  ;;  %v9382_v8 = vld [vmem:[%s9076_s24 + $0x260] sm:$0xff] }
 0x132   : > { %16053 = vst [vmem:[#allocation79_spill] sm:$0xff] %v9382_v8 }
 0x133   : > { %v9350_v17 = vpop.permute.xlu0 %1561  ;;  %v9367_v22 = vpop.permute.xlu1 %1565 }
 0x134   : > { %16044 = vst [vmem:[#allocation70_spill] sm:$0xff] %v9350_v17  ;;  %16049 = vst [vmem:[#allocation75_spill] sm:$0xff] %v9367_v22  ;;  %v9370_v17 = vld [vmem:[%s9076_s24 + $0x258] sm:$0xff] }
 0x135   : > { %16050 = vst [vmem:[#allocation76_spill] sm:$0xff] %v9370_v17 }
 0x137   : > { %v9365_v57 = vpop.permute.xlu0 %1569  ;;  %v9392_v24 = vpop.permute.xlu1 %1573 }
 0x138   : > { %16048 = vst [vmem:[#allocation74_spill] sm:$0xff] %v9365_v57  ;;  %16055 = vst [vmem:[#allocation81_spill] sm:$0xff] %v9392_v24 }
 0x13b   : > { %v9390_v15 = vpop.permute.xlu0 %1577  ;;  %v9406_v7 = vpop.permute.xlu1 %1581 }
 0x13c   : > { %16054 = vst [vmem:[#allocation80_spill] sm:$0xff] %v9390_v15  ;;  %16057 = vst [vmem:[#allocation83_spill] sm:$0xff] %v9406_v7 }
 0x13f   : > { %v9404_v31 = vpop.permute.xlu0 %1585 }
 0x140   : > { %16056 = vst [vmem:[#allocation82_spill] sm:$0xff] %v9404_v31 }
 0x143   : > { %v9416_v7 = vpop.permute.xlu0 %1596 }
 0x144   : > { %16058 = vst [vmem:[#allocation84_spill] sm:$0xff] %v9416_v7 }
 0x1d0   : > { %v596_v56 = vpop.f32.mrb[0].mxu1 }
 0x1d1   : > { %v614_v51 = vcombine.high %v596_v56, %v596_v56  ;;  %v621_v52 = vrot.slane %v596_v56, %v9363_v61  ;;  %v8246_v50 = vpop.f32.mrb[1].mxu1 }
 0x1d2   : > { %v599_v47 = vpop.f32.mrb[2].mxu1 }
 0x1d3   : > { %v628_v57 = vrot.slane %v614_v51, %v9363_v61  ;;  %v9386_v22 = vrot.slane %v621_v52, %v9363_v61  ;;  %v8247_v38 = vpop.f32.mrb[3].mxu1 }
 0x1d5   : > { %v630_v56 = vcombine.high %v628_v57, %v628_v57  ;;  %v9395_v50 = vrot.slane %v628_v57, %v9363_v61  ;;  %v666_v47 = vrot.slane %v9386_v22, %v8967_v11 }
 0x1d7   : > { %v9400_v51 = vrot.slane %v630_v56, %v9363_v61  ;;  %v704_v17 = vmul.f32 %v666_v47, %v9079_v53  ;;  %v703_v38 = vmul.f32 %v666_v47, %v9082_v54  ;;  %v705_v57 = vmul.f32 %v666_v47, %v9091_v58 }
 0x1d8   : > { %v706_v8 = vmul.f32 %v666_v47, %v9094_v59  ;;  %v707_v54 = vmul.f32 %v666_v47, %v9104_v63  ;;  %v708_v31 = vmul.f32 %v666_v47, %v9107_v0 }
 0x1d9   : > { %v834_v24 = vsel %vm15705_vm2, %v704_v17, 0.0  ;;  %v831_v15 = vsel %vm15705_vm2, %v703_v38, 0.0  ;;  %v837_v56 = vsel %vm15705_vm2, %v705_v57, 0.0  ;;  %v9418_v17 = vpop.permute.xlu1 %1592  ;;  %v711_v57 = vmul.f32 %v666_v47, %v9126_v10 }
 0x1da   : > { %835 = vadd.xlane.f32.xlu1 %v834_v24  ;;  %832 = vadd.xlane.f32.xlu0 %v831_v15  ;;  %v840_v53 = vsel %vm15705_vm2, %v706_v8, 0.0  ;;  %16059 = vst [vmem:[#allocation85_spill] sm:$0xff] %v9418_v17  ;;  %v843_v58 = vsel %vm15705_vm2, %v707_v54, 0.0  ;;  %v846_v59 = vsel %vm15705_vm2, %v708_v31, 0.0  ;;  %v709_v24 = vmul.f32 %v666_v47, %v9113_v2  ;;  %v9424_v8 = vpop.permute.xlu0 %1604 }
 0x1db   : > { %v710_v15 = vmul.f32 %v666_v47, %v9116_v5  ;;  %16060 = vst [vmem:[#allocation86_spill] sm:$0xff] %v9424_v8  ;;  %v629_v31 = vcombine.high %v621_v52, %v621_v52  ;;  %v855_v2 = vsel %vm15705_vm2, %v711_v57, 0.0  ;;  %v714_v54 = vmul.f32 %v666_v47, %v9142_v18  ;;  %v9616_v8 = vld [vmem:[%s9076_s24 + $0x2c8] sm:$0xff] }
 0x1dc   : > { %v849_v0 = vsel %vm15705_vm2, %v709_v24, 0.0  ;;  %v715_v24 = vmul.f32 %v666_v47, %v9148_v20  ;;  %v717_v20 = vmul.f32 %v666_v47, %v9161_v26  ;;  %16100 = vst [vmem:[#allocation126_spill] sm:$0xff] %v9616_v8 }
 0x1dd   : > { %v9426_v63 = vpop.permute.xlu1 %1600  ;;  %v852_v38 = vsel %vm15705_vm2, %v710_v15, 0.0  ;;  %v9441_v10 = vrot.slane %v629_v31, %v9363_v61  ;;  %v864_v52 = vsel %vm15705_vm2, %v714_v54, 0.0  ;;  %v716_v15 = vmul.f32 %v666_v47, %v9151_v21  ;;  %v9483_v54 = vld [vmem:[%s9076_s24 + $0x180] sm:$0xff] }
 0x1de   : > { %838 = vadd.xlane.f32.xlu1 %v837_v56  ;;  %841 = vadd.xlane.f32.xlu0 %v840_v53  ;;  %16061 = vst [vmem:[#allocation87_spill] sm:$0xff] %v9426_v63  ;;  %v712_v56 = vmul.f32 %v666_v47, %v9129_v12  ;;  %v713_v53 = vmul.f32 %v666_v47, %v9139_v16  ;;  %v867_v61 = vsel %vm15705_vm2, %v715_v24, 0.0  ;;  %v873_v57 = vsel %vm15705_vm2, %v717_v20, 0.0  ;;  %v9500_v20 = vld [vmem:[%s9076_s24 + $0x1a8] sm:$0xff]  ;;  %v9589_v63 = vld [vmem:[%s9076_s24 + $0x2a0] sm:$0xff] }
 0x1df   : > { %v9449_v16 = vrot.slane %v9441_v10, %v8967_v11  ;;  %v718_v21 = vmul.f32 %v666_v47, %v9164_v27  ;;  %v9470_v47 = vld [vmem:[%s9076_s24 + $0x278] sm:$0xff]  ;;  %16071 = vst [vmem:[#allocation97_spill] sm:$0xff] %v9483_v54  ;;  %16074 = vst [vmem:[#allocation100_spill] sm:$0xff] %v9500_v20 }
 0x1e0   : > { %v858_v5 = vsel %vm15705_vm2, %v712_v56, 0.0  ;;  %v861_v12 = vsel %vm15705_vm2, %v713_v53, 0.0  ;;  %16068 = vst [vmem:[#allocation94_spill] sm:$0xff] %v9470_v47  ;;  %16095 = vst [vmem:[#allocation121_spill] sm:$0xff] %v9589_v63  ;;  %v9619_v63 = vld [vmem:[%s9076_s24 + $0x2c0] sm:$0xff] }
 0x1e1   : > { %v876_v56 = vsel %vm15705_vm2, %v718_v21, 0.0  ;;  %v720_v31 = vmul.f32 %v9449_v16, %v9174_v32  ;;  %v722_v32 = vmul.f32 %v9449_v16, %v9183_v36  ;;  %v721_v24 = vmul.f32 %v9449_v16, %v9186_v39  ;;  %v9492_v36 = vld [vmem:[%s9076_s24 + $0x198] sm:$0xff]  ;;  %v9503_v21 = vld [vmem:[%s9076_s24 + $0x1a0] sm:$0xff]  ;;  %16101 = vst [vmem:[#allocation127_spill] sm:$0xff] %v9619_v63 }
 0x1e2   : > { %844 = vadd.xlane.f32.xlu1 %v843_v58  ;;  %847 = vadd.xlane.f32.xlu0 %v846_v59  ;;  %v9436_v58 = vpop.permute.xlu0 %1612  ;;  %v9438_v59 = vpop.permute.xlu1 %1608  ;;  %16072 = vst [vmem:[#allocation98_spill] sm:$0xff] %v9492_v36  ;;  %16075 = vst [vmem:[#allocation101_spill] sm:$0xff] %v9503_v21  ;;  %v723_v39 = vmul.f32 %v9449_v16, %v9199_v44  ;;  %v725_v44 = vmul.f32 %v9449_v16, %v9212_v55 }
 0x1e3   : > { %16062 = vst [vmem:[#allocation88_spill] sm:$0xff] %v9436_v58  ;;  %16063 = vst [vmem:[#allocation89_spill] sm:$0xff] %v9438_v59  ;;  %v885_v53 = vsel %vm15705_vm2, %v721_v24, 0.0  ;;  %v9537_v24 = vld [vmem:[%s9076_s24 + $0x1d0] sm:$0xff]  ;;  %v9576_v59 = vld [vmem:[%s9076_s24 + $0x298] sm:$0xff] }
 0x1e4   : > { %16083 = vst [vmem:[#allocation109_spill] sm:$0xff] %v9537_v24  ;;  %16092 = vst [vmem:[#allocation118_spill] sm:$0xff] %v9576_v59  ;;  %v9586_v58 = vld [vmem:[%s9076_s24 + $0x2a8] sm:$0xff]  ;;  %v897_v55 = vsel %vm15705_vm2, %v725_v44, 0.0 }
 0x1e5   : > { %16094 = vst [vmem:[#allocation120_spill] sm:$0xff] %v9586_v58 }
 0x1e6   : > { %850 = vadd.xlane.f32.xlu1 %v849_v0  ;;  %853 = vadd.xlane.f32.xlu0 %v852_v38  ;;  %v9451_v18 = vpop.permute.xlu0 %1620  ;;  %v9453_v0 = vpop.permute.xlu1 %1616  ;;  %v870_v38 = vsel %vm15705_vm2, %v716_v15, 0.0  ;;  %v9529_v15 = vld [vmem:[%s9076_s24 + $0x1c0] sm:$0xff] }
 0x1e7   : > { %16064 = vst [vmem:[#allocation90_spill] sm:$0xff] %v9451_v18  ;;  %16065 = vst [vmem:[#allocation91_spill] sm:$0xff] %v9453_v0  ;;  %v9559_v0 = vld [vmem:[%s9076_s24 + $0x1f0] sm:$0xff] }
 0x1e8   : > { %16081 = vst [vmem:[#allocation107_spill] sm:$0xff] %v9529_v15  ;;  %16087 = vst [vmem:[#allocation113_spill] sm:$0xff] %v9559_v0 }
 0x1ea   : > { %856 = vadd.xlane.f32.xlu1 %v855_v2  ;;  %859 = vadd.xlane.f32.xlu0 %v858_v5  ;;  %v719_v2 = vmul.f32 %v9449_v16, %v9177_v33  ;;  %v9465_v26 = vpop.permute.xlu0 %1628  ;;  %v9467_v27 = vpop.permute.xlu1 %1624  ;;  %v9473_v5 = vld [vmem:[%s9076_s24 + $0x270] sm:$0xff]  ;;  %v9480_v33 = vld [vmem:[%s9076_s24 + $0x188] sm:$0xff] }
 0x1eb   : > { %16066 = vst [vmem:[#allocation92_spill] sm:$0xff] %v9465_v26  ;;  %16067 = vst [vmem:[#allocation93_spill] sm:$0xff] %v9467_v27  ;;  %v726_v27 = vmul.f32 %v9449_v16, %v9209_v48  ;;  %v9556_v26 = vld [vmem:[%s9076_s24 + $0x1f8] sm:$0xff] }
 0x1ec   : > { %16069 = vst [vmem:[#allocation95_spill] sm:$0xff] %v9473_v5  ;;  %16070 = vst [vmem:[#allocation96_spill] sm:$0xff] %v9480_v33 }
 0x1ed   : > { %16086 = vst [vmem:[#allocation112_spill] sm:$0xff] %v9556_v26 }
 0x1ee   : > { %862 = vadd.xlane.f32.xlu1 %v861_v12  ;;  %865 = vadd.xlane.f32.xlu0 %v864_v52  ;;  %v882_v12 = vsel %vm15705_vm2, %v720_v31, 0.0  ;;  %v879_v52 = vsel %vm15705_vm2, %v719_v2, 0.0  ;;  %v9513_v31 = vld [vmem:[%s9076_s24 + $0x1b0] sm:$0xff]  ;;  %v9515_v2 = vpop.permute.xlu0 %1636 }
 0x1ef   : > { %16077 = vst [vmem:[#allocation103_spill] sm:$0xff] %v9513_v31  ;;  %16078 = vst [vmem:[#allocation104_spill] sm:$0xff] %v9515_v2  ;;  %v9545_v2 = vld [vmem:[%s9076_s24 + $0x1e0] sm:$0xff] }
 0x1f0   : > { %16085 = vst [vmem:[#allocation111_spill] sm:$0xff] %v9545_v2 }
 0x1f2   : > { %868 = vadd.xlane.f32.xlu1 %v867_v61  ;;  %871 = vadd.xlane.f32.xlu0 %v870_v38  ;;  %v9495_v61 = vld [vmem:[%s9076_s24 + $0x190] sm:$0xff]  ;;  %v9526_v38 = vld [vmem:[%s9076_s24 + $0x1c8] sm:$0xff]  ;;  %v9569_v48 = vpop.permute.xlu0 %1644 }
 0x1f3   : > { %16073 = vst [vmem:[#allocation99_spill] sm:$0xff] %v9495_v61  ;;  %16080 = vst [vmem:[#allocation106_spill] sm:$0xff] %v9526_v38 }
 0x1f4   : > { %16090 = vst [vmem:[#allocation116_spill] sm:$0xff] %v9569_v48  ;;  %v727_v48 = vmul.f32 %v9449_v16, %v9221_v6 }
 0x1f6   : > { %874 = vadd.xlane.f32.xlu1 %v873_v57  ;;  %877 = vadd.xlane.f32.xlu0 %v876_v56  ;;  %v724_v57 = vmul.f32 %v9449_v16, %v9196_v43  ;;  %v9510_v56 = vld [vmem:[%s9076_s24 + $0x1b8] sm:$0xff]  ;;  %v9542_v43 = vld [vmem:[%s9076_s24 + $0x1e8] sm:$0xff]  ;;  %v9605_v7 = vpop.permute.xlu0 %1652  ;;  %v903_v44 = vsel %vm15705_vm2, %v727_v48, 0.0 }
 0x1f7   : > { %16076 = vst [vmem:[#allocation102_spill] sm:$0xff] %v9510_v56  ;;  %16084 = vst [vmem:[#allocation110_spill] sm:$0xff] %v9542_v43 }
 0x1f8   : > { %16098 = vst [vmem:[#allocation124_spill] sm:$0xff] %v9605_v7  ;;  %v734_v7 = vmul.f32 %v9449_v16, %v9253_v35 }
 0x1fa   : > { %883 = vadd.xlane.f32.xlu0 %v882_v12  ;;  %880 = vadd.xlane.f32.xlu1 %v879_v52  ;;  %v9517_v12 = vpop.permute.xlu1 %1632  ;;  %v888_v52 = vsel %vm15705_vm2, %v722_v32, 0.0  ;;  %v9534_v32 = vld [vmem:[%s9076_s24 + $0x1d8] sm:$0xff] }
 0x1fb   : > { %16079 = vst [vmem:[#allocation105_spill] sm:$0xff] %v9517_v12  ;;  %16082 = vst [vmem:[#allocation108_spill] sm:$0xff] %v9534_v32  ;;  %v891_v12 = vsel %vm15705_vm2, %v723_v39, 0.0  ;;  %v9567_v39 = vld [vmem:[%s9076_s24 + $0x280] sm:$0xff] }
 0x1fc   : > { %16089 = vst [vmem:[#allocation115_spill] sm:$0xff] %v9567_v39 }
 0x1fe   : > { %889 = vadd.xlane.f32.xlu0 %v888_v52  ;;  %886 = vadd.xlane.f32.xlu1 %v885_v53  ;;  %v894_v52 = vsel %vm15705_vm2, %v724_v57, 0.0  ;;  %v9564_v57 = vld [vmem:[%s9076_s24 + $0x288] sm:$0xff]  ;;  %v9571_v18 = vpop.permute.xlu1 %1640  ;;  %v9601_v53 = vld [vmem:[%s9076_s24 + $0x2b0] sm:$0xff] }
 0x1ff   : > { %16088 = vst [vmem:[#allocation114_spill] sm:$0xff] %v9564_v57  ;;  %16091 = vst [vmem:[#allocation117_spill] sm:$0xff] %v9571_v18  ;;  %v900_v18 = vsel %vm15705_vm2, %v726_v27, 0.0 }
 0x200   : > { %16097 = vst [vmem:[#allocation123_spill] sm:$0xff] %v9601_v53 }
 0x202   : > { %895 = vadd.xlane.f32.xlu0 %v894_v52  ;;  %892 = vadd.xlane.f32.xlu1 %v891_v12  ;;  %v9579_v52 = vld [vmem:[%s9076_s24 + $0x290] sm:$0xff]  ;;  %v728_v12 = vmul.f32 %v9449_v16, %v9218_v1  ;;  %v9598_v1 = vld [vmem:[%s9076_s24 + $0x2b8] sm:$0xff]  ;;  %v9607_v27 = vpop.permute.xlu1 %1648 }
 0x203   : > { %16093 = vst [vmem:[#allocation119_spill] sm:$0xff] %v9579_v52  ;;  %16096 = vst [vmem:[#allocation122_spill] sm:$0xff] %v9598_v1 }
 0x204   : > { %16099 = vst [vmem:[#allocation125_spill] sm:$0xff] %v9607_v27  ;;  %v906_v6 = vsel %vm15705_vm2, %v728_v12, 0.0  ;;  %v659_v12 = vcombine.high %v9386_v22, %v9386_v22  ;;  %v731_v27 = vmul.f32 %v9449_v16, %v9247_v37  ;;  %v9656_v22 = vld [vmem:[%s9076_s24 + $0x2e0] sm:$0xff] }
 0x205   : > { %16107 = vst [vmem:[#allocation133_spill] sm:$0xff] %v9656_v22  ;;  %v9685_v22 = vld [vmem:[%s9076_s24 + $0x308] sm:$0xff] }
 0x206   : > { %901 = vadd.xlane.f32.xlu0 %v900_v18  ;;  %898 = vadd.xlane.f32.xlu1 %v897_v55  ;;  %v730_v18 = vmul.f32 %v9449_v16, %v9231_v28  ;;  %v729_v55 = vmul.f32 %v9449_v16, %v9234_v34  ;;  %v732_v34 = vmul.f32 %v9449_v16, %v9244_v3  ;;  %v915_v17 = vsel %vm15705_vm2, %v731_v27, 0.0  ;;  %v390_v27 = vld [vmem:[%s9076_s24 + $0x118] sm:$0xff] }
 0x207   : > { %v9644_v3 = vrot.slane %v659_v12, %v8967_v11  ;;  %v388_v12 = vld [vmem:[%s9076_s24 + $0x108] sm:$0xff]  ;;  %16112 = vst [vmem:[#allocation138_spill] sm:$0xff] %v9685_v22  ;;  %v9724_v22 = vld [vmem:[%s9076_s24 + $0x320] sm:$0xff] }
 0x208   : > { %v912_v48 = vsel %vm15705_vm2, %v730_v18, 0.0  ;;  %v909_v28 = vsel %vm15705_vm2, %v729_v55, 0.0  ;;  %v9639_v18 = vpop.permute.xlu0 %1663  ;;  %v9641_v55 = vpop.permute.xlu1 %1659  ;;  %v918_v37 = vsel %vm15705_vm2, %v732_v34, 0.0  ;;  %v387_v34 = vld [vmem:[%s9076_s24 + $0x100] sm:$0xff]  ;;  %16121 = vst [vmem:[#allocation147_spill] sm:$0xff] %v9724_v22 }
 0x209   : > { %16104 = vst [vmem:[#allocation130_spill] sm:$0xff] %v9639_v18  ;;  %16105 = vst [vmem:[#allocation131_spill] sm:$0xff] %v9641_v55  ;;  %v736_v18 = vmul.f32 %v9644_v3, %v388_v12  ;;  %v738_v12 = vmul.f32 %v9644_v3, %v390_v27 }
 0x20a   : > { %907 = vadd.xlane.f32.xlu0 %v906_v6  ;;  %904 = vadd.xlane.f32.xlu1 %v903_v44  ;;  %v9632_v6 = vld [vmem:[%s9076_s24 + $0x2d8] sm:$0xff]  ;;  %v9635_v44 = vld [vmem:[%s9076_s24 + $0x2d0] sm:$0xff] }
 0x20b   : > { %16102 = vst [vmem:[#allocation128_spill] sm:$0xff] %v9632_v6  ;;  %16103 = vst [vmem:[#allocation129_spill] sm:$0xff] %v9635_v44  ;;  %v9674_v44 = vld [vmem:[%s9076_s24 + $0x2f0] sm:$0xff]  ;;  %v936_v27 = vsel %vm15705_vm2, %v738_v12, 0.0  ;;  %v396_v12 = vld [vmem:[%s9076_s24 + $0x148] sm:$0xff] }
 0x20c   : > { %v9662_v55 = vpop.permute.xlu0 %1671  ;;  %v9664_v35 = vpop.permute.xlu1 %1667  ;;  %16111 = vst [vmem:[#allocation137_spill] sm:$0xff] %v9674_v44 }
 0x20d   : > { %16108 = vst [vmem:[#allocation134_spill] sm:$0xff] %v9662_v55  ;;  %16109 = vst [vmem:[#allocation135_spill] sm:$0xff] %v9664_v35  ;;  %v389_v35 = vld [vmem:[%s9076_s24 + $0x110] sm:$0xff]  ;;  %v930_v55 = vsel %vm15705_vm2, %v736_v18, 0.0  ;;  %v394_v18 = vld [vmem:[%s9076_s24 + $0x138] sm:$0xff] }
 0x20e   : > { %913 = vadd.xlane.f32.xlu0 %v912_v48  ;;  %910 = vadd.xlane.f32.xlu1 %v909_v28  ;;  %v733_v48 = vmul.f32 %v9449_v16, %v9256_v30  ;;  %v9653_v28 = vld [vmem:[%s9076_s24 + $0x2e8] sm:$0xff]  ;;  %v924_v30 = vsel %vm15705_vm2, %v734_v7, 0.0 }
 0x20f   : > { %16106 = vst [vmem:[#allocation132_spill] sm:$0xff] %v9653_v28  ;;  %v9688_v28 = vld [vmem:[%s9076_s24 + $0x300] sm:$0xff] }
 0x210   : > { %v921_v16 = vsel %vm15705_vm2, %v733_v48, 0.0  ;;  %16113 = vst [vmem:[#allocation139_spill] sm:$0xff] %v9688_v28  ;;  %v9696_v7 = vpop.permute.xlu1 %1675  ;;  %v742_v28 = vmul.f32 %v9644_v3, %v394_v18  ;;  %v744_v18 = vmul.f32 %v9644_v3, %v396_v12 }
 0x211   : > { %16115 = vst [vmem:[#allocation141_spill] sm:$0xff] %v9696_v7  ;;  %v393_v7 = vld [vmem:[%s9076_s24 + $0x130] sm:$0xff] }
 0x212   : > { %919 = vadd.xlane.f32.xlu0 %v918_v37  ;;  %916 = vadd.xlane.f32.xlu1 %v915_v17  ;;  %v735_v37 = vmul.f32 %v9644_v3, %v387_v34  ;;  %v9671_v17 = vld [vmem:[%s9076_s24 + $0x2f8] sm:$0xff]  ;;  %v737_v34 = vmul.f32 %v9644_v3, %v389_v35 }
 0x213   : > { %16110 = vst [vmem:[#allocation136_spill] sm:$0xff] %v9671_v17  ;;  %v9706_v17 = vld [vmem:[%s9076_s24 + $0x310] sm:$0xff] }
 0x214   : > { %v927_v48 = vsel %vm15705_vm2, %v735_v37, 0.0  ;;  %v9694_v37 = vpop.permute.xlu0 %1679  ;;  %v933_v35 = vsel %vm15705_vm2, %v737_v34, 0.0  ;;  %16117 = vst [vmem:[#allocation143_spill] sm:$0xff] %v9706_v17  ;;  %v9735_v17 = vld [vmem:[%s9076_s24 + $0x338] sm:$0xff] }
 0x215   : > { %16114 = vst [vmem:[#allocation140_spill] sm:$0xff] %v9694_v37  ;;  %v9714_v37 = vpop.permute.xlu1 %1683  ;;  %16122 = vst [vmem:[#allocation148_spill] sm:$0xff] %v9735_v17 }
 0x216   : > { %925 = vadd.xlane.f32.xlu0 %v924_v30  ;;  %922 = vadd.xlane.f32.xlu1 %v921_v16  ;;  %v392_v30 = vld [vmem:[%s9076_s24 + $0x128] sm:$0xff]  ;;  %v391_v16 = vld [vmem:[%s9076_s24 + $0x120] sm:$0xff]  ;;  %16119 = vst [vmem:[#allocation145_spill] sm:$0xff] %v9714_v37 }
 0x217   : > { %v740_v44 = vmul.f32 %v9644_v3, %v392_v30 }
 0x218   : > { %v9712_v34 = vpop.permute.xlu0 %1687 }
 0x219   : > { %16118 = vst [vmem:[#allocation144_spill] sm:$0xff] %v9712_v34  ;;  %v942_v30 = vsel %vm15705_vm2, %v740_v44, 0.0  ;;  %v395_v34 = vld [vmem:[%s9076_s24 + $0x140] sm:$0xff]  ;;  %v948_v44 = vsel %vm15705_vm2, %v742_v28, 0.0  ;;  %v9744_v37 = vpop.permute.xlu1 %1691  ;;  %v954_v28 = vsel %vm15705_vm2, %v744_v18, 0.0 }
 0x21a   : > { %931 = vadd.xlane.f32.xlu0 %v930_v55  ;;  %928 = vadd.xlane.f32.xlu1 %v927_v48  ;;  %v739_v55 = vmul.f32 %v9644_v3, %v391_v16  ;;  %v9703_v48 = vld [vmem:[%s9076_s24 + $0x318] sm:$0xff]  ;;  %16125 = vst [vmem:[#allocation151_spill] sm:$0xff] %v9744_v37 }
 0x21b   : > { %16116 = vst [vmem:[#allocation142_spill] sm:$0xff] %v9703_v48  ;;  %v9738_v48 = vld [vmem:[%s9076_s24 + $0x330] sm:$0xff] }
 0x21c   : > { %v939_v16 = vsel %vm15705_vm2, %v739_v55, 0.0  ;;  %16123 = vst [vmem:[#allocation149_spill] sm:$0xff] %v9738_v48 }
 0x21d   : > { %v9762_v18 = vpop.permute.xlu1 %1699 }
 0x21e   : > { %937 = vadd.xlane.f32.xlu0 %v936_v27  ;;  %934 = vadd.xlane.f32.xlu1 %v933_v35  ;;  %v741_v27 = vmul.f32 %v9644_v3, %v393_v7  ;;  %v9721_v35 = vld [vmem:[%s9076_s24 + $0x328] sm:$0xff]  ;;  %v743_v7 = vmul.f32 %v9644_v3, %v395_v34  ;;  %v746_v34 = vmul.f32 %v9644_v3, %v9279_v60 }
 0x21f   : > { %16120 = vst [vmem:[#allocation146_spill] sm:$0xff] %v9721_v35  ;;  %16129 = vst [vmem:[#allocation155_spill] sm:$0xff] %v9762_v18  ;;  %v9792_v18 = vld [vmem:[%s9076_s24 + $0x360] sm:$0xff] }
 0x220   : > { %v945_v55 = vsel %vm15705_vm2, %v741_v27, 0.0  ;;  %v951_v12 = vsel %vm15705_vm2, %v743_v7, 0.0  ;;  %v745_v27 = vmul.f32 %v9644_v3, %v9282_v40  ;;  %v960_v7 = vsel %vm15705_vm2, %v746_v34, 0.0  ;;  %16133 = vst [vmem:[#allocation159_spill] sm:$0xff] %v9792_v18 }
 0x221   : > { %v748_v40 = vmul.f32 %v9644_v3, %v9291_v19  ;;  %v9780_v34 = vrot.slane %v9395_v50, %v8967_v11 }
 0x222   : > { %943 = vadd.xlane.f32.xlu0 %v942_v30  ;;  %940 = vadd.xlane.f32.xlu1 %v939_v16  ;;  %v9742_v16 = vpop.permute.xlu0 %1695  ;;  %v957_v60 = vsel %vm15705_vm2, %v745_v27, 0.0 }
 0x223   : > { %16124 = vst [vmem:[#allocation150_spill] sm:$0xff] %v9742_v16  ;;  %v9774_v16 = vld [vmem:[%s9076_s24 + $0x350] sm:$0xff]  ;;  %v966_v27 = vsel %vm15705_vm2, %v748_v40, 0.0  ;;  %v9798_v40 = vpop.permute.xlu1 %1707 }
 0x224   : > { %16131 = vst [vmem:[#allocation157_spill] sm:$0xff] %v9774_v16  ;;  %16135 = vst [vmem:[#allocation161_spill] sm:$0xff] %v9798_v40 }
 0x226   : > { %949 = vadd.xlane.f32.xlu0 %v948_v44  ;;  %946 = vadd.xlane.f32.xlu1 %v945_v55  ;;  %v9753_v44 = vld [vmem:[%s9076_s24 + $0x348] sm:$0xff]  ;;  %v9756_v55 = vld [vmem:[%s9076_s24 + $0x340] sm:$0xff]  ;;  %v9760_v37 = vpop.permute.xlu0 %1703 }
 0x227   : > { %16126 = vst [vmem:[#allocation152_spill] sm:$0xff] %v9753_v44  ;;  %16127 = vst [vmem:[#allocation153_spill] sm:$0xff] %v9756_v55 }
 0x228   : > { %16128 = vst [vmem:[#allocation154_spill] sm:$0xff] %v9760_v37 }
 0x22a   : > { %955 = vadd.xlane.f32.xlu0 %v954_v28  ;;  %952 = vadd.xlane.f32.xlu1 %v951_v12  ;;  %v747_v28 = vmul.f32 %v9644_v3, %v9294_v13  ;;  %v9771_v12 = vld [vmem:[%s9076_s24 + $0x358] sm:$0xff]  ;;  %v750_v13 = vmul.f32 %v9644_v3, %v9303_v4  ;;  %v9796_v37 = vpop.permute.xlu0 %1711 }
 0x22b   : > { %16130 = vst [vmem:[#allocation156_spill] sm:$0xff] %v9771_v12  ;;  %16134 = vst [vmem:[#allocation160_spill] sm:$0xff] %v9796_v37  ;;  %v9828_v37 = vld [vmem:[%s9076_s24 + $0x380] sm:$0xff] }
 0x22c   : > { %v963_v19 = vsel %vm15705_vm2, %v747_v28, 0.0  ;;  %v972_v28 = vsel %vm15705_vm2, %v750_v13, 0.0  ;;  %16141 = vst [vmem:[#allocation167_spill] sm:$0xff] %v9828_v37 }
 0x22e   : > { %961 = vadd.xlane.f32.xlu0 %v960_v7  ;;  %958 = vadd.xlane.f32.xlu1 %v957_v60  ;;  %v749_v7 = vmul.f32 %v9644_v3, %v9306_v42  ;;  %v9789_v60 = vld [vmem:[%s9076_s24 + $0x368] sm:$0xff]  ;;  %v768_v3 = vmul.f32 %v9780_v34, %v9311_v45  ;;  %v9810_v42 = vld [vmem:[%s9076_s24 + $0x370] sm:$0xff]  ;;  %v9814_v13 = vpop.permute.xlu0 %1719 }
 0x22f   : > { %16132 = vst [vmem:[#allocation158_spill] sm:$0xff] %v9789_v60  ;;  %16137 = vst [vmem:[#allocation163_spill] sm:$0xff] %v9810_v42 }
 0x230   : > { %v969_v4 = vsel %vm15705_vm2, %v749_v7, 0.0  ;;  %16138 = vst [vmem:[#allocation164_spill] sm:$0xff] %v9814_v13  ;;  %v9816_v7 = vpop.permute.xlu1 %1715  ;;  %v1026_v45 = vsel %vm15705_vm2, %v768_v3, 0.0  ;;  %v9842_v13 = vld [vmem:[%s9076_s24 + $0x390] sm:$0xff] }
 0x231   : > { %16139 = vst [vmem:[#allocation165_spill] sm:$0xff] %v9816_v7  ;;  %v9839_v7 = vld [vmem:[%s9076_s24 + $0x398] sm:$0xff]  ;;  %16143 = vst [vmem:[#allocation169_spill] sm:$0xff] %v9842_v13  ;;  %v9878_v13 = vld [vmem:[%s9076_s24 + $0x3b0] sm:$0xff] }
 0x232   : > { %967 = vadd.xlane.f32.xlu0 %v966_v27  ;;  %964 = vadd.xlane.f32.xlu1 %v963_v19  ;;  %v767_v27 = vmul.f32 %v9780_v34, %v9314_v41  ;;  %v9807_v19 = vld [vmem:[%s9076_s24 + $0x378] sm:$0xff]  ;;  %v770_v41 = vmul.f32 %v9780_v34, %v9323_v46  ;;  %v772_v46 = vmul.f32 %v9780_v34, %v9335_v23  ;;  %v9860_v23 = vld [vmem:[%s9076_s24 + $0x3a0] sm:$0xff] }
 0x233   : > { %16136 = vst [vmem:[#allocation162_spill] sm:$0xff] %v9807_v19  ;;  %16142 = vst [vmem:[#allocation168_spill] sm:$0xff] %v9839_v7 }
 0x234   : > { %v1023_v40 = vsel %vm15705_vm2, %v767_v27, 0.0  ;;  %v1032_v3 = vsel %vm15705_vm2, %v770_v41, 0.0  ;;  %v9848_v41 = vpop.permute.xlu1 %1726  ;;  %16147 = vst [vmem:[#allocation173_spill] sm:$0xff] %v9860_v23  ;;  %16152 = vst [vmem:[#allocation177_spill] sm:$0xff] %v9878_v13  ;;  %v9889_v23 = vld [vmem:[%s9076_s24 + $0x3c8] sm:$0xff] }
 0x235   : > { %16145 = vst [vmem:[#allocation171_spill] sm:$0xff] %v9848_v41  ;;  %16155 = vst [vmem:[#allocation178_spill] sm:$0xff] %v9889_v23 }
 0x236   : > { %973 = vadd.xlane.f32.xlu0 %v972_v28  ;;  %970 = vadd.xlane.f32.xlu1 %v969_v4  ;;  %v769_v28 = vmul.f32 %v9780_v34, %v9326_v29  ;;  %v9825_v4 = vld [vmem:[%s9076_s24 + $0x388] sm:$0xff]  ;;  %v771_v29 = vmul.f32 %v9780_v34, %v9338_v25  ;;  %v774_v25 = vmul.f32 %v9780_v34, %v9343_v14 }
 0x237   : > { %16140 = vst [vmem:[#allocation166_spill] sm:$0xff] %v9825_v4 }
 0x238   : > { %v1029_v27 = vsel %vm15705_vm2, %v769_v28, 0.0  ;;  %v1038_v28 = vsel %vm15705_vm2, %v772_v46, 0.0  ;;  %v1035_v30 = vsel %vm15705_vm2, %v771_v29, 0.0  ;;  %v9866_v29 = vpop.permute.xlu1 %1734  ;;  %v1044_v14 = vsel %vm15705_vm2, %v774_v25, 0.0 }
 0x239   : > { %16149 = vst [vmem:[#allocation175_spill] sm:$0xff] %v9866_v29 }
 0x23a   : > { %1027 = vadd.xlane.f32.xlu0 %v1026_v45  ;;  %1024 = vadd.xlane.f32.xlu1 %v1023_v40  ;;  %v9846_v40 = vpop.permute.xlu0 %1730 }
 0x23b   : > { %16144 = vst [vmem:[#allocation170_spill] sm:$0xff] %v9846_v40  ;;  %v16150_v40 = vld [vmem:[#allocation73_spill] sm:$0xff] }
 0x23e   : > { %1033 = vadd.xlane.f32.xlu0 %v1032_v3  ;;  %1030 = vadd.xlane.f32.xlu1 %v1029_v27  ;;  %v773_v3 = vmul.f32 %v9780_v34, %v9346_v9  ;;  %v9857_v27 = vld [vmem:[%s9076_s24 + $0x3a8] sm:$0xff]  ;;  %v9864_v46 = vpop.permute.xlu0 %1738  ;;  %v776_v9 = vmul.f32 %v9780_v34, %v9355_v62 }
 0x23f   : > { %16146 = vst [vmem:[#allocation172_spill] sm:$0xff] %v9857_v27  ;;  %16148 = vst [vmem:[#allocation174_spill] sm:$0xff] %v9864_v46  ;;  %v16154_v46 = vld [vmem:[#allocation77_spill] sm:$0xff]  ;;  %v9892_v27 = vld [vmem:[%s9076_s24 + $0x3c0] sm:$0xff] }
 0x240   : > { %v1041_v41 = vsel %vm15705_vm2, %v773_v3, 0.0  ;;  %v1050_v29 = vsel %vm15705_vm2, %v776_v9, 0.0  ;;  %v16153_v3 = vld [vmem:[#allocation76_spill] sm:$0xff]  ;;  %16156 = vst [vmem:[#allocation179_spill] sm:$0xff] %v9892_v27 }
 0x241   : > { %v778_v62 = vmul.f32 %v9780_v34, %v16153_v3 }
 0x242   : > { %1039 = vadd.xlane.f32.xlu0 %v1038_v28  ;;  %1036 = vadd.xlane.f32.xlu1 %v1035_v30  ;;  %v775_v28 = vmul.f32 %v9780_v34, %v16150_v40  ;;  %v9875_v30 = vld [vmem:[%s9076_s24 + $0x3b8] sm:$0xff]  ;;  %v777_v40 = vmul.f32 %v9780_v34, %v16154_v46  ;;  %v9896_v9 = vpop.permute.xlu0 %1746 }
 0x243   : > { %16151 = vst [vmem:[#allocation176_spill] sm:$0xff] %v9875_v30  ;;  %16157 = vst [vmem:[#allocation180_spill] sm:$0xff] %v9896_v9  ;;  %v1056_v45 = vsel %vm15705_vm2, %v778_v62, 0.0  ;;  %v9912_v9 = vld [vmem:[%s9076_s24 + $0x3d0] sm:$0xff] }
 0x244   : > { %v1047_v25 = vsel %vm15705_vm2, %v775_v28, 0.0  ;;  %v661_v28 = vcombine.high %v9441_v10, %v9441_v10  ;;  %v1053_v46 = vsel %vm15705_vm2, %v777_v40, 0.0  ;;  %16161 = vst [vmem:[#allocation183_spill] sm:$0xff] %v9912_v9  ;;  %v9930_v10 = vld [vmem:[%s9076_s24 + $0x3e8] sm:$0xff] }
 0x245   : > { %16164 = vst [vmem:[#allocation186_spill] sm:$0xff] %v9930_v10 }
 0x246   : > { %1045 = vadd.xlane.f32.xlu0 %v1044_v14  ;;  %1042 = vadd.xlane.f32.xlu1 %v1041_v41  ;;  %v9898_v41 = vpop.permute.xlu1 %1742  ;;  %v9909_v14 = vld [vmem:[%s9076_s24 + $0x3d8] sm:$0xff]  ;;  %v9917_v62 = vrot.slane %v661_v28, %v8967_v11  ;;  %v9919_v40 = vpop.permute.xlu0 %1754  ;;  %v9933_v28 = vld [vmem:[%s9076_s24 + $0x3e0] sm:$0xff] }
 0x247   : > { %16158 = vst [vmem:[#allocation181_spill] sm:$0xff] %v9898_v41  ;;  %16160 = vst [vmem:[#allocation182_spill] sm:$0xff] %v9909_v14 }
 0x248   : > { %16162 = vst [vmem:[#allocation184_spill] sm:$0xff] %v9919_v40  ;;  %16165 = vst [vmem:[#allocation187_spill] sm:$0xff] %v9933_v28 }
 0x24a   : > { %1051 = vadd.xlane.f32.xlu0 %v1050_v29  ;;  %1048 = vadd.xlane.f32.xlu1 %v1047_v25  ;;  %v780_v29 = vmul.f32 %v9780_v34, %v9379_v49  ;;  %v16159_v25 = vld [vmem:[#allocation79_spill] sm:$0xff]  ;;  %v9921_v49 = vpop.permute.xlu1 %1750 }
 0x24b   : > { %v779_v3 = vmul.f32 %v9780_v34, %v16159_v25  ;;  %16163 = vst [vmem:[#allocation185_spill] sm:$0xff] %v9921_v49 }
 0x24c   : > { %v1062_v25 = vsel %vm15705_vm2, %v780_v29, 0.0 }
 0x24d   : > { %v1059_v41 = vsel %vm15705_vm2, %v779_v3, 0.0  ;;  %v752_v3 = vmul.f32 %v9917_v62, %v9480_v33  ;;  %v753_v33 = vmul.f32 %v9917_v62, %v9495_v61 }
 0x24e   : > { %1057 = vadd.xlane.f32.xlu0 %v1056_v45  ;;  %1054 = vadd.xlane.f32.xlu1 %v1053_v46  ;;  %v782_v45 = vmul.f32 %v9780_v34, %v9470_v47  ;;  %v781_v46 = vmul.f32 %v9780_v34, %v9473_v5  ;;  %v751_v47 = vmul.f32 %v9917_v62, %v9483_v54  ;;  %v9944_v34 = vld [vmem:[%s9076_s24 + $0x3f8] sm:$0xff]  ;;  %v9947_v5 = vld [vmem:[%s9076_s24 + $0x3f0] sm:$0xff] }
 0x24f   : > { %16166 = vst [vmem:[#allocation188_spill] sm:$0xff] %v9944_v34  ;;  %16167 = vst [vmem:[#allocation189_spill] sm:$0xff] %v9947_v5  ;;  %v754_v54 = vmul.f32 %v9917_v62, %v9492_v36 }
 0x250   : > { %v1068_v49 = vsel %vm15705_vm2, %v782_v45, 0.0  ;;  %v1065_v29 = vsel %vm15705_vm2, %v781_v46, 0.0  ;;  %v9953_v45 = vpop.permute.xlu1 %1758  ;;  %v978_v46 = vsel %vm15705_vm2, %v752_v3, 0.0  ;;  %v975_v40 = vsel %vm15705_vm2, %v751_v47, 0.0 }
 0x251   : > { %16169 = vst [vmem:[#allocation191_spill] sm:$0xff] %v9953_v45  ;;  %v981_v45 = vsel %vm15705_vm2, %v753_v33, 0.0  ;;  %v756_v3 = vmul.f32 %v9917_v62, %v9500_v20  ;;  %v755_v47 = vmul.f32 %v9917_v62, %v9503_v21 }
 0x252   : > { %1063 = vadd.xlane.f32.xlu0 %v1062_v25  ;;  %1060 = vadd.xlane.f32.xlu1 %v1059_v41  ;;  %v9951_v25 = vpop.permute.xlu0 %1762  ;;  %v984_v41 = vsel %vm15705_vm2, %v754_v54, 0.0  ;;  %v757_v54 = vmul.f32 %v9917_v62, %v9513_v31 }
 0x253   : > { %16168 = vst [vmem:[#allocation190_spill] sm:$0xff] %v9951_v25  ;;  %v990_v61 = vsel %vm15705_vm2, %v756_v3, 0.0  ;;  %v759_v3 = vmul.f32 %v9917_v62, %v9529_v15 }
 0x255   : > { %v999_v31 = vsel %vm15705_vm2, %v759_v3, 0.0  ;;  %v763_v3 = vmul.f32 %v9917_v62, %v9545_v2  ;;  %v765_v2 = vmul.f32 %v9917_v62, %v9559_v0 }
 0x256   : > { %1069 = vadd.xlane.f32.xlu0 %v1068_v49  ;;  %1066 = vadd.xlane.f32.xlu1 %v1065_v29  ;;  %v9961_v49 = vpop.permute.xlu0 %1770  ;;  %v9963_v29 = vpop.permute.xlu1 %1766 }
 0x257   : > { %16170 = vst [vmem:[#allocation192_spill] sm:$0xff] %v9961_v49  ;;  %16171 = vst [vmem:[#allocation193_spill] sm:$0xff] %v9963_v29 }
 0x25a   : > { %979 = vadd.xlane.f32.xlu0 %v978_v46  ;;  %976 = vadd.xlane.f32.xlu1 %v975_v40  ;;  %v987_v40 = vsel %vm15705_vm2, %v755_v47, 0.0  ;;  %v758_v46 = vmul.f32 %v9917_v62, %v9510_v56  ;;  %v9977_v33 = vpop.xlane.xlu0 %611  ;;  %v9979_v20 = vpop.permute.xlu1 %1774  ;;  %v1017_v56 = vsel %vm15705_vm2, %v765_v2, 0.0 }
 0x25b   : > { %16172 = vst [vmem:[#allocation194_spill] sm:$0xff] %v9979_v20 }
 0x25c   : > { %v996_v21 = vsel %vm15705_vm2, %v758_v46, 0.0  ;;  %v762_v46 = vmul.f32 %v9917_v62, %v9534_v32 }
 0x25e   : > { %985 = vadd.xlane.f32.xlu0 %v984_v41  ;;  %982 = vadd.xlane.f32.xlu1 %v981_v45  ;;  %v993_v41 = vsel %vm15705_vm2, %v757_v54, 0.0  ;;  %v760_v45 = vmul.f32 %v9917_v62, %v9526_v38  ;;  %v761_v54 = vmul.f32 %v9917_v62, %v9537_v24 }
 0x260   : > { %v1005_v15 = vsel %vm15705_vm2, %v761_v54, 0.0  ;;  %v1011_v54 = vsel %vm15705_vm2, %v763_v3, 0.0 }
 0x262   : > { %991 = vadd.xlane.f32.xlu0 %v990_v61  ;;  %988 = vadd.xlane.f32.xlu1 %v987_v40  ;;  %v1002_v40 = vsel %vm15705_vm2, %v760_v45, 0.0  ;;  %v764_v45 = vmul.f32 %v9917_v62, %v9542_v43  ;;  %v766_v43 = vmul.f32 %v9917_v62, %v9556_v26 }
 0x264   : > { %v1020_v24 = vsel %vm15705_vm2, %v766_v43, 0.0 }
 0x266   : > { %997 = vadd.xlane.f32.xlu0 %v996_v21  ;;  %994 = vadd.xlane.f32.xlu1 %v993_v41  ;;  %v1008_v41 = vsel %vm15705_vm2, %v762_v46, 0.0  ;;  %v1014_v46 = vsel %vm15705_vm2, %v764_v45, 0.0 }
 0x267   : > { %v9987_v47 = vpop.xlane.xlu1 %835  ;;  %v9989_v61 = vpop.xlane.xlu0 %832 }
 0x26a   : > { %1003 = vadd.xlane.f32.xlu0 %v1002_v40  ;;  %1000 = vadd.xlane.f32.xlu1 %v999_v31  ;;  %v10013_v31 = vrot.slane %v9400_v51, %v8967_v11 }
 0x26b   : > { %v9997_v38 = vpop.xlane.xlu1 %838  ;;  %v9999_v21 = vpop.xlane.xlu0 %841 }
 0x26c   : > { %v784_v45 = vmul.f32 %v10013_v31, %v9564_v57  ;;  %v783_v3 = vmul.f32 %v10013_v31, %v9567_v39  ;;  %v786_v43 = vmul.f32 %v10013_v31, %v9576_v59  ;;  %v785_v2 = vmul.f32 %v10013_v31, %v9579_v52 }
 0x26e   : > { %1009 = vadd.xlane.f32.xlu0 %v1008_v41  ;;  %1006 = vadd.xlane.f32.xlu1 %v1005_v15  ;;  %v1077_v39 = vsel %vm15705_vm2, %v785_v2, 0.0  ;;  %v789_v2 = vmul.f32 %v10013_v31, %v9601_v53 }
 0x26f   : > { %v10007_v32 = vpop.xlane.xlu1 %844  ;;  %v10009_v40 = vpop.xlane.xlu0 %847 }
 0x272   : > { %1015 = vadd.xlane.f32.xlu0 %v1014_v46  ;;  %1012 = vadd.xlane.f32.xlu1 %v1011_v54  ;;  %v1074_v46 = vsel %vm15705_vm2, %v784_v45, 0.0  ;;  %v1071_v54 = vsel %vm15705_vm2, %v783_v3, 0.0  ;;  %v788_v45 = vmul.f32 %v10013_v31, %v9586_v58  ;;  %v16173_v3 = vld [vmem:[#allocation121_spill] sm:$0xff] }
 0x273   : > { %v10021_v15 = vpop.xlane.xlu1 %850  ;;  %v10023_v41 = vpop.xlane.xlu0 %853  ;;  %v787_v0 = vmul.f32 %v10013_v31, %v16173_v3  ;;  %v1089_v3 = vsel %vm15705_vm2, %v789_v2, 0.0  ;;  %v16174_v2 = vld [vmem:[#allocation129_spill] sm:$0xff] }
 0x274   : > { %v793_v36 = vmul.f32 %v10013_v31, %v16174_v2 }
 0x275   : > { %v1083_v52 = vsel %vm15705_vm2, %v787_v0, 0.0  ;;  %v791_v0 = vmul.f32 %v10013_v31, %v9619_v63 }
 0x276   : > { %1021 = vadd.xlane.f32.xlu0 %v1020_v24  ;;  %1018 = vadd.xlane.f32.xlu1 %v1017_v56  ;;  %v1080_v56 = vsel %vm15705_vm2, %v786_v43, 0.0  ;;  %v790_v43 = vmul.f32 %v10013_v31, %v9598_v1 }
 0x277   : > { %v10031_v26 = vpop.xlane.xlu1 %856  ;;  %v10033_v62 = vpop.xlane.xlu0 %859  ;;  %v1095_v53 = vsel %vm15705_vm2, %v791_v0, 0.0  ;;  %v16175_v0 = vld [vmem:[#allocation132_spill] sm:$0xff] }
 0x278   : > { %v796_v20 = vmul.f32 %v10013_v31, %v16175_v0  ;;  %v16180_v0 = vld [vmem:[#allocation137_spill] sm:$0xff] }
 0x279   : > { %v797_v25 = vmul.f32 %v10013_v31, %v16180_v0  ;;  %v16184_v0 = vld [vmem:[#allocation142_spill] sm:$0xff] }
 0x27a   : > { %1075 = vadd.xlane.f32.xlu0 %v1074_v46  ;;  %1072 = vadd.xlane.f32.xlu1 %v1071_v54  ;;  %v1086_v54 = vsel %vm15705_vm2, %v788_v45, 0.0  ;;  %v792_v45 = vmul.f32 %v10013_v31, %v9616_v8 }
 0x27b   : > { %v10041_v57 = vpop.xlane.xlu1 %862  ;;  %v10043_v24 = vpop.xlane.xlu0 %865 }
 0x27e   : > { %1081 = vadd.xlane.f32.xlu0 %v1080_v56  ;;  %1078 = vadd.xlane.f32.xlu1 %v1077_v39  ;;  %v1092_v39 = vsel %vm15705_vm2, %v790_v43, 0.0  ;;  %v794_v43 = vmul.f32 %v10013_v31, %v9632_v6  ;;  %v16176_v6 = vld [vmem:[#allocation133_spill] sm:$0xff] }
 0x27f   : > { %v10051_v59 = vpop.xlane.xlu1 %868  ;;  %v10053_v46 = vpop.xlane.xlu0 %871  ;;  %v795_v29 = vmul.f32 %v10013_v31, %v16176_v6 }
 0x280   : > { %v1104_v63 = vsel %vm15705_vm2, %v794_v43, 0.0 }
 0x281   : > { %v1107_v43 = vsel %vm15705_vm2, %v795_v29, 0.0  ;;  %v16183_v29 = vld [vmem:[#allocation139_spill] sm:$0xff] }
 0x282   : > { %1087 = vadd.xlane.f32.xlu0 %v1086_v54  ;;  %1084 = vadd.xlane.f32.xlu1 %v1083_v52  ;;  %v1098_v52 = vsel %vm15705_vm2, %v792_v45, 0.0  ;;  %v1101_v45 = vsel %vm15705_vm2, %v793_v36, 0.0  ;;  %v16179_v36 = vld [vmem:[#allocation136_spill] sm:$0xff] }
 0x283   : > { %v10061_v58 = vpop.xlane.xlu1 %874  ;;  %v10063_v56 = vpop.xlane.xlu0 %877  ;;  %v798_v49 = vmul.f32 %v10013_v31, %v16179_v36 }
 0x285   : > { %v1116_v6 = vsel %vm15705_vm2, %v798_v49, 0.0 }
 0x286   : > { %1093 = vadd.xlane.f32.xlu0 %v1092_v39  ;;  %1090 = vadd.xlane.f32.xlu1 %v1089_v3  ;;  %v660_v3 = vcombine.high %v9395_v50, %v9395_v50  ;;  %v1110_v50 = vsel %vm15705_vm2, %v796_v20, 0.0 }
 0x287   : > { %v10071_v1 = vpop.xlane.xlu0 %883  ;;  %v10073_v54 = vpop.xlane.xlu1 %880 }
 0x288   : > { %v10098_v2 = vrot.slane %v660_v3, %v8967_v11  ;;  %v1113_v3 = vsel %vm15705_vm2, %v797_v25, 0.0  ;;  %v16185_v25 = vld [vmem:[#allocation143_spill] sm:$0xff] }
 0x28a   : > { %1099 = vadd.xlane.f32.xlu0 %v1098_v52  ;;  %1096 = vadd.xlane.f32.xlu1 %v1095_v53  ;;  %v802_v49 = vmul.f32 %v10098_v2, %v16184_v0 }
 0x28b   : > { %v10081_v8 = vpop.xlane.xlu0 %889  ;;  %v10083_v39 = vpop.xlane.xlu1 %886 }
 0x28e   : > { %1105 = vadd.xlane.f32.xlu0 %v1104_v63  ;;  %1102 = vadd.xlane.f32.xlu1 %v1101_v45 }
 0x28f   : > { %v10093_v53 = vpop.xlane.xlu0 %895  ;;  %v10095_v52 = vpop.xlane.xlu1 %892 }
 0x290   : > { %16177 = vst [vmem:[#allocation195_spill] sm:$0xff] %v10093_v53  ;;  %16178 = vst [vmem:[#allocation196_spill] sm:$0xff] %v10095_v52  ;;  %v16182_v52 = vld [vmem:[#allocation138_spill] sm:$0xff]  ;;  %v799_v53 = vmul.f32 %v10098_v2, %v16183_v29 }
 0x291   : > { %v800_v20 = vmul.f32 %v10098_v2, %v16182_v52 }
 0x292   : > { %1111 = vadd.xlane.f32.xlu0 %v1110_v50  ;;  %1108 = vadd.xlane.f32.xlu1 %v1107_v43  ;;  %v1119_v43 = vsel %vm15705_vm2, %v799_v53, 0.0  ;;  %v803_v53 = vmul.f32 %v10098_v2, %v9724_v22 }
 0x293   : > { %v10106_v63 = vpop.xlane.xlu0 %901  ;;  %v10108_v45 = vpop.xlane.xlu1 %898  ;;  %v1122_v50 = vsel %vm15705_vm2, %v800_v20, 0.0  ;;  %v804_v20 = vmul.f32 %v10098_v2, %v9721_v35 }
 0x294   : > { %16181 = vst [vmem:[#allocation197_spill] sm:$0xff] %v10108_v45  ;;  %v801_v45 = vmul.f32 %v10098_v2, %v16185_v25  ;;  %v1131_v25 = vsel %vm15705_vm2, %v803_v53, 0.0  ;;  %v807_v53 = vmul.f32 %v10098_v2, %v9756_v55 }
 0x296   : > { %1117 = vadd.xlane.f32.xlu0 %v1116_v6  ;;  %1114 = vadd.xlane.f32.xlu1 %v1113_v3  ;;  %v1128_v3 = vsel %vm15705_vm2, %v802_v49, 0.0  ;;  %v1125_v29 = vsel %vm15705_vm2, %v801_v45, 0.0  ;;  %v806_v49 = vmul.f32 %v10098_v2, %v9735_v17  ;;  %v805_v45 = vmul.f32 %v10098_v2, %v9738_v48 }
 0x297   : > { %v10116_v36 = vpop.xlane.xlu0 %907  ;;  %v10118_v31 = vpop.xlane.xlu1 %904  ;;  %v1143_v48 = vsel %vm15705_vm2, %v807_v53, 0.0 }
 0x298   : > { %v1137_v22 = vsel %vm15705_vm2, %v805_v45, 0.0  ;;  %v809_v45 = vmul.f32 %v10098_v2, %v9774_v16  ;;  %v811_v16 = vmul.f32 %v10098_v2, %v9792_v18 }
 0x29a   : > { %1123 = vadd.xlane.f32.xlu0 %v1122_v50  ;;  %1120 = vadd.xlane.f32.xlu1 %v1119_v43  ;;  %v1134_v43 = vsel %vm15705_vm2, %v804_v20, 0.0  ;;  %v808_v20 = vmul.f32 %v10098_v2, %v9753_v44  ;;  %v8840_v44 = vmov 0   ;;  %v1149_v55 = vsel %vm15705_vm2, %v809_v45, 0.0 }
 0x29b   : > { %v10126_v52 = vpop.xlane.xlu0 %913  ;;  %v10128_v6 = vpop.xlane.xlu1 %910  ;;  %8456 = vset.pattern.permute.xlu1 %v8840_v44  ;;  %8457 = vset.pattern.permute.xlu0 %v8840_v44  ;;  %v814_v45 = vmul.f32 %v10098_v2, %v9807_v19 }
 0x29d   : > { %v1164_v18 = vsel %vm15705_vm2, %v814_v45, 0.0 }
 0x29e   : > { %1129 = vadd.xlane.f32.xlu0 %v1128_v3  ;;  %1126 = vadd.xlane.f32.xlu1 %v1125_v29  ;;  %v1140_v29 = vsel %vm15705_vm2, %v806_v49, 0.0  ;;  %v810_v49 = vmul.f32 %v10098_v2, %v9771_v12  ;;  %v812_v12 = vmul.f32 %v10098_v2, %v9789_v60  ;;  %v813_v60 = vmul.f32 %v10098_v2, %v9810_v42 }
 0x29f   : > { %v10136_v0 = vpop.xlane.xlu0 %919  ;;  %v10138_v50 = vpop.xlane.xlu1 %916 }
 0x2a0   : > { %v1152_v53 = vsel %vm15705_vm2, %v810_v49, 0.0  ;;  %v1155_v49 = vsel %vm15705_vm2, %v811_v16, 0.0 }
 0x2a2   : > { %1135 = vadd.xlane.f32.xlu0 %v1134_v43  ;;  %1132 = vadd.xlane.f32.xlu1 %v1131_v25  ;;  %v1146_v25 = vsel %vm15705_vm2, %v808_v20, 0.0  ;;  %v662_v20 = vcombine.high %v9400_v51, %v9400_v51  ;;  %v1158_v51 = vsel %vm15705_vm2, %v812_v12, 0.0 }
 0x2a3   : > { %v10146_v35 = vpop.xlane.xlu0 %925  ;;  %v10148_v3 = vpop.xlane.xlu1 %922 }
 0x2a6   : > { %1141 = vadd.xlane.f32.xlu0 %v1140_v29  ;;  %1138 = vadd.xlane.f32.xlu1 %v1137_v22 }
 0x2a7   : > { %v10156_v17 = vpop.xlane.xlu0 %931  ;;  %v10158_v43 = vpop.xlane.xlu1 %928 }
 0x2aa   : > { %1147 = vadd.xlane.f32.xlu0 %v1146_v25  ;;  %1144 = vadd.xlane.f32.xlu1 %v1143_v48  ;;  %v10183_v25 = vrot.slane %v662_v20, %v8967_v11  ;;  %v1161_v20 = vsel %vm15705_vm2, %v813_v60, 0.0  ;;  %v16188_v60 = vld [vmem:[#allocation169_spill] sm:$0xff] }
 0x2ab   : > { %v10166_v22 = vpop.xlane.xlu0 %937  ;;  %v10168_v29 = vpop.xlane.xlu1 %934 }
 0x2ac   : > { %v816_v12 = vmul.f32 %v10183_v25, %v9825_v4  ;;  %v815_v16 = vmul.f32 %v10183_v25, %v9828_v37  ;;  %v818_v45 = vmul.f32 %v10183_v25, %v9839_v7  ;;  %v817_v42 = vmul.f32 %v10183_v25, %v16188_v60 }
 0x2ae   : > { %1153 = vadd.xlane.f32.xlu0 %v1152_v53  ;;  %1150 = vadd.xlane.f32.xlu1 %v1149_v55  ;;  %v1173_v37 = vsel %vm15705_vm2, %v817_v42, 0.0  ;;  %v821_v42 = vmul.f32 %v10183_v25, %v9878_v13 }
 0x2af   : > { %v10178_v48 = vpop.xlane.xlu0 %943  ;;  %v10180_v44 = vpop.xlane.xlu1 %940 }
 0x2b2   : > { %1159 = vadd.xlane.f32.xlu0 %v1158_v51  ;;  %1156 = vadd.xlane.f32.xlu1 %v1155_v49  ;;  %v1170_v51 = vsel %vm15705_vm2, %v816_v12, 0.0  ;;  %v1167_v49 = vsel %vm15705_vm2, %v815_v16, 0.0  ;;  %v16190_v16 = vld [vmem:[#allocation173_spill] sm:$0xff] }
 0x2b3   : > { %v10191_v55 = vpop.xlane.xlu0 %949  ;;  %v10193_v53 = vpop.xlane.xlu1 %946 }
 0x2b6   : > { %1165 = vadd.xlane.f32.xlu0 %v1164_v18  ;;  %1162 = vadd.xlane.f32.xlu1 %v1161_v20  ;;  %v1176_v20 = vsel %vm15705_vm2, %v818_v45, 0.0  ;;  %v822_v45 = vmul.f32 %v10183_v25, %v9875_v30 }
 0x2b7   : > { %v10201_v19 = vpop.xlane.xlu0 %955  ;;  %v10203_v2 = vpop.xlane.xlu1 %952 }
 0x2b8   : > { %16186 = vst [vmem:[#allocation198_spill] sm:$0xff] %v10201_v19  ;;  %16187 = vst [vmem:[#allocation199_spill] sm:$0xff] %v10203_v2  ;;  %v16189_v2 = vld [vmem:[#allocation172_spill] sm:$0xff]  ;;  %v819_v19 = vmul.f32 %v10183_v25, %v16190_v16  ;;  %v1185_v16 = vsel %vm15705_vm2, %v821_v42, 0.0  ;;  %v825_v42 = vmul.f32 %v10183_v25, %v9912_v9 }
 0x2b9   : > { %v820_v12 = vmul.f32 %v10183_v25, %v16189_v2 }
 0x2ba   : > { %1171 = vadd.xlane.f32.xlu0 %v1170_v51  ;;  %1168 = vadd.xlane.f32.xlu1 %v1167_v49  ;;  %v1179_v60 = vsel %vm15705_vm2, %v819_v19, 0.0  ;;  %v823_v19 = vmul.f32 %v10183_v25, %v9892_v27  ;;  %v1197_v27 = vsel %vm15705_vm2, %v825_v42, 0.0  ;;  %v829_v42 = vmul.f32 %v10183_v25, %v9947_v5 }
 0x2bb   : > { %v10211_v4 = vpop.xlane.xlu0 %961  ;;  %v10213_v18 = vpop.xlane.xlu1 %958  ;;  %v1182_v49 = vsel %vm15705_vm2, %v820_v12, 0.0  ;;  %v824_v12 = vmul.f32 %v10183_v25, %v9889_v23 }
 0x2bc   : > { %v1191_v13 = vsel %vm15705_vm2, %v823_v19, 0.0  ;;  %v827_v19 = vmul.f32 %v10183_v25, %v9933_v28 }
 0x2be   : > { %1177 = vadd.xlane.f32.xlu0 %v1176_v20  ;;  %1174 = vadd.xlane.f32.xlu1 %v1173_v37  ;;  %v1188_v37 = vsel %vm15705_vm2, %v822_v45, 0.0  ;;  %v826_v45 = vmul.f32 %v10183_v25, %v9909_v14  ;;  %v1203_v9 = vsel %vm15705_vm2, %v827_v19, 0.0 }
 0x2bf   : > { %v10221_v7 = vpop.xlane.xlu0 %967  ;;  %v10223_v51 = vpop.xlane.xlu1 %964 }
 0x2c2   : > { %1183 = vadd.xlane.f32.xlu0 %v1182_v49  ;;  %1180 = vadd.xlane.f32.xlu1 %v1179_v60  ;;  %v1194_v60 = vsel %vm15705_vm2, %v824_v12, 0.0  ;;  %v828_v12 = vmul.f32 %v10183_v25, %v9930_v10  ;;  %v1209_v10 = vsel %vm15705_vm2, %v829_v42, 0.0 }
 0x2c3   : > { %v10231_v2 = vpop.xlane.xlu0 %973  ;;  %v10233_v20 = vpop.xlane.xlu1 %970 }
 0x2c6   : > { %1189 = vadd.xlane.f32.xlu0 %v1188_v37  ;;  %1186 = vadd.xlane.f32.xlu1 %v1185_v16  ;;  %v1200_v16 = vsel %vm15705_vm2, %v826_v45, 0.0  ;;  %v830_v45 = vmul.f32 %v10183_v25, %v9944_v34 }
 0x2c7   : > { %v10241_v30 = vpop.xlane.xlu0 %1027  ;;  %v10243_v49 = vpop.xlane.xlu1 %1024 }
 0x2c8   : > { %16191 = vst [vmem:[#allocation200_spill] sm:$0xff] %v10241_v30  ;;  %16192 = vst [vmem:[#allocation201_spill] sm:$0xff] %v10243_v49 }
 0x2ca   : > { %1195 = vadd.xlane.f32.xlu0 %v1194_v60  ;;  %1192 = vadd.xlane.f32.xlu1 %v1191_v13  ;;  %v1206_v13 = vsel %vm15705_vm2, %v828_v12, 0.0 }
 0x2cb   : > { %v10251_v23 = vpop.xlane.xlu0 %1033  ;;  %v10253_v37 = vpop.xlane.xlu1 %1030 }
 0x2cc   : > { %16193 = vst [vmem:[#allocation202_spill] sm:$0xff] %v10251_v23  ;;  %16194 = vst [vmem:[#allocation203_spill] sm:$0xff] %v10253_v37 }
 0x2ce   : > { %1201 = vadd.xlane.f32.xlu0 %v1200_v16  ;;  %1198 = vadd.xlane.f32.xlu1 %v1197_v27  ;;  %v1212_v16 = vsel %vm15705_vm2, %v830_v45, 0.0  ;;  %v16207_v45 = vld [vmem:[#allocation8_spill] sm:$0xff]  ;;  %vm2799_vm2 = vcmask 1048512  }
 0x2cf   : > { %v10261_v14 = vpop.xlane.xlu0 %1039  ;;  %v10263_v60 = vpop.xlane.xlu1 %1036  ;;  %v10294_v42 = vsub.s32 6, %v16207_v45 }
 0x2d0   : > { %16195 = vst [vmem:[#allocation204_spill] sm:$0xff] %v10261_v14  ;;  %16196 = vst [vmem:[#allocation205_spill] sm:$0xff] %v10263_v60 }
 0x2d1   : > { %16208 = vst [vmem:[#allocation216_spill] sm:$0xff] %v10294_v42 }
 0x2d2   : > { %1207 = vadd.xlane.f32.xlu0 %v1206_v13  ;;  %1204 = vadd.xlane.f32.xlu1 %v1203_v9 }
 0x2d3   : > { %v10271_v28 = vpop.xlane.xlu0 %1045  ;;  %v10273_v27 = vpop.xlane.xlu1 %1042 }
 0x2d4   : > { %16197 = vst [vmem:[#allocation206_spill] sm:$0xff] %v10271_v28  ;;  %16198 = vst [vmem:[#allocation207_spill] sm:$0xff] %v10273_v27 }
 0x2d6   : > { %1213 = vadd.xlane.f32.xlu0 %v1212_v16  ;;  %1210 = vadd.xlane.f32.xlu1 %v1209_v10  ;;  %v8730_v10 = vld [vmem:[%s8975_s23] sm:$0xff]  ;;  %s15266_s23 = sand.u32 1, %s8827_s28  }
 0x2d7   : > { %v10277_v12 = vpop.xlane.xlu0 %1051  ;;  %v10279_v19 = vpop.xlane.xlu1 %1048  ;;  %v1791_v16 = vrot.slane %v8730_v10, %v10294_v42  ;;  %s8127_s25 = sshll.u32 %s15266_s23, 3  ;;  %s7977_s19 = scalar_lea.sflag [#allocation3], %s15266_s23 }
 0x2d8   : > { %16199 = vst [vmem:[#allocation208_spill] sm:$0xff] %v10277_v12  ;;  %16200 = vst [vmem:[#allocation209_spill] sm:$0xff] %v10279_v19  ;;  %s331_s10 = scalar_lea.vmem [#allocation2], %s8127_s25 }
 0x2d9   : > { %s7995_s12 = sshll.u32 %s331_s10, 4  ;;  %s15285_s12 = int_to_ptr.vmem [resolvable:$true] %s7995_s12 }
 0x2da   : > { %s8741_s20 = scalar_lea.vmem %s15285_s12, 128  ;;  %p8748_p1 = scmp.lt.s32.totalorder %s15285_s12, %s8746_s22 }
 0x2db   : > { %v10281_v34 = vpop.xlane.xlu0 %1057  ;;  %v10283_v25 = vpop.xlane.xlu1 %1054  ;;  %p8742_p12 = scmp.ne.s32.totalorder %s15285_s12, %s8741_s20 }
 0x2dc   : > { %16201 = vst [vmem:[#allocation210_spill] sm:$0xff] %v10281_v34  ;;  %16202 = vst [vmem:[#allocation211_spill] sm:$0xff] %v10283_v25  ;;  %v16209_v34 = vld [vmem:[#allocation15_spill] sm:$0xff] }
 0x2dd   : > { %p8743_p13 = pnand %p8742_p12, %p8926_p5 }
 0x2df   : > { %v10285_v9 = vpop.xlane.xlu0 %1063  ;;  %v10287_v13 = vpop.xlane.xlu1 %1060  ;;  %p8744_p0 = pneg %p8743_p13 }
 0x2e0   : > { %16203 = vst [vmem:[#allocation212_spill] sm:$0xff] %v10285_v9  ;;  %16204 = vst [vmem:[#allocation213_spill] sm:$0xff] %v10287_v13 }
 0x2e3   : > { %v10289_v5 = vpop.xlane.xlu0 %1069  ;;  %v10291_v27 = vpop.xlane.xlu1 %1066 }
 0x2e4   : > { %16205 = vst [vmem:[#allocation214_spill] sm:$0xff] %v10289_v5  ;;  %16206 = vst [vmem:[#allocation215_spill] sm:$0xff] %v10291_v27 }
 0x2e7   : > { %v10298_v12 = vpop.xlane.xlu0 %979  ;;  %v10300_v19 = vpop.xlane.xlu1 %976  ;;  %1782 = vbcast.lane.b32.xlu1 %v16209_v34, 368 }
 0x2eb   : > { %v10303_v25 = vpop.xlane.xlu0 %985  ;;  %v10305_v9 = vpop.xlane.xlu1 %982  ;;  %1793 = vbcast.lane.b32.xlu1 %v1791_v16, 256 }
 0x2ec   : > { %1778 = vbcast.lane.b32.xlu0 %v16209_v34, 360 }
 0x2ef   : > { %v10308_v27 = vpop.xlane.xlu0 %991  ;;  %v10310_v5 = vpop.xlane.xlu1 %988  ;;  %1801 = vbcast.lane.b32.xlu1 %v1791_v16, 272 }
 0x2f0   : > { %1786 = vbcast.lane.b32.xlu0 %v16209_v34, 376 }
 0x2f3   : > { %v10313_v42 = vpop.xlane.xlu0 %997  ;;  %v10315_v13 = vpop.xlane.xlu1 %994  ;;  %1809 = vbcast.lane.b32.xlu1 %v1791_v16, 288 }
 0x2f4   : > { %1797 = vbcast.lane.b32.xlu0 %v1791_v16, 264 }
 0x2f7   : > { %v10317_v28 = vpop.xlane.xlu0 %1003  ;;  %v10319_v60 = vpop.xlane.xlu1 %1000  ;;  %1817 = vbcast.lane.b32.xlu1 %v1791_v16, 304 }
 0x2f8   : > { %16210 = vst [vmem:[#allocation15_spill] sm:$0xff] %v10317_v28  ;;  %16211 = vst [vmem:[#allocation217_spill] sm:$0xff] %v10319_v60  ;;  %1805 = vbcast.lane.b32.xlu0 %v1791_v16, 280  ;;  %v10334_v60 = vsub.s32 7, %v16207_v45 }
 0x2fa   : > { %16218 = vst [vmem:[#allocation224_spill] sm:$0xff] %v10334_v60 }
 0x2fb   : > { %v10321_v14 = vpop.xlane.xlu0 %1009  ;;  %v10323_v37 = vpop.xlane.xlu1 %1006  ;;  %1825 = vbcast.lane.b32.xlu1 %v1791_v16, 320 }
 0x2fc   : > { %16212 = vst [vmem:[#allocation218_spill] sm:$0xff] %v10321_v14  ;;  %16213 = vst [vmem:[#allocation219_spill] sm:$0xff] %v10323_v37  ;;  %1813 = vbcast.lane.b32.xlu0 %v1791_v16, 296  ;;  %v1858_v14 = vrot.slane %v8730_v10, %v10334_v60 }
 0x2ff   : > { %v10325_v23 = vpop.xlane.xlu0 %1015  ;;  %v10327_v34 = vpop.xlane.xlu1 %1012  ;;  %1833 = vbcast.lane.b32.xlu1 %v1791_v16, 336 }
 0x300   : > { %16214 = vst [vmem:[#allocation220_spill] sm:$0xff] %v10325_v23  ;;  %16215 = vst [vmem:[#allocation221_spill] sm:$0xff] %v10327_v34  ;;  %1821 = vbcast.lane.b32.xlu0 %v1791_v16, 312 }
 0x303   : > { %v10329_v49 = vpop.xlane.xlu0 %1021  ;;  %v10331_v30 = vpop.xlane.xlu1 %1018  ;;  %1841 = vbcast.lane.b32.xlu1 %v1791_v16, 352 }
 0x304   : > { %16216 = vst [vmem:[#allocation222_spill] sm:$0xff] %v10329_v49  ;;  %16217 = vst [vmem:[#allocation223_spill] sm:$0xff] %v10331_v30  ;;  %1829 = vbcast.lane.b32.xlu0 %v1791_v16, 328 }
 0x307   : > { %v10337_v37 = vpop.xlane.xlu0 %1075  ;;  %v10339_v28 = vpop.xlane.xlu1 %1072  ;;  %1849 = vbcast.lane.b32.xlu1 %v1791_v16, 368 }
 0x308   : > { %16219 = vst [vmem:[#allocation225_spill] sm:$0xff] %v10339_v28  ;;  %1837 = vbcast.lane.b32.xlu0 %v1791_v16, 344 }
 0x30b   : > { %v10341_v34 = vpop.xlane.xlu0 %1081  ;;  %v10343_v23 = vpop.xlane.xlu1 %1078  ;;  %1860 = vbcast.lane.b32.xlu1 %v1858_v14, 256 }
 0x30c   : > { %16220 = vst [vmem:[#allocation226_spill] sm:$0xff] %v10341_v34  ;;  %16221 = vst [vmem:[#allocation227_spill] sm:$0xff] %v10343_v23  ;;  %1845 = vbcast.lane.b32.xlu0 %v1791_v16, 360 }
 0x30f   : > { %v10345_v30 = vpop.xlane.xlu0 %1087  ;;  %v10347_v49 = vpop.xlane.xlu1 %1084  ;;  %1868 = vbcast.lane.b32.xlu1 %v1858_v14, 272 }
 0x310   : > { %16222 = vst [vmem:[#allocation228_spill] sm:$0xff] %v10345_v30  ;;  %16223 = vst [vmem:[#allocation229_spill] sm:$0xff] %v10347_v49  ;;  %1853 = vbcast.lane.b32.xlu0 %v1791_v16, 376 }
 0x313   : > { %v10349_v45 = vpop.xlane.xlu0 %1093  ;;  %v10351_v10 = vpop.xlane.xlu1 %1090  ;;  %1876 = vbcast.lane.b32.xlu1 %v1858_v14, 288 }
 0x314   : > { %16224 = vst [vmem:[#allocation230_spill] sm:$0xff] %v10349_v45  ;;  %16225 = vst [vmem:[#allocation231_spill] sm:$0xff] %v10351_v10  ;;  %1864 = vbcast.lane.b32.xlu0 %v1858_v14, 264  ;;  %v10367_v10 = vrot.slane %v9977_v33, %v8967_v11 }
 0x316   : > { %v1258_v11 = vadd.f32 %v10367_v10, %v9997_v38  ;;  %v16242_v38 = vld [vmem:[#allocation19_spill] sm:$0xff] }
 0x317   : > { %v10353_v60 = vpop.xlane.xlu0 %1099  ;;  %v10355_v28 = vpop.xlane.xlu1 %1096  ;;  %1884 = vbcast.lane.b32.xlu1 %v1858_v14, 304 }
 0x318   : > { %16226 = vst [vmem:[#allocation232_spill] sm:$0xff] %v10353_v60  ;;  %16227 = vst [vmem:[#allocation233_spill] sm:$0xff] %v10355_v28  ;;  %1872 = vbcast.lane.b32.xlu0 %v1858_v14, 280 }
 0x31b   : > { %v10357_v23 = vpop.xlane.xlu0 %1105  ;;  %v10359_v34 = vpop.xlane.xlu1 %1102  ;;  %1892 = vbcast.lane.b32.xlu1 %v1858_v14, 320 }
 0x31c   : > { %16228 = vst [vmem:[#allocation234_spill] sm:$0xff] %v10357_v23  ;;  %16229 = vst [vmem:[#allocation235_spill] sm:$0xff] %v10359_v34  ;;  %1880 = vbcast.lane.b32.xlu0 %v1858_v14, 296  ;;  %v1256_v34 = vadd.f32 %v10367_v10, %v9989_v61  ;;  %v16239_v61 = vld [vmem:[#allocation17_spill] sm:$0xff] }
 0x31d   : > { %v10390_v30 = vadd.f32 %v16239_v61, %v1258_v11  ;;  %v1261_v11 = vadd.f32 %v10367_v10, %v10009_v40  ;;  %v16244_v61 = vld [vmem:[#allocation18_spill] sm:$0xff]  ;;  %v1263_v40 = vadd.f32 %v10367_v10, %v10023_v41  ;;  %v1265_v41 = vadd.f32 %v10367_v10, %v10033_v62 }
 0x31e   : > { %v1267_v62 = vadd.f32 %v10367_v10, %v10043_v24  ;;  %v1269_v24 = vadd.f32 %v10367_v10, %v10053_v46  ;;  %v1271_v46 = vadd.f32 %v10367_v10, %v10063_v56 }
 0x31f   : > { %v10361_v49 = vpop.xlane.xlu0 %1111  ;;  %v10363_v16 = vpop.xlane.xlu1 %1108  ;;  %1900 = vbcast.lane.b32.xlu1 %v1858_v14, 336  ;;  %16240 = vst [vmem:[#allocation17_spill] sm:$0xff] %v10390_v30 }
 0x320   : > { %16230 = vst [vmem:[#allocation236_spill] sm:$0xff] %v10361_v49  ;;  %16231 = vst [vmem:[#allocation237_spill] sm:$0xff] %v10363_v16  ;;  %1888 = vbcast.lane.b32.xlu0 %v1858_v14, 312  ;;  %v16236_v16 = vld [vmem:[#allocation16_spill] sm:$0xff] }
 0x321   : > { %v10380_v45 = vadd.f32 %v16236_v16, %v1256_v34  ;;  %v1257_v34 = vadd.f32 %v10367_v10, %v9987_v47 }
 0x323   : > { %v10369_v60 = vpop.xlane.xlu0 %1117  ;;  %v10371_v28 = vpop.xlane.xlu1 %1114  ;;  %1908 = vbcast.lane.b32.xlu1 %v1858_v14, 352  ;;  %16237 = vst [vmem:[#allocation16_spill] sm:$0xff] %v10380_v45 }
 0x324   : > { %16232 = vst [vmem:[#allocation238_spill] sm:$0xff] %v10369_v60  ;;  %16233 = vst [vmem:[#allocation239_spill] sm:$0xff] %v10371_v28  ;;  %1896 = vbcast.lane.b32.xlu0 %v1858_v14, 328 }
 0x327   : > { %v10375_v23 = vpop.xlane.xlu0 %1123  ;;  %v10377_v49 = vpop.xlane.xlu1 %1120  ;;  %1916 = vbcast.lane.b32.xlu1 %v1858_v14, 368 }
 0x328   : > { %16234 = vst [vmem:[#allocation240_spill] sm:$0xff] %v10375_v23  ;;  %16235 = vst [vmem:[#allocation241_spill] sm:$0xff] %v10377_v49  ;;  %1904 = vbcast.lane.b32.xlu0 %v1858_v14, 344  ;;  %v1259_v49 = vadd.f32 %v10367_v10, %v9999_v21  ;;  %v1260_v21 = vadd.f32 %v10367_v10, %v10007_v32  ;;  %v1262_v32 = vadd.f32 %v10367_v10, %v10021_v15 }
 0x329   : > { %v1264_v15 = vadd.f32 %v10367_v10, %v10031_v26  ;;  %v1266_v26 = vadd.f32 %v10367_v10, %v10041_v57  ;;  %v1268_v57 = vadd.f32 %v10367_v10, %v10051_v59  ;;  %v1270_v59 = vadd.f32 %v10367_v10, %v10061_v58 }
 0x32b   : > { %v10384_v60 = vpop.xlane.xlu0 %1129  ;;  %v10386_v28 = vpop.xlane.xlu1 %1126  ;;  %2307 = vperm.xlu1 %8456, %v10380_v45   ;;  %v10407_v45 = vadd.f32 %v16244_v61, %v1257_v34 }
 0x32c   : > { %16238 = vst [vmem:[#allocation242_spill] sm:$0xff] %v10386_v28  ;;  %1912 = vbcast.lane.b32.xlu0 %v1858_v14, 360  ;;  %v10402_v28 = vadd.f32 %v16242_v38, %v1259_v49  ;;  %v16248_v38 = vld [vmem:[#allocation21_spill] sm:$0xff] }
 0x32d   : > { %16245 = vst [vmem:[#allocation18_spill] sm:$0xff] %v10407_v45  ;;  %v10423_v34 = vadd.f32 %v16248_v38, %v1260_v21 }
 0x32e   : > { %16243 = vst [vmem:[#allocation19_spill] sm:$0xff] %v10402_v28 }
 0x32f   : > { %v10396_v16 = vpop.xlane.xlu0 %1135  ;;  %v10398_v23 = vpop.xlane.xlu1 %1132  ;;  %2313 = vperm.xlu1 %8456, %v10390_v30   ;;  %16249 = vst [vmem:[#allocation21_spill] sm:$0xff] %v10423_v34 }
 0x330   : > { %16241 = vst [vmem:[#allocation243_spill] sm:$0xff] %v10396_v16  ;;  %1920 = vbcast.lane.b32.xlu0 %v1858_v14, 376  ;;  %v16246_v14 = vld [vmem:[#allocation20_spill] sm:$0xff] }
 0x331   : > { %v10418_v49 = vadd.f32 %v16246_v14, %v1261_v11  ;;  %v16252_v14 = vld [vmem:[#allocation23_spill] sm:$0xff] }
 0x332   : > { %v10439_v21 = vadd.f32 %v16252_v14, %v1262_v32 }
 0x333   : > { %v10411_v47 = vpop.xlane.xlu0 %1141  ;;  %v10413_v16 = vpop.xlane.xlu1 %1138  ;;  %2316 = vperm.xlu1 %8456, %v10402_v28   ;;  %16247 = vst [vmem:[#allocation20_spill] sm:$0xff] %v10418_v49  ;;  %v16250_v28 = vld [vmem:[#allocation22_spill] sm:$0xff] }
 0x334   : > { %2310 = vperm.xlu0 %8457, %v10407_v45   ;;  %v10434_v11 = vadd.f32 %v16250_v28, %v1263_v40  ;;  %16253 = vst [vmem:[#allocation23_spill] sm:$0xff] %v10439_v21  ;;  %v16256_v40 = vld [vmem:[#allocation25_spill] sm:$0xff] }
 0x335   : > { %v10455_v32 = vadd.f32 %v16256_v40, %v1264_v15 }
 0x336   : > { %16251 = vst [vmem:[#allocation22_spill] sm:$0xff] %v10434_v11 }
 0x337   : > { %v10427_v61 = vpop.xlane.xlu0 %1147  ;;  %v10429_v30 = vpop.xlane.xlu1 %1144  ;;  %2322 = vperm.xlu1 %8456, %v10418_v49   ;;  %v16254_v49 = vld [vmem:[#allocation24_spill] sm:$0xff]  ;;  %16257 = vst [vmem:[#allocation25_spill] sm:$0xff] %v10455_v32 }
 0x338   : > { %2319 = vperm.xlu0 %8457, %v10423_v34   ;;  %v10450_v28 = vadd.f32 %v16254_v49, %v1265_v41  ;;  %v16260_v41 = vld [vmem:[#allocation27_spill] sm:$0xff] }
 0x339   : > { %v10471_v15 = vadd.f32 %v16260_v41, %v1266_v26  ;;  %v16267_v41 = vld [vmem:[#allocation10_spill] sm:$0xff] }
 0x33a   : > { %16255 = vst [vmem:[#allocation24_spill] sm:$0xff] %v10450_v28 }
 0x33b   : > { %v10443_v38 = vpop.xlane.xlu0 %1153  ;;  %v10445_v45 = vpop.xlane.xlu1 %1150  ;;  %2328 = vperm.xlu1 %8456, %v10434_v11   ;;  %16261 = vst [vmem:[#allocation27_spill] sm:$0xff] %v10471_v15 }
 0x33c   : > { %2325 = vperm.xlu0 %8457, %v10439_v21   ;;  %v16258_v21 = vld [vmem:[#allocation26_spill] sm:$0xff] }
 0x33d   : > { %v10466_v49 = vadd.f32 %v16258_v21, %v1267_v62  ;;  %v16265_v62 = vld [vmem:[#allocation29_spill] sm:$0xff] }
 0x33e   : > { %v10487_v26 = vadd.f32 %v16265_v62, %v1268_v57  ;;  %v16270_v57 = vld [vmem:[#allocation31_spill] sm:$0xff] }
 0x33f   : > { %v10459_v14 = vpop.xlane.xlu0 %1159  ;;  %v10461_v34 = vpop.xlane.xlu1 %1156  ;;  %2334 = vperm.xlu1 %8456, %v10450_v28   ;;  %16259 = vst [vmem:[#allocation26_spill] sm:$0xff] %v10466_v49  ;;  %v16263_v28 = vld [vmem:[#allocation28_spill] sm:$0xff]  ;;  %v10507_v58 = vadd.f32 %v16270_v57, %v1270_v59 }
 0x340   : > { %2331 = vperm.xlu0 %8457, %v10455_v32   ;;  %v10482_v21 = vadd.f32 %v16263_v28, %v1269_v24  ;;  %16266 = vst [vmem:[#allocation29_spill] sm:$0xff] %v10487_v26  ;;  %v10493_v32 = vrot.slane %v9977_v33, %v16267_v41  ;;  %v16268_v28 = vld [vmem:[#allocation30_spill] sm:$0xff] }
 0x341   : > { %v10502_v56 = vadd.f32 %v16268_v28, %v1271_v46  ;;  %16271 = vst [vmem:[#allocation31_spill] sm:$0xff] %v10507_v58  ;;  %v16274_v28 = vld [vmem:[#allocation33_spill] sm:$0xff] }
 0x342   : > { %16264 = vst [vmem:[#allocation28_spill] sm:$0xff] %v10482_v21  ;;  %v1273_v24 = vadd.f32 %v10493_v32, %v10071_v1  ;;  %v1272_v10 = vadd.f32 %v10493_v32, %v10073_v54  ;;  %v1275_v1 = vadd.f32 %v10493_v32, %v10081_v8  ;;  %v1274_v54 = vadd.f32 %v10493_v32, %v10083_v39 }
 0x343   : > { %v10475_v40 = vpop.xlane.xlu0 %1165  ;;  %v10477_v11 = vpop.xlane.xlu1 %1162  ;;  %2340 = vperm.xlu1 %8456, %v10466_v49   ;;  %16269 = vst [vmem:[#allocation30_spill] sm:$0xff] %v10502_v56 }
 0x344   : > { %16262 = vst [vmem:[#allocation244_spill] sm:$0xff] %v10477_v11  ;;  %2337 = vperm.xlu0 %8457, %v10471_v15   ;;  %v10523_v59 = vadd.f32 %v16274_v28, %v1272_v10  ;;  %v16277_v15 = vld [vmem:[#allocation34_spill] sm:$0xff]  ;;  %v16282_v28 = vld [vmem:[#allocation196_spill] sm:$0xff] }
 0x345   : > { %v1276_v39 = vadd.f32 %v10493_v32, %v16282_v28 }
 0x346   : > { %16275 = vst [vmem:[#allocation33_spill] sm:$0xff] %v10523_v59 }
 0x347   : > { %v10495_v11 = vpop.xlane.xlu0 %1171  ;;  %2346 = vperm.xlu1 %8456, %v10482_v21   ;;  %v10498_v49 = vpop.xlane.xlu1 %1168 }
 0x348   : > { %2343 = vperm.xlu0 %8457, %v10487_v26   ;;  %v16272_v26 = vld [vmem:[#allocation32_spill] sm:$0xff] }
 0x349   : > { %v10518_v46 = vadd.f32 %v16272_v26, %v1273_v24  ;;  %v10534_v26 = vadd.f32 %v16277_v15, %v1275_v1  ;;  %v16279_v24 = vld [vmem:[#allocation195_spill] sm:$0xff]  ;;  %v1279_v1 = vadd.f32 %v10493_v32, %v10106_v63  ;;  %v1281_v63 = vadd.f32 %v10493_v32, %v10116_v36 }
 0x34a   : > { %v1277_v8 = vadd.f32 %v10493_v32, %v16279_v24  ;;  %v16285_v24 = vld [vmem:[#allocation37_spill] sm:$0xff]  ;;  %v1283_v36 = vadd.f32 %v10493_v32, %v10126_v52  ;;  %v1285_v52 = vadd.f32 %v10493_v32, %v10136_v0  ;;  %v1287_v0 = vadd.f32 %v10493_v32, %v10146_v35 }
 0x34b   : > { %v10511_v62 = vpop.xlane.xlu0 %1177  ;;  %2352 = vperm.xlu1 %8456, %v10502_v56   ;;  %v10514_v21 = vpop.xlane.xlu1 %1174  ;;  %16273 = vst [vmem:[#allocation32_spill] sm:$0xff] %v10518_v46  ;;  %16278 = vst [vmem:[#allocation34_spill] sm:$0xff] %v10534_v26 }
 0x34c   : > { %2349 = vperm.xlu0 %8457, %v10507_v58   ;;  %v16280_v58 = vld [vmem:[#allocation35_spill] sm:$0xff] }
 0x34d   : > { %v10539_v10 = vadd.f32 %v16280_v58, %v1274_v54  ;;  %v10555_v58 = vadd.f32 %v16285_v24, %v1276_v39  ;;  %v16287_v54 = vld [vmem:[#allocation197_spill] sm:$0xff]  ;;  %v1280_v24 = vadd.f32 %v10493_v32, %v10118_v31  ;;  %v1282_v31 = vadd.f32 %v10493_v32, %v10128_v6 }
 0x34e   : > { %v1278_v28 = vadd.f32 %v10493_v32, %v16287_v54  ;;  %v1284_v6 = vadd.f32 %v10493_v32, %v10138_v50  ;;  %v1286_v50 = vadd.f32 %v10493_v32, %v10148_v3 }
 0x34f   : > { %v10527_v57 = vpop.xlane.xlu0 %1183  ;;  %2358 = vperm.xlu1 %8456, %v10518_v46   ;;  %v10530_v56 = vpop.xlane.xlu1 %1180  ;;  %16281 = vst [vmem:[#allocation195_spill] sm:$0xff] %v10539_v10  ;;  %16286 = vst [vmem:[#allocation196_spill] sm:$0xff] %v10555_v58 }
 0x350   : > { %16276 = vst [vmem:[#allocation245_spill] sm:$0xff] %v10530_v56  ;;  %2355 = vperm.xlu0 %8457, %v10523_v59   ;;  %v16283_v59 = vld [vmem:[#allocation36_spill] sm:$0xff] }
 0x351   : > { %v10550_v15 = vadd.f32 %v16283_v59, %v1277_v8  ;;  %v16291_v8 = vld [vmem:[#allocation39_spill] sm:$0xff] }
 0x352   : > { %v10571_v39 = vadd.f32 %v16291_v8, %v1278_v28 }
 0x353   : > { %v10543_v41 = vpop.xlane.xlu0 %1189  ;;  %2364 = vperm.xlu1 %8456, %v10534_v26   ;;  %v10546_v46 = vpop.xlane.xlu1 %1186  ;;  %16284 = vst [vmem:[#allocation35_spill] sm:$0xff] %v10550_v15 }
 0x354   : > { %2361 = vperm.xlu0 %8457, %v10539_v10   ;;  %v16289_v10 = vld [vmem:[#allocation38_spill] sm:$0xff]  ;;  %16292 = vst [vmem:[#allocation197_spill] sm:$0xff] %v10571_v39 }
 0x355   : > { %v10566_v59 = vadd.f32 %v16289_v10, %v1279_v1  ;;  %v16297_v1 = vld [vmem:[#allocation41_spill] sm:$0xff] }
 0x356   : > { %v10587_v28 = vadd.f32 %v16297_v1, %v1280_v24 }
 0x357   : > { %v10559_v56 = vpop.xlane.xlu0 %1195  ;;  %2370 = vperm.xlu1 %8456, %v10550_v15   ;;  %v10562_v26 = vpop.xlane.xlu1 %1192  ;;  %16290 = vst [vmem:[#allocation37_spill] sm:$0xff] %v10566_v59 }
 0x358   : > { %16288 = vst [vmem:[#allocation36_spill] sm:$0xff] %v10562_v26  ;;  %2367 = vperm.xlu0 %8457, %v10555_v58   ;;  %v16295_v58 = vld [vmem:[#allocation40_spill] sm:$0xff]  ;;  %16298 = vst [vmem:[#allocation41_spill] sm:$0xff] %v10587_v28 }
 0x359   : > { %v10582_v10 = vadd.f32 %v16295_v58, %v1281_v63  ;;  %v16303_v63 = vld [vmem:[#allocation43_spill] sm:$0xff] }
 0x35a   : > { %v10603_v24 = vadd.f32 %v16303_v63, %v1282_v31  ;;  %v16311_v63 = vld [vmem:[#allocation11_spill] sm:$0xff] }
 0x35b   : > { %v10575_v54 = vpop.xlane.xlu0 %1201  ;;  %2376 = vperm.xlu1 %8456, %v10566_v59   ;;  %v10578_v15 = vpop.xlane.xlu1 %1198  ;;  %16296 = vst [vmem:[#allocation40_spill] sm:$0xff] %v10582_v10 }
 0x35c   : > { %16293 = vst [vmem:[#allocation38_spill] sm:$0xff] %v10575_v54  ;;  %16294 = vst [vmem:[#allocation39_spill] sm:$0xff] %v10578_v15  ;;  %2373 = vperm.xlu0 %8457, %v10571_v39   ;;  %v16301_v39 = vld [vmem:[#allocation42_spill] sm:$0xff]  ;;  %v16373_v15 = vld [vmem:[#allocation93_spill] sm:$0xff] }
 0x35d   : > { %v10598_v58 = vadd.f32 %v16301_v39, %v1283_v36  ;;  %16304 = vst [vmem:[#allocation43_spill] sm:$0xff] %v10603_v24  ;;  %v16309_v36 = vld [vmem:[#allocation45_spill] sm:$0xff] }
 0x35e   : > { %v10619_v31 = vadd.f32 %v16309_v36, %v1284_v6  ;;  %v16314_v6 = vld [vmem:[#allocation47_spill] sm:$0xff] }
 0x35f   : > { %v10591_v8 = vpop.xlane.xlu0 %1207  ;;  %2382 = vperm.xlu1 %8456, %v10582_v10   ;;  %v10594_v59 = vpop.xlane.xlu1 %1204  ;;  %16302 = vst [vmem:[#allocation42_spill] sm:$0xff] %v10598_v58  ;;  %v10639_v3 = vadd.f32 %v16314_v6, %v1286_v50 }
 0x360   : > { %16299 = vst [vmem:[#allocation246_spill] sm:$0xff] %v10591_v8  ;;  %16300 = vst [vmem:[#allocation247_spill] sm:$0xff] %v10594_v59  ;;  %2379 = vperm.xlu0 %8457, %v10587_v28   ;;  %v16307_v28 = vld [vmem:[#allocation44_spill] sm:$0xff] }
 0x361   : > { %v10614_v39 = vadd.f32 %v16307_v28, %v1285_v52  ;;  %16310 = vst [vmem:[#allocation45_spill] sm:$0xff] %v10619_v31  ;;  %v16312_v28 = vld [vmem:[#allocation46_spill] sm:$0xff]  ;;  %16315 = vst [vmem:[#allocation47_spill] sm:$0xff] %v10639_v3 }
 0x362   : > { %v10634_v35 = vadd.f32 %v16312_v28, %v1287_v0  ;;  %v16318_v28 = vld [vmem:[#allocation51_spill] sm:$0xff] }
 0x363   : > { %v10607_v1 = vpop.xlane.xlu0 %1213  ;;  %2388 = vperm.xlu1 %8456, %v10598_v58   ;;  %v10610_v10 = vpop.xlane.xlu1 %1210  ;;  %16308 = vst [vmem:[#allocation44_spill] sm:$0xff] %v10614_v39 }
 0x364   : > { %16305 = vst [vmem:[#allocation248_spill] sm:$0xff] %v10607_v1  ;;  %16306 = vst [vmem:[#allocation249_spill] sm:$0xff] %v10610_v10  ;;  %2385 = vperm.xlu0 %8457, %v10603_v24   ;;  %v10625_v1 = vrot.slane %v9977_v33, %v16311_v63  ;;  %v16316_v63 = vld [vmem:[#allocation50_spill] sm:$0xff] }
 0x365   : > { %16313 = vst [vmem:[#allocation46_spill] sm:$0xff] %v10634_v35 }
 0x366   : > { %v1289_v52 = vadd.f32 %v10625_v1, %v10156_v17  ;;  %v1288_v32 = vadd.f32 %v10625_v1, %v10158_v43  ;;  %v1291_v17 = vadd.f32 %v10625_v1, %v10166_v22  ;;  %v1290_v43 = vadd.f32 %v10625_v1, %v10168_v29 }
 0x367   : > { %v10627_v58 = vpop.permute.xlu0 %1778  ;;  %2394 = vperm.xlu1 %8456, %v10614_v39   ;;  %v10630_v24 = vpop.permute.xlu1 %1782  ;;  %v1293_v22 = vadd.f32 %v10625_v1, %v10178_v48  ;;  %v1292_v29 = vadd.f32 %v10625_v1, %v10180_v44  ;;  %v1295_v48 = vadd.f32 %v10625_v1, %v10191_v55  ;;  %v1294_v44 = vadd.f32 %v10625_v1, %v10193_v53 }
 0x368   : > { %2391 = vperm.xlu0 %8457, %v10619_v31   ;;  %v10650_v0 = vadd.f32 %v16316_v63, %v1289_v52  ;;  %v10655_v50 = vadd.f32 %v16318_v28, %v1288_v32  ;;  %v16322_v52 = vld [vmem:[#allocation55_spill] sm:$0xff]  ;;  %v16331_v31 = vld [vmem:[#allocation65_spill] sm:$0xff] }
 0x369   : > { %v10671_v32 = vadd.f32 %v16322_v52, %v1290_v43 }
 0x36a   : > { %16317 = vst [vmem:[#allocation50_spill] sm:$0xff] %v10650_v0  ;;  %16319 = vst [vmem:[#allocation51_spill] sm:$0xff] %v10655_v50 }
 0x36b   : > { %v10643_v36 = vpop.permute.xlu0 %1786  ;;  %2400 = vperm.xlu1 %8456, %v10634_v35   ;;  %v10646_v39 = vpop.permute.xlu1 %1793  ;;  %16323 = vst [vmem:[#allocation55_spill] sm:$0xff] %v10671_v32 }
 0x36c   : > { %2397 = vperm.xlu0 %8457, %v10639_v3   ;;  %v16320_v3 = vld [vmem:[#allocation54_spill] sm:$0xff] }
 0x36d   : > { %v10666_v63 = vadd.f32 %v16320_v3, %v1291_v17  ;;  %v16326_v17 = vld [vmem:[#allocation61_spill] sm:$0xff] }
 0x36e   : > { %v10687_v43 = vadd.f32 %v16326_v17, %v1292_v29  ;;  %v10703_v29 = vadd.f32 %v16331_v31, %v1294_v44  ;;  %v16333_v17 = vld [vmem:[#allocation199_spill] sm:$0xff]  ;;  %v1298_v44 = vadd.f32 %v10625_v1, %v10213_v18  ;;  %v1300_v18 = vadd.f32 %v10625_v1, %v10223_v51 }
 0x36f   : > { %v10659_v6 = vpop.permute.xlu0 %1797  ;;  %2406 = vperm.xlu1 %8456, %v10650_v0   ;;  %v10662_v35 = vpop.permute.xlu1 %1801  ;;  %16321 = vst [vmem:[#allocation54_spill] sm:$0xff] %v10666_v63  ;;  %v1296_v53 = vadd.f32 %v10625_v1, %v16333_v17  ;;  %v1302_v51 = vadd.f32 %v10625_v1, %v10233_v20 }
 0x370   : > { %2403 = vperm.xlu0 %8457, %v10655_v50   ;;  %v16324_v50 = vld [vmem:[#allocation60_spill] sm:$0xff]  ;;  %16327 = vst [vmem:[#allocation61_spill] sm:$0xff] %v10687_v43 }
 0x371   : > { %v10682_v3 = vadd.f32 %v16324_v50, %v1293_v22  ;;  %v16330_v22 = vld [vmem:[#allocation198_spill] sm:$0xff] }
 0x372   : > { %v1297_v55 = vadd.f32 %v10625_v1, %v16330_v22  ;;  %16332 = vst [vmem:[#allocation198_spill] sm:$0xff] %v10703_v29  ;;  %v16336_v22 = vld [vmem:[#allocation71_spill] sm:$0xff] }
 0x373   : > { %v10675_v28 = vpop.permute.xlu0 %1805  ;;  %2412 = vperm.xlu1 %8456, %v10666_v63   ;;  %v10678_v0 = vpop.permute.xlu1 %1809  ;;  %16325 = vst [vmem:[#allocation60_spill] sm:$0xff] %v10682_v3  ;;  %v10719_v31 = vadd.f32 %v16336_v22, %v1296_v53 }
 0x374   : > { %2409 = vperm.xlu0 %8457, %v10671_v32   ;;  %v16328_v32 = vld [vmem:[#allocation64_spill] sm:$0xff] }
 0x375   : > { %v10698_v50 = vadd.f32 %v16328_v32, %v1295_v48  ;;  %v1299_v48 = vadd.f32 %v10625_v1, %v10211_v4  ;;  %16337 = vst [vmem:[#allocation199_spill] sm:$0xff] %v10719_v31  ;;  %v1301_v4 = vadd.f32 %v10625_v1, %v10221_v7  ;;  %v1303_v7 = vadd.f32 %v10625_v1, %v10231_v2 }
 0x377   : > { %v10691_v52 = vpop.permute.xlu0 %1813  ;;  %2418 = vperm.xlu1 %8456, %v10682_v3   ;;  %v10694_v63 = vpop.permute.xlu1 %1817  ;;  %16329 = vst [vmem:[#allocation64_spill] sm:$0xff] %v10698_v50 }
 0x378   : > { %2415 = vperm.xlu0 %8457, %v10687_v43   ;;  %v16334_v43 = vld [vmem:[#allocation70_spill] sm:$0xff] }
 0x379   : > { %v10714_v32 = vadd.f32 %v16334_v43, %v1297_v55  ;;  %v16340_v55 = vld [vmem:[#allocation75_spill] sm:$0xff] }
 0x37a   : > { %v10735_v53 = vadd.f32 %v16340_v55, %v1298_v44  ;;  %v16346_v55 = vld [vmem:[#allocation12_spill] sm:$0xff] }
 0x37b   : > { %v10707_v10 = vpop.permute.xlu0 %1821  ;;  %2424 = vperm.xlu1 %8456, %v10698_v50   ;;  %v10710_v3 = vpop.permute.xlu1 %1825  ;;  %16335 = vst [vmem:[#allocation65_spill] sm:$0xff] %v10714_v32  ;;  %v10757_v59 = vrot.slane %v9977_v33, %v16346_v55  ;;  %v16351_v55 = vld [vmem:[#allocation84_spill] sm:$0xff] }
 0x37c   : > { %2421 = vperm.xlu0 %8457, %v10703_v29   ;;  %v16338_v29 = vld [vmem:[#allocation74_spill] sm:$0xff]  ;;  %16341 = vst [vmem:[#allocation71_spill] sm:$0xff] %v10735_v53 }
 0x37d   : > { %v10730_v43 = vadd.f32 %v16338_v29, %v1299_v48  ;;  %v16344_v48 = vld [vmem:[#allocation81_spill] sm:$0xff]  ;;  %v1304_v1 = vadd.f32 %v10757_v59, %v10300_v19  ;;  %v1306_v19 = vadd.f32 %v10757_v59, %v10305_v9  ;;  %v1308_v9 = vadd.f32 %v10757_v59, %v10310_v5 }
 0x37e   : > { %v10751_v44 = vadd.f32 %v16344_v48, %v1300_v18  ;;  %v16349_v18 = vld [vmem:[#allocation83_spill] sm:$0xff]  ;;  %v1310_v5 = vadd.f32 %v10757_v59, %v10315_v13 }
 0x37f   : > { %v10723_v17 = vpop.permute.xlu0 %1829  ;;  %2430 = vperm.xlu1 %8456, %v10714_v32   ;;  %v10726_v50 = vpop.permute.xlu1 %1833  ;;  %16339 = vst [vmem:[#allocation70_spill] sm:$0xff] %v10730_v43  ;;  %v10771_v20 = vadd.f32 %v16349_v18, %v1302_v51 }
 0x380   : > { %2427 = vperm.xlu0 %8457, %v10719_v31   ;;  %v16342_v31 = vld [vmem:[#allocation80_spill] sm:$0xff]  ;;  %16345 = vst [vmem:[#allocation75_spill] sm:$0xff] %v10751_v44 }
 0x381   : > { %v10746_v29 = vadd.f32 %v16342_v31, %v1301_v4  ;;  %v16347_v31 = vld [vmem:[#allocation82_spill] sm:$0xff]  ;;  %v1305_v4 = vadd.f32 %v10757_v59, %v10298_v12  ;;  %16350 = vst [vmem:[#allocation81_spill] sm:$0xff] %v10771_v20  ;;  %v1307_v12 = vadd.f32 %v10757_v59, %v10303_v25  ;;  %v1309_v25 = vadd.f32 %v10757_v59, %v10308_v27 }
 0x382   : > { %v10766_v2 = vadd.f32 %v16347_v31, %v1303_v7  ;;  %v16353_v31 = vld [vmem:[#allocation85_spill] sm:$0xff]  ;;  %v1311_v27 = vadd.f32 %v10757_v59, %v10313_v42 }
 0x383   : > { %v10739_v22 = vpop.permute.xlu0 %1837  ;;  %2436 = vperm.xlu1 %8456, %v10730_v43   ;;  %v10742_v32 = vpop.permute.xlu1 %1841  ;;  %16343 = vst [vmem:[#allocation74_spill] sm:$0xff] %v10746_v29  ;;  %v10782_v7 = vadd.f32 %v16351_v55, %v1305_v4  ;;  %v10787_v51 = vadd.f32 %v16353_v31, %v1304_v1  ;;  %v16357_v4 = vld [vmem:[#allocation87_spill] sm:$0xff] }
 0x384   : > { %2433 = vperm.xlu0 %8457, %v10735_v53   ;;  %16348 = vst [vmem:[#allocation80_spill] sm:$0xff] %v10766_v2  ;;  %v10803_v1 = vadd.f32 %v16357_v4, %v1306_v19 }
 0x385   : > { %16352 = vst [vmem:[#allocation82_spill] sm:$0xff] %v10782_v7  ;;  %16354 = vst [vmem:[#allocation83_spill] sm:$0xff] %v10787_v51 }
 0x386   : > { %16358 = vst [vmem:[#allocation85_spill] sm:$0xff] %v10803_v1 }
 0x387   : > { %v10759_v43 = vpop.permute.xlu0 %1845  ;;  %2442 = vperm.xlu1 %8456, %v10746_v29   ;;  %v10762_v53 = vpop.permute.xlu1 %1849 }
 0x388   : > { %2439 = vperm.xlu0 %8457, %v10751_v44   ;;  %v16366_v44 = vld [vmem:[#allocation91_spill] sm:$0xff] }
 0x38b   : > { %v10775_v48 = vpop.permute.xlu0 %1853  ;;  %2448 = vperm.xlu1 %8456, %v10766_v2   ;;  %v10778_v29 = vpop.permute.xlu1 %1860 }
 0x38c   : > { %2445 = vperm.xlu0 %8457, %v10771_v20   ;;  %v16355_v20 = vld [vmem:[#allocation86_spill] sm:$0xff] }
 0x38d   : > { %v10798_v55 = vadd.f32 %v16355_v20, %v1307_v12  ;;  %v16361_v12 = vld [vmem:[#allocation89_spill] sm:$0xff] }
 0x38e   : > { %v10819_v19 = vadd.f32 %v16361_v12, %v1308_v9  ;;  %v10835_v9 = vadd.f32 %v16366_v44, %v1310_v5  ;;  %v16368_v12 = vld [vmem:[#allocation217_spill] sm:$0xff]  ;;  %v16375_v5 = vld [vmem:[#allocation219_spill] sm:$0xff] }
 0x38f   : > { %v10791_v18 = vpop.permute.xlu0 %1864  ;;  %2454 = vperm.xlu1 %8456, %v10782_v7   ;;  %v10794_v2 = vpop.permute.xlu1 %1868  ;;  %16356 = vst [vmem:[#allocation84_spill] sm:$0xff] %v10798_v55  ;;  %v1312_v13 = vadd.f32 %v10757_v59, %v16368_v12  ;;  %v1314_v12 = vadd.f32 %v10757_v59, %v16375_v5 }
 0x390   : > { %2451 = vperm.xlu0 %8457, %v10787_v51   ;;  %v16359_v51 = vld [vmem:[#allocation88_spill] sm:$0xff]  ;;  %16362 = vst [vmem:[#allocation87_spill] sm:$0xff] %v10819_v19  ;;  %16367 = vst [vmem:[#allocation89_spill] sm:$0xff] %v10835_v9 }
 0x391   : > { %v10814_v20 = vadd.f32 %v16359_v51, %v1309_v25  ;;  %v16365_v25 = vld [vmem:[#allocation15_spill] sm:$0xff]  ;;  %v10851_v44 = vadd.f32 %v16373_v15, %v1312_v13  ;;  %v16383_v13 = vld [vmem:[#allocation221_spill] sm:$0xff] }
 0x392   : > { %v1313_v42 = vadd.f32 %v10757_v59, %v16365_v25  ;;  %v1316_v5 = vadd.f32 %v10757_v59, %v16383_v13 }
 0x393   : > { %v10807_v31 = vpop.permute.xlu0 %1872  ;;  %2460 = vperm.xlu1 %8456, %v10798_v55   ;;  %v10810_v7 = vpop.permute.xlu1 %1876  ;;  %16360 = vst [vmem:[#allocation86_spill] sm:$0xff] %v10814_v20  ;;  %16374 = vst [vmem:[#allocation91_spill] sm:$0xff] %v10851_v44 }
 0x394   : > { %2457 = vperm.xlu0 %8457, %v10803_v1   ;;  %v16363_v1 = vld [vmem:[#allocation90_spill] sm:$0xff] }
 0x395   : > { %v10830_v51 = vadd.f32 %v16363_v1, %v1311_v27  ;;  %v16372_v27 = vld [vmem:[#allocation218_spill] sm:$0xff] }
 0x396   : > { %v1315_v25 = vadd.f32 %v10757_v59, %v16372_v27 }
 0x397   : > { %v10823_v4 = vpop.permute.xlu0 %1880  ;;  %2466 = vperm.xlu1 %8456, %v10814_v20   ;;  %v10826_v55 = vpop.permute.xlu1 %1884  ;;  %16364 = vst [vmem:[#allocation88_spill] sm:$0xff] %v10830_v51 }
 0x398   : > { %2463 = vperm.xlu0 %8457, %v10819_v19   ;;  %v16370_v19 = vld [vmem:[#allocation92_spill] sm:$0xff] }
 0x399   : > { %v10846_v1 = vadd.f32 %v16370_v19, %v1313_v42  ;;  %v16380_v42 = vld [vmem:[#allocation220_spill] sm:$0xff] }
 0x39a   : > { %v1317_v27 = vadd.f32 %v10757_v59, %v16380_v42 }
 0x39b   : > { %v10839_v8 = vpop.permute.xlu0 %1888  ;;  %2472 = vperm.xlu1 %8456, %v10830_v51   ;;  %v10842_v20 = vpop.permute.xlu1 %1892  ;;  %16371 = vst [vmem:[#allocation15_spill] sm:$0xff] %v10846_v1 }
 0x39c   : > { %16369 = vst [vmem:[#allocation90_spill] sm:$0xff] %v10842_v20  ;;  %2469 = vperm.xlu0 %8457, %v10835_v9   ;;  %v16378_v9 = vld [vmem:[#allocation104_spill] sm:$0xff]  ;;  %v16381_v20 = vld [vmem:[#allocation105_spill] sm:$0xff] }
 0x39d   : > { %v10862_v19 = vadd.f32 %v16378_v9, %v1315_v25  ;;  %v10867_v15 = vadd.f32 %v16381_v20, %v1314_v12  ;;  %v16388_v25 = vld [vmem:[#allocation222_spill] sm:$0xff]  ;;  %v16391_v12 = vld [vmem:[#allocation223_spill] sm:$0xff] }
 0x39e   : > { %v1319_v42 = vadd.f32 %v10757_v59, %v16388_v25  ;;  %v1318_v13 = vadd.f32 %v10757_v59, %v16391_v12  ;;  %v16395_v25 = vld [vmem:[#allocation124_spill] sm:$0xff]  ;;  %v16399_v12 = vld [vmem:[#allocation125_spill] sm:$0xff] }
 0x39f   : > { %v10855_v54 = vpop.permute.xlu0 %1896  ;;  %2478 = vperm.xlu1 %8456, %v10846_v1   ;;  %v10858_v51 = vpop.permute.xlu1 %1900  ;;  %16379 = vst [vmem:[#allocation218_spill] sm:$0xff] %v10862_v19  ;;  %16382 = vst [vmem:[#allocation93_spill] sm:$0xff] %v10867_v15 }
 0x3a0   : > { %16376 = vst [vmem:[#allocation217_spill] sm:$0xff] %v10855_v54  ;;  %16377 = vst [vmem:[#allocation92_spill] sm:$0xff] %v10858_v51  ;;  %2475 = vperm.xlu0 %8457, %v10851_v44   ;;  %v16386_v44 = vld [vmem:[#allocation116_spill] sm:$0xff]  ;;  %v16389_v51 = vld [vmem:[#allocation117_spill] sm:$0xff] }
 0x3a1   : > { %v10878_v9 = vadd.f32 %v16386_v44, %v1317_v27  ;;  %v10883_v20 = vadd.f32 %v16389_v51, %v1316_v5  ;;  %v16392_v54 = vld [vmem:[#allocation13_spill] sm:$0xff]  ;;  %v16394_v44 = vld [vmem:[#allocation200_spill] sm:$0xff] }
 0x3a2   : > { %v16398_v5 = vld [vmem:[#allocation201_spill] sm:$0xff] }
 0x3a3   : > { %v10871_v26 = vpop.permute.xlu0 %1904  ;;  %2484 = vperm.xlu1 %8456, %v10862_v19   ;;  %v10874_v1 = vpop.permute.xlu1 %1908  ;;  %16387 = vst [vmem:[#allocation220_spill] sm:$0xff] %v10878_v9  ;;  %16390 = vst [vmem:[#allocation105_spill] sm:$0xff] %v10883_v20 }
 0x3a4   : > { %16384 = vst [vmem:[#allocation219_spill] sm:$0xff] %v10871_v26  ;;  %16385 = vst [vmem:[#allocation104_spill] sm:$0xff] %v10874_v1  ;;  %2481 = vperm.xlu0 %8457, %v10867_v15   ;;  %v10889_v26 = vrot.slane %v9977_v33, %v16392_v54  ;;  %v10898_v15 = vadd.f32 %v16395_v25, %v1319_v42  ;;  %v10905_v54 = vadd.f32 %v16399_v12, %v1318_v13  ;;  %v16405_v25 = vld [vmem:[#allocation131_spill] sm:$0xff] }
 0x3a6   : > { %v1321_v27 = vadd.f32 %v10889_v26, %v16394_v44  ;;  %16396 = vst [vmem:[#allocation116_spill] sm:$0xff] %v10898_v15  ;;  %v1320_v59 = vadd.f32 %v10889_v26, %v16398_v5  ;;  %16400 = vst [vmem:[#allocation117_spill] sm:$0xff] %v10905_v54  ;;  %v16404_v44 = vld [vmem:[#allocation202_spill] sm:$0xff] }
 0x3a7   : > { %2490 = vperm.xlu1 %8456, %v10878_v9   ;;  %v10892_v19 = vpop.permute.xlu1 %1916  ;;  %v10900_v51 = vpop.permute.xlu0 %1912  ;;  %v1323_v42 = vadd.f32 %v10889_v26, %v16404_v44 }
 0x3a8   : > { %16393 = vst [vmem:[#allocation221_spill] sm:$0xff] %v10892_v19  ;;  %2487 = vperm.xlu0 %8457, %v10883_v20   ;;  %16397 = vst [vmem:[#allocation222_spill] sm:$0xff] %v10900_v51  ;;  %v16402_v20 = vld [vmem:[#allocation130_spill] sm:$0xff]  ;;  %v10917_v1 = vadd.f32 %v16405_v25, %v1320_v59  ;;  %v16407_v51 = vld [vmem:[#allocation203_spill] sm:$0xff] }
 0x3a9   : > { %v10912_v19 = vadd.f32 %v16402_v20, %v1321_v27  ;;  %v1322_v5 = vadd.f32 %v10889_v26, %v16407_v51  ;;  %v16412_v27 = vld [vmem:[#allocation204_spill] sm:$0xff]  ;;  %v16415_v25 = vld [vmem:[#allocation205_spill] sm:$0xff] }
 0x3aa   : > { %16406 = vst [vmem:[#allocation124_spill] sm:$0xff] %v10917_v1  ;;  %v1325_v44 = vadd.f32 %v10889_v26, %v16412_v27  ;;  %v1324_v51 = vadd.f32 %v10889_v26, %v16415_v25 }
 0x3ab   : > { %2496 = vperm.xlu1 %8456, %v10898_v15   ;;  %v10908_v9 = vpop.permute.xlu1 %2307  ;;  %16403 = vst [vmem:[#allocation200_spill] sm:$0xff] %v10912_v19  ;;  %v10921_v13 = vpop.permute.xlu0 %1920  ;;  %v16410_v15 = vld [vmem:[#allocation134_spill] sm:$0xff] }
 0x3ac   : > { %16401 = vst [vmem:[#allocation223_spill] sm:$0xff] %v10908_v9  ;;  %2493 = vperm.xlu0 %8457, %v10905_v54   ;;  %16408 = vst [vmem:[#allocation201_spill] sm:$0xff] %v10921_v13  ;;  %v10928_v20 = vadd.f32 %v16410_v15, %v1323_v42  ;;  %v16413_v54 = vld [vmem:[#allocation135_spill] sm:$0xff]  ;;  %v16420_v42 = vld [vmem:[#allocation206_spill] sm:$0xff] }
 0x3ad   : > { %v10933_v59 = vadd.f32 %v16413_v54, %v1322_v5  ;;  %v1327_v27 = vadd.f32 %v10889_v26, %v16420_v42  ;;  %v16423_v5 = vld [vmem:[#allocation207_spill] sm:$0xff] }
 0x3ae   : > { %16411 = vst [vmem:[#allocation130_spill] sm:$0xff] %v10928_v20  ;;  %v1326_v25 = vadd.f32 %v10889_v26, %v16423_v5 }
 0x3af   : > { %2502 = vperm.xlu1 %8456, %v10912_v19   ;;  %v10924_v12 = vpop.permute.xlu1 %2313  ;;  %16414 = vst [vmem:[#allocation202_spill] sm:$0xff] %v10933_v59 }
 0x3b0   : > { %16409 = vst [vmem:[#allocation125_spill] sm:$0xff] %v10924_v12  ;;  %2499 = vperm.xlu0 %8457, %v10917_v1   ;;  %v16418_v1 = vld [vmem:[#allocation140_spill] sm:$0xff]  ;;  %v16421_v12 = vld [vmem:[#allocation141_spill] sm:$0xff] }
 0x3b1   : > { %v10944_v15 = vadd.f32 %v16418_v1, %v1325_v44  ;;  %v10949_v54 = vadd.f32 %v16421_v12, %v1324_v51  ;;  %v16428_v44 = vld [vmem:[#allocation208_spill] sm:$0xff]  ;;  %v16431_v51 = vld [vmem:[#allocation209_spill] sm:$0xff] }
 0x3b2   : > { %v1329_v42 = vadd.f32 %v10889_v26, %v16428_v44  ;;  %v1328_v5 = vadd.f32 %v10889_v26, %v16431_v51 }
 0x3b3   : > { %v10937_v9 = vpop.permute.xlu0 %2310  ;;  %2508 = vperm.xlu1 %8456, %v10928_v20   ;;  %v10940_v19 = vpop.permute.xlu1 %2316  ;;  %16419 = vst [vmem:[#allocation134_spill] sm:$0xff] %v10944_v15  ;;  %16422 = vst [vmem:[#allocation204_spill] sm:$0xff] %v10949_v54 }
 0x3b4   : > { %16416 = vst [vmem:[#allocation131_spill] sm:$0xff] %v10937_v9  ;;  %16417 = vst [vmem:[#allocation203_spill] sm:$0xff] %v10940_v19  ;;  %2505 = vperm.xlu0 %8457, %v10933_v59   ;;  %v16426_v59 = vld [vmem:[#allocation144_spill] sm:$0xff]  ;;  %v16429_v19 = vld [vmem:[#allocation145_spill] sm:$0xff] }
 0x3b5   : > { %v10960_v1 = vadd.f32 %v16426_v59, %v1327_v27  ;;  %v10965_v12 = vadd.f32 %v16429_v19, %v1326_v25  ;;  %v16436_v27 = vld [vmem:[#allocation210_spill] sm:$0xff]  ;;  %v16439_v25 = vld [vmem:[#allocation211_spill] sm:$0xff] }
 0x3b6   : > { %v1331_v44 = vadd.f32 %v10889_v26, %v16436_v27  ;;  %v1330_v51 = vadd.f32 %v10889_v26, %v16439_v25 }
 0x3b7   : > { %v10953_v13 = vpop.permute.xlu0 %2319  ;;  %2514 = vperm.xlu1 %8456, %v10944_v15   ;;  %v10956_v20 = vpop.permute.xlu1 %2322  ;;  %16427 = vst [vmem:[#allocation140_spill] sm:$0xff] %v10960_v1  ;;  %16430 = vst [vmem:[#allocation206_spill] sm:$0xff] %v10965_v12 }
 0x3b8   : > { %16424 = vst [vmem:[#allocation135_spill] sm:$0xff] %v10953_v13  ;;  %16425 = vst [vmem:[#allocation205_spill] sm:$0xff] %v10956_v20  ;;  %2511 = vperm.xlu0 %8457, %v10949_v54   ;;  %v16434_v54 = vld [vmem:[#allocation150_spill] sm:$0xff]  ;;  %v16437_v20 = vld [vmem:[#allocation151_spill] sm:$0xff] }
 0x3b9   : > { %v10976_v59 = vadd.f32 %v16434_v54, %v1329_v42  ;;  %v10981_v19 = vadd.f32 %v16437_v20, %v1328_v5  ;;  %v16444_v42 = vld [vmem:[#allocation212_spill] sm:$0xff]  ;;  %v16447_v5 = vld [vmem:[#allocation213_spill] sm:$0xff] }
 0x3ba   : > { %v1333_v27 = vadd.f32 %v10889_v26, %v16444_v42  ;;  %v1332_v25 = vadd.f32 %v10889_v26, %v16447_v5 }
 0x3bb   : > { %v10969_v9 = vpop.permute.xlu0 %2325  ;;  %2520 = vperm.xlu1 %8456, %v10960_v1   ;;  %v10972_v15 = vpop.permute.xlu1 %2328  ;;  %16435 = vst [vmem:[#allocation144_spill] sm:$0xff] %v10976_v59  ;;  %16438 = vst [vmem:[#allocation208_spill] sm:$0xff] %v10981_v19 }
 0x3bc   : > { %16432 = vst [vmem:[#allocation141_spill] sm:$0xff] %v10969_v9  ;;  %16433 = vst [vmem:[#allocation207_spill] sm:$0xff] %v10972_v15  ;;  %2517 = vperm.xlu0 %8457, %v10965_v12   ;;  %v16442_v12 = vld [vmem:[#allocation154_spill] sm:$0xff]  ;;  %v16445_v15 = vld [vmem:[#allocation155_spill] sm:$0xff] }
 0x3bd   : > { %v10992_v54 = vadd.f32 %v16442_v12, %v1331_v44  ;;  %v10997_v20 = vadd.f32 %v16445_v15, %v1330_v51  ;;  %v16452_v44 = vld [vmem:[#allocation214_spill] sm:$0xff]  ;;  %v16455_v51 = vld [vmem:[#allocation215_spill] sm:$0xff] }
 0x3be   : > { %v1335_v42 = vadd.f32 %v10889_v26, %v16452_v44  ;;  %v1334_v5 = vadd.f32 %v10889_v26, %v16455_v51  ;;  %v16463_v44 = vld [vmem:[#allocation225_spill] sm:$0xff] }
 0x3bf   : > { %v10985_v13 = vpop.permute.xlu0 %2331  ;;  %2526 = vperm.xlu1 %8456, %v10976_v59   ;;  %v10988_v1 = vpop.permute.xlu1 %2334  ;;  %16443 = vst [vmem:[#allocation150_spill] sm:$0xff] %v10992_v54  ;;  %16446 = vst [vmem:[#allocation210_spill] sm:$0xff] %v10997_v20 }
 0x3c0   : > { %16440 = vst [vmem:[#allocation145_spill] sm:$0xff] %v10985_v13  ;;  %16441 = vst [vmem:[#allocation209_spill] sm:$0xff] %v10988_v1  ;;  %2523 = vperm.xlu0 %8457, %v10981_v19   ;;  %v16450_v19 = vld [vmem:[#allocation160_spill] sm:$0xff]  ;;  %v16453_v1 = vld [vmem:[#allocation161_spill] sm:$0xff] }
 0x3c1   : > { %v11008_v12 = vadd.f32 %v16450_v19, %v1333_v27  ;;  %v11013_v15 = vadd.f32 %v16453_v1, %v1332_v25  ;;  %v16456_v13 = vld [vmem:[#allocation14_spill] sm:$0xff]  ;;  %v16459_v19 = vld [vmem:[#allocation164_spill] sm:$0xff]  ;;  %v16461_v25 = vld [vmem:[#allocation165_spill] sm:$0xff] }
 0x3c2   : > { %v11028_v27 = vadd.f32 %v16459_v19, %v1335_v42  ;;  %v11033_v26 = vadd.f32 %v16461_v25, %v1334_v5  ;;  %v16468_v19 = vld [vmem:[#allocation226_spill] sm:$0xff]  ;;  %v16471_v25 = vld [vmem:[#allocation227_spill] sm:$0xff] }
 0x3c3   : > { %v11001_v9 = vpop.permute.xlu0 %2337  ;;  %2532 = vperm.xlu1 %8456, %v10992_v54   ;;  %v11004_v59 = vpop.permute.xlu1 %2340  ;;  %16451 = vst [vmem:[#allocation154_spill] sm:$0xff] %v11008_v12  ;;  %16454 = vst [vmem:[#allocation212_spill] sm:$0xff] %v11013_v15 }
 0x3c4   : > { %16448 = vst [vmem:[#allocation151_spill] sm:$0xff] %v11001_v9  ;;  %16449 = vst [vmem:[#allocation211_spill] sm:$0xff] %v11004_v59  ;;  %2529 = vperm.xlu0 %8457, %v10997_v20   ;;  %v11019_v9 = vrot.slane %v9977_v33, %v16456_v13  ;;  %v16484_v59 = vld [vmem:[#allocation181_spill] sm:$0xff] }
 0x3c5   : > { %16460 = vst [vmem:[#allocation160_spill] sm:$0xff] %v11028_v27  ;;  %16462 = vst [vmem:[#allocation214_spill] sm:$0xff] %v11033_v26 }
 0x3c6   : > { %v1337_v1 = vadd.f32 %v11019_v9, %v10337_v37  ;;  %v1336_v51 = vadd.f32 %v11019_v9, %v16463_v44  ;;  %v1339_v37 = vadd.f32 %v11019_v9, %v16468_v19  ;;  %v1338_v44 = vadd.f32 %v11019_v9, %v16471_v25 }
 0x3c7   : > { %v11021_v54 = vpop.permute.xlu0 %2343  ;;  %2538 = vperm.xlu1 %8456, %v11008_v12   ;;  %v11024_v20 = vpop.permute.xlu1 %2346 }
 0x3c8   : > { %16457 = vst [vmem:[#allocation155_spill] sm:$0xff] %v11021_v54  ;;  %16458 = vst [vmem:[#allocation213_spill] sm:$0xff] %v11024_v20  ;;  %2535 = vperm.xlu0 %8457, %v11013_v15   ;;  %v16466_v15 = vld [vmem:[#allocation170_spill] sm:$0xff]  ;;  %v16469_v20 = vld [vmem:[#allocation171_spill] sm:$0xff] }
 0x3c9   : > { %v11044_v42 = vadd.f32 %v16466_v15, %v1337_v1  ;;  %v11049_v5 = vadd.f32 %v16469_v20, %v1336_v51  ;;  %v16475_v1 = vld [vmem:[#allocation228_spill] sm:$0xff]  ;;  %v16478_v51 = vld [vmem:[#allocation229_spill] sm:$0xff] }
 0x3ca   : > { %v1341_v19 = vadd.f32 %v11019_v9, %v16475_v1  ;;  %v1340_v25 = vadd.f32 %v11019_v9, %v16478_v51 }
 0x3cb   : > { %v11037_v13 = vpop.permute.xlu0 %2349  ;;  %2544 = vperm.xlu1 %8456, %v11028_v27   ;;  %v11040_v12 = vpop.permute.xlu1 %2352  ;;  %16467 = vst [vmem:[#allocation164_spill] sm:$0xff] %v11044_v42  ;;  %16470 = vst [vmem:[#allocation165_spill] sm:$0xff] %v11049_v5 }
 0x3cc   : > { %16464 = vst [vmem:[#allocation161_spill] sm:$0xff] %v11037_v13  ;;  %16465 = vst [vmem:[#allocation215_spill] sm:$0xff] %v11040_v12  ;;  %2541 = vperm.xlu0 %8457, %v11033_v26   ;;  %v16473_v26 = vld [vmem:[#allocation174_spill] sm:$0xff]  ;;  %v16476_v12 = vld [vmem:[#allocation175_spill] sm:$0xff] }
 0x3cd   : > { %v11060_v15 = vadd.f32 %v16473_v26, %v1339_v37  ;;  %v11065_v20 = vadd.f32 %v16476_v12, %v1338_v44  ;;  %v16483_v37 = vld [vmem:[#allocation230_spill] sm:$0xff]  ;;  %v11081_v12 = vadd.f32 %v16484_v59, %v1340_v25  ;;  %v16486_v44 = vld [vmem:[#allocation231_spill] sm:$0xff]  ;;  %v16494_v25 = vld [vmem:[#allocation233_spill] sm:$0xff] }
 0x3ce   : > { %v1343_v1 = vadd.f32 %v11019_v9, %v16483_v37  ;;  %v1342_v51 = vadd.f32 %v11019_v9, %v16486_v44  ;;  %v1344_v44 = vadd.f32 %v11019_v9, %v16494_v25 }
 0x3cf   : > { %v11053_v54 = vpop.permute.xlu0 %2355  ;;  %2550 = vperm.xlu1 %8456, %v11044_v42   ;;  %v11056_v27 = vpop.permute.xlu1 %2358  ;;  %16474 = vst [vmem:[#allocation170_spill] sm:$0xff] %v11060_v15  ;;  %16477 = vst [vmem:[#allocation226_spill] sm:$0xff] %v11065_v20 }
 0x3d0   : > { %16472 = vst [vmem:[#allocation225_spill] sm:$0xff] %v11056_v27  ;;  %2547 = vperm.xlu0 %8457, %v11049_v5   ;;  %v16481_v5 = vld [vmem:[#allocation180_spill] sm:$0xff]  ;;  %16485 = vst [vmem:[#allocation228_spill] sm:$0xff] %v11081_v12 }
 0x3d1   : > { %v11076_v26 = vadd.f32 %v16481_v5, %v1341_v19  ;;  %v16491_v19 = vld [vmem:[#allocation232_spill] sm:$0xff] }
 0x3d2   : > { %v1345_v37 = vadd.f32 %v11019_v9, %v16491_v19 }
 0x3d3   : > { %v11069_v13 = vpop.permute.xlu0 %2361  ;;  %2556 = vperm.xlu1 %8456, %v11060_v15   ;;  %v11072_v42 = vpop.permute.xlu1 %2364  ;;  %16482 = vst [vmem:[#allocation174_spill] sm:$0xff] %v11076_v26 }
 0x3d4   : > { %16479 = vst [vmem:[#allocation171_spill] sm:$0xff] %v11069_v13  ;;  %16480 = vst [vmem:[#allocation227_spill] sm:$0xff] %v11072_v42  ;;  %2553 = vperm.xlu0 %8457, %v11065_v20   ;;  %v16489_v20 = vld [vmem:[#allocation184_spill] sm:$0xff]  ;;  %v16492_v42 = vld [vmem:[#allocation185_spill] sm:$0xff] }
 0x3d5   : > { %v11092_v5 = vadd.f32 %v16489_v20, %v1343_v1  ;;  %v11097_v59 = vadd.f32 %v16492_v42, %v1342_v51  ;;  %v16499_v1 = vld [vmem:[#allocation234_spill] sm:$0xff]  ;;  %v16502_v51 = vld [vmem:[#allocation235_spill] sm:$0xff] }
 0x3d6   : > { %v1347_v19 = vadd.f32 %v11019_v9, %v16499_v1  ;;  %v1346_v25 = vadd.f32 %v11019_v9, %v16502_v51  ;;  %v16507_v1 = vld [vmem:[#allocation237_spill] sm:$0xff] }
 0x3d7   : > { %v11085_v27 = vpop.permute.xlu0 %2367  ;;  %2562 = vperm.xlu1 %8456, %v11076_v26   ;;  %v11088_v15 = vpop.permute.xlu1 %2370  ;;  %16490 = vst [vmem:[#allocation180_spill] sm:$0xff] %v11092_v5  ;;  %16493 = vst [vmem:[#allocation230_spill] sm:$0xff] %v11097_v59 }
 0x3d8   : > { %16487 = vst [vmem:[#allocation175_spill] sm:$0xff] %v11085_v27  ;;  %16488 = vst [vmem:[#allocation229_spill] sm:$0xff] %v11088_v15  ;;  %2559 = vperm.xlu0 %8457, %v11081_v12   ;;  %v16497_v12 = vld [vmem:[#allocation190_spill] sm:$0xff]  ;;  %v16500_v15 = vld [vmem:[#allocation191_spill] sm:$0xff] }
 0x3d9   : > { %v11108_v20 = vadd.f32 %v16497_v12, %v1345_v37  ;;  %v11113_v42 = vadd.f32 %v16500_v15, %v1344_v44  ;;  %v16505_v37 = vld [vmem:[#allocation193_spill] sm:$0xff]  ;;  %v1348_v15 = vadd.f32 %v11019_v9, %v16507_v1  ;;  %v16508_v44 = vld [vmem:[#allocation236_spill] sm:$0xff] }
 0x3da   : > { %v1349_v51 = vadd.f32 %v11019_v9, %v16508_v44 }
 0x3db   : > { %v11101_v13 = vpop.permute.xlu0 %2373  ;;  %2568 = vperm.xlu1 %8456, %v11092_v5   ;;  %v11104_v26 = vpop.permute.xlu1 %2376  ;;  %16498 = vst [vmem:[#allocation184_spill] sm:$0xff] %v11108_v20  ;;  %16501 = vst [vmem:[#allocation232_spill] sm:$0xff] %v11113_v42 }
 0x3dc   : > { %16495 = vst [vmem:[#allocation181_spill] sm:$0xff] %v11101_v13  ;;  %16496 = vst [vmem:[#allocation231_spill] sm:$0xff] %v11104_v26  ;;  %2565 = vperm.xlu0 %8457, %v11097_v59   ;;  %v16503_v59 = vld [vmem:[#allocation192_spill] sm:$0xff]  ;;  %v11127_v26 = vadd.f32 %v16505_v37, %v1346_v25  ;;  %v16513_v37 = vld [vmem:[#allocation238_spill] sm:$0xff] }
 0x3dd   : > { %v11124_v12 = vadd.f32 %v16503_v59, %v1347_v19  ;;  %v11140_v59 = vadd.f32 %v10627_v58, %v1349_v51  ;;  %v16511_v19 = vld [vmem:[#allocation194_spill] sm:$0xff]  ;;  %v1351_v1 = vadd.f32 %v11019_v9, %v16513_v37 }
 0x3de   : > { %16506 = vst [vmem:[#allocation233_spill] sm:$0xff] %v11127_v26  ;;  %v11143_v25 = vadd.f32 %v16511_v19, %v1348_v15  ;;  %v16518_v19 = vld [vmem:[#allocation240_spill] sm:$0xff] }
 0x3df   : > { %v11117_v27 = vpop.permute.xlu0 %2379  ;;  %2574 = vperm.xlu1 %8456, %v11108_v20   ;;  %v11120_v5 = vpop.permute.xlu1 %2382  ;;  %16504 = vst [vmem:[#allocation185_spill] sm:$0xff] %v11124_v12  ;;  %16510 = vst [vmem:[#allocation234_spill] sm:$0xff] %v11140_v59  ;;  %v11160_v15 = vadd.f32 %v10643_v36, %v1351_v1 }
 0x3e0   : > { %2571 = vperm.xlu0 %8457, %v11113_v42   ;;  %16512 = vst [vmem:[#allocation191_spill] sm:$0xff] %v11143_v25 }
 0x3e1   : > { %16516 = vst [vmem:[#allocation235_spill] sm:$0xff] %v11160_v15 }
 0x3e3   : > { %v11133_v13 = vpop.permute.xlu0 %2385  ;;  %2580 = vperm.xlu1 %8456, %v11124_v12   ;;  %v11136_v20 = vpop.permute.xlu1 %2388  ;;  %v16514_v12 = vld [vmem:[#allocation239_spill] sm:$0xff] }
 0x3e4   : > { %16509 = vst [vmem:[#allocation190_spill] sm:$0xff] %v11136_v20  ;;  %2577 = vperm.xlu0 %8457, %v11127_v26   ;;  %v1350_v20 = vadd.f32 %v11019_v9, %v16514_v12  ;;  %v16515_v26 = vld [vmem:[#allocation216_spill] sm:$0xff]  ;;  %v16519_v12 = vld [vmem:[#allocation241_spill] sm:$0xff] }
 0x3e5   : > { %v11157_v58 = vrot.slane %v9977_v33, %v16515_v26 }
 0x3e6   : > { %v11163_v51 = vadd.f32 %v10630_v24, %v1350_v20 }
 0x3e7   : > { %v11147_v42 = vpop.permute.xlu0 %2391  ;;  %2586 = vperm.xlu1 %8456, %v11140_v59   ;;  %v11150_v44 = vpop.permute.xlu1 %2394  ;;  %v1353_v37 = vadd.f32 %v11157_v58, %v16518_v19  ;;  %v1355_v20 = vadd.f32 %v11157_v58, %v10384_v60 }
 0x3e8   : > { %2583 = vperm.xlu0 %8457, %v11143_v25   ;;  %16517 = vst [vmem:[#allocation192_spill] sm:$0xff] %v11163_v51  ;;  %v1352_v25 = vadd.f32 %v11157_v58, %v16519_v12 }
 0x3e9   : > { %v11176_v36 = vadd.f32 %v10659_v6, %v1353_v37  ;;  %v11192_v6 = vadd.f32 %v10675_v28, %v1355_v20  ;;  %v1359_v20 = vadd.f32 %v11157_v58, %v10411_v47  ;;  %v1361_v47 = vadd.f32 %v11157_v58, %v10427_v61 }
 0x3ea   : > { %v11179_v24 = vadd.f32 %v10646_v39, %v1352_v25  ;;  %v16525_v25 = vld [vmem:[#allocation243_spill] sm:$0xff]  ;;  %v1363_v61 = vadd.f32 %v11157_v58, %v10443_v38  ;;  %v1365_v38 = vadd.f32 %v11157_v58, %v10459_v14  ;;  %v1367_v14 = vadd.f32 %v11157_v58, %v10475_v40 }
 0x3eb   : > { %v11167_v59 = vpop.permute.xlu0 %2397  ;;  %2592 = vperm.xlu1 %8456, %v11160_v15   ;;  %v11170_v9 = vpop.permute.xlu1 %2400  ;;  %16520 = vst [vmem:[#allocation193_spill] sm:$0xff] %v11176_v36  ;;  %v16522_v15 = vld [vmem:[#allocation242_spill] sm:$0xff]  ;;  %16523 = vst [vmem:[#allocation236_spill] sm:$0xff] %v11192_v6  ;;  %v1357_v60 = vadd.f32 %v11157_v58, %v16525_v25 }
 0x3ec   : > { %2589 = vperm.xlu0 %8457, %v11163_v51   ;;  %16521 = vst [vmem:[#allocation237_spill] sm:$0xff] %v11179_v24  ;;  %v1354_v12 = vadd.f32 %v11157_v58, %v16522_v15  ;;  %v1356_v15 = vadd.f32 %v11157_v58, %v10398_v23  ;;  %v1358_v23 = vadd.f32 %v11157_v58, %v10413_v16  ;;  %v16603_v51 = vlaneseq }
 0x3ed   : > { %v11208_v28 = vadd.f32 %v10691_v52, %v1357_v60  ;;  %v11224_v52 = vadd.f32 %v10707_v10, %v1359_v20  ;;  %v1360_v16 = vadd.f32 %v11157_v58, %v10429_v30  ;;  %v11240_v10 = vadd.f32 %v10723_v17, %v1361_v47 }
 0x3ee   : > { %v11195_v39 = vadd.f32 %v10662_v35, %v1354_v12  ;;  %v11211_v35 = vadd.f32 %v10678_v0, %v1356_v15  ;;  %v11227_v0 = vadd.f32 %v10694_v63, %v1358_v23  ;;  %v1362_v30 = vadd.f32 %v11157_v58, %v10445_v45 }
 0x3ef   : > { %v11183_v1 = vpop.permute.xlu0 %2403  ;;  %2598 = vperm.xlu1 %8456, %v11176_v36   ;;  %v11186_v19 = vpop.permute.xlu1 %2406  ;;  %16526 = vst [vmem:[#allocation238_spill] sm:$0xff] %v11208_v28  ;;  %16528 = vst [vmem:[#allocation240_spill] sm:$0xff] %v11224_v52  ;;  %v11243_v63 = vadd.f32 %v10710_v3, %v1360_v16  ;;  %v11256_v17 = vadd.f32 %v10739_v22, %v1363_v61  ;;  %v1364_v45 = vadd.f32 %v11157_v58, %v10461_v34 }
 0x3f0   : > { %2595 = vperm.xlu0 %8457, %v11179_v24   ;;  %16524 = vst [vmem:[#allocation194_spill] sm:$0xff] %v11195_v39  ;;  %16527 = vst [vmem:[#allocation239_spill] sm:$0xff] %v11211_v35  ;;  %v11259_v3 = vadd.f32 %v10726_v50, %v1362_v30  ;;  %v11272_v22 = vadd.f32 %v10759_v43, %v1365_v38  ;;  %v2691_v26 = vand.u32 127, %v16603_v51 }
 0x3f1   : > { %16529 = vst [vmem:[#allocation241_spill] sm:$0xff] %v11227_v0  ;;  %16530 = vst [vmem:[#allocation242_spill] sm:$0xff] %v11240_v10  ;;  %v11275_v50 = vadd.f32 %v10742_v32, %v1364_v45  ;;  %v11292_v32 = vadd.f32 %v10775_v48, %v1367_v14 }
 0x3f2   : > { %16531 = vst [vmem:[#allocation243_spill] sm:$0xff] %v11243_v63  ;;  %16532 = vst [vmem:[#allocation250_spill] sm:$0xff] %v11256_v17 }
 0x3f3   : > { %v11199_v37 = vpop.permute.xlu0 %2409  ;;  %2604 = vperm.xlu1 %8456, %v11192_v6   ;;  %v11202_v36 = vpop.permute.xlu1 %2412  ;;  %16533 = vst [vmem:[#allocation251_spill] sm:$0xff] %v11259_v3  ;;  %16534 = vst [vmem:[#allocation252_spill] sm:$0xff] %v11272_v22  ;;  %v16568_v6 = vld [vmem:[#allocation222_spill] sm:$0xff] }
 0x3f4   : > { %2601 = vperm.xlu0 %8457, %v11195_v39   ;;  %16535 = vst [vmem:[#allocation253_spill] sm:$0xff] %v11275_v50 }
 0x3f7   : > { %v11215_v12 = vpop.permute.xlu0 %2415  ;;  %2610 = vperm.xlu1 %8456, %v11208_v28   ;;  %v11218_v25 = vpop.permute.xlu1 %2418  ;;  %v16567_v28 = vld [vmem:[#allocation247_spill] sm:$0xff] }
 0x3f8   : > { %2607 = vperm.xlu0 %8457, %v11211_v35  }
 0x3fb   : > { %v11231_v60 = vpop.permute.xlu0 %2421  ;;  %2616 = vperm.xlu1 %8456, %v11224_v52   ;;  %v11234_v15 = vpop.permute.xlu1 %2424 }
 0x3fc   : > { %2613 = vperm.xlu0 %8457, %v11227_v0  }
 0x3ff   : > { %v11247_v20 = vpop.permute.xlu0 %2427  ;;  %2622 = vperm.xlu1 %8456, %v11240_v10   ;;  %v11250_v23 = vpop.permute.xlu1 %2430  ;;  %v16538_v10 = vld [vmem:[#allocation224_spill] sm:$0xff] }
 0x400   : > { %2619 = vperm.xlu0 %8457, %v11243_v63   ;;  %v11289_v43 = vrot.slane %v9977_v33, %v16538_v10 }
 0x402   : > { %v1369_v38 = vadd.f32 %v11289_v43, %v10495_v11  ;;  %v1371_v11 = vadd.f32 %v11289_v43, %v10511_v62  ;;  %v1373_v62 = vadd.f32 %v11289_v43, %v10527_v57  ;;  %v1375_v57 = vadd.f32 %v11289_v43, %v10543_v41 }
 0x403   : > { %v11263_v47 = vpop.permute.xlu0 %2433  ;;  %2628 = vperm.xlu1 %8456, %v11256_v17   ;;  %v11266_v16 = vpop.permute.xlu1 %2436  ;;  %v16537_v17 = vld [vmem:[#allocation244_spill] sm:$0xff]  ;;  %v1377_v41 = vadd.f32 %v11289_v43, %v10559_v56 }
 0x404   : > { %2625 = vperm.xlu0 %8457, %v11259_v3   ;;  %v1366_v34 = vadd.f32 %v11157_v58, %v16537_v17  ;;  %16539 = vst [vmem:[#allocation244_spill] sm:$0xff] %v11292_v32  ;;  %v1368_v17 = vadd.f32 %v11289_v43, %v10498_v49  ;;  %v11308_v33 = vadd.f32 %v10791_v18, %v1369_v38 }
 0x405   : > { %v1370_v49 = vadd.f32 %v11289_v43, %v10514_v21  ;;  %v11324_v18 = vadd.f32 %v10807_v31, %v1371_v11  ;;  %v11340_v31 = vadd.f32 %v10823_v4, %v1373_v62  ;;  %v11356_v4 = vadd.f32 %v10839_v8, %v1375_v57  ;;  %v16555_v57 = vld [vmem:[#allocation90_spill] sm:$0xff] }
 0x406   : > { %v11295_v40 = vadd.f32 %v10762_v53, %v1366_v34  ;;  %16543 = vst [vmem:[#allocation258_spill] sm:$0xff] %v11308_v33  ;;  %v11311_v53 = vadd.f32 %v10778_v29, %v1368_v17  ;;  %v16547_v17 = vld [vmem:[#allocation245_spill] sm:$0xff] }
 0x407   : > { %v11279_v61 = vpop.permute.xlu0 %2439  ;;  %2634 = vperm.xlu1 %8456, %v11272_v22   ;;  %v11282_v30 = vpop.permute.xlu1 %2442  ;;  %16545 = vst [vmem:[#allocation260_spill] sm:$0xff] %v11324_v18  ;;  %v11327_v29 = vadd.f32 %v10794_v2, %v1370_v49  ;;  %v1372_v21 = vadd.f32 %v11289_v43, %v16547_v17  ;;  %16548 = vst [vmem:[#allocation245_spill] sm:$0xff] %v11340_v31  ;;  %v1374_v17 = vadd.f32 %v11289_v43, %v10546_v46  ;;  %v16560_v22 = vld [vmem:[#allocation219_spill] sm:$0xff] }
 0x408   : > { %16536 = vst [vmem:[#allocation254_spill] sm:$0xff] %v11282_v30  ;;  %2631 = vperm.xlu0 %8457, %v11275_v50   ;;  %16540 = vst [vmem:[#allocation255_spill] sm:$0xff] %v11295_v40  ;;  %v16626_v30 = vld [vmem:[#allocation141_spill] sm:$0xff] }
 0x409   : > { %16544 = vst [vmem:[#allocation259_spill] sm:$0xff] %v11311_v53  ;;  %16546 = vst [vmem:[#allocation261_spill] sm:$0xff] %v11327_v29  ;;  %v11343_v2 = vadd.f32 %v10810_v7, %v1372_v21  ;;  %v11359_v7 = vadd.f32 %v10826_v55, %v1374_v17  ;;  %v16557_v17 = vld [vmem:[#allocation38_spill] sm:$0xff] }
 0x40a   : > { %16550 = vst [vmem:[#allocation263_spill] sm:$0xff] %v11356_v4  ;;  %v1379_v56 = vadd.f32 %v11289_v43, %v16557_v17 }
 0x40b   : > { %v11299_v45 = vpop.permute.xlu0 %2445  ;;  %2640 = vperm.xlu1 %8456, %v11292_v32   ;;  %v11302_v58 = vpop.permute.xlu1 %2448  ;;  %16549 = vst [vmem:[#allocation262_spill] sm:$0xff] %v11343_v2  ;;  %16551 = vst [vmem:[#allocation264_spill] sm:$0xff] %v11359_v7  ;;  %v16559_v32 = vld [vmem:[#allocation39_spill] sm:$0xff] }
 0x40c   : > { %16541 = vst [vmem:[#allocation256_spill] sm:$0xff] %v11299_v45  ;;  %16542 = vst [vmem:[#allocation257_spill] sm:$0xff] %v11302_v58  ;;  %2637 = vperm.xlu0 %8457, %v11295_v40   ;;  %v2766_v58 = vadd.s32 4294967208, %v2691_v26 }
 0x40f   : > { %v11315_v48 = vpop.permute.xlu0 %2451  ;;  %2646 = vperm.xlu1 %8456, %v11308_v33   ;;  %v11318_v14 = vpop.permute.xlu1 %2454 }
 0x410   : > { %2643 = vperm.xlu0 %8457, %v11311_v53  }
 0x413   : > { %v11331_v34 = vpop.permute.xlu0 %2457  ;;  %2652 = vperm.xlu1 %8456, %v11324_v18   ;;  %v11334_v38 = vpop.permute.xlu1 %2460  ;;  %v16553_v18 = vld [vmem:[#allocation217_spill] sm:$0xff] }
 0x414   : > { %2649 = vperm.xlu0 %8457, %v11327_v29   ;;  %v11372_v8 = vadd.f32 %v16553_v18, %v1377_v41  ;;  %v11388_v18 = vadd.f32 %v16560_v22, %v1379_v56  ;;  %v16562_v41 = vld [vmem:[#allocation92_spill] sm:$0xff] }
 0x415   : > { %v16570_v56 = vld [vmem:[#allocation104_spill] sm:$0xff] }
 0x416   : > { %16561 = vst [vmem:[#allocation38_spill] sm:$0xff] %v11388_v18 }
 0x417   : > { %v11347_v11 = vpop.permute.xlu0 %2463  ;;  %2658 = vperm.xlu1 %8456, %v11340_v31   ;;  %v11350_v49 = vpop.permute.xlu1 %2466  ;;  %v16552_v31 = vld [vmem:[#allocation36_spill] sm:$0xff] }
 0x418   : > { %2655 = vperm.xlu0 %8457, %v11343_v2   ;;  %v1376_v46 = vadd.f32 %v11289_v43, %v16552_v31  ;;  %16554 = vst [vmem:[#allocation36_spill] sm:$0xff] %v11372_v8  ;;  %v1378_v31 = vadd.f32 %v11289_v43, %v16559_v32  ;;  %v1380_v32 = vadd.f32 %v11289_v43, %v16567_v28 }
 0x41a   : > { %v11375_v55 = vadd.f32 %v16555_v57, %v1376_v46  ;;  %v11391_v46 = vadd.f32 %v16562_v41, %v1378_v31  ;;  %v16564_v57 = vld [vmem:[#allocation246_spill] sm:$0xff]  ;;  %v11407_v31 = vadd.f32 %v16570_v56, %v1380_v32  ;;  %v16572_v41 = vld [vmem:[#allocation248_spill] sm:$0xff] }
 0x41b   : > { %v11363_v62 = vpop.permute.xlu0 %2469  ;;  %2664 = vperm.xlu1 %8456, %v11356_v4   ;;  %v11366_v21 = vpop.permute.xlu1 %2472  ;;  %v1381_v17 = vadd.f32 %v11289_v43, %v16564_v57  ;;  %v1383_v57 = vadd.f32 %v11289_v43, %v16572_v41 }
 0x41c   : > { %2661 = vperm.xlu0 %8457, %v11359_v7   ;;  %16556 = vst [vmem:[#allocation217_spill] sm:$0xff] %v11375_v55  ;;  %16563 = vst [vmem:[#allocation39_spill] sm:$0xff] %v11391_v46  ;;  %v16575_v7 = vld [vmem:[#allocation249_spill] sm:$0xff] }
 0x41d   : > { %v11404_v22 = vadd.f32 %v16568_v6, %v1381_v17  ;;  %16571 = vst [vmem:[#allocation247_spill] sm:$0xff] %v11407_v31  ;;  %v1382_v28 = vadd.f32 %v11289_v43, %v16575_v7  ;;  %v16578_v17 = vld [vmem:[#allocation221_spill] sm:$0xff] }
 0x41f   : > { %v11379_v33 = vpop.permute.xlu0 %2475  ;;  %2670 = vperm.xlu1 %8456, %v11372_v8   ;;  %v11382_v4 = vpop.permute.xlu1 %2478  ;;  %16569 = vst [vmem:[#allocation246_spill] sm:$0xff] %v11404_v22  ;;  %v11423_v32 = vadd.f32 %v16578_v17, %v1382_v28 }
 0x420   : > { %16558 = vst [vmem:[#allocation90_spill] sm:$0xff] %v11382_v4  ;;  %2667 = vperm.xlu0 %8457, %v11375_v55   ;;  %v2794_v4 = vadd.s32 4294967176, %v2691_v26 }
 0x421   : > { %16579 = vst [vmem:[#allocation249_spill] sm:$0xff] %v11423_v32 }
 0x423   : > { %v11395_v52 = vpop.permute.xlu0 %2481  ;;  %2676 = vperm.xlu1 %8456, %v11388_v18   ;;  %v11398_v8 = vpop.permute.xlu1 %2484 }
 0x424   : > { %16565 = vst [vmem:[#allocation219_spill] sm:$0xff] %v11395_v52  ;;  %16566 = vst [vmem:[#allocation92_spill] sm:$0xff] %v11398_v8  ;;  %2673 = vperm.xlu0 %8457, %v11391_v46   ;;  %v16576_v46 = vld [vmem:[#allocation201_spill] sm:$0xff] }
 0x425   : > { %v11420_v6 = vadd.f32 %v16576_v46, %v1383_v57 }
 0x427   : > { %v11411_v55 = vpop.permute.xlu0 %2487  ;;  %2682 = vperm.xlu1 %8456, %v11404_v22   ;;  %v11414_v18 = vpop.permute.xlu1 %2490  ;;  %16577 = vst [vmem:[#allocation248_spill] sm:$0xff] %v11420_v6 }
 0x428   : > { %16573 = vst [vmem:[#allocation222_spill] sm:$0xff] %v11411_v55  ;;  %16574 = vst [vmem:[#allocation104_spill] sm:$0xff] %v11414_v18  ;;  %2679 = vperm.xlu0 %8457, %v11407_v31   ;;  %v2724_v18 = vadd.s32 4294967256, %v2691_v26 }
 0x42b   : > { %v11425_v56 = vpop.permute.xlu0 %2493  ;;  %2688 = vperm.xlu1 %8456, %v11420_v6   ;;  %v11428_v41 = vpop.permute.xlu1 %2496 }
 0x42c   : > { %16580 = vst [vmem:[#allocation201_spill] sm:$0xff] %v11425_v56  ;;  %16581 = vst [vmem:[#allocation221_spill] sm:$0xff] %v11428_v41  ;;  %2685 = vperm.xlu0 %8457, %v11423_v32   ;;  %v2696_v41 = vadd.s32 4294967288, %v2691_v26 }
 0x42f   : > { %v11431_v22 = vpop.permute.xlu0 %2499  ;;  %v11433_v2 = vpop.permute.xlu1 %2502 }
 0x430   : > { %16582 = vst [vmem:[#allocation265_spill] sm:$0xff] %v11433_v2 }
 0x433   : > { %v11435_v43 = vpop.permute.xlu0 %2505  ;;  %v11437_v7 = vpop.permute.xlu1 %2508 }
 0x434   : > { %16583 = vst [vmem:[#allocation266_spill] sm:$0xff] %v11435_v43  ;;  %16584 = vst [vmem:[#allocation267_spill] sm:$0xff] %v11437_v7  ;;  %v16618_v7 = vld [vmem:[#allocation171_spill] sm:$0xff] }
 0x435   : > { %v16623_v43 = vld [vmem:[#allocation227_spill] sm:$0xff] }
 0x437   : > { %v11439_v46 = vpop.permute.xlu0 %2511  ;;  %v11441_v57 = vpop.permute.xlu1 %2514 }
 0x438   : > { %16585 = vst [vmem:[#allocation268_spill] sm:$0xff] %v11439_v46  ;;  %16586 = vst [vmem:[#allocation269_spill] sm:$0xff] %v11441_v57 }
 0x43b   : > { %v11443_v28 = vpop.permute.xlu0 %2517  ;;  %v11445_v17 = vpop.permute.xlu1 %2520 }
 0x43c   : > { %16587 = vst [vmem:[#allocation270_spill] sm:$0xff] %v11443_v28  ;;  %16588 = vst [vmem:[#allocation271_spill] sm:$0xff] %v11445_v17  ;;  %v16609_v17 = vld [vmem:[#allocation131_spill] sm:$0xff]  ;;  %v2738_v28 = vadd.s32 4294967240, %v2691_v26 }
 0x43f   : > { %v11447_v6 = vpop.permute.xlu0 %2523  ;;  %v11449_v31 = vpop.permute.xlu1 %2526 }
 0x440   : > { %16589 = vst [vmem:[#allocation272_spill] sm:$0xff] %v11447_v6  ;;  %16590 = vst [vmem:[#allocation273_spill] sm:$0xff] %v11449_v31  ;;  %v2710_v6 = vadd.s32 4294967272, %v2691_v26 }
 0x443   : > { %v11451_v32 = vpop.permute.xlu0 %2529  ;;  %v11453_v29 = vpop.permute.xlu1 %2532 }
 0x444   : > { %16591 = vst [vmem:[#allocation274_spill] sm:$0xff] %v11451_v32  ;;  %16592 = vst [vmem:[#allocation275_spill] sm:$0xff] %v11453_v29  ;;  %v2703_v29 = vadd.s32 4294967280, %v2691_v26 }
 0x447   : > { %v11455_v53 = vpop.permute.xlu0 %2535  ;;  %v11457_v40 = vpop.permute.xlu1 %2538 }
 0x448   : > { %16593 = vst [vmem:[#allocation276_spill] sm:$0xff] %v11455_v53  ;;  %16594 = vst [vmem:[#allocation277_spill] sm:$0xff] %v11457_v40 }
 0x44b   : > { %v11459_v10 = vpop.permute.xlu0 %2541  ;;  %v11461_v50 = vpop.permute.xlu1 %2544 }
 0x44c   : > { %16595 = vst [vmem:[#allocation278_spill] sm:$0xff] %v11459_v10  ;;  %16596 = vst [vmem:[#allocation279_spill] sm:$0xff] %v11461_v50  ;;  %v16606_v50 = vld [vmem:[#allocation8_spill] sm:$0xff] }
 0x44d   : > { %v11481_v53 = vsub.s32 %v2696_v41, %v16606_v50  ;;  %v11488_v31 = vsub.s32 %v2691_v26, %v16606_v50 }
 0x44f   : > { %v11463_v3 = vpop.permute.xlu0 %2547  ;;  %v11465_v63 = vpop.permute.xlu1 %2550  ;;  %v2700_v51 = vrot.slane %v16609_v17, %v11481_v53  ;;  %v2752_v17 = vadd.s32 4294967224, %v2691_v26 }
 0x450   : > { %16597 = vst [vmem:[#allocation280_spill] sm:$0xff] %v11463_v3  ;;  %16598 = vst [vmem:[#allocation281_spill] sm:$0xff] %v11465_v63  ;;  %v2804_v63 = vrot.slane %v11053_v54, %v11488_v31 }
 0x453   : > { %v11467_v0 = vpop.permute.xlu0 %2553  ;;  %v11469_v35 = vpop.permute.xlu1 %2556 }
 0x454   : > { %16599 = vst [vmem:[#allocation282_spill] sm:$0xff] %v11467_v0  ;;  %16600 = vst [vmem:[#allocation283_spill] sm:$0xff] %v11469_v35  ;;  %v2745_v35 = vadd.s32 4294967232, %v2691_v26 }
 0x457   : > { %v11471_v39 = vpop.permute.xlu0 %2559  ;;  %v11473_v24 = vpop.permute.xlu1 %2562 }
 0x458   : > { %16601 = vst [vmem:[#allocation284_spill] sm:$0xff] %v11471_v39  ;;  %16602 = vst [vmem:[#allocation285_spill] sm:$0xff] %v11473_v24  ;;  %v11493_v24 = vsub.s32 %v2703_v29, %v16606_v50  ;;  %v11502_v39 = vsub.s32 %v2710_v6, %v16606_v50  ;;  %v11515_v6 = vsub.s32 %v2724_v18, %v16606_v50 }
 0x459   : > { %v11529_v18 = vsub.s32 %v2745_v35, %v16606_v50 }
 0x45a   : > { %v2813_v52 = vrot.slane %v16618_v7, %v11493_v24 }
 0x45b   : > { %v11476_v40 = vpop.permute.xlu0 %2565  ;;  %v11478_v10 = vpop.permute.xlu1 %2568 }
 0x45c   : > { %16604 = vst [vmem:[#allocation286_spill] sm:$0xff] %v11476_v40  ;;  %16605 = vst [vmem:[#allocation287_spill] sm:$0xff] %v11478_v10  ;;  %v2717_v40 = vadd.s32 4294967264, %v2691_v26 }
 0x45e   : > { %v11506_v57 = vsub.s32 %v2717_v40, %v16606_v50 }
 0x45f   : > { %v11483_v32 = vpop.permute.xlu0 %2571  ;;  %v11485_v56 = vpop.permute.xlu1 %2574 }
 0x460   : > { %16607 = vst [vmem:[#allocation8_spill] sm:$0xff] %v11483_v32  ;;  %16608 = vst [vmem:[#allocation288_spill] sm:$0xff] %v11485_v56  ;;  %v2731_v32 = vadd.s32 4294967248, %v2691_v26  ;;  %v16612_v56 = vld [vmem:[#allocation223_spill] sm:$0xff] }
 0x461   : > { %v2695_v55 = vrot.slane %v16612_v56, %v11488_v31 }
 0x462   : > { %v11518_v46 = vsub.s32 %v2731_v32, %v16606_v50  ;;  %v16617_v32 = vld [vmem:[#allocation203_spill] sm:$0xff] }
 0x463   : > { %v11495_v10 = vpop.permute.xlu0 %2577  ;;  %v11497_v41 = vpop.permute.xlu1 %2580  ;;  %v2702_v29 = vsel %vm2701_vm3, %v2700_v51, %v2695_v55  ;;  %v2773_v55 = vadd.s32 4294967200, %v2691_v26  ;;  %v2780_v51 = vadd.s32 4294967192, %v2691_v26 }
 0x464   : > { %16610 = vst [vmem:[#allocation131_spill] sm:$0xff] %v11495_v10  ;;  %16611 = vst [vmem:[#allocation289_spill] sm:$0xff] %v11497_v41  ;;  %v2759_v10 = vadd.s32 4294967216, %v2691_v26  ;;  %v16613_v41 = vld [vmem:[#allocation125_spill] sm:$0xff] }
 0x465   : > { %v2707_v8 = vrot.slane %v16613_v41, %v11493_v24  ;;  %v16616_v41 = vld [vmem:[#allocation225_spill] sm:$0xff] }
 0x466   : > { %v2808_v3 = vrot.slane %v16616_v41, %v11481_v53  ;;  %v11539_v54 = vsub.s32 %v2759_v10, %v16606_v50  ;;  %v11555_v10 = vsub.s32 %v2780_v51, %v16606_v50  ;;  %v2735_v51 = vrot.slane %v16626_v30, %v11518_v46 }
 0x467   : > { %v11510_v0 = vpop.permute.xlu0 %2583  ;;  %v11512_v56 = vpop.permute.xlu1 %2586  ;;  %v2709_v40 = vsel %vm2708_vm4, %v2707_v8, %v2702_v29  ;;  %v11536_v8 = vsub.s32 %v2752_v17, %v16606_v50  ;;  %v11542_v29 = vsub.s32 %v2766_v58, %v16606_v50  ;;  %v11552_v17 = vsub.s32 %v2773_v55, %v16606_v50 }
 0x468   : > { %16614 = vst [vmem:[#allocation223_spill] sm:$0xff] %v11510_v0  ;;  %16615 = vst [vmem:[#allocation125_spill] sm:$0xff] %v11512_v56  ;;  %v11526_v0 = vsub.s32 %v2738_v28, %v16606_v50  ;;  %v2714_v56 = vrot.slane %v16617_v32, %v11502_v39  ;;  %v16619_v28 = vld [vmem:[#allocation135_spill] sm:$0xff]  ;;  %v2787_v32 = vadd.s32 4294967184, %v2691_v26  ;;  %v2809_v58 = vsel %vm2701_vm3, %v2808_v3, %v2804_v63 }
 0x469   : > { %v2721_v41 = vrot.slane %v16619_v28, %v11506_v57  ;;  %16622 = vst [vmem:[#allocation171_spill] sm:$0xff] %v11555_v10  ;;  %v2818_v28 = vrot.slane %v16623_v43, %v11502_v39  ;;  %v2814_v26 = vsel %vm2708_vm4, %v2813_v52, %v2809_v58  ;;  %v2883_v63 = vrot.slane %v11183_v1, %v11488_v31  ;;  %v16632_v58 = vld [vmem:[#allocation207_spill] sm:$0xff] }
 0x46a   : > { %v2716_v7 = vsel %vm2715_vm5, %v2714_v56, %v2709_v40  ;;  %v16625_v56 = vld [vmem:[#allocation175_spill] sm:$0xff]  ;;  %v2887_v3 = vrot.slane %v11186_v19, %v11481_v53  ;;  %v11577_v52 = vsub.s32 %v2787_v32, %v16606_v50  ;;  %v2892_v30 = vrot.slane %v11199_v37, %v11493_v24  ;;  %v16631_v19 = vld [vmem:[#allocation229_spill] sm:$0xff] }
 0x46b   : > { %v11546_v35 = vpop.permute.xlu0 %2589  ;;  %v11548_v45 = vpop.permute.xlu1 %2592  ;;  %v2823_v40 = vrot.slane %v16625_v56, %v11506_v57  ;;  %v2723_v55 = vsel %vm15857_vm6, %v2721_v41, %v2716_v7  ;;  %v2819_v1 = vsel %vm2715_vm5, %v2818_v28, %v2814_v26  ;;  %v2828_v41 = vrot.slane %v16631_v19, %v11515_v6  ;;  %v16634_v37 = vld [vmem:[#allocation145_spill] sm:$0xff] }
 0x46c   : > { %16620 = vst [vmem:[#allocation225_spill] sm:$0xff] %v11546_v35  ;;  %16621 = vst [vmem:[#allocation203_spill] sm:$0xff] %v11548_v45  ;;  %v16624_v35 = vld [vmem:[#allocation205_spill] sm:$0xff]  ;;  %v2742_v32 = vrot.slane %v16632_v58, %v11526_v0  ;;  %v2888_v28 = vsel %vm2701_vm3, %v2887_v3, %v2883_v63  ;;  %v2897_v26 = vrot.slane %v11202_v36, %v11502_v39  ;;  %v16635_v63 = vld [vmem:[#allocation231_spill] sm:$0xff] }
 0x46d   : > { %v2728_v45 = vrot.slane %v16624_v35, %v11515_v6  ;;  %16629 = vst [vmem:[#allocation205_spill] sm:$0xff] %v11577_v52  ;;  %v11580_v35 = vsub.s32 %v2794_v4, %v16606_v50  ;;  %v2824_v56 = vsel %vm15857_vm6, %v2823_v40, %v2819_v1  ;;  %v16633_v50 = vld [vmem:[#allocation181_spill] sm:$0xff]  ;;  %v2893_v40 = vsel %vm2708_vm4, %v2892_v30, %v2888_v28 }
 0x46e   : > { %v2833_v4 = vrot.slane %v16633_v50, %v11518_v46  ;;  %v2838_v3 = vrot.slane %v16635_v63, %v11526_v0  ;;  %v16636_v1 = vld [vmem:[#allocation209_spill] sm:$0xff]  ;;  %v2843_v30 = vrot.slane %v11117_v27, %v11529_v18  ;;  %v2912_v27 = vrot.slane %v11231_v60, %v11518_v46 }
 0x46f   : > { %v11572_v43 = vpop.permute.xlu0 %2595  ;;  %v11574_v2 = vpop.permute.xlu1 %2598  ;;  %16630 = vst [vmem:[#allocation175_spill] sm:$0xff] %v11580_v35  ;;  %v2730_v7 = vsel %vm15708_vm7, %v2728_v45, %v2723_v55  ;;  %v2902_v55 = vrot.slane %v11215_v12, %v11506_v57  ;;  %v16637_v12 = vld [vmem:[#allocation151_spill] sm:$0xff]  ;;  %v2966_v28 = vrot.slane %v11318_v14, %v11481_v53 }
 0x470   : > { %16627 = vst [vmem:[#allocation135_spill] sm:$0xff] %v11572_v43  ;;  %16628 = vst [vmem:[#allocation227_spill] sm:$0xff] %v11574_v2  ;;  %v2737_v2 = vsel %vm15709_vm8, %v2735_v51, %v2730_v7  ;;  %v2749_v43 = vrot.slane %v16634_v37, %v11529_v18  ;;  %v2829_v51 = vsel %vm15708_vm7, %v2828_v41, %v2824_v56 }
 0x471   : > { %v2744_v36 = vsel %vm2743_vm9, %v2742_v32, %v2737_v2  ;;  %v2756_v7 = vrot.slane %v16636_v1, %v11536_v8  ;;  %v2834_v58 = vsel %vm15709_vm8, %v2833_v4, %v2829_v51  ;;  %v2763_v37 = vrot.slane %v16637_v12, %v11539_v54  ;;  %v16638_v51 = vld [vmem:[#allocation211_spill] sm:$0xff] }
 0x472   : > { %v2751_v50 = vsel %vm15712_vm10, %v2749_v43, %v2744_v36  ;;  %v2898_v41 = vsel %vm2715_vm5, %v2897_v26, %v2893_v40  ;;  %v2907_v56 = vrot.slane %v11218_v25, %v11515_v6  ;;  %v2962_v43 = vrot.slane %v11315_v48, %v11488_v31 }
 0x473   : > { %v11599_v19 = vpop.permute.xlu0 %2601  ;;  %v11601_v45 = vpop.permute.xlu1 %2604  ;;  %v2903_v4 = vsel %vm15857_vm6, %v2902_v55, %v2898_v41  ;;  %v2839_v26 = vsel %vm2743_vm9, %v2838_v3, %v2834_v58  ;;  %v2848_v25 = vrot.slane %v11120_v5, %v11536_v8  ;;  %v2971_v40 = vrot.slane %v11331_v34, %v11493_v24  ;;  %v16639_v3 = vld [vmem:[#allocation155_spill] sm:$0xff] }
 0x474   : > { %v2758_v55 = vsel %vm15711_vm11, %v2756_v7, %v2751_v50  ;;  %v2770_v60 = vrot.slane %v16638_v51, %v11542_v29  ;;  %v2844_v63 = vsel %vm15712_vm10, %v2843_v30, %v2839_v26  ;;  %v2853_v48 = vrot.slane %v11133_v13, %v11539_v54  ;;  %v16642_v26 = vld [vmem:[#allocation161_spill] sm:$0xff] }
 0x475   : > { %v2765_v14 = vsel %vm15710_vm12, %v2763_v37, %v2758_v55  ;;  %v2777_v36 = vrot.slane %v16639_v3, %v11552_v17  ;;  %v2908_v5 = vsel %vm15708_vm7, %v2907_v56, %v2903_v4  ;;  %v2917_v34 = vrot.slane %v11234_v15, %v11526_v0  ;;  %v16640_v37 = vld [vmem:[#allocation190_spill] sm:$0xff] }
 0x476   : > { %v2913_v58 = vsel %vm15709_vm8, %v2912_v27, %v2908_v5  ;;  %v2922_v30 = vrot.slane %v11247_v20, %v11529_v18  ;;  %v2967_v13 = vsel %vm2701_vm3, %v2966_v28, %v2962_v43  ;;  %v2976_v50 = vrot.slane %v11334_v38, %v11502_v39  ;;  %v16641_v27 = vld [vmem:[#allocation213_spill] sm:$0xff] }
 0x477   : > { %v11621_v2 = vpop.permute.xlu0 %2607  ;;  %v11623_v32 = vpop.permute.xlu1 %2610  ;;  %v2849_v12 = vsel %vm15711_vm11, %v2848_v25, %v2844_v63  ;;  %v2858_v41 = vrot.slane %v16640_v37, %v11542_v29  ;;  %v2972_v15 = vsel %vm2708_vm4, %v2971_v40, %v2967_v13  ;;  %v2981_v56 = vrot.slane %v11347_v11, %v11506_v57 }
 0x478   : > { %v2772_v4 = vsel %vm2771_vm13, %v2770_v60, %v2765_v14  ;;  %v2784_v20 = vrot.slane %v16641_v27, %v11555_v10  ;;  %v2854_v43 = vsel %vm15710_vm12, %v2853_v48, %v2849_v12  ;;  %v2863_v38 = vrot.slane %v11147_v42, %v11552_v17 }
 0x479   : > { %v2779_v28 = vsel %vm2778_vm14, %v2777_v36, %v2772_v4  ;;  %v2791_v25 = vrot.slane %v16642_v26, %v11577_v52  ;;  %v2918_v40 = vsel %vm2743_vm9, %v2917_v34, %v2913_v58  ;;  %v2927_v11 = vrot.slane %v11250_v23, %v11536_v8  ;;  %v16643_v58 = vld [vmem:[#allocation215_spill] sm:$0xff] }
 0x47a   : > { %v2923_v60 = vsel %vm15712_vm10, %v2922_v30, %v2918_v40  ;;  %v2932_v63 = vrot.slane %v11263_v47, %v11539_v54  ;;  %v2977_v42 = vsel %vm2715_vm5, %v2976_v50, %v2972_v15  ;;  %v2986_v48 = vrot.slane %v11350_v49, %v11515_v6 }
 0x47b   : > { %v11649_v1 = vpop.permute.xlu0 %2613  ;;  %v11651_v7 = vpop.permute.xlu1 %2616  ;;  %v2859_v14 = vsel %vm2771_vm13, %v2858_v41, %v2854_v43  ;;  %v2868_v3 = vrot.slane %v11150_v44, %v11555_v10  ;;  %v2982_v23 = vsel %vm15857_vm6, %v2981_v56, %v2977_v42  ;;  %v2991_v36 = vrot.slane %v11363_v62, %v11518_v46 }
 0x47c   : > { %v2786_v5 = vsel %vm2785_vm15, %v2784_v20, %v2779_v28  ;;  %v2864_v47 = vsel %vm2778_vm14, %v2863_v38, %v2859_v14  ;;  %v2873_v34 = vrot.slane %v11167_v59, %v11577_v52  ;;  %v2798_v30 = vrot.slane %v16643_v58, %v11580_v35  ;;  %v16644_v20 = vld [vmem:[#allocation265_spill] sm:$0xff]  ;;  %v16645_v38 = vld [vmem:[#allocation254_spill] sm:$0xff] }
 0x47d   : > { %v2793_v49 = vsel %vm2792_vm1, %v2791_v25, %v2786_v5  ;;  %v2928_v44 = vsel %vm15711_vm11, %v2927_v11, %v2923_v60  ;;  %v2937_v13 = vrot.slane %v11266_v16, %v11542_v29  ;;  %v2942_v37 = vrot.slane %v11279_v61, %v11552_v17  ;;  %v16647_v60 = vld [vmem:[#allocation90_spill] sm:$0xff] }
 0x47e   : > { %v2933_v12 = vsel %vm15710_vm12, %v2932_v63, %v2928_v44  ;;  %v2987_v59 = vsel %vm15708_vm7, %v2986_v48, %v2982_v23  ;;  %v2996_v41 = vrot.slane %v11366_v21, %v11526_v0  ;;  %v2869_v15 = vsel %vm2785_vm15, %v2868_v3, %v2864_v47  ;;  %v16648_v48 = vld [vmem:[#allocation256_spill] sm:$0xff]  ;;  %v16649_v23 = vld [vmem:[#allocation219_spill] sm:$0xff] }
 0x47f   : > { %v11677_v55 = vpop.permute.xlu0 %2619  ;;  %v11679_v51 = vpop.permute.xlu1 %2622  ;;  %v2878_v56 = vrot.slane %v11170_v9, %v11580_v35  ;;  %v2992_v16 = vsel %vm15709_vm8, %v2991_v36, %v2987_v59  ;;  %v3001_v4 = vrot.slane %v11379_v33, %v11529_v18  ;;  %v2874_v27 = vsel %vm2792_vm1, %v2873_v34, %v2869_v15  ;;  %v16646_v9 = vld [vmem:[#allocation266_spill] sm:$0xff]  ;;  %v16650_v47 = vld [vmem:[#allocation267_spill] sm:$0xff] }
 0x480   : > { %v3041_v61 = vrot.slane %v11431_v22, %v11488_v31  ;;  %v3045_v43 = vrot.slane %v16644_v20, %v11481_v53  ;;  %v2938_v21 = vsel %vm2771_vm13, %v2937_v13, %v2933_v12  ;;  %v2947_v28 = vrot.slane %v16645_v38, %v11555_v10  ;;  %v16656_v20 = vld [vmem:[#allocation135_spill] sm:$0xff] }
 0x481   : > { %v3050_v26 = vrot.slane %v16646_v9, %v11493_v24  ;;  %v11734_v33 = vsel %vm2799_vm2, %v2798_v30, %v2793_v49  ;;  %v2943_v22 = vsel %vm2778_vm14, %v2942_v37, %v2938_v21  ;;  %v2997_v11 = vsel %vm2743_vm9, %v2996_v41, %v2992_v16  ;;  %v16651_v49 = vld [vmem:[#allocation280_spill] sm:$0xff]  ;;  %v16652_v30 = vld [vmem:[#allocation281_spill] sm:$0xff]  ;;  %v16654_v41 = vld [vmem:[#allocation282_spill] sm:$0xff] }
 0x482   : > { %v3006_v63 = vrot.slane %v16647_v60, %v11536_v8  ;;  %v11741_v42 = vsel %vm2799_vm2, %v2878_v56, %v2874_v27  ;;  %v2952_v14 = vrot.slane %v16648_v48, %v11577_v52  ;;  %v3002_v3 = vsel %vm15712_vm10, %v3001_v4, %v2997_v11  ;;  %v16653_v37 = vld [vmem:[#allocation268_spill] sm:$0xff]  ;;  %v16657_v21 = vld [vmem:[#allocation227_spill] sm:$0xff]  ;;  %v16658_v9 = vld [vmem:[#allocation257_spill] sm:$0xff] }
 0x483   : > { %v11703_v50 = vpop.permute.xlu0 %2625  ;;  %v11705_v62 = vpop.permute.xlu1 %2628  ;;  %v3011_v36 = vrot.slane %v16649_v23, %v11539_v54  ;;  %v3046_v5 = vsel %vm2701_vm3, %v3045_v43, %v3041_v61  ;;  %v3055_v34 = vrot.slane %v16650_v47, %v11502_v39  ;;  %v3120_v58 = vrot.slane %v16651_v49, %v11488_v31  ;;  %v16655_v27 = vld [vmem:[#allocation92_spill] sm:$0xff]  ;;  %v16660_v23 = vld [vmem:[#allocation283_spill] sm:$0xff]  ;;  %v16661_v47 = vld [vmem:[#allocation270_spill] sm:$0xff] }
 0x484   : > { %v3124_v44 = vrot.slane %v16652_v30, %v11481_v53  ;;  %v2948_v13 = vsel %vm2785_vm15, %v2947_v28, %v2943_v22  ;;  %v3051_v12 = vsel %vm2708_vm4, %v3050_v26, %v3046_v5  ;;  %v3060_v59 = vrot.slane %v16653_v37, %v11506_v57  ;;  %v16662_v30 = vld [vmem:[#allocation284_spill] sm:$0xff]  ;;  %v16663_v37 = vld [vmem:[#allocation222_spill] sm:$0xff] }
 0x485   : > { %v3129_v15 = vrot.slane %v16654_v41, %v11493_v24  ;;  %v3007_v4 = vsel %vm15711_vm11, %v3006_v63, %v3002_v3  ;;  %v3016_v61 = vrot.slane %v16655_v27, %v11542_v29  ;;  %v3199_v43 = vrot.slane %v16656_v20, %v11488_v31  ;;  %v16659_v63 = vld [vmem:[#allocation269_spill] sm:$0xff]  ;;  %v16664_v20 = vld [vmem:[#allocation104_spill] sm:$0xff] }
 0x486   : > { %v3203_v38 = vrot.slane %v16657_v21, %v11481_v53  ;;  %v11773_v28 = vsel %vm2792_vm1, %v2952_v14, %v2948_v13  ;;  %v2957_v26 = vrot.slane %v16658_v9, %v11580_v35  ;;  %v3012_v22 = vsel %vm15710_vm12, %v3011_v36, %v3007_v4 }
 0x487   : > { %v11729_v25 = vpop.permute.xlu0 %2631  ;;  %v11731_v40 = vpop.permute.xlu1 %2634  ;;  %v3208_v11 = vrot.slane %v11599_v19, %v11493_v24  ;;  %v3056_v60 = vsel %vm2715_vm5, %v3055_v34, %v3051_v12  ;;  %v3065_v48 = vrot.slane %v16659_v63, %v11515_v6  ;;  %v3125_v3 = vsel %vm2701_vm3, %v3124_v44, %v3120_v58  ;;  %v16667_v63 = vld [vmem:[#allocation286_spill] sm:$0xff] }
 0x488   : > { %v3134_v5 = vrot.slane %v16660_v23, %v11502_v39  ;;  %v3061_v14 = vsel %vm15857_vm6, %v3060_v59, %v3056_v60  ;;  %v3070_v49 = vrot.slane %v16661_v47, %v11518_v46  ;;  %v3130_v36 = vsel %vm2708_vm4, %v3129_v15, %v3125_v3 }
 0x489   : > { %v3139_v19 = vrot.slane %v16662_v30, %v11506_v57  ;;  %v3017_v12 = vsel %vm2771_vm13, %v3016_v61, %v3012_v22  ;;  %v3021_v58 = vrot.slane %v16663_v37, %v11552_v17  ;;  %v3204_v44 = vsel %vm2701_vm3, %v3203_v38, %v3199_v43  ;;  %v16665_v43 = vld [vmem:[#allocation285_spill] sm:$0xff]  ;;  %v16668_v30 = vld [vmem:[#allocation272_spill] sm:$0xff] }
 0x48a   : > { %v3213_v59 = vrot.slane %v11601_v45, %v11502_v39  ;;  %v3209_v41 = vsel %vm2708_vm4, %v3208_v11, %v3204_v44  ;;  %v3218_v15 = vrot.slane %v11621_v2, %v11506_v57  ;;  %v3026_v61 = vrot.slane %v16664_v20, %v11555_v10  ;;  %v16666_v11 = vld [vmem:[#allocation271_spill] sm:$0xff] }
 0x48b   : > { %v11761_v56 = vpop.permute.xlu0 %2637  ;;  %v11763_v16 = vpop.permute.xlu1 %2640  ;;  %v3066_v21 = vsel %vm15708_vm7, %v3065_v48, %v3061_v14  ;;  %v3135_v22 = vsel %vm2715_vm5, %v3134_v5, %v3130_v36  ;;  %v3144_v38 = vrot.slane %v16665_v43, %v11515_v6  ;;  %v3075_v60 = vrot.slane %v16666_v11, %v11526_v0 }
 0x48c   : > { %v3071_v45 = vsel %vm15709_vm8, %v3070_v49, %v3066_v21  ;;  %v3140_v2 = vsel %vm15857_vm6, %v3139_v19, %v3135_v22  ;;  %v3149_v3 = vrot.slane %v16667_v63, %v11518_v46  ;;  %v3080_v48 = vrot.slane %v16668_v30, %v11529_v18 }
 0x48d   : > { %v3214_v5 = vsel %vm2715_vm5, %v3213_v59, %v3209_v41  ;;  %v3223_v14 = vrot.slane %v11623_v32, %v11515_v6  ;;  %v3228_v19 = vrot.slane %v11649_v1, %v11518_v46  ;;  %v3022_v37 = vsel %vm2778_vm14, %v3021_v58, %v3017_v12  ;;  %v16669_v59 = vld [vmem:[#allocation287_spill] sm:$0xff] }
 0x48e   : > { %v3219_v36 = vsel %vm15857_vm6, %v3218_v15, %v3214_v5  ;;  %v3145_v44 = vsel %vm15708_vm7, %v3144_v38, %v3140_v2  ;;  %v3154_v41 = vrot.slane %v16669_v59, %v11526_v0  ;;  %v3076_v20 = vsel %vm2743_vm9, %v3075_v60, %v3071_v45  ;;  %v16670_v15 = vld [vmem:[#allocation273_spill] sm:$0xff] }
 0x48f   : > { %v2644_v13 = vpop.permute.xlu0 %2643  ;;  %v2647_v34 = vpop.permute.xlu1 %2646  ;;  %v3085_v21 = vrot.slane %v16670_v15, %v11536_v8  ;;  %v3150_v1 = vsel %vm15709_vm8, %v3149_v3, %v3145_v44  ;;  %v3081_v12 = vsel %vm15712_vm10, %v3080_v48, %v3076_v20  ;;  %v3224_v58 = vsel %vm15708_vm7, %v3223_v14, %v3219_v36  ;;  %v16673_v48 = vld [vmem:[#allocation201_spill] sm:$0xff]  ;;  %v16674_v14 = vld [vmem:[#allocation274_spill] sm:$0xff]  ;;  %v16675_v36 = vld [vmem:[#allocation131_spill] sm:$0xff] }
 0x490   : > { %v3278_v4 = vrot.slane %v2644_v13, %v11488_v31  ;;  %v3282_v27 = vrot.slane %v2647_v34, %v11481_v53  ;;  %v3233_v38 = vrot.slane %v11651_v7, %v11526_v0  ;;  %v3229_v45 = vsel %vm15709_vm8, %v3228_v19, %v3224_v58 }
 0x491   : > { %v3238_v60 = vrot.slane %v11677_v55, %v11529_v18  ;;  %v3027_v3 = vsel %vm2785_vm15, %v3026_v61, %v3022_v37  ;;  %v3031_v5 = vrot.slane %v16673_v48, %v11577_v52  ;;  %v3169_v19 = vrot.slane %v16675_v36, %v11539_v54  ;;  %v16681_v36 = vld [vmem:[#allocation277_spill] sm:$0xff] }
 0x492   : > { %v3283_v13 = vsel %vm2701_vm3, %v3282_v27, %v3278_v4  ;;  %v16671_v4 = vld [vmem:[#allocation8_spill] sm:$0xff]  ;;  %v3234_v37 = vsel %vm2743_vm9, %v3233_v38, %v3229_v45  ;;  %v3243_v44 = vrot.slane %v11679_v51, %v11536_v8  ;;  %v16679_v38 = vld [vmem:[#allocation223_spill] sm:$0xff]  ;;  %v3258_v48 = vrot.slane %v11729_v25, %v11552_v17 }
 0x493   : > { %v2650_v23 = vpop.permute.xlu0 %2649  ;;  %v2653_v47 = vpop.permute.xlu1 %2652  ;;  %v3159_v27 = vrot.slane %v16671_v4, %v11529_v18 }
 0x494   : > { %v3287_v49 = vrot.slane %v2650_v23, %v11493_v24  ;;  %v3292_v34 = vrot.slane %v2653_v47, %v11502_v39  ;;  %v3155_v23 = vsel %vm2743_vm9, %v3154_v41, %v3150_v1  ;;  %v16672_v47 = vld [vmem:[#allocation288_spill] sm:$0xff]  ;;  %v3239_v41 = vsel %vm15712_vm10, %v3238_v60, %v3234_v37  ;;  %v16676_v1 = vld [vmem:[#allocation275_spill] sm:$0xff] }
 0x495   : > { %v3164_v30 = vrot.slane %v16672_v47, %v11536_v8  ;;  %v3160_v55 = vsel %vm15712_vm10, %v3159_v27, %v3155_v23  ;;  %v3095_v4 = vrot.slane %v16676_v1, %v11542_v29  ;;  %v16677_v27 = vld [vmem:[#allocation289_spill] sm:$0xff]  ;;  %v3244_v23 = vsel %vm15711_vm11, %v3243_v44, %v3239_v41 }
 0x496   : > { %v3288_v32 = vsel %vm2708_vm4, %v3287_v49, %v3283_v13  ;;  %v3090_v49 = vrot.slane %v16674_v14, %v11539_v54  ;;  %v3253_v47 = vrot.slane %v11705_v62, %v11542_v29  ;;  %v16683_v44 = vld [vmem:[#allocation125_spill] sm:$0xff] }
 0x497   : > { %v2656_v22 = vpop.permute.xlu0 %2655  ;;  %v2659_v43 = vpop.permute.xlu1 %2658  ;;  %v3293_v2 = vsel %vm2715_vm5, %v3292_v34, %v3288_v32  ;;  %v3086_v34 = vsel %vm15711_vm11, %v3085_v21, %v3081_v12  ;;  %v3248_v32 = vrot.slane %v11703_v50, %v11539_v54  ;;  %v3165_v21 = vsel %vm15711_vm11, %v3164_v30, %v3160_v55  ;;  %v16678_v12 = vld [vmem:[#allocation276_spill] sm:$0xff] }
 0x498   : > { %v3297_v11 = vrot.slane %v2656_v22, %v11506_v57  ;;  %v3302_v63 = vrot.slane %v2659_v43, %v11515_v6  ;;  %v3174_v22 = vrot.slane %v16677_v27, %v11542_v29  ;;  %v3091_v43 = vsel %vm15710_vm12, %v3090_v49, %v3086_v34  ;;  %v16682_v34 = vld [vmem:[#allocation278_spill] sm:$0xff] }
 0x499   : > { %v3100_v50 = vrot.slane %v16678_v12, %v11552_v17  ;;  %v3170_v58 = vsel %vm15710_vm12, %v3169_v19, %v3165_v21  ;;  %v3096_v55 = vsel %vm2771_vm13, %v3095_v4, %v3091_v43  ;;  %v3105_v19 = vrot.slane %v16681_v36, %v11555_v10 }
 0x49a   : > { %v3298_v7 = vsel %vm15857_vm6, %v3297_v11, %v3293_v2  ;;  %v3179_v11 = vrot.slane %v16679_v38, %v11552_v17  ;;  %v16680_v2 = vld [vmem:[#allocation221_spill] sm:$0xff]  ;;  %v3110_v37 = vrot.slane %v16682_v34, %v11577_v52  ;;  %v3263_v4 = vrot.slane %v11731_v40, %v11555_v10 }
 0x49b   : > { %v2662_v13 = vpop.permute.xlu0 %2661  ;;  %v2665_v61 = vpop.permute.xlu1 %2664  ;;  %v3303_v20 = vsel %vm15708_vm7, %v3302_v63, %v3298_v7  ;;  %vm3356_vm7 = vcmask 1042434   ;;  %v3036_v63 = vrot.slane %v16680_v2, %v11580_v35  ;;  %v3249_v7 = vsel %vm15710_vm12, %v3248_v32, %v3244_v23 }
 0x49c   : > { %v3307_v59 = vrot.slane %v2662_v13, %v11518_v46  ;;  %v3312_v15 = vrot.slane %v2665_v61, %v11526_v0  ;;  %v3175_v13 = vsel %vm2771_vm13, %v3174_v22, %v3170_v58  ;;  %v3101_v61 = vsel %vm2778_vm14, %v3100_v50, %v3096_v55  ;;  %v16685_v58 = vld [vmem:[#allocation279_spill] sm:$0xff] }
 0x49d   : > { %v3180_v25 = vsel %vm2778_vm14, %v3179_v11, %v3175_v13  ;;  %v3254_v1 = vsel %vm2771_vm13, %v3253_v47, %v3249_v7  ;;  %v3268_v22 = vrot.slane %v11761_v56, %v11577_v52  ;;  %v3032_v12 = vsel %vm2792_vm1, %v3031_v5, %v3027_v3 }
 0x49e   : > { %v3308_v51 = vsel %vm15709_vm8, %v3307_v59, %v3303_v20  ;;  %vm3358_vm8 = vcmask 1043459   ;;  %v3184_v59 = vrot.slane %v16683_v44, %v11555_v10  ;;  %v16684_v20 = vld [vmem:[#allocation225_spill] sm:$0xff]  ;;  %v3259_v27 = vsel %vm2778_vm14, %v3258_v48, %v3254_v1  ;;  %v16688_v1 = vld [vmem:[#allocation10_spill] sm:$0xff] }
 0x49f   : > { %v2668_v45 = vpop.permute.xlu0 %2667  ;;  %v2671_v60 = vpop.permute.xlu1 %2670  ;;  %v3313_v14 = vsel %vm2743_vm9, %v3312_v15, %v3308_v51  ;;  %v3189_v15 = vrot.slane %v16684_v20, %v11577_v52  ;;  %v3106_v50 = vsel %vm2785_vm15, %v3105_v19, %v3101_v61  ;;  %v3115_v38 = vrot.slane %v16685_v58, %v11580_v35  ;;  %v16687_v20 = vld [vmem:[#allocation9_spill] sm:$0xff] }
 0x4a0   : > { %v3317_v30 = vrot.slane %v2668_v45, %v11529_v18  ;;  %v3322_v49 = vrot.slane %v2671_v60, %v11536_v8  ;;  %v2958_v11 = vsel %vm2799_vm2, %v2957_v26, %v11773_v28  ;;  %v3111_v56 = vsel %vm2792_vm1, %v3110_v37, %v3106_v50  ;;  %v16686_v60 = vld [vmem:[#allocation203_spill] sm:$0xff]  ;;  %v16692_v50 = vld [vmem:[#allocation18_spill] sm:$0xff] }
 0x4a1   : > { %v3185_v45 = vsel %vm2785_vm15, %v3184_v59, %v3180_v25  ;;  %v3194_v3 = vrot.slane %v16686_v60, %v11580_v35  ;;  %v3264_v47 = vsel %vm2785_vm15, %v3263_v4, %v3259_v27  ;;  %v3037_v28 = vsel %vm2799_vm2, %v3036_v63, %v3032_v12 }
 0x4a2   : > { %v3318_v62 = vsel %vm15712_vm10, %v3317_v30, %v3313_v14  ;;  %v3190_v23 = vsel %vm2792_vm1, %v3189_v15, %v3185_v45  ;;  %v3273_v30 = vrot.slane %v11763_v16, %v11580_v35  ;;  %v3269_v26 = vsel %vm2792_vm1, %v3268_v22, %v3264_v47  ;;  %v16690_v22 = vld [vmem:[#allocation16_spill] sm:$0xff] }
 0x4a3   : > { %v2674_v41 = vpop.permute.xlu0 %2673  ;;  %v2677_v32 = vpop.permute.xlu1 %2676  ;;  %v3323_v51 = vsel %vm15711_vm11, %v3322_v49, %v3318_v62  ;;  %v3355_v14 = vsel %vm15713_vm0, %v11741_v42, %v11734_v33  ;;  %v3116_v49 = vsel %vm2799_vm2, %v3115_v38, %v3111_v56  ;;  %v3195_v36 = vsel %vm2799_vm2, %v3194_v3, %v3190_v23  ;;  %v16693_v56 = vld [vmem:[#allocation33_spill] sm:$0xff]  ;;  %v16695_v23 = vld [vmem:[#allocation195_spill] sm:$0xff] }
 0x4a4   : > { %v3327_v21 = vrot.slane %v2674_v41, %v11539_v54  ;;  %v3332_v43 = vrot.slane %v2677_v32, %v11542_v29  ;;  %v3357_v16 = vsel %vm3356_vm7, %v2958_v11, %v3355_v14  ;;  %vm15855_vm11 = vcmask 1045509   ;;  %v16694_v3 = vld [vmem:[#allocation17_spill] sm:$0xff] }
 0x4a5   : > { %vm15854_vm10 = vcmask 1046534   ;;  %v3359_v13 = vsel %vm3358_vm8, %v3037_v28, %v3357_v16  ;;  %v3274_v33 = vsel %vm2799_vm2, %v3273_v30, %v3269_v26  ;;  %vm15853_vm0 = vcmask 1047559  }
 0x4a6   : > { %v3328_v40 = vsel %vm15710_vm12, %v3327_v21, %v3323_v51  ;;  %vm15856_vm12 = vcmask 1044484   ;;  %v16689_v21 = vld [vmem:[#allocation22_spill] sm:$0xff] }
 0x4a7   : > { %v2680_v5 = vpop.permute.xlu0 %2679  ;;  %v2683_v2 = vpop.permute.xlu1 %2682  ;;  %v3333_v7 = vsel %vm2771_vm13, %v3332_v43, %v3328_v40  ;;  %v3361_v34 = vsel %vm15856_vm12, %v3116_v49, %v3359_v13  ;;  %v16691_v43 = vld [vmem:[#allocation31_spill] sm:$0xff]  ;;  %v16698_v49 = vld [vmem:[#allocation21_spill] sm:$0xff]  ;;  %vm17015_vm12 = vcmask 458112  }
 0x4a8   : > { %v3337_v9 = vrot.slane %v2680_v5, %v11552_v17  ;;  %v3342_v48 = vrot.slane %v2683_v2, %v11555_v10  ;;  %v3363_v25 = vsel %vm15855_vm11, %v3195_v36, %v3361_v34 }
 0x4a9   : > { %v3365_v59 = vsel %vm15854_vm10, %v3274_v33, %v3363_v25  ;;  %v16705_v25 = vld [vmem:[#allocation41_spill] sm:$0xff]  ;;  %vm17010_vm10 = vcmask 458112  }
 0x4aa   : > { %v3338_v55 = vsel %vm2778_vm14, %v3337_v9, %v3333_v7  ;;  %v16696_v9 = vld [vmem:[#allocation19_spill] sm:$0xff]  ;;  %v16697_v7 = vld [vmem:[#allocation196_spill] sm:$0xff]  ;;  %vm17011_vm11 = vmmov %vm17010_vm10 }
 0x4ab   : > { %v2686_v63 = vpop.permute.xlu0 %2685  ;;  %v2689_v19 = vpop.permute.xlu1 %2688  ;;  %v3343_v42 = vsel %vm2785_vm15, %v3342_v48, %v3338_v55 }
 0x4ac   : > { %v3347_v62 = vrot.slane %v2686_v63, %v11577_v52  ;;  %v3352_v61 = vrot.slane %v2689_v19, %v11580_v35  ;;  %v16701_v19 = vld [vmem:[#allocation197_spill] sm:$0xff] }
 0x4ae   : > { %v3348_v37 = vsel %vm2792_vm1, %v3347_v62, %v3343_v42 }
 0x4af   : > { %v3353_v44 = vsel %vm2799_vm2, %v3352_v61, %v3348_v37  ;;  %v16702_v61 = vld [vmem:[#allocation20_spill] sm:$0xff] }
 0x4b0   : > { %v3367_v41 = vsel %vm15853_vm0, %v3353_v44, %v3365_v59  ;;  %vm17009_vm0 = vcmask 392512  }
 0x4b1   : > { %3369 = vmax.xlane.f32.xlu0 %v3367_v41  ;;  %v16706_v41 = vld [vmem:[#allocation23_spill] sm:$0xff] }
 0x53e   : > { %v11955_v32 = vpop.xlane.xlu0 %3369 }
 0x53f   : > { %v11959_v15 = vrot.slane %v11955_v32, %v16687_v20  ;;  %v11963_v4 = vrot.slane %v11955_v32, %v16688_v1 }
 0x541   : > { %v3419_v27 = vsub.f32 %v16689_v21, %v11959_v15  ;;  %v3412_v51 = vsub.f32 %v16690_v22, %v11959_v15  ;;  %v3426_v12 = vsub.f32 %v16691_v43, %v11959_v15  ;;  %v3413_v58 = vsub.f32 %v16692_v50, %v11959_v15  ;;  %v16709_v43 = vld [vmem:[#allocation43_spill] sm:$0xff] }
 0x542   : > { %v3428_v45 = vsub.f32 %v16693_v56, %v11963_v4  ;;  %v3414_v5 = vsub.f32 %v16694_v3, %v11959_v15  ;;  %v3430_v47 = vsub.f32 %v16695_v23, %v11963_v4  ;;  %v3415_v28 = vsub.f32 %v16696_v9, %v11959_v15 }
 0x543   : > { %v3554_v38 = vmul.f32 1.442695, %v3419_v27  ;;  %v3540_v40 = vmul.f32 1.442695, %v3412_v51  ;;  %v3568_v11 = vmul.f32 1.442695, %v3426_v12  ;;  %v3432_v48 = vsub.f32 %v16697_v7, %v11963_v4 }
 0x544   : > { %v3542_v60 = vmul.f32 1.442695, %v3413_v58  ;;  %v3572_v2 = vmul.f32 1.442695, %v3428_v45  ;;  %v3544_v30 = vmul.f32 1.442695, %v3414_v5  ;;  %v3416_v55 = vsub.f32 %v16698_v49, %v11959_v15 }
 0x545   : > { %8458 = vpow2.f32 %v3554_v38  ;;  %v3576_v26 = vmul.f32 1.442695, %v3430_v47  ;;  %v3546_v14 = vmul.f32 1.442695, %v3415_v28  ;;  %v3580_v63 = vmul.f32 1.442695, %v3432_v48 }
 0x546   : > { %8460 = vpow2.f32 %v3540_v40  ;;  %v3434_v13 = vsub.f32 %v16701_v19, %v11963_v4  ;;  %v3548_v62 = vmul.f32 1.442695, %v3416_v55  ;;  %v3417_v33 = vsub.f32 %v16702_v61, %v11959_v15  ;;  %v16710_v58 = vld [vmem:[#allocation25_spill] sm:$0xff]  ;;  %v16714_v5 = vld [vmem:[#allocation24_spill] sm:$0xff] }
 0x547   : > { %8462 = vpow2.f32 %v3568_v11  ;;  %v3436_v44 = vsub.f32 %v16705_v25, %v11963_v4  ;;  %v3418_v21 = vsub.f32 %v16706_v41, %v11959_v15  ;;  %v3438_v12 = vsub.f32 %v16709_v43, %v11963_v4  ;;  %v16713_v45 = vld [vmem:[#allocation45_spill] sm:$0xff]  ;;  %v16726_v41 = vld [vmem:[#allocation55_spill] sm:$0xff] }
 0x548   : > { %8464 = vpow2.f32 %v3542_v60  ;;  %v3584_v37 = vmul.f32 1.442695, %v3434_v13  ;;  %v3550_v59 = vmul.f32 1.442695, %v3417_v33  ;;  %v3420_v38 = vsub.f32 %v16710_v58, %v11959_v15  ;;  %v16722_v13 = vld [vmem:[#allocation51_spill] sm:$0xff]  ;;  %v16723_v33 = vld [vmem:[#allocation26_spill] sm:$0xff] }
 0x549   : > { %8466 = vpow2.f32 %v3572_v2  ;;  %v3588_v51 = vmul.f32 1.442695, %v3436_v44  ;;  %v3552_v50 = vmul.f32 1.442695, %v3418_v21  ;;  %v3592_v56 = vmul.f32 1.442695, %v3438_v12 }
 0x54a   : > { %8468 = vpow2.f32 %v3544_v30  ;;  %v3440_v60 = vsub.f32 %v16713_v45, %v11963_v4  ;;  %v3556_v3 = vmul.f32 1.442695, %v3420_v38  ;;  %v3421_v2 = vsub.f32 %v16714_v5, %v11959_v15  ;;  %v16717_v30 = vld [vmem:[#allocation11_spill] sm:$0xff]  ;;  %v16727_v43 = vld [vmem:[#allocation29_spill] sm:$0xff] }
 0x54b   : > { %8470 = vpow2.f32 %v3576_v26  ;;  %v12032_v9 = vrot.slane %v11955_v32, %v16717_v30  ;;  %v16718_v26 = vld [vmem:[#allocation47_spill] sm:$0xff]  ;;  %v3424_v12 = vsub.f32 %v16727_v43, %v11959_v15 }
 0x54c   : > { %8472 = vpow2.f32 %v3546_v14  ;;  %v3596_v28 = vmul.f32 1.442695, %v3440_v60  ;;  %v3442_v7 = vsub.f32 %v16718_v26, %v11963_v4  ;;  %v3558_v48 = vmul.f32 1.442695, %v3421_v2  ;;  %v16719_v14 = vld [vmem:[#allocation27_spill] sm:$0xff] }
 0x54d   : > { %8474 = vpow2.f32 %v3580_v63  ;;  %v3422_v49 = vsub.f32 %v16719_v14, %v11959_v15  ;;  %v3446_v21 = vsub.f32 %v16726_v41, %v12032_v9  ;;  %v3564_v60 = vmul.f32 1.442695, %v3424_v12  ;;  %v16739_v41 = vld [vmem:[#allocation32_spill] sm:$0xff]  ;;  %v16742_v12 = vld [vmem:[#allocation71_spill] sm:$0xff] }
 0x54e   : > { %8476 = vpow2.f32 %v3548_v62  ;;  %v3600_v19 = vmul.f32 1.442695, %v3442_v7  ;;  %v3444_v62 = vsub.f32 %v16722_v13, %v12032_v9  ;;  %v16734_v7 = vld [vmem:[#allocation198_spill] sm:$0xff] }
 0x54f   : > { %v11985_v16 = vpop.eup %8458  ;;  %8478 = vpow2.f32 %v3584_v37  ;;  %v3560_v61 = vmul.f32 1.442695, %v3422_v49  ;;  %v3423_v37 = vsub.f32 %v16723_v33, %v11959_v15  ;;  %v3608_v38 = vmul.f32 1.442695, %v3446_v21  ;;  %v16735_v49 = vld [vmem:[#allocation30_spill] sm:$0xff]  ;;  %v16738_v33 = vld [vmem:[#allocation199_spill] sm:$0xff] }
 0x550   : > { %16699 = vst [vmem:[#allocation141_spill] sm:$0xff] %v11985_v16  ;;  %v11987_v36 = vpop.eup %8460  ;;  %3946 = vperm.xlu0 %8457, %v11985_v16   ;;  %8480 = vpow2.f32 %v3550_v59  ;;  %v3604_v59 = vmul.f32 1.442695, %v3444_v62  ;;  %v3429_v21 = vsub.f32 %v16739_v41, %v11963_v4 }
 0x551   : > { %16700 = vst [vmem:[#allocation229_spill] sm:$0xff] %v11987_v36  ;;  %3925 = vperm.xlu1 %8456, %v11987_v36   ;;  %v11995_v42 = vpop.eup %8462  ;;  %8482 = vpow2.f32 %v3588_v51  ;;  %v3562_v51 = vmul.f32 1.442695, %v3423_v37  ;;  %v3452_v37 = vsub.f32 %v16738_v33, %v12032_v9 }
 0x552   : > { %16703 = vst [vmem:[#allocation207_spill] sm:$0xff] %v11995_v42  ;;  %v11997_v34 = vpop.eup %8464  ;;  %8484 = vpow2.f32 %v3552_v50 }
 0x553   : > { %16704 = vst [vmem:[#allocation181_spill] sm:$0xff] %v11997_v34  ;;  %v12005_v27 = vpop.eup %8466  ;;  %8486 = vpow2.f32 %v3592_v56  ;;  %v16730_v56 = vld [vmem:[#allocation61_spill] sm:$0xff]  ;;  %v3620_v43 = vmul.f32 1.442695, %v3452_v37  ;;  %v16750_v37 = vld [vmem:[#allocation12_spill] sm:$0xff] }
 0x554   : > { %3967 = vperm.xlu0 %8457, %v11995_v42   ;;  %16707 = vst [vmem:[#allocation145_spill] sm:$0xff] %v12005_v27  ;;  %v12007_v22 = vpop.eup %8468  ;;  %8488 = vpow2.f32 %v3556_v3  ;;  %v3448_v45 = vsub.f32 %v16730_v56, %v12032_v9  ;;  %v16731_v3 = vld [vmem:[#allocation28_spill] sm:$0xff]  ;;  %v3574_v56 = vmul.f32 1.442695, %v3429_v21  ;;  %v16751_v21 = vld [vmem:[#allocation81_spill] sm:$0xff] }
 0x555   : > { %3928 = vperm.xlu1 %8456, %v11997_v34   ;;  %16708 = vst [vmem:[#allocation231_spill] sm:$0xff] %v12007_v22  ;;  %v12015_v40 = vpop.eup %8470  ;;  %8490 = vpow2.f32 %v3596_v28  ;;  %v3425_v5 = vsub.f32 %v16731_v3, %v11959_v15 }
 0x556   : > { %16711 = vst [vmem:[#allocation209_spill] sm:$0xff] %v12015_v40  ;;  %v12017_v11 = vpop.eup %8472  ;;  %8492 = vpow2.f32 %v3558_v48  ;;  %v3612_v26 = vmul.f32 1.442695, %v3448_v45  ;;  %v3450_v48 = vsub.f32 %v16734_v7, %v12032_v9  ;;  %v16743_v45 = vld [vmem:[#allocation34_spill] sm:$0xff]  ;;  %v16746_v7 = vld [vmem:[#allocation75_spill] sm:$0xff] }
 0x557   : > { %16712 = vst [vmem:[#allocation151_spill] sm:$0xff] %v12017_v11  ;;  %v12025_v23 = vpop.eup %8474  ;;  %8494 = vpow2.f32 %v3600_v19  ;;  %v3566_v14 = vmul.f32 1.442695, %v3425_v5  ;;  %v3427_v19 = vsub.f32 %v16735_v49, %v11959_v15  ;;  %v16747_v49 = vld [vmem:[#allocation35_spill] sm:$0xff] }
 0x558   : > { %3973 = vperm.xlu0 %8457, %v12005_v27   ;;  %16715 = vst [vmem:[#allocation211_spill] sm:$0xff] %v12025_v23  ;;  %v12027_v47 = vpop.eup %8476  ;;  %8496 = vpow2.f32 %v3560_v61  ;;  %v3616_v61 = vmul.f32 1.442695, %v3450_v48  ;;  %v3456_v48 = vsub.f32 %v16746_v7, %v12032_v9 }
 0x559   : > { %3931 = vperm.xlu1 %8456, %v12007_v22   ;;  %16716 = vst [vmem:[#allocation155_spill] sm:$0xff] %v12027_v47  ;;  %v12039_v55 = vpop.eup %8478  ;;  %8498 = vpow2.f32 %v3604_v59  ;;  %v3570_v59 = vmul.f32 1.442695, %v3427_v19  ;;  %v3433_v19 = vsub.f32 %v16747_v49, %v11963_v4 }
 0x55a   : > { %16720 = vst [vmem:[#allocation190_spill] sm:$0xff] %v12039_v55  ;;  %v12041_v63 = vpop.eup %8480  ;;  %8500 = vpow2.f32 %v3562_v51  ;;  %v3628_v41 = vmul.f32 1.442695, %v3456_v48 }
 0x55b   : > { %16721 = vst [vmem:[#allocation213_spill] sm:$0xff] %v12041_v63  ;;  %v12049_v25 = vpop.eup %8482  ;;  %8502 = vpow2.f32 %v3608_v38  ;;  %v3454_v38 = vsub.f32 %v16742_v12, %v12032_v9  ;;  %v3582_v12 = vmul.f32 1.442695, %v3433_v19 }
 0x55c   : > { %3979 = vperm.xlu0 %8457, %v12015_v40   ;;  %16724 = vst [vmem:[#allocation161_spill] sm:$0xff] %v12049_v25  ;;  %v12051_v44 = vpop.eup %8484  ;;  %8504 = vpow2.f32 %v3564_v60  ;;  %v3431_v60 = vsub.f32 %v16743_v45, %v11963_v4 }
 0x55d   : > { %3934 = vperm.xlu1 %8456, %v12017_v11   ;;  %16725 = vst [vmem:[#allocation215_spill] sm:$0xff] %v12051_v44  ;;  %v12059_v50 = vpop.eup %8486  ;;  %8506 = vpow2.f32 %v3612_v26  ;;  %v3624_v26 = vmul.f32 1.442695, %v3454_v38  ;;  %v16752_v38 = vld [vmem:[#allocation37_spill] sm:$0xff] }
 0x55e   : > { %16728 = vst [vmem:[#allocation265_spill] sm:$0xff] %v12059_v50  ;;  %v12061_v58 = vpop.eup %8488  ;;  %8508 = vpow2.f32 %v3566_v14  ;;  %v3578_v14 = vmul.f32 1.442695, %v3431_v60 }
 0x55f   : > { %16729 = vst [vmem:[#allocation254_spill] sm:$0xff] %v12061_v58  ;;  %v12069_v2 = vpop.eup %8490  ;;  %8510 = vpow2.f32 %v3616_v61 }
 0x560   : > { %3985 = vperm.xlu0 %8457, %v12025_v23   ;;  %16732 = vst [vmem:[#allocation266_spill] sm:$0xff] %v12069_v2  ;;  %v12071_v28 = vpop.eup %8492  ;;  %8512 = vpow2.f32 %v3570_v59  ;;  %v12116_v59 = vrot.slane %v11955_v32, %v16750_v37 }
 0x561   : > { %3937 = vperm.xlu1 %8456, %v12027_v47   ;;  %16733 = vst [vmem:[#allocation90_spill] sm:$0xff] %v12071_v28  ;;  %v12079_v13 = vpop.eup %8494  ;;  %8514 = vpow2.f32 %v3620_v43  ;;  %v3458_v43 = vsub.f32 %v16751_v21, %v12032_v9 }
 0x562   : > { %16736 = vst [vmem:[#allocation256_spill] sm:$0xff] %v12079_v13  ;;  %v12081_v62 = vpop.eup %8496  ;;  %8516 = vpow2.f32 %v3574_v56  ;;  %v3435_v56 = vsub.f32 %v16752_v38, %v11963_v4 }
 0x563   : > { %16737 = vst [vmem:[#allocation219_spill] sm:$0xff] %v12081_v62  ;;  %v12089_v51 = vpop.eup %8498  ;;  %8518 = vpow2.f32 %v3624_v26  ;;  %v3632_v7 = vmul.f32 1.442695, %v3458_v43  ;;  %v16755_v26 = vld [vmem:[#allocation83_spill] sm:$0xff] }
 0x564   : > { %3991 = vperm.xlu0 %8457, %v12039_v55   ;;  %16740 = vst [vmem:[#allocation267_spill] sm:$0xff] %v12089_v51  ;;  %v12091_v15 = vpop.eup %8500  ;;  %8520 = vpow2.f32 %v3578_v14  ;;  %v3460_v48 = vsub.f32 %v16755_v26, %v12116_v59  ;;  %v3586_v49 = vmul.f32 1.442695, %v3435_v56  ;;  %v16756_v14 = vld [vmem:[#allocation40_spill] sm:$0xff] }
 0x565   : > { %3940 = vperm.xlu1 %8456, %v12041_v63   ;;  %16741 = vst [vmem:[#allocation280_spill] sm:$0xff] %v12091_v15  ;;  %v12099_v3 = vpop.eup %8502  ;;  %8522 = vpow2.f32 %v3628_v41  ;;  %v3437_v19 = vsub.f32 %v16756_v14, %v11963_v4  ;;  %v16759_v41 = vld [vmem:[#allocation85_spill] sm:$0xff] }
 0x566   : > { %16744 = vst [vmem:[#allocation281_spill] sm:$0xff] %v12099_v3  ;;  %v12101_v5 = vpop.eup %8504  ;;  %8524 = vpow2.f32 %v3582_v12  ;;  %v3636_v37 = vmul.f32 1.442695, %v3460_v48  ;;  %v3462_v43 = vsub.f32 %v16759_v41, %v12116_v59  ;;  %v16760_v12 = vld [vmem:[#allocation42_spill] sm:$0xff] }
 0x567   : > { %16745 = vst [vmem:[#allocation268_spill] sm:$0xff] %v12101_v5  ;;  %v12109_v61 = vpop.eup %8506  ;;  %8526 = vpow2.f32 %v3632_v7  ;;  %v3590_v26 = vmul.f32 1.442695, %v3437_v19  ;;  %v3439_v56 = vsub.f32 %v16760_v12, %v11963_v4  ;;  %v16763_v7 = vld [vmem:[#allocation87_spill] sm:$0xff] }
 0x568   : > { %3997 = vperm.xlu0 %8457, %v12049_v25   ;;  %16748 = vst [vmem:[#allocation282_spill] sm:$0xff] %v12109_v61  ;;  %v12111_v33 = vpop.eup %8508  ;;  %8528 = vpow2.f32 %v3586_v49  ;;  %v3464_v48 = vsub.f32 %v16763_v7, %v12116_v59  ;;  %v16764_v49 = vld [vmem:[#allocation44_spill] sm:$0xff] }
 0x569   : > { %3943 = vperm.xlu1 %8456, %v12051_v44   ;;  %16749 = vst [vmem:[#allocation92_spill] sm:$0xff] %v12111_v33  ;;  %v12123_v45 = vpop.eup %8510  ;;  %8530 = vpow2.f32 %v3636_v37  ;;  %v3594_v41 = vmul.f32 1.442695, %v3439_v56  ;;  %v3441_v19 = vsub.f32 %v16764_v49, %v11963_v4  ;;  %v16767_v37 = vld [vmem:[#allocation89_spill] sm:$0xff] }
 0x56a   : > { %16753 = vst [vmem:[#allocation135_spill] sm:$0xff] %v12123_v45  ;;  %v12125_v60 = vpop.eup %8512  ;;  %8532 = vpow2.f32 %v3590_v26  ;;  %v16768_v26 = vld [vmem:[#allocation46_spill] sm:$0xff] }
 0x56b   : > { %16754 = vst [vmem:[#allocation227_spill] sm:$0xff] %v12125_v60  ;;  %v12133_v21 = vpop.eup %8514  ;;  %v3598_v7 = vmul.f32 1.442695, %v3441_v19  ;;  %v3443_v56 = vsub.f32 %v16768_v26, %v11963_v4 }
 0x56c   : > { %4003 = vperm.xlu0 %8457, %v12059_v50   ;;  %16757 = vst [vmem:[#allocation257_spill] sm:$0xff] %v12133_v21  ;;  %v12135_v38 = vpop.eup %8516 }
 0x56d   : > { %3949 = vperm.xlu1 %8456, %v12061_v58   ;;  %16758 = vst [vmem:[#allocation269_spill] sm:$0xff] %v12135_v38 }
 0x570   : > { %4009 = vperm.xlu0 %8457, %v12069_v2  }
 0x571   : > { %3952 = vperm.xlu1 %8456, %v12071_v28  }
 0x574   : > { %4015 = vperm.xlu0 %8457, %v12079_v13  }
 0x575   : > { %3955 = vperm.xlu1 %8456, %v12081_v62  }
 0x578   : > { %4021 = vperm.xlu0 %8457, %v12089_v51   ;;  %v16783_v51 = vld [vmem:[#allocation13_spill] sm:$0xff] }
 0x579   : > { %3958 = vperm.xlu1 %8456, %v12091_v15  }
 0x57c   : > { %4027 = vperm.xlu0 %8457, %v12099_v3  }
 0x57d   : > { %3961 = vperm.xlu1 %8456, %v12101_v5  }
 0x580   : > { %4033 = vperm.xlu0 %8457, %v12109_v61  }
 0x581   : > { %3964 = vperm.xlu1 %8456, %v12111_v33  }
 0x584   : > { %4039 = vperm.xlu0 %8457, %v12123_v45   ;;  %v12143_v45 = vpop.eup %8518 }
 0x585   : > { %3970 = vperm.xlu1 %8456, %v12125_v60   ;;  %16761 = vst [vmem:[#allocation283_spill] sm:$0xff] %v12143_v45  ;;  %v12145_v14 = vpop.eup %8520 }
 0x586   : > { %16762 = vst [vmem:[#allocation270_spill] sm:$0xff] %v12145_v14  ;;  %v12153_v61 = vpop.eup %8522 }
 0x587   : > { %16765 = vst [vmem:[#allocation284_spill] sm:$0xff] %v12153_v61  ;;  %v12155_v12 = vpop.eup %8524 }
 0x588   : > { %4045 = vperm.xlu0 %8457, %v12133_v21   ;;  %v3640_v21 = vmul.f32 1.442695, %v3462_v43  ;;  %16766 = vst [vmem:[#allocation222_spill] sm:$0xff] %v12155_v12  ;;  %v3466_v43 = vsub.f32 %v16767_v37, %v12116_v59  ;;  %v12163_v33 = vpop.eup %8526  ;;  %v3602_v37 = vmul.f32 1.442695, %v3443_v56 }
 0x589   : > { %3976 = vperm.xlu1 %8456, %v12135_v38   ;;  %16769 = vst [vmem:[#allocation104_spill] sm:$0xff] %v12163_v33  ;;  %v12165_v49 = vpop.eup %8528 }
 0x58a   : > { %8534 = vpow2.f32 %v3640_v21  ;;  %16770 = vst [vmem:[#allocation285_spill] sm:$0xff] %v12165_v49  ;;  %v16771_v21 = vld [vmem:[#allocation91_spill] sm:$0xff]  ;;  %v12173_v5 = vpop.eup %8530 }
 0x58b   : > { %8536 = vpow2.f32 %v3594_v41  ;;  %v16772_v41 = vld [vmem:[#allocation50_spill] sm:$0xff]  ;;  %16773 = vst [vmem:[#allocation271_spill] sm:$0xff] %v12173_v5  ;;  %v12175_v4 = vpop.eup %8532 }
 0x58c   : > { %4051 = vperm.xlu0 %8457, %v12143_v45   ;;  %v3644_v45 = vmul.f32 1.442695, %v3464_v48  ;;  %v3468_v48 = vsub.f32 %v16771_v21, %v12116_v59  ;;  %v3445_v19 = vsub.f32 %v16772_v41, %v12032_v9  ;;  %16774 = vst [vmem:[#allocation286_spill] sm:$0xff] %v12175_v4 }
 0x58d   : > { %3982 = vperm.xlu1 %8456, %v12145_v14  }
 0x58e   : > { %8538 = vpow2.f32 %v3644_v45  ;;  %v3652_v26 = vmul.f32 1.442695, %v3468_v48  ;;  %v16775_v45 = vld [vmem:[#allocation93_spill] sm:$0xff]  ;;  %v3606_v21 = vmul.f32 1.442695, %v3445_v19 }
 0x58f   : > { %8540 = vpow2.f32 %v3598_v7  ;;  %v16776_v7 = vld [vmem:[#allocation54_spill] sm:$0xff] }
 0x590   : > { %4057 = vperm.xlu0 %8457, %v12153_v61   ;;  %v3648_v61 = vmul.f32 1.442695, %v3466_v43  ;;  %v3470_v43 = vsub.f32 %v16775_v45, %v12116_v59  ;;  %v3447_v56 = vsub.f32 %v16776_v7, %v12032_v9 }
 0x591   : > { %3988 = vperm.xlu1 %8456, %v12155_v12  }
 0x592   : > { %8542 = vpow2.f32 %v3648_v61  ;;  %v16779_v61 = vld [vmem:[#allocation105_spill] sm:$0xff]  ;;  %v3610_v45 = vmul.f32 1.442695, %v3447_v56 }
 0x593   : > { %8544 = vpow2.f32 %v3602_v37  ;;  %v3472_v48 = vsub.f32 %v16779_v61, %v12116_v59  ;;  %v16780_v37 = vld [vmem:[#allocation60_spill] sm:$0xff] }
 0x594   : > { %4063 = vperm.xlu0 %8457, %v12163_v33   ;;  %v12183_v33 = vpop.eup %8534  ;;  %8546 = vpow2.f32 %v3652_v26  ;;  %v3449_v19 = vsub.f32 %v16780_v37, %v12032_v9  ;;  %v16785_v61 = vld [vmem:[#allocation64_spill] sm:$0xff] }
 0x595   : > { %3994 = vperm.xlu1 %8456, %v12165_v49   ;;  %16777 = vst [vmem:[#allocation272_spill] sm:$0xff] %v12183_v33  ;;  %v12185_v41 = vpop.eup %8536  ;;  %8548 = vpow2.f32 %v3606_v21  ;;  %v3660_v26 = vmul.f32 1.442695, %v3472_v48  ;;  %v3451_v37 = vsub.f32 %v16785_v61, %v12032_v9 }
 0x596   : > { %16778 = vst [vmem:[#allocation287_spill] sm:$0xff] %v12185_v41  ;;  %v3614_v56 = vmul.f32 1.442695, %v3449_v19 }
 0x598   : > { %4069 = vperm.xlu0 %8457, %v12173_v5   ;;  %v3656_v5 = vmul.f32 1.442695, %v3470_v43  ;;  %v12193_v3 = vpop.eup %8538  ;;  %v16784_v43 = vld [vmem:[#allocation117_spill] sm:$0xff] }
 0x599   : > { %4000 = vperm.xlu1 %8456, %v12175_v4   ;;  %16781 = vst [vmem:[#allocation273_spill] sm:$0xff] %v12193_v3  ;;  %v12195_v7 = vpop.eup %8540  ;;  %v3474_v21 = vsub.f32 %v16784_v43, %v12116_v59  ;;  %v3618_v43 = vmul.f32 1.442695, %v3451_v37 }
 0x59a   : > { %16782 = vst [vmem:[#allocation8_spill] sm:$0xff] %v12195_v7  ;;  %8550 = vpow2.f32 %v3656_v5  ;;  %v16788_v5 = vld [vmem:[#allocation124_spill] sm:$0xff] }
 0x59b   : > { %8552 = vpow2.f32 %v3610_v45  ;;  %v16789_v45 = vld [vmem:[#allocation65_spill] sm:$0xff] }
 0x59c   : > { %4075 = vperm.xlu0 %8457, %v12183_v33   ;;  %v12200_v33 = vrot.slane %v11955_v32, %v16783_v51  ;;  %v12207_v15 = vpop.eup %8542  ;;  %8554 = vpow2.f32 %v3660_v26  ;;  %v3664_v51 = vmul.f32 1.442695, %v3474_v21  ;;  %v3453_v19 = vsub.f32 %v16789_v45, %v12032_v9  ;;  %v16792_v26 = vld [vmem:[#allocation202_spill] sm:$0xff] }
 0x59d   : > { %4006 = vperm.xlu1 %8456, %v12185_v41   ;;  %16786 = vst [vmem:[#allocation288_spill] sm:$0xff] %v12207_v15  ;;  %v12209_v62 = vpop.eup %8544  ;;  %8556 = vpow2.f32 %v3614_v56  ;;  %v16793_v56 = vld [vmem:[#allocation70_spill] sm:$0xff] }
 0x59e   : > { %16787 = vst [vmem:[#allocation201_spill] sm:$0xff] %v12209_v62  ;;  %v3476_v48 = vsub.f32 %v16788_v5, %v12200_v33  ;;  %8558 = vpow2.f32 %v3664_v51  ;;  %v3478_v21 = vsub.f32 %v16792_v26, %v12200_v33  ;;  %v3622_v5 = vmul.f32 1.442695, %v3453_v19  ;;  %v16796_v51 = vld [vmem:[#allocation204_spill] sm:$0xff] }
 0x59f   : > { %8560 = vpow2.f32 %v3618_v43  ;;  %v3455_v37 = vsub.f32 %v16793_v56, %v12032_v9  ;;  %v16797_v43 = vld [vmem:[#allocation74_spill] sm:$0xff] }
 0x5a0   : > { %4081 = vperm.xlu0 %8457, %v12193_v3   ;;  %v12217_v3 = vpop.eup %8546  ;;  %v3457_v19 = vsub.f32 %v16797_v43, %v12032_v9 }
 0x5a1   : > { %4012 = vperm.xlu1 %8456, %v12195_v7   ;;  %16790 = vst [vmem:[#allocation274_spill] sm:$0xff] %v12217_v3  ;;  %v12219_v61 = vpop.eup %8548  ;;  %v3626_v26 = vmul.f32 1.442695, %v3455_v37 }
 0x5a2   : > { %16791 = vst [vmem:[#allocation131_spill] sm:$0xff] %v12219_v61 }
 0x5a4   : > { %4087 = vperm.xlu0 %8457, %v12207_v15   ;;  %v3668_v15 = vmul.f32 1.442695, %v3476_v48  ;;  %v3480_v48 = vsub.f32 %v16796_v51, %v12200_v33  ;;  %v3630_v51 = vmul.f32 1.442695, %v3457_v19 }
 0x5a5   : > { %4018 = vperm.xlu1 %8456, %v12209_v62   ;;  %v12227_v62 = vpop.eup %8550 }
 0x5a6   : > { %16794 = vst [vmem:[#allocation275_spill] sm:$0xff] %v12227_v62  ;;  %v12229_v45 = vpop.eup %8552  ;;  %8562 = vpow2.f32 %v3668_v15  ;;  %v16800_v15 = vld [vmem:[#allocation206_spill] sm:$0xff] }
 0x5a7   : > { %16795 = vst [vmem:[#allocation289_spill] sm:$0xff] %v12229_v45  ;;  %8564 = vpow2.f32 %v3622_v5  ;;  %v16801_v5 = vld [vmem:[#allocation80_spill] sm:$0xff] }
 0x5a8   : > { %4093 = vperm.xlu0 %8457, %v12217_v3   ;;  %v3672_v3 = vmul.f32 1.442695, %v3478_v21  ;;  %v3482_v21 = vsub.f32 %v16800_v15, %v12200_v33  ;;  %v3459_v37 = vsub.f32 %v16801_v5, %v12032_v9 }
 0x5a9   : > { %4024 = vperm.xlu1 %8456, %v12219_v61   ;;  %v12237_v61 = vpop.eup %8554 }
 0x5aa   : > { %16798 = vst [vmem:[#allocation276_spill] sm:$0xff] %v12237_v61  ;;  %v12239_v56 = vpop.eup %8556  ;;  %8566 = vpow2.f32 %v3672_v3  ;;  %v16804_v3 = vld [vmem:[#allocation208_spill] sm:$0xff]  ;;  %v3634_v15 = vmul.f32 1.442695, %v3459_v37 }
 0x5ab   : > { %16799 = vst [vmem:[#allocation223_spill] sm:$0xff] %v12239_v56  ;;  %8568 = vpow2.f32 %v3626_v26  ;;  %v16805_v26 = vld [vmem:[#allocation82_spill] sm:$0xff] }
 0x5ac   : > { %4099 = vperm.xlu0 %8457, %v12227_v62   ;;  %v3676_v62 = vmul.f32 1.442695, %v3480_v48  ;;  %v3484_v48 = vsub.f32 %v16804_v3, %v12200_v33  ;;  %v3461_v19 = vsub.f32 %v16805_v26, %v12116_v59 }
 0x5ad   : > { %4030 = vperm.xlu1 %8456, %v12229_v45   ;;  %v12247_v45 = vpop.eup %8558 }
 0x5ae   : > { %16802 = vst [vmem:[#allocation221_spill] sm:$0xff] %v12247_v45  ;;  %v12249_v43 = vpop.eup %8560  ;;  %8570 = vpow2.f32 %v3676_v62  ;;  %v3684_v5 = vmul.f32 1.442695, %v3484_v48  ;;  %v16808_v62 = vld [vmem:[#allocation210_spill] sm:$0xff]  ;;  %v3638_v3 = vmul.f32 1.442695, %v3461_v19 }
 0x5af   : > { %16803 = vst [vmem:[#allocation277_spill] sm:$0xff] %v12249_v43  ;;  %8572 = vpow2.f32 %v3630_v51  ;;  %v16809_v51 = vld [vmem:[#allocation84_spill] sm:$0xff] }
 0x5b0   : > { %4105 = vperm.xlu0 %8457, %v12237_v61   ;;  %v3680_v61 = vmul.f32 1.442695, %v3482_v21  ;;  %v3486_v21 = vsub.f32 %v16808_v62, %v12200_v33  ;;  %v3463_v37 = vsub.f32 %v16809_v51, %v12116_v59 }
 0x5b1   : > { %4036 = vperm.xlu1 %8456, %v12239_v56   ;;  %v12257_v56 = vpop.eup %8562 }
 0x5b2   : > { %16806 = vst [vmem:[#allocation278_spill] sm:$0xff] %v12257_v56  ;;  %v12259_v9 = vpop.eup %8564  ;;  %8574 = vpow2.f32 %v3680_v61  ;;  %v16812_v61 = vld [vmem:[#allocation212_spill] sm:$0xff]  ;;  %v3642_v62 = vmul.f32 1.442695, %v3463_v37 }
 0x5b3   : > { %16807 = vst [vmem:[#allocation125_spill] sm:$0xff] %v12259_v9  ;;  %8576 = vpow2.f32 %v3634_v15  ;;  %v3488_v48 = vsub.f32 %v16812_v61, %v12200_v33  ;;  %v16813_v15 = vld [vmem:[#allocation86_spill] sm:$0xff]  ;;  %v16818_v61 = vld [vmem:[#allocation88_spill] sm:$0xff] }
 0x5b4   : > { %4111 = vperm.xlu0 %8457, %v12247_v45   ;;  %v12267_v45 = vpop.eup %8566  ;;  %8578 = vpow2.f32 %v3684_v5  ;;  %v3465_v19 = vsub.f32 %v16813_v15, %v12116_v59  ;;  %v3467_v15 = vsub.f32 %v16818_v61, %v12116_v59 }
 0x5b5   : > { %4042 = vperm.xlu1 %8456, %v12249_v43   ;;  %16810 = vst [vmem:[#allocation225_spill] sm:$0xff] %v12267_v45  ;;  %v12269_v26 = vpop.eup %8568  ;;  %8580 = vpow2.f32 %v3638_v3  ;;  %v16816_v43 = vld [vmem:[#allocation14_spill] sm:$0xff]  ;;  %v3692_v5 = vmul.f32 1.442695, %v3488_v48 }
 0x5b6   : > { %16811 = vst [vmem:[#allocation279_spill] sm:$0xff] %v12269_v26  ;;  %v3646_v37 = vmul.f32 1.442695, %v3465_v19 }
 0x5b8   : > { %4117 = vperm.xlu0 %8457, %v12257_v56   ;;  %v3688_v56 = vmul.f32 1.442695, %v3486_v21  ;;  %v16817_v21 = vld [vmem:[#allocation214_spill] sm:$0xff] }
 0x5b9   : > { %4048 = vperm.xlu1 %8456, %v12259_v9   ;;  %v12277_v9 = vpop.eup %8570  ;;  %v3490_v3 = vsub.f32 %v16817_v21, %v12200_v33  ;;  %v3650_v21 = vmul.f32 1.442695, %v3467_v15 }
 0x5ba   : > { %16814 = vst [vmem:[#allocation203_spill] sm:$0xff] %v12277_v9  ;;  %v12279_v51 = vpop.eup %8572  ;;  %8582 = vpow2.f32 %v3688_v56  ;;  %v16821_v56 = vld [vmem:[#allocation165_spill] sm:$0xff] }
 0x5bb   : > { %16815 = vst [vmem:[#allocation22_spill] sm:$0xff] %v12279_v51  ;;  %8584 = vpow2.f32 %v3642_v62  ;;  %v16822_v62 = vld [vmem:[#allocation15_spill] sm:$0xff] }
 0x5bc   : > { %4123 = vperm.xlu0 %8457, %v12267_v45   ;;  %v12284_v45 = vrot.slane %v11955_v32, %v16816_v43  ;;  %8586 = vpow2.f32 %v3692_v5  ;;  %v3696_v43 = vmul.f32 1.442695, %v3490_v3  ;;  %v3469_v19 = vsub.f32 %v16822_v62, %v12116_v59  ;;  %v16825_v5 = vld [vmem:[#allocation226_spill] sm:$0xff] }
 0x5bd   : > { %4054 = vperm.xlu1 %8456, %v12269_v26   ;;  %v12291_v26 = vpop.eup %8574  ;;  %8588 = vpow2.f32 %v3646_v37  ;;  %v16826_v37 = vld [vmem:[#allocation218_spill] sm:$0xff] }
 0x5be   : > { %16819 = vst [vmem:[#allocation16_spill] sm:$0xff] %v12291_v26  ;;  %v12293_v13 = vpop.eup %8576  ;;  %v3492_v48 = vsub.f32 %v16821_v56, %v12284_v45  ;;  %8590 = vpow2.f32 %v3696_v43  ;;  %v3494_v3 = vsub.f32 %v16825_v5, %v12284_v45  ;;  %v3654_v56 = vmul.f32 1.442695, %v3469_v19  ;;  %v16829_v43 = vld [vmem:[#allocation228_spill] sm:$0xff] }
 0x5bf   : > { %16820 = vst [vmem:[#allocation31_spill] sm:$0xff] %v12293_v13  ;;  %8592 = vpow2.f32 %v3650_v21  ;;  %v3471_v15 = vsub.f32 %v16826_v37, %v12116_v59  ;;  %v16830_v21 = vld [vmem:[#allocation220_spill] sm:$0xff] }
 0x5c0   : > { %4129 = vperm.xlu0 %8457, %v12277_v9   ;;  %v12301_v9 = vpop.eup %8578  ;;  %v3473_v19 = vsub.f32 %v16830_v21, %v12116_v59 }
 0x5c1   : > { %4060 = vperm.xlu1 %8456, %v12279_v51   ;;  %16823 = vst [vmem:[#allocation18_spill] sm:$0xff] %v12301_v9  ;;  %v12303_v61 = vpop.eup %8580  ;;  %v3658_v5 = vmul.f32 1.442695, %v3471_v15 }
 0x5c2   : > { %16824 = vst [vmem:[#allocation33_spill] sm:$0xff] %v12303_v61  ;;  %v3662_v15 = vmul.f32 1.442695, %v3473_v19 }
 0x5c4   : > { %4135 = vperm.xlu0 %8457, %v12291_v26   ;;  %v3700_v26 = vmul.f32 1.442695, %v3492_v48  ;;  %v3496_v48 = vsub.f32 %v16829_v43, %v12284_v45  ;;  %v16834_v43 = vld [vmem:[#allocation116_spill] sm:$0xff] }
 0x5c5   : > { %4066 = vperm.xlu1 %8456, %v12293_v13   ;;  %v12311_v13 = vpop.eup %8582  ;;  %v3475_v21 = vsub.f32 %v16834_v43, %v12116_v59  ;;  %v16839_v59 = vld [vmem:[#allocation200_spill] sm:$0xff] }
 0x5c6   : > { %16827 = vst [vmem:[#allocation17_spill] sm:$0xff] %v12311_v13  ;;  %v12313_v62 = vpop.eup %8584  ;;  %8594 = vpow2.f32 %v3700_v26  ;;  %v3708_v26 = vmul.f32 1.442695, %v3496_v48  ;;  %v16838_v48 = vld [vmem:[#allocation232_spill] sm:$0xff] }
 0x5c7   : > { %16828 = vst [vmem:[#allocation195_spill] sm:$0xff] %v12313_v62  ;;  %8596 = vpow2.f32 %v3654_v56  ;;  %v3666_v19 = vmul.f32 1.442695, %v3475_v21 }
 0x5c8   : > { %4141 = vperm.xlu0 %8457, %v12301_v9   ;;  %v3704_v9 = vmul.f32 1.442695, %v3494_v3  ;;  %v16833_v3 = vld [vmem:[#allocation230_spill] sm:$0xff] }
 0x5c9   : > { %4072 = vperm.xlu1 %8456, %v12303_v61   ;;  %v12321_v61 = vpop.eup %8586  ;;  %v3498_v56 = vsub.f32 %v16833_v3, %v12284_v45  ;;  %v3477_v3 = vsub.f32 %v16839_v59, %v12200_v33 }
 0x5ca   : > { %16831 = vst [vmem:[#allocation19_spill] sm:$0xff] %v12321_v61  ;;  %v12325_v51 = vpop.eup %8588  ;;  %8598 = vpow2.f32 %v3704_v9 }
 0x5cb   : > { %16832 = vst [vmem:[#allocation196_spill] sm:$0xff] %v12325_v51  ;;  %8600 = vpow2.f32 %v3658_v5  ;;  %v3712_v9 = vmul.f32 1.442695, %v3498_v56  ;;  %v3500_v5 = vsub.f32 %v16838_v48, %v12284_v45  ;;  %v16842_v56 = vld [vmem:[#allocation233_spill] sm:$0xff]  ;;  %v3670_v21 = vmul.f32 1.442695, %v3477_v3 }
 0x5cc   : > { %4147 = vperm.xlu0 %8457, %v12311_v13   ;;  %v12335_v13 = vpop.eup %8590  ;;  %8602 = vpow2.f32 %v3708_v26  ;;  %v16843_v48 = vld [vmem:[#allocation130_spill] sm:$0xff] }
 0x5cd   : > { %4078 = vperm.xlu1 %8456, %v12313_v62   ;;  %16835 = vst [vmem:[#allocation21_spill] sm:$0xff] %v12335_v13  ;;  %v12339_v2 = vpop.eup %8592  ;;  %8604 = vpow2.f32 %v3662_v15  ;;  %v3716_v26 = vmul.f32 1.442695, %v3500_v5  ;;  %v3502_v15 = vsub.f32 %v16842_v56, %v12284_v45  ;;  %v3479_v59 = vsub.f32 %v16843_v48, %v12200_v33  ;;  %v16846_v5 = vld [vmem:[#allocation191_spill] sm:$0xff]  ;;  %v16847_v56 = vld [vmem:[#allocation134_spill] sm:$0xff] }
 0x5ce   : > { %16837 = vst [vmem:[#allocation20_spill] sm:$0xff] %v12339_v2  ;;  %8606 = vpow2.f32 %v3712_v9  ;;  %v3481_v48 = vsub.f32 %v16847_v56, %v12200_v33 }
 0x5cf   : > { %v12323_v37 = vpop.permute.xlu0 %3946  ;;  %8608 = vpow2.f32 %v3666_v19  ;;  %v3720_v9 = vmul.f32 1.442695, %v3502_v15  ;;  %v3504_v19 = vsub.f32 %v16846_v5, %v12284_v45  ;;  %v3674_v3 = vmul.f32 1.442695, %v3479_v59  ;;  %v16851_v59 = vld [vmem:[#allocation192_spill] sm:$0xff] }
 0x5d0   : > { %v12327_v7 = vpop.permute.xlu1 %3925  ;;  %4153 = vperm.xlu0 %8457, %v12321_v61   ;;  %v12349_v43 = vpop.eup %8594  ;;  %8610 = vpow2.f32 %v3716_v26  ;;  %v16850_v26 = vld [vmem:[#allocation216_spill] sm:$0xff]  ;;  %v3506_v5 = vsub.f32 %v16851_v59, %v12284_v45  ;;  %v3678_v56 = vmul.f32 1.442695, %v3481_v48 }
 0x5d1   : > { %4084 = vperm.xlu1 %8456, %v12325_v51   ;;  %16840 = vst [vmem:[#allocation41_spill] sm:$0xff] %v12349_v43  ;;  %v12353_v51 = vpop.eup %8596  ;;  %8612 = vpow2.f32 %v3670_v21  ;;  %v12388_v15 = vrot.slane %v11955_v32, %v16850_v26  ;;  %v3724_v21 = vmul.f32 1.442695, %v3504_v19  ;;  %v16855_v19 = vld [vmem:[#allocation237_spill] sm:$0xff] }
 0x5d2   : > { %16841 = vst [vmem:[#allocation23_spill] sm:$0xff] %v12353_v51  ;;  %8614 = vpow2.f32 %v3720_v9  ;;  %v3728_v9 = vmul.f32 1.442695, %v3506_v5  ;;  %v16859_v5 = vld [vmem:[#allocation194_spill] sm:$0xff] }
 0x5d3   : > { %v12337_v62 = vpop.permute.xlu0 %3967  ;;  %8616 = vpow2.f32 %v3674_v3  ;;  %v3508_v3 = vsub.f32 %v16855_v19, %v12388_v15  ;;  %v16860_v19 = vld [vmem:[#allocation150_spill] sm:$0xff] }
 0x5d4   : > { %16836 = vst [vmem:[#allocation197_spill] sm:$0xff] %v12337_v62  ;;  %v12341_v41 = vpop.permute.xlu1 %3928  ;;  %4159 = vperm.xlu0 %8457, %v12335_v13   ;;  %v12363_v13 = vpop.eup %8598  ;;  %8618 = vpow2.f32 %v3724_v21 }
 0x5d5   : > { %4090 = vperm.xlu1 %8456, %v12339_v2   ;;  %16844 = vst [vmem:[#allocation43_spill] sm:$0xff] %v12363_v13  ;;  %v12367_v16 = vpop.eup %8600  ;;  %8620 = vpow2.f32 %v3678_v56  ;;  %v3732_v21 = vmul.f32 1.442695, %v3508_v3  ;;  %v16863_v3 = vld [vmem:[#allocation239_spill] sm:$0xff] }
 0x5d6   : > { %16845 = vst [vmem:[#allocation25_spill] sm:$0xff] %v12367_v16  ;;  %8622 = vpow2.f32 %v3728_v9 }
 0x5d7   : > { %v12351_v61 = vpop.permute.xlu0 %3973 }
 0x5d8   : > { %v12355_v50 = vpop.permute.xlu1 %3931  ;;  %4165 = vperm.xlu0 %8457, %v12349_v43   ;;  %v12377_v43 = vpop.eup %8602 }
 0x5d9   : > { %4096 = vperm.xlu1 %8456, %v12353_v51   ;;  %16848 = vst [vmem:[#allocation45_spill] sm:$0xff] %v12377_v43  ;;  %v12381_v4 = vpop.eup %8604 }
 0x5da   : > { %16849 = vst [vmem:[#allocation24_spill] sm:$0xff] %v12381_v4  ;;  %v12395_v30 = vpop.eup %8606 }
 0x5db   : > { %v12365_v2 = vpop.permute.xlu0 %3979  ;;  %16853 = vst [vmem:[#allocation47_spill] sm:$0xff] %v12395_v30 }
 0x5dc   : > { %v12369_v44 = vpop.permute.xlu1 %3934  ;;  %4171 = vperm.xlu0 %8457, %v12363_v13   ;;  %v16852_v13 = vld [vmem:[#allocation140_spill] sm:$0xff] }
 0x5dd   : > { %4102 = vperm.xlu1 %8456, %v12367_v16   ;;  %v3483_v16 = vsub.f32 %v16852_v13, %v12200_v33  ;;  %v16856_v13 = vld [vmem:[#allocation144_spill] sm:$0xff] }
 0x5de   : > { %v3485_v59 = vsub.f32 %v16856_v13, %v12200_v33  ;;  %v3487_v13 = vsub.f32 %v16860_v19, %v12200_v33 }
 0x5df   : > { %v12379_v51 = vpop.permute.xlu0 %3985  ;;  %v3682_v48 = vmul.f32 1.442695, %v3483_v16  ;;  %v3510_v16 = vsub.f32 %v16859_v5, %v12388_v15  ;;  %v16864_v5 = vld [vmem:[#allocation154_spill] sm:$0xff] }
 0x5e0   : > { %v12383_v25 = vpop.permute.xlu1 %3937  ;;  %4177 = vperm.xlu0 %8457, %v12377_v43   ;;  %v12399_v43 = vpop.eup %8608  ;;  %v3686_v56 = vmul.f32 1.442695, %v3485_v59  ;;  %v3690_v59 = vmul.f32 1.442695, %v3487_v13  ;;  %v3489_v19 = vsub.f32 %v16864_v5, %v12200_v33 }
 0x5e1   : > { %4108 = vperm.xlu1 %8456, %v12381_v4   ;;  %16854 = vst [vmem:[#allocation27_spill] sm:$0xff] %v12399_v43  ;;  %v12409_v4 = vpop.eup %8610  ;;  %8624 = vpow2.f32 %v3682_v48  ;;  %v3736_v9 = vmul.f32 1.442695, %v3510_v16  ;;  %v3512_v48 = vsub.f32 %v16863_v3, %v12388_v15  ;;  %v16867_v16 = vld [vmem:[#allocation241_spill] sm:$0xff]  ;;  %v16868_v3 = vld [vmem:[#allocation160_spill] sm:$0xff] }
 0x5e2   : > { %16857 = vst [vmem:[#allocation51_spill] sm:$0xff] %v12409_v4  ;;  %v12413_v63 = vpop.eup %8612  ;;  %8626 = vpow2.f32 %v3732_v21  ;;  %v3694_v13 = vmul.f32 1.442695, %v3489_v19  ;;  %v3491_v5 = vsub.f32 %v16868_v3, %v12200_v33  ;;  %v16873_v33 = vld [vmem:[#allocation164_spill] sm:$0xff] }
 0x5e3   : > { %v12397_v49 = vpop.permute.xlu0 %3991  ;;  %16858 = vst [vmem:[#allocation26_spill] sm:$0xff] %v12413_v63  ;;  %8628 = vpow2.f32 %v3686_v56  ;;  %v3740_v21 = vmul.f32 1.442695, %v3512_v48  ;;  %v3514_v56 = vsub.f32 %v16867_v16, %v12388_v15  ;;  %v16872_v48 = vld [vmem:[#allocation243_spill] sm:$0xff]  ;;  %v3493_v16 = vsub.f32 %v16873_v33, %v12284_v45 }
 0x5e4   : > { %v12401_v26 = vpop.permute.xlu1 %3940  ;;  %4183 = vperm.xlu0 %8457, %v12395_v30   ;;  %v12423_v30 = vpop.eup %8614  ;;  %8630 = vpow2.f32 %v3736_v9  ;;  %v3698_v19 = vmul.f32 1.442695, %v3491_v5 }
 0x5e5   : > { %4114 = vperm.xlu1 %8456, %v12399_v43   ;;  %16861 = vst [vmem:[#allocation55_spill] sm:$0xff] %v12423_v30  ;;  %v12427_v12 = vpop.eup %8616  ;;  %8632 = vpow2.f32 %v3690_v59  ;;  %v3744_v9 = vmul.f32 1.442695, %v3514_v56  ;;  %v3516_v59 = vsub.f32 %v16872_v48, %v12388_v15  ;;  %v16876_v56 = vld [vmem:[#allocation251_spill] sm:$0xff]  ;;  %v3702_v5 = vmul.f32 1.442695, %v3493_v16 }
 0x5e6   : > { %16862 = vst [vmem:[#allocation29_spill] sm:$0xff] %v12427_v12  ;;  %8634 = vpow2.f32 %v3740_v21  ;;  %v16877_v48 = vld [vmem:[#allocation170_spill] sm:$0xff] }
 0x5e7   : > { %v12411_v55 = vpop.permute.xlu0 %3997  ;;  %8636 = vpow2.f32 %v3694_v13  ;;  %v3748_v21 = vmul.f32 1.442695, %v3516_v59  ;;  %v3518_v13 = vsub.f32 %v16876_v56, %v12388_v15  ;;  %v3495_v33 = vsub.f32 %v16877_v48, %v12284_v45  ;;  %v16881_v59 = vld [vmem:[#allocation253_spill] sm:$0xff]  ;;  %v16882_v56 = vld [vmem:[#allocation174_spill] sm:$0xff] }
 0x5e8   : > { %v12415_v47 = vpop.permute.xlu1 %3943  ;;  %4189 = vperm.xlu0 %8457, %v12409_v4   ;;  %v12437_v4 = vpop.eup %8618  ;;  %8638 = vpow2.f32 %v3744_v9  ;;  %v3497_v48 = vsub.f32 %v16882_v56, %v12284_v45 }
 0x5e9   : > { %4120 = vperm.xlu1 %8456, %v12413_v63   ;;  %16865 = vst [vmem:[#allocation61_spill] sm:$0xff] %v12437_v4  ;;  %v12441_v14 = vpop.eup %8620  ;;  %8640 = vpow2.f32 %v3698_v19  ;;  %v3752_v9 = vmul.f32 1.442695, %v3518_v13  ;;  %v3520_v19 = vsub.f32 %v16881_v59, %v12388_v15  ;;  %v3706_v16 = vmul.f32 1.442695, %v3495_v33  ;;  %v16887_v33 = vld [vmem:[#allocation255_spill] sm:$0xff] }
 0x5ea   : > { %16866 = vst [vmem:[#allocation28_spill] sm:$0xff] %v12441_v14  ;;  %8642 = vpow2.f32 %v3748_v21  ;;  %v16886_v21 = vld [vmem:[#allocation224_spill] sm:$0xff]  ;;  %v3522_v59 = vsub.f32 %v16887_v33, %v12388_v15  ;;  %v3710_v56 = vmul.f32 1.442695, %v3497_v48 }
 0x5eb   : > { %v12425_v43 = vpop.permute.xlu0 %4003  ;;  %8644 = vpow2.f32 %v3702_v5  ;;  %v12504_v13 = vrot.slane %v11955_v32, %v16886_v21  ;;  %v3756_v5 = vmul.f32 1.442695, %v3520_v19  ;;  %v16892_v19 = vld [vmem:[#allocation259_spill] sm:$0xff] }
 0x5ec   : > { %v12429_v23 = vpop.permute.xlu1 %3949  ;;  %4195 = vperm.xlu0 %8457, %v12423_v30   ;;  %v12451_v30 = vpop.eup %8622  ;;  %8646 = vpow2.f32 %v3752_v9  ;;  %v3760_v9 = vmul.f32 1.442695, %v3522_v59  ;;  %v16896_v59 = vld [vmem:[#allocation261_spill] sm:$0xff] }
 0x5ed   : > { %4126 = vperm.xlu1 %8456, %v12427_v12   ;;  %16869 = vst [vmem:[#allocation198_spill] sm:$0xff] %v12451_v30  ;;  %v12455_v11 = vpop.eup %8624  ;;  %8648 = vpow2.f32 %v3706_v16  ;;  %v3524_v16 = vsub.f32 %v16892_v19, %v12504_v13  ;;  %v16897_v19 = vld [vmem:[#allocation185_spill] sm:$0xff] }
 0x5ee   : > { %16871 = vst [vmem:[#allocation199_spill] sm:$0xff] %v12455_v11  ;;  %v12465_v3 = vpop.eup %8626  ;;  %8650 = vpow2.f32 %v3756_v5 }
 0x5ef   : > { %v12439_v63 = vpop.permute.xlu0 %4009  ;;  %16874 = vst [vmem:[#allocation32_spill] sm:$0xff] %v12465_v3  ;;  %8652 = vpow2.f32 %v3710_v56  ;;  %v3764_v5 = vmul.f32 1.442695, %v3524_v16  ;;  %v16901_v16 = vld [vmem:[#allocation262_spill] sm:$0xff] }
 0x5f0   : > { %v12443_v40 = vpop.permute.xlu1 %3952  ;;  %4201 = vperm.xlu0 %8457, %v12437_v4   ;;  %8654 = vpow2.f32 %v3760_v9 }
 0x5f1   : > { %4132 = vperm.xlu1 %8456, %v12441_v14   ;;  %v12469_v14 = vpop.eup %8628 }
 0x5f2   : > { %16875 = vst [vmem:[#allocation71_spill] sm:$0xff] %v12469_v14 }
 0x5f3   : > { %v12453_v12 = vpop.permute.xlu0 %4015 }
 0x5f4   : > { %16870 = vst [vmem:[#allocation30_spill] sm:$0xff] %v12453_v12  ;;  %v12457_v22 = vpop.permute.xlu1 %3955  ;;  %4207 = vperm.xlu0 %8457, %v12451_v30   ;;  %v12479_v30 = vpop.eup %8630 }
 0x5f5   : > { %4138 = vperm.xlu1 %8456, %v12455_v11   ;;  %16878 = vst [vmem:[#allocation34_spill] sm:$0xff] %v12479_v30  ;;  %v12483_v27 = vpop.eup %8632 }
 0x5f6   : > { %16879 = vst [vmem:[#allocation75_spill] sm:$0xff] %v12483_v27 }
 0x5f7   : > { %v12467_v4 = vpop.permute.xlu0 %4021 }
 0x5f8   : > { %v12471_v38 = vpop.permute.xlu1 %3958  ;;  %4213 = vperm.xlu0 %8457, %v12465_v3   ;;  %v12493_v3 = vpop.eup %8634 }
 0x5f9   : > { %4144 = vperm.xlu1 %8456, %v12469_v14   ;;  %16883 = vst [vmem:[#allocation81_spill] sm:$0xff] %v12493_v3  ;;  %v12497_v42 = vpop.eup %8636 }
 0x5fa   : > { %16884 = vst [vmem:[#allocation37_spill] sm:$0xff] %v12497_v42  ;;  %v12511_v36 = vpop.eup %8638 }
 0x5fb   : > { %v12481_v11 = vpop.permute.xlu0 %4027  ;;  %16889 = vst [vmem:[#allocation40_spill] sm:$0xff] %v12511_v36 }
 0x5fc   : > { %v12485_v60 = vpop.permute.xlu1 %3961  ;;  %4219 = vperm.xlu0 %8457, %v12479_v30   ;;  %v16888_v30 = vld [vmem:[#allocation180_spill] sm:$0xff] }
 0x5fd   : > { %16880 = vst [vmem:[#allocation35_spill] sm:$0xff] %v12485_v60  ;;  %4150 = vperm.xlu1 %8456, %v12483_v27   ;;  %v3499_v27 = vsub.f32 %v16888_v30, %v12284_v45  ;;  %v16893_v30 = vld [vmem:[#allocation184_spill] sm:$0xff] }
 0x5fe   : > { %v3501_v33 = vsub.f32 %v16893_v30, %v12284_v45  ;;  %v3503_v30 = vsub.f32 %v16897_v19, %v12284_v45 }
 0x5ff   : > { %v12495_v14 = vpop.permute.xlu0 %4033  ;;  %v3714_v48 = vmul.f32 1.442695, %v3499_v27  ;;  %v3526_v27 = vsub.f32 %v16896_v59, %v12504_v13  ;;  %v16902_v59 = vld [vmem:[#allocation234_spill] sm:$0xff] }
 0x600   : > { %v12499_v34 = vpop.permute.xlu1 %3964  ;;  %4225 = vperm.xlu0 %8457, %v12493_v3   ;;  %v12515_v3 = vpop.eup %8640  ;;  %v3718_v56 = vmul.f32 1.442695, %v3501_v33  ;;  %v3722_v33 = vmul.f32 1.442695, %v3503_v30  ;;  %v3505_v19 = vsub.f32 %v16902_v59, %v12284_v45 }
 0x601   : > { %16885 = vst [vmem:[#allocation83_spill] sm:$0xff] %v12499_v34  ;;  %4156 = vperm.xlu1 %8456, %v12497_v42   ;;  %16890 = vst [vmem:[#allocation85_spill] sm:$0xff] %v12515_v3  ;;  %v12525_v21 = vpop.eup %8642  ;;  %8656 = vpow2.f32 %v3714_v48  ;;  %v3768_v9 = vmul.f32 1.442695, %v3526_v27  ;;  %v3528_v48 = vsub.f32 %v16901_v16, %v12504_v13  ;;  %v16906_v27 = vld [vmem:[#allocation264_spill] sm:$0xff]  ;;  %v16907_v16 = vld [vmem:[#allocation235_spill] sm:$0xff] }
 0x602   : > { %16894 = vst [vmem:[#allocation87_spill] sm:$0xff] %v12525_v21  ;;  %v12529_v58 = vpop.eup %8644  ;;  %8658 = vpow2.f32 %v3764_v5  ;;  %v3726_v30 = vmul.f32 1.442695, %v3505_v19  ;;  %v3507_v59 = vsub.f32 %v16907_v16, %v12284_v45  ;;  %v16912_v45 = vld [vmem:[#allocation193_spill] sm:$0xff] }
 0x603   : > { %v12513_v28 = vpop.permute.xlu0 %4039  ;;  %16895 = vst [vmem:[#allocation44_spill] sm:$0xff] %v12529_v58  ;;  %8660 = vpow2.f32 %v3718_v56  ;;  %v3772_v5 = vmul.f32 1.442695, %v3528_v48  ;;  %v3530_v56 = vsub.f32 %v16906_v27, %v12504_v13  ;;  %v16911_v48 = vld [vmem:[#allocation217_spill] sm:$0xff]  ;;  %v3509_v27 = vsub.f32 %v16912_v45, %v12388_v15 }
 0x604   : > { %v12517_v32 = vpop.permute.xlu1 %3970  ;;  %4231 = vperm.xlu0 %8457, %v12511_v36   ;;  %v12539_v36 = vpop.eup %8646  ;;  %8662 = vpow2.f32 %v3768_v9  ;;  %v3730_v19 = vmul.f32 1.442695, %v3507_v59 }
 0x605   : > { %16891 = vst [vmem:[#allocation42_spill] sm:$0xff] %v12517_v32  ;;  %4162 = vperm.xlu1 %8456, %v12515_v3   ;;  %16898 = vst [vmem:[#allocation89_spill] sm:$0xff] %v12539_v36  ;;  %v12543_v20 = vpop.eup %8648  ;;  %8664 = vpow2.f32 %v3722_v33  ;;  %v3776_v9 = vmul.f32 1.442695, %v3530_v56  ;;  %v3532_v33 = vsub.f32 %v16911_v48, %v12504_v13  ;;  %v16915_v56 = vld [vmem:[#allocation39_spill] sm:$0xff]  ;;  %v16916_v48 = vld [vmem:[#allocation236_spill] sm:$0xff] }
 0x606   : > { %16900 = vst [vmem:[#allocation91_spill] sm:$0xff] %v12543_v20  ;;  %8666 = vpow2.f32 %v3772_v5  ;;  %v3734_v59 = vmul.f32 1.442695, %v3509_v27  ;;  %v3511_v45 = vsub.f32 %v16916_v48, %v12388_v15 }
 0x607   : > { %v12527_v42 = vpop.permute.xlu0 %4045  ;;  %8668 = vpow2.f32 %v3726_v30  ;;  %v3780_v5 = vmul.f32 1.442695, %v3532_v33  ;;  %v3534_v30 = vsub.f32 %v16915_v56, %v12504_v13  ;;  %v16920_v33 = vld [vmem:[#allocation247_spill] sm:$0xff]  ;;  %v16921_v56 = vld [vmem:[#allocation238_spill] sm:$0xff] }
 0x608   : > { %v12531_v1 = vpop.permute.xlu1 %3976  ;;  %4237 = vperm.xlu0 %8457, %v12525_v21   ;;  %v12553_v21 = vpop.eup %8650  ;;  %8670 = vpow2.f32 %v3776_v9  ;;  %v3738_v27 = vmul.f32 1.442695, %v3511_v45  ;;  %v3513_v48 = vsub.f32 %v16921_v56, %v12388_v15 }
 0x609   : > { %4168 = vperm.xlu1 %8456, %v12529_v58   ;;  %16903 = vst [vmem:[#allocation50_spill] sm:$0xff] %v12553_v21  ;;  %v12557_v32 = vpop.eup %8652  ;;  %8672 = vpow2.f32 %v3730_v19  ;;  %v3784_v9 = vmul.f32 1.442695, %v3534_v30  ;;  %v3536_v19 = vsub.f32 %v16920_v33, %v12504_v13  ;;  %v16926_v30 = vld [vmem:[#allocation249_spill] sm:$0xff]  ;;  %v16927_v33 = vld [vmem:[#allocation240_spill] sm:$0xff] }
 0x60a   : > { %16905 = vst [vmem:[#allocation54_spill] sm:$0xff] %v12557_v32  ;;  %8674 = vpow2.f32 %v3780_v5  ;;  %v3742_v45 = vmul.f32 1.442695, %v3513_v48  ;;  %v3515_v56 = vsub.f32 %v16927_v33, %v12388_v15 }
 0x60b   : > { %v12541_v3 = vpop.permute.xlu0 %4051  ;;  %8676 = vpow2.f32 %v3734_v59  ;;  %v3788_v5 = vmul.f32 1.442695, %v3536_v19  ;;  %v3538_v59 = vsub.f32 %v16926_v30, %v12504_v13 }
 0x60c   : > { %16899 = vst [vmem:[#allocation46_spill] sm:$0xff] %v12541_v3  ;;  %v12545_v12 = vpop.permute.xlu1 %3982  ;;  %4243 = vperm.xlu0 %8457, %v12539_v36   ;;  %v12567_v36 = vpop.eup %8654  ;;  %8678 = vpow2.f32 %v3784_v9  ;;  %v3746_v19 = vmul.f32 1.442695, %v3515_v56 }
 0x60d   : > { %4174 = vperm.xlu1 %8456, %v12543_v20   ;;  %16908 = vst [vmem:[#allocation105_spill] sm:$0xff] %v12567_v36  ;;  %8680 = vpow2.f32 %v3738_v27  ;;  %v3792_v9 = vmul.f32 1.442695, %v3538_v59  ;;  %v16932_v27 = vld [vmem:[#allocation242_spill] sm:$0xff] }
 0x60e   : > { %8682 = vpow2.f32 %v3788_v5  ;;  %v3517_v48 = vsub.f32 %v16932_v27, %v12388_v15  ;;  %v16936_v59 = vld [vmem:[#allocation250_spill] sm:$0xff] }
 0x60f   : > { %v12555_v58 = vpop.permute.xlu0 %4057  ;;  %8684 = vpow2.f32 %v3742_v45  ;;  %v3519_v45 = vsub.f32 %v16936_v59, %v12388_v15 }
 0x610   : > { %16904 = vst [vmem:[#allocation93_spill] sm:$0xff] %v12555_v58  ;;  %v12559_v35 = vpop.permute.xlu1 %3988  ;;  %4249 = vperm.xlu0 %8457, %v12553_v21   ;;  %v12571_v58 = vpop.eup %8656  ;;  %8686 = vpow2.f32 %v3792_v9  ;;  %v3750_v5 = vmul.f32 1.442695, %v3517_v48  ;;  %v16940_v9 = vld [vmem:[#allocation252_spill] sm:$0xff] }
 0x611   : > { %4180 = vperm.xlu1 %8456, %v12557_v32   ;;  %16910 = vst [vmem:[#allocation117_spill] sm:$0xff] %v12571_v58  ;;  %v12581_v16 = vpop.eup %8658  ;;  %8688 = vpow2.f32 %v3746_v19  ;;  %v3521_v19 = vsub.f32 %v16940_v9, %v12388_v15 }
 0x612   : > { %16913 = vst [vmem:[#allocation64_spill] sm:$0xff] %v12581_v16  ;;  %v12585_v32 = vpop.eup %8660  ;;  %8690 = vpow2.f32 %v3750_v5  ;;  %v16944_v5 = vld [vmem:[#allocation244_spill] sm:$0xff] }
 0x613   : > { %v12569_v20 = vpop.permute.xlu0 %4063  ;;  %16914 = vst [vmem:[#allocation124_spill] sm:$0xff] %v12585_v32 }
 0x614   : > { %16909 = vst [vmem:[#allocation60_spill] sm:$0xff] %v12569_v20  ;;  %v12573_v62 = vpop.permute.xlu1 %3994  ;;  %4255 = vperm.xlu0 %8457, %v12567_v36   ;;  %v12595_v36 = vpop.eup %8662 }
 0x615   : > { %4186 = vperm.xlu1 %8456, %v12571_v58   ;;  %16917 = vst [vmem:[#allocation65_spill] sm:$0xff] %v12595_v36  ;;  %v12599_v52 = vpop.eup %8664 }
 0x616   : > { %16919 = vst [vmem:[#allocation70_spill] sm:$0xff] %v12599_v52 }
 0x617   : > { %v12583_v21 = vpop.permute.xlu0 %4069 }
 0x618   : > { %v12587_v20 = vpop.permute.xlu1 %4000  ;;  %4261 = vperm.xlu0 %8457, %v12581_v16   ;;  %v12609_v16 = vpop.eup %8666 }
 0x619   : > { %4192 = vperm.xlu1 %8456, %v12585_v32   ;;  %16922 = vst [vmem:[#allocation204_spill] sm:$0xff] %v12609_v16  ;;  %v12613_v34 = vpop.eup %8668 }
 0x61a   : > { %16924 = vst [vmem:[#allocation206_spill] sm:$0xff] %v12613_v34 }
 0x61b   : > { %v12597_v58 = vpop.permute.xlu0 %4075 }
 0x61c   : > { %16918 = vst [vmem:[#allocation202_spill] sm:$0xff] %v12597_v58  ;;  %v12601_v3 = vpop.permute.xlu1 %4006  ;;  %4267 = vperm.xlu0 %8457, %v12595_v36   ;;  %v12623_v36 = vpop.eup %8670 }
 0x61d   : > { %4198 = vperm.xlu1 %8456, %v12599_v52   ;;  %16928 = vst [vmem:[#allocation208_spill] sm:$0xff] %v12623_v36 }
 0x61f   : > { %v12611_v32 = vpop.permute.xlu0 %4081 }
 0x620   : > { %16923 = vst [vmem:[#allocation74_spill] sm:$0xff] %v12611_v32  ;;  %v12615_v10 = vpop.permute.xlu1 %4012  ;;  %4273 = vperm.xlu0 %8457, %v12609_v16   ;;  %v12627_v32 = vpop.eup %8672 }
 0x621   : > { %16925 = vst [vmem:[#allocation80_spill] sm:$0xff] %v12615_v10  ;;  %4204 = vperm.xlu1 %8456, %v12613_v34   ;;  %16930 = vst [vmem:[#allocation210_spill] sm:$0xff] %v12627_v32  ;;  %v12635_v30 = vpop.eup %8674 }
 0x622   : > { %16933 = vst [vmem:[#allocation212_spill] sm:$0xff] %v12635_v30  ;;  %v12639_v16 = vpop.eup %8676 }
 0x623   : > { %v12625_v52 = vpop.permute.xlu0 %4087  ;;  %16935 = vst [vmem:[#allocation214_spill] sm:$0xff] %v12639_v16  ;;  %v12647_v56 = vpop.eup %8678 }
 0x624   : > { %16929 = vst [vmem:[#allocation82_spill] sm:$0xff] %v12625_v52  ;;  %v12629_v10 = vpop.permute.xlu1 %4018  ;;  %4279 = vperm.xlu0 %8457, %v12623_v36   ;;  %16937 = vst [vmem:[#allocation88_spill] sm:$0xff] %v12647_v56  ;;  %v12651_v36 = vpop.eup %8680  ;;  %v16951_v52 = vld [vmem:[#allocation260_spill] sm:$0xff] }
 0x625   : > { %16931 = vst [vmem:[#allocation84_spill] sm:$0xff] %v12629_v10  ;;  %4210 = vperm.xlu1 %8456, %v12627_v32   ;;  %16939 = vst [vmem:[#allocation15_spill] sm:$0xff] %v12651_v36  ;;  %v12659_v48 = vpop.eup %8682 }
 0x626   : > { %16941 = vst [vmem:[#allocation226_spill] sm:$0xff] %v12659_v48 }
 0x627   : > { %v12637_v33 = vpop.permute.xlu0 %4093 }
 0x628   : > { %16934 = vst [vmem:[#allocation86_spill] sm:$0xff] %v12637_v33  ;;  %v12641_v34 = vpop.permute.xlu1 %4024  ;;  %4285 = vperm.xlu0 %8457, %v12635_v30   ;;  %v3754_v30 = vmul.f32 1.442695, %v3519_v45  ;;  %v3523_v45 = vsub.f32 %v16944_v5, %v12388_v15 }
 0x629   : > { %4216 = vperm.xlu1 %8456, %v12639_v16   ;;  %v12663_v16 = vpop.eup %8684 }
 0x62a   : > { %16943 = vst [vmem:[#allocation228_spill] sm:$0xff] %v12663_v16  ;;  %8692 = vpow2.f32 %v3754_v30  ;;  %v16948_v30 = vld [vmem:[#allocation258_spill] sm:$0xff] }
 0x62b   : > { %v12649_v27 = vpop.permute.xlu0 %4099 }
 0x62c   : > { %16938 = vst [vmem:[#allocation165_spill] sm:$0xff] %v12649_v27  ;;  %v12653_v32 = vpop.permute.xlu1 %4030  ;;  %4291 = vperm.xlu0 %8457, %v12647_v56   ;;  %v3758_v56 = vmul.f32 1.442695, %v3521_v19  ;;  %v3525_v19 = vsub.f32 %v16948_v30, %v12504_v13 }
 0x62d   : > { %4222 = vperm.xlu1 %8456, %v12651_v36   ;;  %v12671_v36 = vpop.eup %8686 }
 0x62e   : > { %16945 = vst [vmem:[#allocation220_spill] sm:$0xff] %v12671_v36  ;;  %v12675_v33 = vpop.eup %8688  ;;  %8694 = vpow2.f32 %v3758_v56 }
 0x62f   : > { %v12661_v59 = vpop.permute.xlu0 %4105  ;;  %16947 = vst [vmem:[#allocation116_spill] sm:$0xff] %v12675_v33  ;;  %v12685_v15 = vpop.eup %8690 }
 0x630   : > { %16942 = vst [vmem:[#allocation218_spill] sm:$0xff] %v12661_v59  ;;  %v12665_v27 = vpop.permute.xlu1 %4036  ;;  %4297 = vperm.xlu0 %8457, %v12659_v48   ;;  %v3762_v48 = vmul.f32 1.442695, %v3523_v45  ;;  %16950 = vst [vmem:[#allocation200_spill] sm:$0xff] %v12685_v15 }
 0x631   : > { %4228 = vperm.xlu1 %8456, %v12663_v16  }
 0x632   : > { %8696 = vpow2.f32 %v3762_v48 }
 0x633   : > { %v12673_v9 = vpop.permute.xlu0 %4111 }
 0x634   : > { %16946 = vst [vmem:[#allocation230_spill] sm:$0xff] %v12673_v9  ;;  %v12677_v59 = vpop.permute.xlu1 %4042  ;;  %4303 = vperm.xlu0 %8457, %v12671_v36   ;;  %v3766_v9 = vmul.f32 1.442695, %v3525_v19  ;;  %v3527_v36 = vsub.f32 %v16951_v52, %v12504_v13  ;;  %v12694_v56 = vpop.eup %8692 }
 0x635   : > { %4234 = vperm.xlu1 %8456, %v12675_v33   ;;  %16953 = vst [vmem:[#allocation130_spill] sm:$0xff] %v12694_v56  ;;  %v16955_v33 = vld [vmem:[#allocation245_spill] sm:$0xff] }
 0x636   : > { %8698 = vpow2.f32 %v3766_v9  ;;  %v3770_v30 = vmul.f32 1.442695, %v3527_v36 }
 0x637   : > { %v12683_v16 = vpop.permute.xlu0 %4117 }
 0x638   : > { %16949 = vst [vmem:[#allocation232_spill] sm:$0xff] %v12683_v16  ;;  %v12687_v5 = vpop.permute.xlu1 %4048  ;;  %v3529_v16 = vsub.f32 %v16955_v33, %v12504_v13  ;;  %v12703_v48 = vpop.eup %8694  ;;  %8700 = vpow2.f32 %v3770_v30 }
 0x639   : > { %4240 = vperm.xlu1 %8456, %v12685_v15   ;;  %16957 = vst [vmem:[#allocation192_spill] sm:$0xff] %v12703_v48  ;;  %v16959_v15 = vld [vmem:[#allocation263_spill] sm:$0xff] }
 0x63a   : > { %v3774_v52 = vmul.f32 1.442695, %v3529_v16 }
 0x63b   : > { %v12692_v10 = vpop.permute.xlu0 %4123 }
 0x63c   : > { %16952 = vst [vmem:[#allocation233_spill] sm:$0xff] %v12692_v10  ;;  %v12696_v45 = vpop.permute.xlu1 %4054  ;;  %v3531_v10 = vsub.f32 %v16959_v15, %v12504_v13  ;;  %v12712_v9 = vpop.eup %8696  ;;  %8702 = vpow2.f32 %v3774_v52 }
 0x63d   : > { %16954 = vst [vmem:[#allocation191_spill] sm:$0xff] %v12696_v45  ;;  %4246 = vperm.xlu1 %8456, %v12694_v56   ;;  %16961 = vst [vmem:[#allocation144_spill] sm:$0xff] %v12712_v9  ;;  %v16963_v56 = vld [vmem:[#allocation36_spill] sm:$0xff] }
 0x63e   : > { %v3778_v33 = vmul.f32 1.442695, %v3531_v10 }
 0x63f   : > { %v12701_v58 = vpop.permute.xlu0 %4129 }
 0x640   : > { %16956 = vst [vmem:[#allocation134_spill] sm:$0xff] %v12701_v58  ;;  %v12705_v19 = vpop.permute.xlu1 %4060  ;;  %v3533_v58 = vsub.f32 %v16963_v56, %v12504_v13  ;;  %v12721_v30 = vpop.eup %8698  ;;  %8704 = vpow2.f32 %v3778_v33 }
 0x641   : > { %16958 = vst [vmem:[#allocation140_spill] sm:$0xff] %v12705_v19  ;;  %4252 = vperm.xlu1 %8456, %v12703_v48   ;;  %16965 = vst [vmem:[#allocation239_spill] sm:$0xff] %v12721_v30  ;;  %v16966_v48 = vld [vmem:[#allocation38_spill] sm:$0xff] }
 0x642   : > { %v3782_v15 = vmul.f32 1.442695, %v3533_v58  ;;  %v12730_v52 = vpop.eup %8700 }
 0x643   : > { %v12710_v45 = vpop.permute.xlu0 %4135  ;;  %16968 = vst [vmem:[#allocation241_spill] sm:$0xff] %v12730_v52 }
 0x644   : > { %16960 = vst [vmem:[#allocation237_spill] sm:$0xff] %v12710_v45  ;;  %v12714_v36 = vpop.permute.xlu1 %4066  ;;  %v3535_v45 = vsub.f32 %v16966_v48, %v12504_v13  ;;  %8706 = vpow2.f32 %v3782_v15 }
 0x645   : > { %16962 = vst [vmem:[#allocation194_spill] sm:$0xff] %v12714_v36  ;;  %4258 = vperm.xlu1 %8456, %v12712_v9   ;;  %v16970_v9 = vld [vmem:[#allocation246_spill] sm:$0xff] }
 0x646   : > { %v3786_v56 = vmul.f32 1.442695, %v3535_v45  ;;  %v12739_v33 = vpop.eup %8702 }
 0x647   : > { %v12719_v19 = vpop.permute.xlu0 %4141  ;;  %16972 = vst [vmem:[#allocation164_spill] sm:$0xff] %v12739_v33 }
 0x648   : > { %16964 = vst [vmem:[#allocation150_spill] sm:$0xff] %v12719_v19  ;;  %v12723_v16 = vpop.permute.xlu1 %4072  ;;  %v3537_v19 = vsub.f32 %v16970_v9, %v12504_v13  ;;  %8708 = vpow2.f32 %v3786_v56 }
 0x649   : > { %4264 = vperm.xlu1 %8456, %v12721_v30   ;;  %v16973_v30 = vld [vmem:[#allocation248_spill] sm:$0xff] }
 0x64a   : > { %v3790_v48 = vmul.f32 1.442695, %v3537_v19  ;;  %v12748_v15 = vpop.eup %8704 }
 0x64b   : > { %v12728_v36 = vpop.permute.xlu0 %4147  ;;  %16975 = vst [vmem:[#allocation170_spill] sm:$0xff] %v12748_v15 }
 0x64c   : > { %16967 = vst [vmem:[#allocation154_spill] sm:$0xff] %v12728_v36  ;;  %v12732_v10 = vpop.permute.xlu1 %4078  ;;  %v3539_v36 = vsub.f32 %v16973_v30, %v12504_v13  ;;  %8710 = vpow2.f32 %v3790_v48 }
 0x64d   : > { %16969 = vst [vmem:[#allocation160_spill] sm:$0xff] %v12732_v10  ;;  %4270 = vperm.xlu1 %8456, %v12730_v52  }
 0x64e   : > { %v3794_v9 = vmul.f32 1.442695, %v3539_v36 }
 0x64f   : > { %v12737_v60 = vpop.permute.xlu0 %4153 }
 0x650   : > { %16971 = vst [vmem:[#allocation243_spill] sm:$0xff] %v12737_v60  ;;  %v12741_v58 = vpop.permute.xlu1 %4084  ;;  %v12755_v60 = vpop.eup %8706  ;;  %8712 = vpow2.f32 %v3794_v9 }
 0x651   : > { %4276 = vperm.xlu1 %8456, %v12739_v33   ;;  %16977 = vst [vmem:[#allocation174_spill] sm:$0xff] %v12755_v60 }
 0x652   : > { %v12760_v13 = vpop.eup %8708 }
 0x653   : > { %v12746_v10 = vpop.permute.xlu0 %4159  ;;  %16978 = vst [vmem:[#allocation255_spill] sm:$0xff] %v12760_v13 }
 0x654   : > { %16974 = vst [vmem:[#allocation251_spill] sm:$0xff] %v12746_v10  ;;  %v12750_v45 = vpop.permute.xlu1 %4090 }
 0x655   : > { %4282 = vperm.xlu1 %8456, %v12748_v15  }
 0x656   : > { %v12767_v56 = vpop.eup %8710 }
 0x657   : > { %v12753_v52 = vpop.permute.xlu0 %4165  ;;  %16981 = vst [vmem:[#allocation184_spill] sm:$0xff] %v12767_v56 }
 0x658   : > { %16976 = vst [vmem:[#allocation253_spill] sm:$0xff] %v12753_v52  ;;  %v12757_v33 = vpop.permute.xlu1 %4096 }
 0x659   : > { %4288 = vperm.xlu1 %8456, %v12755_v60  }
 0x65a   : > { %v12774_v15 = vpop.eup %8712 }
 0x65b   : > { %v12764_v30 = vpop.permute.xlu0 %4171  ;;  %16984 = vst [vmem:[#allocation262_spill] sm:$0xff] %v12774_v15 }
 0x65c   : > { %v12762_v19 = vpop.permute.xlu1 %4102  ;;  %16980 = vst [vmem:[#allocation259_spill] sm:$0xff] %v12764_v30 }
 0x65d   : > { %16979 = vst [vmem:[#allocation180_spill] sm:$0xff] %v12762_v19  ;;  %4294 = vperm.xlu1 %8456, %v12760_v13  }
 0x65f   : > { %v12772_v48 = vpop.permute.xlu0 %4177 }
 0x660   : > { %v12769_v36 = vpop.permute.xlu1 %4108  ;;  %16983 = vst [vmem:[#allocation185_spill] sm:$0xff] %v12772_v48 }
 0x661   : > { %16982 = vst [vmem:[#allocation261_spill] sm:$0xff] %v12769_v36  ;;  %4300 = vperm.xlu1 %8456, %v12767_v56  }
 0x663   : > { %v12781_v10 = vpop.permute.xlu0 %4183 }
 0x664   : > { %v12776_v60 = vpop.permute.xlu1 %4114  ;;  %16987 = vst [vmem:[#allocation235_spill] sm:$0xff] %v12781_v10 }
 0x665   : > { %16985 = vst [vmem:[#allocation234_spill] sm:$0xff] %v12776_v60  ;;  %4306 = vperm.xlu1 %8456, %v12774_v15  }
 0x667   : > { %v12785_v13 = vpop.permute.xlu0 %4189 }
 0x668   : > { %v12779_v9 = vpop.permute.xlu1 %4120  ;;  %16989 = vst [vmem:[#allocation193_spill] sm:$0xff] %v12785_v13 }
 0x669   : > { %16986 = vst [vmem:[#allocation264_spill] sm:$0xff] %v12779_v9 }
 0x66b   : > { %v12791_v56 = vpop.permute.xlu0 %4195 }
 0x66c   : > { %v12783_v30 = vpop.permute.xlu1 %4126  ;;  %16992 = vst [vmem:[#allocation247_spill] sm:$0xff] %v12791_v56 }
 0x66d   : > { %16988 = vst [vmem:[#allocation217_spill] sm:$0xff] %v12783_v30 }
 0x66f   : > { %v12795_v52 = vpop.permute.xlu0 %4201 }
 0x670   : > { %v12787_v19 = vpop.permute.xlu1 %4132  ;;  %16994 = vst [vmem:[#allocation249_spill] sm:$0xff] %v12795_v52 }
 0x671   : > { %16990 = vst [vmem:[#allocation39_spill] sm:$0xff] %v12787_v19 }
 0x673   : > { %v12801_v9 = vpop.permute.xlu0 %4207 }
 0x674   : > { %v12789_v36 = vpop.permute.xlu1 %4138  ;;  %16997 = vst [vmem:[#allocation250_spill] sm:$0xff] %v12801_v9 }
 0x675   : > { %16991 = vst [vmem:[#allocation236_spill] sm:$0xff] %v12789_v36 }
 0x677   : > { %v12805_v30 = vpop.permute.xlu0 %4213 }
 0x678   : > { %v12793_v48 = vpop.permute.xlu1 %4144  ;;  %16999 = vst [vmem:[#allocation244_spill] sm:$0xff] %v12805_v30 }
 0x679   : > { %16993 = vst [vmem:[#allocation238_spill] sm:$0xff] %v12793_v48 }
 0x67b   : > { %v12811_v36 = vpop.permute.xlu0 %4219 }
 0x67c   : > { %v12797_v60 = vpop.permute.xlu1 %4150 }
 0x67d   : > { %16995 = vst [vmem:[#allocation240_spill] sm:$0xff] %v12797_v60 }
 0x67f   : > { %v12815_v48 = vpop.permute.xlu0 %4225 }
 0x680   : > { %v12799_v15 = vpop.permute.xlu1 %4156  ;;  %17002 = vst [vmem:[#allocation245_spill] sm:$0xff] %v12815_v48 }
 0x681   : > { %16996 = vst [vmem:[#allocation242_spill] sm:$0xff] %v12799_v15 }
 0x683   : > { %v12821_v15 = vpop.permute.xlu0 %4231 }
 0x684   : > { %v12803_v10 = vpop.permute.xlu1 %4162  ;;  %17005 = vst [vmem:[#allocation38_spill] sm:$0xff] %v12821_v15 }
 0x685   : > { %16998 = vst [vmem:[#allocation252_spill] sm:$0xff] %v12803_v10  ;;  %v4394_v10 = vrot.slane %v12531_v1, %v11481_v53  ;;  %v4315_v1 = vrot.slane %v12341_v41, %v11481_v53  ;;  %v4414_v41 = vrot.slane %v12559_v35, %v11515_v6  ;;  %v4478_v35 = vrot.slane %v12481_v11, %v11493_v24 }
 0x687   : > { %v12827_v30 = vpop.permute.xlu0 %4237 }
 0x688   : > { %v12807_v13 = vpop.permute.xlu1 %4168 }
 0x68c   : > { %v12809_v19 = vpop.permute.xlu1 %4174 }
 0x68d   : > { %17000 = vst [vmem:[#allocation258_spill] sm:$0xff] %v12809_v19 }
 0x690   : > { %v12813_v56 = vpop.permute.xlu1 %4180 }
 0x691   : > { %17001 = vst [vmem:[#allocation260_spill] sm:$0xff] %v12813_v56  ;;  %v4390_v56 = vrot.slane %v12351_v61, %v11488_v31  ;;  %v4320_v61 = vrot.slane %v12355_v50, %v11493_v24  ;;  %v4330_v50 = vrot.slane %v12383_v25, %v11506_v57  ;;  %v4340_v25 = vrot.slane %v12415_v47, %v11518_v46 }
 0x693   : > { %v4395_v48 = vsel %vm2701_vm3, %v4394_v10, %v4390_v56  ;;  %v4469_v10 = vrot.slane %v12467_v4, %v11488_v31 }
 0x694   : > { %v12817_v52 = vpop.permute.xlu1 %4186 }
 0x695   : > { %17003 = vst [vmem:[#allocation263_spill] sm:$0xff] %v12817_v52  ;;  %v4404_v52 = vrot.slane %v12545_v12, %v11502_v39 }
 0x698   : > { %v12819_v60 = vpop.permute.xlu1 %4192 }
 0x699   : > { %17004 = vst [vmem:[#allocation36_spill] sm:$0xff] %v12819_v60  ;;  %v4399_v60 = vrot.slane %v12365_v2, %v11493_v24  ;;  %v4311_v2 = vrot.slane %v12327_v7, %v11488_v31 }
 0x69b   : > { %v4400_v12 = vsel %vm2708_vm4, %v4399_v60, %v4395_v48  ;;  %v4483_v60 = vrot.slane %v12653_v32, %v11502_v39 }
 0x69c   : > { %v12823_v9 = vpop.permute.xlu1 %4198  ;;  %v4405_v56 = vsel %vm2715_vm5, %v4404_v52, %v4400_v12  ;;  %v4335_v52 = vrot.slane %v12401_v26, %v11515_v6 }
 0x69d   : > { %17006 = vst [vmem:[#allocation246_spill] sm:$0xff] %v12823_v9  ;;  %v4473_v9 = vrot.slane %v12641_v34, %v11481_v53  ;;  %v4325_v34 = vrot.slane %v12369_v44, %v11502_v39  ;;  %v4316_v44 = vsel %vm2701_vm3, %v4315_v1, %v4311_v2  ;;  %v4424_v1 = vrot.slane %v12573_v62, %v11526_v0 }
 0x69e   : > { %v4488_v62 = vrot.slane %v12495_v14, %v11506_v57  ;;  %v4429_v14 = vrot.slane %v12411_v55, %v11529_v18  ;;  %v4439_v55 = vrot.slane %v12425_v43, %v11539_v54  ;;  %v4449_v43 = vrot.slane %v12439_v63, %v11552_v17  ;;  %v17016_v63 = vld [vmem:[#allocation160_spill] sm:$0xff] }
 0x69f   : > { %v4474_v4 = vsel %vm2701_vm3, %v4473_v9, %v4469_v10 }
 0x6a0   : > { %v12829_v19 = vpop.permute.xlu1 %4204  ;;  %v4479_v10 = vsel %vm2708_vm4, %v4478_v35, %v4474_v4 }
 0x6a1   : > { %17007 = vst [vmem:[#allocation248_spill] sm:$0xff] %v12829_v19  ;;  %v12844_v19 = vpop.permute.xlu0 %4243  ;;  %v4484_v47 = vsel %vm2715_vm5, %v4483_v60, %v4479_v10 }
 0x6a2   : > { %v4489_v4 = vsel %vm15857_vm6, %v4488_v62, %v4484_v47  ;;  %v17018_v47 = vld [vmem:[#allocation35_spill] sm:$0xff] }
 0x6a4   : > { %v12840_v15 = vpop.permute.xlu1 %4210 }
 0x6a5   : > { %17008 = vst [vmem:[#allocation290_spill] sm:$0xff] %v12840_v15  ;;  %v4409_v15 = vrot.slane %v12379_v51, %v11506_v57  ;;  %v4321_v51 = vsel %vm2708_vm4, %v4320_v61, %v4316_v44  ;;  %v12881_v26 = vpop.permute.xlu0 %4249  ;;  %v4419_v61 = vrot.slane %v12397_v49, %v11518_v46  ;;  %v4345_v49 = vrot.slane %v12323_v37, %v11526_v0 }
 0x6a6   : > { %v4326_v9 = vsel %vm2715_vm5, %v4325_v34, %v4321_v51  ;;  %v4498_v37 = vrot.slane %v12513_v28, %v11518_v46 }
 0x6a7   : > { %v4410_v48 = vsel %vm15857_vm6, %v4409_v15, %v4405_v56  ;;  %v4331_v11 = vsel %vm15857_vm6, %v4330_v50, %v4326_v9  ;;  %v4493_v15 = vrot.slane %v12665_v27, %v11515_v6  ;;  %v4350_v56 = vrot.slane %v12429_v23, %v11529_v18 }
 0x6a8   : > { %v12865_v7 = vpop.permute.xlu1 %4216  ;;  %v4415_v32 = vsel %vm17009_vm0, %v4414_v41, %v4410_v48  ;;  %v4336_v2 = vsel %vm17009_vm0, %v4335_v52, %v4331_v11  ;;  %v4434_v27 = vrot.slane %v12587_v20, %v11536_v8  ;;  %v4503_v23 = vrot.slane %v12677_v59, %v11526_v0 }
 0x6a9   : > { %v4341_v34 = vsel %vm17010_vm10, %v4340_v25, %v4336_v2  ;;  %v4420_v41 = vsel %vm17011_vm11, %v4419_v61, %v4415_v32  ;;  %v4494_v60 = vsel %vm17009_vm0, %v4493_v15, %v4489_v4  ;;  %v4552_v20 = vrot.slane %v12723_v16, %v11481_v53  ;;  %v12916_v35 = vpop.permute.xlu0 %4255 }
 0x6aa   : > { %v4425_v50 = vsel %vm2743_vm9, %v4424_v1, %v4420_v41  ;;  %v4346_v52 = vsel %vm2743_vm9, %v4345_v49, %v4341_v34  ;;  %vm17012_vm10 = vcmask 589312   ;;  %v4355_v59 = vrot.slane %v12443_v40, %v11536_v8  ;;  %v17021_v34 = vld [vmem:[#allocation171_spill] sm:$0xff]  ;;  %v17023_v41 = vld [vmem:[#allocation80_spill] sm:$0xff] }
 0x6ab   : > { %v4351_v51 = vsel %vm17012_vm10, %v4350_v56, %v4346_v52  ;;  %vm17013_vm11 = vmmov %vm17012_vm10  ;;  %v4548_v48 = vrot.slane %v12583_v21, %v11488_v31  ;;  %vm17014_vm0 = vcmask 654912   ;;  %v4444_v16 = vrot.slane %v12601_v3, %v11542_v29 }
 0x6ac   : > { %v12889_v12 = vpop.permute.xlu1 %4222  ;;  %v4430_v25 = vsel %vm17013_vm11, %v4429_v14, %v4425_v50  ;;  %v4499_v9 = vsel %vm17015_vm12, %v4498_v37, %v4494_v60  ;;  %v4360_v32 = vrot.slane %v12457_v22, %v11539_v54  ;;  %v4513_v1 = vrot.slane %v12687_v5, %v11536_v8  ;;  %vm17017_vm12 = vmmov %vm17014_vm0  ;;  %v17019_v5 = vld [vmem:[#allocation202_spill] sm:$0xff]  ;;  %v17025_v60 = vld [vmem:[#allocation191_spill] sm:$0xff] }
 0x6ad   : > { %v4435_v28 = vsel %vm17014_vm0, %v4434_v27, %v4430_v25  ;;  %v4504_v40 = vsel %vm2743_vm9, %v4503_v23, %v4499_v9  ;;  %v4365_v21 = vrot.slane %v12471_v38, %v11542_v29  ;;  %v4508_v3 = vrot.slane %v12527_v42, %v11529_v18  ;;  %v17022_v38 = vld [vmem:[#allocation83_spill] sm:$0xff]  ;;  %v12958_v27 = vpop.permute.xlu0 %4261 }
 0x6ae   : > { %v4553_v11 = vsel %vm2701_vm3, %v4552_v20, %v4548_v48  ;;  %v4562_v61 = vrot.slane %v17016_v63, %v11502_v39  ;;  %v4356_v22 = vsel %vm17017_vm12, %v4355_v59, %v4351_v51  ;;  %v4370_v15 = vrot.slane %v17018_v47, %v11552_v17  ;;  %v17027_v48 = vld [vmem:[#allocation205_spill] sm:$0xff] }
 0x6af   : > { %v4557_v2 = vrot.slane %v17019_v5, %v11493_v24  ;;  %vm17020_vm10 = vcmask 720512   ;;  %v4375_v56 = vrot.slane %v17022_v38, %v17021_v34  ;;  %v4454_v49 = vrot.slane %v17023_v41, %v17021_v34  ;;  %v17035_v38 = vld [vmem:[#allocation30_spill] sm:$0xff] }
 0x6b0   : > { %v12909_v44 = vpop.permute.xlu1 %4228  ;;  %v4440_v62 = vsel %vm17020_vm10, %v4439_v55, %v4435_v28  ;;  %v4509_v50 = vsel %vm17013_vm11, %v4508_v3, %v4504_v40  ;;  %vm17024_vm0 = vmmov %vm17020_vm10  ;;  %v4523_v23 = vrot.slane %v17025_v60, %v11542_v29  ;;  %v17026_v55 = vld [vmem:[#allocation46_spill] sm:$0xff]  ;;  %v4572_v25 = vrot.slane %v12741_v58, %v11515_v6  ;;  %v17028_v28 = vld [vmem:[#allocation197_spill] sm:$0xff] }
 0x6b1   : > { %v4445_v42 = vsel %vm2771_vm13, %v4444_v16, %v4440_v62  ;;  %v4361_v4 = vsel %vm17024_vm0, %v4360_v32, %v4356_v22  ;;  %v4514_v14 = vsel %vm17017_vm12, %v4513_v1, %v4509_v50  ;;  %v4558_v52 = vsel %vm2708_vm4, %v4557_v2, %v4553_v11  ;;  %v17029_v32 = vld [vmem:[#allocation74_spill] sm:$0xff]  ;;  %v17030_v3 = vld [vmem:[#allocation175_spill] sm:$0xff]  ;;  %vm17032_vm10 = vmmov %vm17024_vm0 }
 0x6b2   : > { %v4366_v20 = vsel %vm2771_vm13, %v4365_v21, %v4361_v4  ;;  %v4518_v51 = vrot.slane %v17026_v55, %v11539_v54  ;;  %v4563_v59 = vsel %vm2715_vm5, %v4562_v61, %v4558_v52  ;;  %v4380_v16 = vrot.slane %v17028_v28, %v17027_v48  ;;  %v17031_v11 = vld [vmem:[#allocation42_spill] sm:$0xff]  ;;  %v17033_v58 = vld [vmem:[#allocation84_spill] sm:$0xff]  ;;  %v12999_v4 = vpop.permute.xlu0 %4267 }
 0x6b3   : > { %v4371_v9 = vsel %vm2778_vm14, %v4370_v15, %v4366_v20  ;;  %v4567_v40 = vrot.slane %v17029_v32, %v11506_v57  ;;  %v4450_v1 = vsel %vm2778_vm14, %v4449_v43, %v4445_v42  ;;  %v4385_v63 = vrot.slane %v17031_v11, %v17030_v3  ;;  %v17034_v15 = vld [vmem:[#allocation140_spill] sm:$0xff]  ;;  %v17036_v42 = vld [vmem:[#allocation93_spill] sm:$0xff]  ;;  %v17038_v60 = vld [vmem:[#allocation82_spill] sm:$0xff] }
 0x6b4   : > { %v12937_v10 = vpop.permute.xlu1 %4234  ;;  %v4376_v21 = vsel %vm2785_vm15, %v4375_v56, %v4371_v9  ;;  %v4455_v61 = vsel %vm2785_vm15, %v4454_v49, %v4450_v1  ;;  %v4519_v22 = vsel %vm17032_vm10, %v4518_v51, %v4514_v14  ;;  %v4464_v47 = vrot.slane %v17033_v58, %v17030_v3  ;;  %v17039_v20 = vld [vmem:[#allocation60_spill] sm:$0xff]  ;;  %v17040_v28 = vld [vmem:[#allocation194_spill] sm:$0xff] }
 0x6b5   : > { %v4524_v5 = vsel %vm2771_vm13, %v4523_v23, %v4519_v22  ;;  %v4533_v2 = vrot.slane %v17034_v15, %v17021_v34  ;;  %v4568_v62 = vsel %vm15857_vm6, %v4567_v40, %v4563_v59  ;;  %v4459_v56 = vrot.slane %v17035_v38, %v17027_v48  ;;  %v17042_v40 = vld [vmem:[#allocation86_spill] sm:$0xff]  ;;  %v17046_v15 = vld [vmem:[#allocation232_spill] sm:$0xff] }
 0x6b6   : > { %v4528_v41 = vrot.slane %v17036_v42, %v11552_v17  ;;  %vm17037_vm11 = vcmask 392512   ;;  %v4582_v50 = vrot.slane %v12750_v45, %v11526_v0  ;;  %v4381_v14 = vsel %vm2792_vm1, %v4380_v16, %v4376_v21  ;;  %v17043_v21 = vld [vmem:[#allocation165_spill] sm:$0xff]  ;;  %v17044_v22 = vld [vmem:[#allocation218_spill] sm:$0xff] }
 0x6b7   : > { %v4573_v49 = vsel %vm17037_vm11, %v4572_v25, %v4568_v62  ;;  %v4577_v23 = vrot.slane %v17038_v60, %v11518_v46  ;;  %v13005_v52 = vsel %vm2799_vm2, %v4385_v63, %v4381_v14  ;;  %v4538_v55 = vrot.slane %v17039_v20, %v17027_v48  ;;  %v17047_v62 = vld [vmem:[#allocation264_spill] sm:$0xff]  ;;  %v13042_v14 = vpop.permute.xlu0 %4273  ;;  %v17050_v60 = vld [vmem:[#allocation237_spill] sm:$0xff] }
 0x6b8   : > { %v12965_v37 = vpop.permute.xlu1 %4240  ;;  %v4460_v51 = vsel %vm2792_vm1, %v4459_v56, %v4455_v61  ;;  %v4529_v59 = vsel %vm2778_vm14, %v4528_v41, %v4524_v5  ;;  %v4543_v16 = vrot.slane %v17040_v28, %v17030_v3  ;;  %vm17041_vm0 = vcmask 458112   ;;  %v17048_v56 = vld [vmem:[#allocation233_spill] sm:$0xff]  ;;  %v17049_v41 = vld [vmem:[#allocation134_spill] sm:$0xff] }
 0x6b9   : > { %v13012_v25 = vsel %vm2799_vm2, %v4464_v47, %v4460_v51  ;;  %v4534_v45 = vsel %vm2785_vm15, %v4533_v2, %v4529_v59  ;;  %v4578_v9 = vsel %vm17041_vm0, %v4577_v23, %v4573_v49  ;;  %v4587_v1 = vrot.slane %v17042_v40, %v11529_v18  ;;  %v17045_v47 = vld [vmem:[#allocation230_spill] sm:$0xff]  ;;  %v17054_v40 = vld [vmem:[#allocation253_spill] sm:$0xff] }
 0x6ba   : > { %v4597_v11 = vrot.slane %v17043_v21, %v11539_v54  ;;  %v4583_v63 = vsel %vm2743_vm9, %v4582_v50, %v4578_v9  ;;  %v4592_v61 = vrot.slane %v12757_v33, %v11536_v8  ;;  %v4607_v58 = vrot.slane %v17044_v22, %v11552_v17 }
 0x6bb   : > { %v4627_v2 = vrot.slane %v17046_v15, %v11488_v31  ;;  %v4631_v38 = vrot.slane %v17047_v62, %v11481_v53  ;;  %v4636_v42 = vrot.slane %v17048_v56, %v11493_v24  ;;  %v4646_v49 = vrot.slane %v17049_v41, %v11506_v57  ;;  %v17058_v62 = vld [vmem:[#allocation244_spill] sm:$0xff]  ;;  %v17059_v41 = vld [vmem:[#allocation243_spill] sm:$0xff] }
 0x6bc   : > { %v12990_v43 = vpop.permute.xlu1 %4246  ;;  %v4539_v33 = vsel %vm2792_vm1, %v4538_v55, %v4534_v45  ;;  %v4710_v50 = vrot.slane %v12807_v13, %v11481_v53  ;;  %v4656_v23 = vrot.slane %v17050_v60, %v11518_v46  ;;  %vm17051_vm12 = vcmask 589312   ;;  %v17052_v55 = vld [vmem:[#allocation150_spill] sm:$0xff]  ;;  %v17060_v60 = vld [vmem:[#allocation251_spill] sm:$0xff] }
 0x6bd   : > { %v13047_v20 = vsel %vm2799_vm2, %v4543_v16, %v4539_v33  ;;  %v4588_v51 = vsel %vm17051_vm12, %v4587_v1, %v4583_v63  ;;  %v4789_v59 = vrot.slane %v12865_v7, %v11481_v53  ;;  %v17053_v13 = vld [vmem:[#allocation154_spill] sm:$0xff]  ;;  %v4706_v21 = vrot.slane %v17054_v40, %v11488_v31  ;;  %v17056_v16 = vld [vmem:[#allocation180_spill] sm:$0xff]  ;;  %v17057_v7 = vld [vmem:[#allocation217_spill] sm:$0xff] }
 0x6be   : > { %vm17055_vm10 = vcmask 654912   ;;  %v4602_v15 = vrot.slane %v17056_v16, %v11542_v29  ;;  %v4632_v1 = vsel %vm2701_vm3, %v4631_v38, %v4627_v2  ;;  %v4641_v63 = vrot.slane %v17057_v7, %v11502_v39  ;;  %v17062_v16 = vld [vmem:[#allocation259_spill] sm:$0xff] }
 0x6bf   : > { %v4593_v22 = vsel %vm17055_vm10, %v4592_v61, %v4588_v51  ;;  %v4785_v56 = vrot.slane %v17058_v62, %v11488_v31  ;;  %v4711_v40 = vsel %vm2701_vm3, %v4710_v50, %v4706_v21  ;;  %v17061_v61 = vld [vmem:[#allocation258_spill] sm:$0xff]  ;;  %v4715_v2 = vrot.slane %v17062_v16, %v11493_v24  ;;  %v4280_v21 = vpop.permute.xlu0 %4279 }
 0x6c0   : > { %v13018_v32 = vpop.permute.xlu1 %4252  ;;  %v4720_v51 = vrot.slane %v17061_v61, %v11502_v39  ;;  %vm17063_vm11 = vcmask 720512   ;;  %v4799_v62 = vrot.slane %v12889_v12, %v11502_v39  ;;  %v4637_v33 = vsel %vm2708_vm4, %v4636_v42, %v4632_v1  ;;  %v17065_v1 = vld [vmem:[#allocation260_spill] sm:$0xff] }
 0x6c1   : > { %v4598_v38 = vsel %vm17063_vm11, %v4597_v11, %v4593_v22  ;;  %v4790_v7 = vsel %vm2701_vm3, %v4789_v59, %v4785_v56  ;;  %v4794_v9 = vrot.slane %v12811_v36, %v11493_v24  ;;  %v4864_v50 = vrot.slane %v12958_v27, %v11488_v31  ;;  %v17064_v59 = vld [vmem:[#allocation39_spill] sm:$0xff] }
 0x6c2   : > { %v4603_v16 = vsel %vm2771_vm13, %v4602_v15, %v4598_v38  ;;  %v4642_v11 = vsel %vm2715_vm5, %v4641_v63, %v4637_v33  ;;  %v4651_v22 = vrot.slane %v17064_v59, %v11515_v6  ;;  %v4716_v12 = vsel %vm2708_vm4, %v4715_v2, %v4711_v40 }
 0x6c3   : > { %v4721_v42 = vsel %vm2715_vm5, %v4720_v51, %v4716_v12  ;;  %v4730_v36 = vrot.slane %v17065_v1, %v11515_v6  ;;  %v4795_v56 = vsel %vm2708_vm4, %v4794_v9, %v4790_v7  ;;  %v4873_v15 = vrot.slane %v12999_v4, %v11493_v24  ;;  %v17067_v9 = vld [vmem:[#allocation245_spill] sm:$0xff]  ;;  %v17072_v1 = vld [vmem:[#allocation235_spill] sm:$0xff] }
 0x6c4   : > { %v13052_v28 = vpop.permute.xlu1 %4258  ;;  %v4800_v63 = vsel %vm2715_vm5, %v4799_v62, %v4795_v56  ;;  %v4809_v33 = vrot.slane %v12909_v44, %v11515_v6  ;;  %v4608_v51 = vsel %vm2778_vm14, %v4607_v58, %v4603_v16  ;;  %v4647_v2 = vsel %vm15857_vm6, %v4646_v49, %v4642_v11  ;;  %v17071_v58 = vld [vmem:[#allocation263_spill] sm:$0xff]  ;;  %v4286_v49 = vpop.permute.xlu0 %4285 }
 0x6c5   : > { %v4804_v38 = vrot.slane %v17067_v9, %v11506_v57  ;;  %vm17068_vm0 = vcmask 392512   ;;  %v4740_v16 = vrot.slane %v17071_v58, %v11526_v0  ;;  %v4883_v56 = vrot.slane %v13042_v14, %v11506_v57  ;;  %v17077_v14 = vld [vmem:[#allocation238_spill] sm:$0xff] }
 0x6c6   : > { %vm17070_vm12 = vmmov %vm17068_vm0  ;;  %vm17075_vm11 = vcmask 458112  }
 0x6c7   : > { %v4805_v11 = vsel %vm15857_vm6, %v4804_v38, %v4800_v63  ;;  %vm17073_vm10 = vmmov %vm17068_vm0  ;;  %v17076_v63 = vld [vmem:[#allocation38_spill] sm:$0xff]  ;;  %v4671_v38 = vrot.slane %v17077_v14, %v11536_v8 }
 0x6c8   : > { %v4265_v5 = vpop.permute.xlu1 %4264 }
 0x6c9   : > { %v4868_v61 = vrot.slane %v4265_v5, %v11481_v53  ;;  %v17066_v5 = vld [vmem:[#allocation185_spill] sm:$0xff] }
 0x6ca   : > { %v4725_v45 = vrot.slane %v17066_v5, %v11506_v57 }
 0x6cb   : > { %v4869_v27 = vsel %vm2701_vm3, %v4868_v61, %v4864_v50  ;;  %v4652_v50 = vsel %vm17068_vm0, %v4651_v22, %v4647_v2  ;;  %v17069_v61 = vld [vmem:[#allocation236_spill] sm:$0xff]  ;;  %v4735_v22 = vrot.slane %v17072_v1, %v11518_v46  ;;  %vm17078_vm0 = vmmov %vm17075_vm11  ;;  %v17082_v1 = vrot.slane %v17052_v55, %v11529_v18  ;;  %v17089_v55 = vld [vmem:[#allocation246_spill] sm:$0xff] }
 0x6cc   : > { %v4271_v40 = vpop.permute.xlu1 %4270  ;;  %v4661_v4 = vrot.slane %v17069_v61, %v11526_v0  ;;  %v4726_v62 = vsel %vm15857_vm6, %v4725_v45, %v4721_v42  ;;  %v4874_v59 = vsel %vm2708_vm4, %v4873_v15, %v4869_v27  ;;  %v4810_v45 = vsel %vm17073_vm10, %v4809_v33, %v4805_v11  ;;  %v17074_v27 = vld [vmem:[#allocation261_spill] sm:$0xff]  ;;  %v17079_v61 = vld [vmem:[#allocation36_spill] sm:$0xff] }
 0x6cd   : > { %v4878_v7 = vrot.slane %v4271_v40, %v11502_v39  ;;  %v4731_v44 = vsel %vm17070_vm12, %v4730_v36, %v4726_v62  ;;  %v4819_v42 = vrot.slane %v12937_v10, %v11526_v0  ;;  %v4612_v5 = vrot.slane %v17074_v27, %v17021_v34  ;;  %vm17080_vm12 = vmmov %vm17078_vm0 }
 0x6ce   : > { %v4657_v15 = vsel %vm17075_vm11, %v4656_v23, %v4652_v50  ;;  %v4814_v40 = vrot.slane %v17076_v63, %v11518_v46  ;;  %v4736_v33 = vsel %vm17078_vm0, %v4735_v22, %v4731_v44  ;;  %v4750_v62 = vrot.slane %v17079_v61, %v11536_v8 }
 0x6cf   : > { %v4879_v12 = vsel %vm2715_vm5, %v4878_v7, %v4874_v59  ;;  %v4662_v9 = vsel %vm2743_vm9, %v4661_v4, %v4657_v15  ;;  %v4741_v7 = vsel %vm2743_vm9, %v4740_v16, %v4736_v33  ;;  %v17081_v59 = vld [vmem:[#allocation193_spill] sm:$0xff]  ;;  %v4893_v4 = vrot.slane %v4280_v21, %v11518_v46 }
 0x6d0   : > { %v4277_v36 = vpop.permute.xlu1 %4276  ;;  %v4884_v10 = vsel %vm15857_vm6, %v4883_v56, %v4879_v12  ;;  %v4815_v23 = vsel %vm17080_vm12, %v4814_v40, %v4810_v45  ;;  %v4745_v58 = vrot.slane %v17081_v59, %v11529_v18  ;;  %v4829_v44 = vrot.slane %v12965_v37, %v11536_v8  ;;  %v4292_v45 = vpop.permute.xlu0 %4291  ;;  %v17090_v40 = vld [vmem:[#allocation247_spill] sm:$0xff] }
 0x6d1   : > { %v4888_v2 = vrot.slane %v4277_v36, %v11515_v6  ;;  %v4820_v11 = vsel %vm2743_vm9, %v4819_v42, %v4815_v23  ;;  %v4613_v16 = vsel %vm2785_vm15, %v4612_v5, %v4608_v51  ;;  %vm17083_vm11 = vcmask 589312   ;;  %v17085_v42 = vld [vmem:[#allocation240_spill] sm:$0xff] }
 0x6d2   : > { %v4667_v22 = vsel %vm17083_vm11, %v17082_v1, %v4662_v9  ;;  %v4824_v56 = vrot.slane %v12827_v30, %v11529_v18  ;;  %vm17084_vm0 = vcmask 654912   ;;  %v4681_v27 = vrot.slane %v17085_v42, %v11542_v29  ;;  %vm17086_vm12 = vmmov %vm17083_vm11  ;;  %v17100_v42 = vld [vmem:[#allocation234_spill] sm:$0xff] }
 0x6d3   : > { %v4889_v50 = vsel %vm17073_vm10, %v4888_v2, %v4884_v10  ;;  %v4672_v21 = vsel %vm17084_vm0, %v4671_v38, %v4667_v22  ;;  %v4746_v37 = vsel %vm17086_vm12, %v4745_v58, %v4741_v7  ;;  %vm17087_vm10 = vcmask 458112   ;;  %vm17088_vm6 = vmmov %vm17084_vm0 }
 0x6d4   : > { %v4283_v12 = vpop.permute.xlu1 %4282  ;;  %v4894_v51 = vsel %vm17087_vm10, %v4893_v4, %v4889_v50  ;;  %v4751_v5 = vsel %vm17088_vm6, %v4750_v62, %v4746_v37  ;;  %v4760_v15 = vrot.slane %v17089_v55, %v11542_v29  ;;  %v4825_v63 = vsel %vm17083_vm11, %v4824_v56, %v4820_v11  ;;  %vm17096_vm10 = vmmov %vm17083_vm11 }
 0x6d5   : > { %v4898_v36 = vrot.slane %v4283_v12, %v11526_v0  ;;  %v4755_v2 = vrot.slane %v17090_v40, %v11539_v54  ;;  %v4903_v9 = vrot.slane %v4286_v49, %v11529_v18  ;;  %v4830_v14 = vsel %vm17084_vm0, %v4829_v44, %v4825_v63  ;;  %v4298_v44 = vpop.permute.xlu0 %4297 }
 0x6d6   : > { %v4839_v38 = vrot.slane %v12990_v43, %v11542_v29  ;;  %v17091_v10 = vrot.slane %v17045_v47, %v17027_v48  ;;  %v17092_v61 = vrot.slane %v17053_v13, %v11539_v54  ;;  %vm17093_vm6 = vcmask 720512   ;;  %v17094_v43 = vld [vmem:[#allocation242_spill] sm:$0xff]  ;;  %v17097_v13 = vld [vmem:[#allocation248_spill] sm:$0xff] }
 0x6d7   : > { %v4899_v30 = vsel %vm2743_vm9, %v4898_v36, %v4894_v51  ;;  %v4834_v23 = vrot.slane %v12844_v19, %v11539_v54  ;;  %v4691_v59 = vrot.slane %v17094_v43, %v17021_v34  ;;  %vm17095_vm12 = vmmov %vm17093_vm6  ;;  %v4770_v11 = vrot.slane %v17097_v13, %v17021_v34 }
 0x6d8   : > { %v4289_v33 = vpop.permute.xlu1 %4288  ;;  %v4618_v7 = vsel %vm2792_vm1, %v17091_v10, %v4613_v16  ;;  %v4677_v62 = vsel %vm17093_vm6, %v17092_v61, %v4672_v21  ;;  %v4756_v58 = vsel %vm17095_vm12, %v4755_v2, %v4751_v5  ;;  %v4904_v47 = vsel %vm17096_vm10, %v4903_v9, %v4899_v30  ;;  %vm17098_vm11 = vmmov %vm17093_vm6  ;;  %v17099_v16 = vld [vmem:[#allocation249_spill] sm:$0xff] }
 0x6d9   : > { %v4908_v49 = vrot.slane %v4289_v33, %v11536_v8  ;;  %v4682_v50 = vsel %vm2771_vm13, %v4681_v27, %v4677_v62  ;;  %v4761_v4 = vsel %vm2771_vm13, %v4760_v15, %v4756_v58  ;;  %v4835_v12 = vsel %vm17098_vm11, %v4834_v23, %v4830_v14  ;;  %v17102_v15 = vld [vmem:[#allocation252_spill] sm:$0xff]  ;;  %v17104_v14 = vld [vmem:[#allocation250_spill] sm:$0xff] }
 0x6da   : > { %v4765_v1 = vrot.slane %v17099_v16, %v11552_v17  ;;  %v4913_v22 = vrot.slane %v4292_v45, %v11539_v54  ;;  %v4840_v56 = vsel %vm2771_vm13, %v4839_v38, %v4835_v12  ;;  %v4849_v36 = vrot.slane %v13018_v32, %v17021_v34 }
 0x6db   : > { %v4909_v19 = vsel %vm17084_vm0, %v4908_v49, %v4904_v47  ;;  %v4622_v27 = vrot.slane %v17100_v42, %v17030_v3  ;;  %v17101_v37 = vrot.slane %v17059_v41, %v11552_v17  ;;  %v4844_v5 = vrot.slane %v12881_v26, %v11552_v17  ;;  %v17103_v41 = vld [vmem:[#allocation290_spill] sm:$0xff]  ;;  %v17111_v42 = vld [vmem:[#allocation9_spill] sm:$0xff] }
 0x6dc   : > { %v4295_v21 = vpop.permute.xlu1 %4294  ;;  %v4701_v63 = vrot.slane %v17102_v15, %v17030_v3  ;;  %v4766_v32 = vsel %vm2778_vm14, %v4765_v1, %v4761_v4  ;;  %v4914_v30 = vsel %vm17093_vm6, %v4913_v22, %v4909_v19  ;;  %v4780_v2 = vrot.slane %v17103_v41, %v17030_v3  ;;  %v17119_v41 = vld [vmem:[#allocation181_spill] sm:$0xff] }
 0x6dd   : > { %v4687_v51 = vsel %vm2778_vm14, %v17101_v37, %v4682_v50  ;;  %v4918_v55 = vrot.slane %v4295_v21, %v11542_v29  ;;  %v4771_v40 = vsel %vm2785_vm15, %v4770_v11, %v4766_v32  ;;  %v4845_v9 = vsel %vm2778_vm14, %v4844_v5, %v4840_v56  ;;  %v17112_v37 = vld [vmem:[#allocation10_spill] sm:$0xff] }
 0x6de   : > { %v4692_v45 = vsel %vm2785_vm15, %v4691_v59, %v4687_v51  ;;  %v4775_v38 = vrot.slane %v17104_v14, %v17027_v48  ;;  %v4923_v33 = vrot.slane %v4298_v44, %v11552_v17  ;;  %v4850_v10 = vsel %vm2785_vm15, %v4849_v36, %v4845_v9  ;;  %v4304_v59 = vpop.permute.xlu0 %4303  ;;  %v17121_v9 = vld [vmem:[#allocation207_spill] sm:$0xff] }
 0x6df   : > { %v4919_v26 = vsel %vm2771_vm13, %v4918_v55, %v4914_v30  ;;  %v4859_v61 = vrot.slane %v13052_v28, %v17030_v3  ;;  %v4623_v23 = vsel %vm2799_vm2, %v4622_v27, %v4618_v7  ;;  %v17105_v49 = vrot.slane %v17060_v60, %v17027_v48  ;;  %v17117_v30 = vld [vmem:[#allocation229_spill] sm:$0xff]  ;;  %v17123_v14 = vld [vmem:[#allocation227_spill] sm:$0xff] }
 0x6e0   : > { %v4301_v62 = vpop.permute.xlu1 %4300  ;;  %v4854_v43 = vrot.slane %v12916_v35, %v17027_v48  ;;  %vm17106_vm12 = vcmask 1041409   ;;  %v4776_v4 = vsel %vm2792_vm1, %v4775_v38, %v4771_v40  ;;  %v4924_v7 = vsel %vm2778_vm14, %v4923_v33, %v4919_v26 }
 0x6e1   : > { %v4697_v50 = vsel %vm2792_vm1, %v17105_v49, %v4692_v45  ;;  %v4928_v58 = vrot.slane %v4301_v62, %v17021_v34  ;;  %v4940_v47 = vsel %vm17106_vm12, %v13012_v25, %v13005_v52  ;;  %v4781_v13 = vsel %vm2799_vm2, %v4780_v2, %v4776_v4  ;;  %v17113_v45 = vld [vmem:[#allocation254_spill] sm:$0xff] }
 0x6e2   : > { %v4702_v28 = vsel %vm2799_vm2, %v4701_v63, %v4697_v50  ;;  %v4941_v60 = vsel %vm3356_vm7, %v13047_v20, %v4940_v47  ;;  %v4855_v11 = vsel %vm2792_vm1, %v4854_v43, %v4850_v10  ;;  %v4933_v12 = vrot.slane %v4304_v59, %v17027_v48  ;;  %v17115_v63 = vld [vmem:[#allocation90_spill] sm:$0xff]  ;;  %v17129_v50 = vld [vmem:[#allocation231_spill] sm:$0xff] }
 0x6e3   : > { %v4929_v35 = vsel %vm2785_vm15, %v4928_v58, %v4924_v7  ;;  %v4942_v44 = vsel %vm3358_vm8, %v4623_v23, %v4941_v60  ;;  %v4860_v25 = vsel %vm2799_vm2, %v4859_v61, %v4855_v11  ;;  %vm17107_vm10 = vcmask 1044484   ;;  %v17125_v61 = vld [vmem:[#allocation145_spill] sm:$0xff] }
 0x6e4   : > { %v4307_v52 = vpop.permute.xlu1 %4306  ;;  %v4943_v16 = vsel %vm17107_vm10, %v4702_v28, %v4942_v44  ;;  %v4934_v1 = vsel %vm2792_vm1, %v4933_v12, %v4929_v35  ;;  %vm17108_vm11 = vcmask 1045509   ;;  %vm17109_vm0 = vcmask 1046534   ;;  %v17127_v23 = vld [vmem:[#allocation269_spill] sm:$0xff]  ;;  %v17131_v28 = vld [vmem:[#allocation151_spill] sm:$0xff]  ;;  %v17135_v35 = vld [vmem:[#allocation270_spill] sm:$0xff] }
 0x6e5   : > { %v4938_v19 = vrot.slane %v4307_v52, %v17030_v3  ;;  %v4944_v20 = vsel %vm17108_vm11, %v4781_v13, %v4943_v16  ;;  %vm17110_vm6 = vcmask 1047559   ;;  %v17133_v60 = vld [vmem:[#allocation209_spill] sm:$0xff]  ;;  %v17137_v16 = vld [vmem:[#allocation211_spill] sm:$0xff]  ;;  %vm17320_vm12 = vcmask 326912  }
 0x6e6   : > { %v4945_v56 = vsel %vm17109_vm0, %v4860_v25, %v4944_v20  ;;  %vm17321_vm10 = vcmask 392512   ;;  %vm17322_vm11 = vcmask 458112   ;;  %vm17327_vm0 = vcmask 589312  }
 0x6e7   : > { %v4939_v22 = vsel %vm2799_vm2, %v4938_v19, %v4934_v1 }
 0x6e8   : > { %v4946_v36 = vsel %vm17110_vm6, %v4939_v22, %v4945_v56  ;;  %v17139_v22 = vld [vmem:[#allocation222_spill] sm:$0xff]  ;;  %vm17330_vm6 = vcmask 654912  }
 0x6e9   : > { %4948 = vadd.xlane.f32.xlu0 %v4946_v36  ;;  %v17141_v36 = vld [vmem:[#allocation155_spill] sm:$0xff] }
 0x776   : > { %v13253_v21 = vpop.xlane.xlu0 %4948 }
 0x777   : > { %v4954_v27 = vrot.slane %v13253_v21, %v17111_v42  ;;  %v4958_v51 = vrot.slane %v13253_v21, %v17112_v37 }
 0x779   : > { %8714 = vrcp.f32 %v4954_v27  ;;  %v17143_v27 = vld [vmem:[#allocation213_spill] sm:$0xff] }
 0x77a   : > { %8716 = vrcp.f32 %v4958_v51 }
 0x783   : > { %v13259_v5 = vpop.eup %8714 }
 0x784   : > { %v13261_v55 = vpop.eup %8716  ;;  %v13265_v15 = vmul.f32 %v13259_v5, %v17113_v45  ;;  %v13269_v32 = vmul.f32 %v13259_v5, %v17115_v63  ;;  %v13273_v40 = vmul.f32 %v13259_v5, %v17117_v30  ;;  %v13277_v2 = vmul.f32 %v13259_v5, %v17119_v41  ;;  %v17145_v41 = vld [vmem:[#allocation190_spill] sm:$0xff] }
 0x785   : > { %v13281_v26 = vmul.f32 %v13259_v5, %v17121_v9  ;;  %v13285_v38 = vmul.f32 %v13259_v5, %v17123_v14  ;;  %v13295_v62 = vmul.f32 %v13261_v55, %v17125_v61  ;;  %v13299_v49 = vmul.f32 %v13261_v55, %v17127_v23  ;;  %v17147_v14 = vld [vmem:[#allocation285_spill] sm:$0xff]  ;;  %v17149_v61 = vld [vmem:[#allocation11_spill] sm:$0xff] }
 0x786   : > { %17114 = vst [vmem:[#allocation160_spill] sm:$0xff] %v13265_v15  ;;  %17116 = vst [vmem:[#allocation35_spill] sm:$0xff] %v13269_v32  ;;  %v13289_v33 = vpack.c.bf16 %v13269_v32, %v13265_v15  ;;  %v5127_v10 = vpack.c.bf16 %v13277_v2, %v13273_v40  ;;  %v13303_v43 = vmul.f32 %v13259_v5, %v17129_v50  ;;  %v17150_v50 = vld [vmem:[#allocation161_spill] sm:$0xff]  ;;  %v17188_v32 = vld [vmem:[#allocation223_spill] sm:$0xff] }
 0x787   : > { %17118 = vst [vmem:[#allocation202_spill] sm:$0xff] %v13273_v40  ;;  %17120 = vst [vmem:[#allocation171_spill] sm:$0xff] %v13277_v2  ;;  %v13308_v47 = vpack.c.bf16 %v13285_v38, %v13281_v26  ;;  %v13312_v4 = vmul.f32 %v13259_v5, %v17131_v28  ;;  %v13316_v7 = vpack.c.bf16 %v13299_v49, %v13295_v62  ;;  %v17296_v2 = vld [vmem:[#allocation124_spill] sm:$0xff]  ;;  %v17315_v15 = vld [vmem:[#allocation15_spill] sm:$0xff] }
 0x788   : > { %17122 = vst [vmem:[#allocation83_spill] sm:$0xff] %v13281_v26  ;;  %17124 = vst [vmem:[#allocation80_spill] sm:$0xff] %v13285_v38  ;;  %v5271_v59 = vunpack.c.l.b16 %v13289_v33  ;;  %v5263_v58 = vunpack.c.l.b16 %v5127_v10  ;;  %v13320_v13 = vmul.f32 %v13261_v55, %v17133_v60  ;;  %v13324_v11 = vmul.f32 %v13261_v55, %v17135_v35  ;;  %v17154_v60 = vld [vmem:[#allocation215_spill] sm:$0xff] }
 0x789   : > { %17126 = vst [vmem:[#allocation191_spill] sm:$0xff] %v13295_v62  ;;  %17128 = vst [vmem:[#allocation46_spill] sm:$0xff] %v13299_v49  ;;  %v5277_v44 = vunpack.c.l.b16 %v13308_v47  ;;  %v5264_v12 = vunpack.c.h.b16 %v5127_v10  ;;  %v5128_v52 = vpack.c.bf16 %v13312_v4, %v13303_v43  ;;  %v5456_v25 = vunpack.c.l.b16 %v13316_v7  ;;  %v17308_v62 = vld [vmem:[#allocation210_spill] sm:$0xff] }
 0x78a   : > { %17130 = vst [vmem:[#allocation205_spill] sm:$0xff] %v13303_v43  ;;  %17132 = vst [vmem:[#allocation197_spill] sm:$0xff] %v13312_v4  ;;  %5304 = vperm.xlu0 %8457, %v5271_v59   ;;  %5280 = vperm.xlu1 %8456, %v5263_v58   ;;  %v13332_v19 = vpack.c.bf16 %v13324_v11, %v13320_v13  ;;  %v13336_v1 = vmul.f32 %v13261_v55, %v17137_v16  ;;  %v17152_v58 = vld [vmem:[#allocation286_spill] sm:$0xff] }
 0x78b   : > { %17134 = vst [vmem:[#allocation74_spill] sm:$0xff] %v13320_v13  ;;  %17136 = vst [vmem:[#allocation175_spill] sm:$0xff] %v13324_v11  ;;  %v5265_v20 = vunpack.c.l.b16 %v5128_v52  ;;  %v13340_v56 = vmul.f32 %v13261_v55, %v17139_v22  ;;  %v13344_v42 = vmul.f32 %v13259_v5, %v17141_v36  ;;  %v13348_v37 = vmul.f32 %v13259_v5, %v17143_v27  ;;  %v17158_v22 = vld [vmem:[#allocation265_spill] sm:$0xff] }
 0x78c   : > { %17138 = vst [vmem:[#allocation42_spill] sm:$0xff] %v13336_v1  ;;  %v5458_v51 = vunpack.c.l.b16 %v13332_v19  ;;  %v5266_v45 = vunpack.c.h.b16 %v5128_v52  ;;  %v13359_v9 = vmul.f32 %v13261_v55, %v17145_v41  ;;  %v13363_v10 = vmul.f32 %v13261_v55, %v17147_v14  ;;  %v17160_v41 = vld [vmem:[#allocation287_spill] sm:$0xff] }
 0x78d   : > { %17140 = vst [vmem:[#allocation84_spill] sm:$0xff] %v13340_v56  ;;  %17142 = vst [vmem:[#allocation140_spill] sm:$0xff] %v13344_v42  ;;  %v13353_v63 = vpack.c.bf16 %v13340_v56, %v13336_v1  ;;  %v5129_v30 = vpack.c.bf16 %v13348_v37, %v13344_v42  ;;  %v4962_v23 = vrot.slane %v13253_v21, %v17149_v61  ;;  %v17162_v61 = vld [vmem:[#allocation266_spill] sm:$0xff] }
 0x78e   : > { %5322 = vperm.xlu0 %8457, %v5277_v44   ;;  %5283 = vperm.xlu1 %8456, %v5264_v12   ;;  %17144 = vst [vmem:[#allocation30_spill] sm:$0xff] %v13348_v37  ;;  %17146 = vst [vmem:[#allocation93_spill] sm:$0xff] %v13359_v9  ;;  %v13369_v59 = vmul.f32 %v13261_v55, %v17150_v50  ;;  %v13373_v28 = vmul.f32 %v13261_v55, %v17152_v58 }
 0x78f   : > { %17148 = vst [vmem:[#allocation82_spill] sm:$0xff] %v13363_v10  ;;  %v13377_v35 = vmul.f32 %v13259_v5, %v17154_v60  ;;  %v5460_v44 = vunpack.c.l.b16 %v13353_v63  ;;  %v5267_v12 = vunpack.c.l.b16 %v5129_v30  ;;  %v13382_v52 = vpack.c.bf16 %v13363_v10, %v13359_v9  ;;  %v17176_v10 = vld [vmem:[#allocation131_spill] sm:$0xff] }
 0x790   : > { %17151 = vst [vmem:[#allocation60_spill] sm:$0xff] %v13369_v59  ;;  %17153 = vst [vmem:[#allocation194_spill] sm:$0xff] %v13373_v28  ;;  %8718 = vrcp.f32 %v4962_v23  ;;  %v13394_v36 = vmul.f32 %v13261_v55, %v17158_v22  ;;  %v13401_v14 = vmul.f32 %v13261_v55, %v17160_v41  ;;  %v13405_v23 = vmul.f32 %v13261_v55, %v17162_v61 }
 0x791   : > { %17155 = vst [vmem:[#allocation86_spill] sm:$0xff] %v13377_v35  ;;  %v5462_v27 = vunpack.c.l.b16 %v13382_v52 }
 0x792   : > { %5473 = vperm.xlu0 %8457, %v5456_v25   ;;  %5286 = vperm.xlu1 %8456, %v5265_v20   ;;  %v17156_v25 = vld [vmem:[#allocation141_spill] sm:$0xff]  ;;  %v13390_v20 = vpack.c.bf16 %v13373_v28, %v13369_v59  ;;  %17159 = vst [vmem:[#allocation218_spill] sm:$0xff] %v13394_v36  ;;  %17161 = vst [vmem:[#allocation230_spill] sm:$0xff] %v13401_v14  ;;  %v13410_v60 = vpack.c.bf16 %v13401_v14, %v13394_v36  ;;  %v17170_v14 = vld [vmem:[#allocation219_spill] sm:$0xff] }
 0x793   : > { %v13386_v16 = vmul.f32 %v13259_v5, %v17156_v25  ;;  %17163 = vst [vmem:[#allocation232_spill] sm:$0xff] %v13405_v23  ;;  %v17166_v25 = vld [vmem:[#allocation256_spill] sm:$0xff]  ;;  %v17294_v36 = vld [vmem:[#allocation51_spill] sm:$0xff] }
 0x794   : > { %v5464_v50 = vunpack.c.l.b16 %v13390_v20  ;;  %v13418_v22 = vmul.f32 %v13261_v55, %v17166_v25  ;;  %v5466_v41 = vunpack.c.l.b16 %v13410_v60 }
 0x795   : > { %17157 = vst [vmem:[#allocation165_spill] sm:$0xff] %v13386_v16 }
 0x796   : > { %5479 = vperm.xlu0 %8457, %v5458_v51   ;;  %5289 = vperm.xlu1 %8456, %v5266_v45   ;;  %v5268_v51 = vunpack.c.h.b16 %v5129_v30  ;;  %v5130_v45 = vpack.c.bf16 %v13386_v16, %v13377_v35  ;;  %v17164_v30 = vld [vmem:[#allocation8_spill] sm:$0xff]  ;;  %17167 = vst [vmem:[#allocation233_spill] sm:$0xff] %v13418_v22 }
 0x798   : > { %v5269_v58 = vunpack.c.l.b16 %v5130_v45 }
 0x79a   : > { %5485 = vperm.xlu0 %8457, %v5460_v44   ;;  %5292 = vperm.xlu1 %8456, %v5267_v12   ;;  %v13414_v44 = vmul.f32 %v13261_v55, %v17164_v30  ;;  %v5270_v12 = vunpack.c.h.b16 %v5130_v45  ;;  %v13431_v30 = vmul.f32 %v13259_v5, %v17170_v14  ;;  %v17174_v14 = vld [vmem:[#allocation267_spill] sm:$0xff] }
 0x79c   : > { %17165 = vst [vmem:[#allocation264_spill] sm:$0xff] %v13414_v44  ;;  %v13427_v61 = vpack.c.bf16 %v13414_v44, %v13405_v23  ;;  %17171 = vst [vmem:[#allocation237_spill] sm:$0xff] %v13431_v30 }
 0x79e   : > { %5491 = vperm.xlu0 %8457, %v5462_v27   ;;  %5295 = vperm.xlu1 %8456, %v5268_v51   ;;  %v17168_v27 = vld [vmem:[#allocation201_spill] sm:$0xff] }
 0x79f   : > { %v13422_v51 = vmul.f32 %v13261_v55, %v17168_v27  ;;  %v5272_v55 = vunpack.c.h.b16 %v13289_v33  ;;  %v5468_v27 = vunpack.c.l.b16 %v13427_v61  ;;  %v17180_v33 = vld [vmem:[#allocation289_spill] sm:$0xff] }
 0x7a1   : > { %17169 = vst [vmem:[#allocation134_spill] sm:$0xff] %v13422_v51  ;;  %v13440_v25 = vpack.c.bf16 %v13422_v51, %v13418_v22  ;;  %v17182_v51 = vld [vmem:[#allocation268_spill] sm:$0xff] }
 0x7a2   : > { %5497 = vperm.xlu0 %8457, %v5464_v50   ;;  %5298 = vperm.xlu1 %8456, %v5269_v58   ;;  %v17172_v50 = vld [vmem:[#allocation280_spill] sm:$0xff]  ;;  %v8719_v58 = vpop.eup %8718  ;;  %v13459_v11 = vmul.f32 %v13259_v5, %v17182_v51 }
 0x7a3   : > { %v13435_v45 = vmul.f32 %v13259_v5, %v17172_v50  ;;  %v13446_v28 = vmul.f32 %v8719_v58, %v17174_v14  ;;  %v13449_v50 = vmul.f32 %v8719_v58, %v17176_v10  ;;  %v13455_v56 = vmul.f32 %v8719_v58, %v17180_v33  ;;  %v17184_v10 = vld [vmem:[#allocation92_spill] sm:$0xff] }
 0x7a4   : > { %17183 = vst [vmem:[#allocation244_spill] sm:$0xff] %v13459_v11  ;;  %v5470_v49 = vunpack.c.l.b16 %v13440_v25 }
 0x7a5   : > { %17173 = vst [vmem:[#allocation150_spill] sm:$0xff] %v13435_v45  ;;  %v5132_v44 = vpack.c.bf16 %v13435_v45, %v13431_v30  ;;  %17175 = vst [vmem:[#allocation154_spill] sm:$0xff] %v13446_v28  ;;  %v13464_v14 = vpack.c.bf16 %v13449_v50, %v13446_v28  ;;  %v13481_v28 = vmul.f32 %v8719_v58, %v17188_v32 }
 0x7a6   : > { %5503 = vperm.xlu0 %8457, %v5466_v41   ;;  %5301 = vperm.xlu1 %8456, %v5270_v12   ;;  %17177 = vst [vmem:[#allocation253_spill] sm:$0xff] %v13449_v50  ;;  %v17178_v12 = vld [vmem:[#allocation281_spill] sm:$0xff]  ;;  %17181 = vst [vmem:[#allocation217_spill] sm:$0xff] %v13455_v56 }
 0x7a7   : > { %v13452_v41 = vmul.f32 %v8719_v58, %v17178_v12  ;;  %v5273_v38 = vunpack.c.l.b16 %v5132_v44  ;;  %v17186_v12 = vld [vmem:[#allocation282_spill] sm:$0xff]  ;;  %v5649_v51 = vunpack.c.l.b16 %v13464_v14  ;;  %17189 = vst [vmem:[#allocation258_spill] sm:$0xff] %v13481_v28 }
 0x7a8   : > { %v13471_v33 = vmul.f32 %v8719_v58, %v17186_v12  ;;  %v17192_v12 = vld [vmem:[#allocation277_spill] sm:$0xff] }
 0x7a9   : > { %17179 = vst [vmem:[#allocation180_spill] sm:$0xff] %v13452_v41  ;;  %v13476_v45 = vpack.c.bf16 %v13455_v56, %v13452_v41  ;;  %v13492_v56 = vmul.f32 %v8719_v58, %v17192_v12  ;;  %v17199_v12 = vld [vmem:[#allocation283_spill] sm:$0xff] }
 0x7aa   : > { %5509 = vperm.xlu0 %8457, %v5468_v27   ;;  %5307 = vperm.xlu1 %8456, %v5272_v55   ;;  %v13468_v55 = vmul.f32 %v13259_v5, %v17184_v10  ;;  %v5274_v27 = vunpack.c.h.b16 %v5132_v44  ;;  %17187 = vst [vmem:[#allocation251_spill] sm:$0xff] %v13471_v33  ;;  %v17190_v5 = vld [vmem:[#allocation135_spill] sm:$0xff]  ;;  %v13489_v10 = vpack.c.bf16 %v13481_v28, %v13471_v33  ;;  %v17197_v28 = vld [vmem:[#allocation125_spill] sm:$0xff] }
 0x7ab   : > { %17193 = vst [vmem:[#allocation39_spill] sm:$0xff] %v13492_v56  ;;  %v13505_v33 = vmul.f32 %v8719_v58, %v17197_v28  ;;  %v5457_v28 = vunpack.c.h.b16 %v13316_v7 }
 0x7ac   : > { %17185 = vst [vmem:[#allocation243_spill] sm:$0xff] %v13468_v55  ;;  %v5133_v50 = vpack.c.bf16 %v13468_v55, %v13459_v11  ;;  %v17194_v55 = vld [vmem:[#allocation12_spill] sm:$0xff] }
 0x7ad   : > { %v4966_v32 = vrot.slane %v13253_v21, %v17194_v55  ;;  %17198 = vst [vmem:[#allocation185_spill] sm:$0xff] %v13505_v33 }
 0x7ae   : > { %5515 = vperm.xlu0 %8457, %v5470_v49   ;;  %5310 = vperm.xlu1 %8456, %v5273_v38   ;;  %v13484_v38 = vmul.f32 %v8719_v58, %v17190_v5  ;;  %v5651_v49 = vunpack.c.l.b16 %v13476_v45  ;;  %v5275_v44 = vunpack.c.l.b16 %v5133_v50  ;;  %v5653_v5 = vunpack.c.l.b16 %v13489_v10 }
 0x7af   : > { %v5276_v41 = vunpack.c.h.b16 %v5133_v50  ;;  %8720 = vrcp.f32 %v4966_v32  ;;  %v13514_v50 = vmul.f32 %v8719_v58, %v17199_v12  ;;  %v17203_v32 = vld [vmem:[#allocation284_spill] sm:$0xff]  ;;  %v5459_v12 = vunpack.c.h.b16 %v13332_v19 }
 0x7b0   : > { %17191 = vst [vmem:[#allocation259_spill] sm:$0xff] %v13484_v38  ;;  %v13502_v16 = vpack.c.bf16 %v13492_v56, %v13484_v38 }
 0x7b1   : > { %17200 = vst [vmem:[#allocation245_spill] sm:$0xff] %v13514_v50 }
 0x7b2   : > { %5666 = vperm.xlu0 %8457, %v5649_v51   ;;  %5313 = vperm.xlu1 %8456, %v5274_v27   ;;  %v17195_v51 = vld [vmem:[#allocation257_spill] sm:$0xff]  ;;  %v5655_v55 = vunpack.c.l.b16 %v13502_v16 }
 0x7b3   : > { %v13497_v27 = vmul.f32 %v8719_v58, %v17195_v51  ;;  %v17201_v51 = vld [vmem:[#allocation279_spill] sm:$0xff] }
 0x7b4   : > { %v13517_v56 = vmul.f32 %v8719_v58, %v17201_v51 }
 0x7b5   : > { %17196 = vst [vmem:[#allocation260_spill] sm:$0xff] %v13497_v27 }
 0x7b6   : > { %5672 = vperm.xlu0 %8457, %v5651_v49   ;;  %5316 = vperm.xlu1 %8456, %v5275_v44   ;;  %v5278_v49 = vunpack.c.h.b16 %v13308_v47  ;;  %v13511_v44 = vpack.c.bf16 %v13505_v33, %v13497_v27  ;;  %17202 = vst [vmem:[#allocation236_spill] sm:$0xff] %v13517_v56  ;;  %v13523_v47 = vpack.c.bf16 %v13517_v56, %v13514_v50  ;;  %v17205_v33 = vld [vmem:[#allocation22_spill] sm:$0xff]  ;;  %v17209_v56 = vld [vmem:[#allocation31_spill] sm:$0xff] }
 0x7b7   : > { %v13529_v27 = vmul.f32 %v8719_v58, %v17205_v33  ;;  %v13541_v50 = vmul.f32 %v8719_v58, %v17209_v56  ;;  %v5461_v33 = vunpack.c.h.b16 %v13353_v63  ;;  %v5463_v56 = vunpack.c.h.b16 %v13382_v52 }
 0x7b9   : > { %17206 = vst [vmem:[#allocation235_spill] sm:$0xff] %v13529_v27  ;;  %17210 = vst [vmem:[#allocation38_spill] sm:$0xff] %v13541_v50 }
 0x7ba   : > { %5678 = vperm.xlu0 %8457, %v5653_v5   ;;  %5319 = vperm.xlu1 %8456, %v5276_v41   ;;  %v5657_v41 = vunpack.c.l.b16 %v13511_v44  ;;  %v13526_v5 = vmul.f32 %v8719_v58, %v17203_v32  ;;  %v8721_v32 = vpop.eup %8720 }
 0x7bc   : > { %17204 = vst [vmem:[#allocation263_spill] sm:$0xff] %v13526_v5  ;;  %v13535_v7 = vpack.c.bf16 %v13529_v27, %v13526_v5  ;;  %v17213_v5 = vld [vmem:[#allocation33_spill] sm:$0xff] }
 0x7be   : > { %5684 = vperm.xlu0 %8457, %v5655_v55   ;;  %5325 = vperm.xlu1 %8456, %v5278_v49   ;;  %v5659_v49 = vunpack.c.l.b16 %v13523_v47  ;;  %v17207_v55 = vld [vmem:[#allocation104_spill] sm:$0xff] }
 0x7bf   : > { %v13538_v51 = vmul.f32 %v8719_v58, %v17207_v55  ;;  %v13553_v55 = vmul.f32 %v8721_v32, %v17213_v5  ;;  %v5465_v5 = vunpack.c.h.b16 %v13390_v20 }
 0x7c1   : > { %17208 = vst [vmem:[#allocation261_spill] sm:$0xff] %v13538_v51  ;;  %v13547_v19 = vpack.c.bf16 %v13541_v50, %v13538_v51  ;;  %17214 = vst [vmem:[#allocation36_spill] sm:$0xff] %v13553_v55  ;;  %v17217_v50 = vld [vmem:[#allocation195_spill] sm:$0xff] }
 0x7c2   : > { %5690 = vperm.xlu0 %8457, %v5657_v41   ;;  %5476 = vperm.xlu1 %8456, %v5457_v28   ;;  %v5661_v28 = vunpack.c.l.b16 %v13535_v7  ;;  %v17211_v41 = vld [vmem:[#allocation271_spill] sm:$0xff]  ;;  %v13565_v51 = vmul.f32 %v8721_v32, %v17217_v50  ;;  %v5467_v50 = vunpack.c.h.b16 %v13410_v60 }
 0x7c3   : > { %v13550_v27 = vmul.f32 %v8721_v32, %v17211_v41  ;;  %v5663_v58 = vunpack.c.l.b16 %v13547_v19 }
 0x7c4   : > { %17218 = vst [vmem:[#allocation240_spill] sm:$0xff] %v13565_v51 }
 0x7c5   : > { %17212 = vst [vmem:[#allocation238_spill] sm:$0xff] %v13550_v27  ;;  %v13559_v63 = vpack.c.bf16 %v13553_v55, %v13550_v27  ;;  %v17221_v55 = vld [vmem:[#allocation196_spill] sm:$0xff] }
 0x7c6   : > { %5696 = vperm.xlu0 %8457, %v5659_v49   ;;  %5482 = vperm.xlu1 %8456, %v5459_v12   ;;  %v17215_v12 = vld [vmem:[#allocation272_spill] sm:$0xff]  ;;  %v13577_v27 = vmul.f32 %v8721_v32, %v17221_v55  ;;  %v17227_v55 = vld [vmem:[#allocation13_spill] sm:$0xff] }
 0x7c7   : > { %v13562_v49 = vmul.f32 %v8721_v32, %v17215_v12 }
 0x7c8   : > { %17222 = vst [vmem:[#allocation247_spill] sm:$0xff] %v13577_v27 }
 0x7c9   : > { %17216 = vst [vmem:[#allocation193_spill] sm:$0xff] %v13562_v49  ;;  %v13571_v52 = vpack.c.bf16 %v13565_v51, %v13562_v49  ;;  %v17225_v51 = vld [vmem:[#allocation20_spill] sm:$0xff] }
 0x7ca   : > { %5702 = vperm.xlu0 %8457, %v5661_v28   ;;  %5488 = vperm.xlu1 %8456, %v5461_v33   ;;  %v5842_v33 = vunpack.c.l.b16 %v13559_v63  ;;  %v17219_v28 = vld [vmem:[#allocation273_spill] sm:$0xff]  ;;  %v13589_v49 = vmul.f32 %v8721_v32, %v17225_v51  ;;  %v5471_v51 = vunpack.c.h.b16 %v13440_v25 }
 0x7cb   : > { %v13574_v41 = vmul.f32 %v8721_v32, %v17219_v28 }
 0x7cc   : > { %17226 = vst [vmem:[#allocation248_spill] sm:$0xff] %v13589_v49 }
 0x7cd   : > { %17220 = vst [vmem:[#allocation246_spill] sm:$0xff] %v13574_v41  ;;  %v13583_v20 = vpack.c.bf16 %v13577_v27, %v13574_v41  ;;  %v17228_v27 = vld [vmem:[#allocation274_spill] sm:$0xff] }
 0x7ce   : > { %5708 = vperm.xlu0 %8457, %v5663_v58   ;;  %5494 = vperm.xlu1 %8456, %v5463_v56   ;;  %v5844_v56 = vunpack.c.l.b16 %v13571_v52  ;;  %v17223_v58 = vld [vmem:[#allocation288_spill] sm:$0xff]  ;;  %v13600_v41 = vmul.f32 %v8721_v32, %v17228_v27 }
 0x7cf   : > { %v13586_v12 = vmul.f32 %v8721_v32, %v17223_v58  ;;  %v5846_v60 = vunpack.c.l.b16 %v13583_v20  ;;  %v17230_v58 = vld [vmem:[#allocation23_spill] sm:$0xff] }
 0x7d0   : > { %17229 = vst [vmem:[#allocation249_spill] sm:$0xff] %v13600_v41  ;;  %v13603_v38 = vmul.f32 %v8721_v32, %v17230_v58 }
 0x7d1   : > { %17224 = vst [vmem:[#allocation242_spill] sm:$0xff] %v13586_v12  ;;  %v13597_v28 = vpack.c.bf16 %v13589_v49, %v13586_v12  ;;  %v17234_v49 = vld [vmem:[#allocation25_spill] sm:$0xff] }
 0x7d2   : > { %5859 = vperm.xlu0 %8457, %v5842_v33   ;;  %5500 = vperm.xlu1 %8456, %v5465_v5   ;;  %v4970_v33 = vrot.slane %v13253_v21, %v17227_v55  ;;  %v5469_v5 = vunpack.c.h.b16 %v13427_v61  ;;  %17231 = vst [vmem:[#allocation234_spill] sm:$0xff] %v13603_v38  ;;  %v13609_v61 = vpack.c.bf16 %v13603_v38, %v13600_v41  ;;  %v17238_v38 = vld [vmem:[#allocation24_spill] sm:$0xff] }
 0x7d3   : > { %v13615_v27 = vmul.f32 %v8721_v32, %v17234_v49  ;;  %v13627_v41 = vmul.f32 %v8721_v32, %v17238_v38  ;;  %v5652_v49 = vunpack.c.h.b16 %v13476_v45  ;;  %v5654_v38 = vunpack.c.h.b16 %v13489_v10 }
 0x7d4   : > { %8722 = vrcp.f32 %v4970_v33  ;;  %v5850_v33 = vunpack.c.l.b16 %v13609_v61 }
 0x7d5   : > { %17235 = vst [vmem:[#allocation290_spill] sm:$0xff] %v13615_v27  ;;  %17239 = vst [vmem:[#allocation9_spill] sm:$0xff] %v13627_v41 }
 0x7d6   : > { %5865 = vperm.xlu0 %8457, %v5844_v56   ;;  %5506 = vperm.xlu1 %8456, %v5467_v50   ;;  %v5848_v50 = vunpack.c.l.b16 %v13597_v28  ;;  %v17232_v56 = vld [vmem:[#allocation275_spill] sm:$0xff] }
 0x7d7   : > { %v13612_v55 = vmul.f32 %v8721_v32, %v17232_v56 }
 0x7d9   : > { %17233 = vst [vmem:[#allocation252_spill] sm:$0xff] %v13612_v55  ;;  %v13621_v25 = vpack.c.bf16 %v13615_v27, %v13612_v55  ;;  %v17242_v27 = vld [vmem:[#allocation27_spill] sm:$0xff] }
 0x7da   : > { %5871 = vperm.xlu0 %8457, %v5846_v60   ;;  %5512 = vperm.xlu1 %8456, %v5469_v5   ;;  %v5650_v60 = vunpack.c.h.b16 %v13464_v14  ;;  %v17236_v5 = vld [vmem:[#allocation276_spill] sm:$0xff]  ;;  %v13639_v55 = vmul.f32 %v8721_v32, %v17242_v27 }
 0x7db   : > { %v13624_v58 = vmul.f32 %v8721_v32, %v17236_v5 }
 0x7dc   : > { %17243 = vst [vmem:[#allocation254_spill] sm:$0xff] %v13639_v55 }
 0x7dd   : > { %17237 = vst [vmem:[#allocation250_spill] sm:$0xff] %v13624_v58  ;;  %v13633_v14 = vpack.c.bf16 %v13627_v41, %v13624_v58  ;;  %v17246_v58 = vld [vmem:[#allocation26_spill] sm:$0xff] }
 0x7de   : > { %5877 = vperm.xlu0 %8457, %v5848_v50   ;;  %5518 = vperm.xlu1 %8456, %v5471_v51   ;;  %v5852_v51 = vunpack.c.l.b16 %v13621_v25  ;;  %v17240_v50 = vld [vmem:[#allocation221_spill] sm:$0xff]  ;;  %v8723_v5 = vpop.eup %8722 }
 0x7df   : > { %v13636_v56 = vmul.f32 %v8721_v32, %v17240_v50  ;;  %v13651_v50 = vmul.f32 %v8723_v5, %v17246_v58  ;;  %v5656_v32 = vunpack.c.h.b16 %v13502_v16  ;;  %v5658_v58 = vunpack.c.h.b16 %v13511_v44 }
 0x7e1   : > { %17241 = vst [vmem:[#allocation10_spill] sm:$0xff] %v13636_v56  ;;  %v13645_v45 = vpack.c.bf16 %v13639_v55, %v13636_v56  ;;  %17247 = vst [vmem:[#allocation229_spill] sm:$0xff] %v13651_v50  ;;  %v17250_v55 = vld [vmem:[#allocation29_spill] sm:$0xff] }
 0x7e2   : > { %5883 = vperm.xlu0 %8457, %v5850_v33   ;;  %5669 = vperm.xlu1 %8456, %v5650_v60   ;;  %v5854_v60 = vunpack.c.l.b16 %v13633_v14  ;;  %v17244_v33 = vld [vmem:[#allocation278_spill] sm:$0xff]  ;;  %v13663_v56 = vmul.f32 %v8723_v5, %v17250_v55  ;;  %v5660_v55 = vunpack.c.h.b16 %v13523_v47 }
 0x7e3   : > { %v13648_v41 = vmul.f32 %v8723_v5, %v17244_v33  ;;  %v5856_v27 = vunpack.c.l.b16 %v13645_v45 }
 0x7e4   : > { %17251 = vst [vmem:[#allocation207_spill] sm:$0xff] %v13663_v56 }
 0x7e5   : > { %17245 = vst [vmem:[#allocation90_spill] sm:$0xff] %v13648_v41  ;;  %v13657_v10 = vpack.c.bf16 %v13651_v50, %v13648_v41  ;;  %v17254_v50 = vld [vmem:[#allocation28_spill] sm:$0xff] }
 0x7e6   : > { %5889 = vperm.xlu0 %8457, %v5852_v51   ;;  %5675 = vperm.xlu1 %8456, %v5652_v49   ;;  %v17248_v49 = vld [vmem:[#allocation225_spill] sm:$0xff]  ;;  %v13675_v41 = vmul.f32 %v8723_v5, %v17254_v50  ;;  %v17260_v50 = vld [vmem:[#allocation14_spill] sm:$0xff] }
 0x7e7   : > { %v13660_v51 = vmul.f32 %v8723_v5, %v17248_v49 }
 0x7e8   : > { %17255 = vst [vmem:[#allocation145_spill] sm:$0xff] %v13675_v41 }
 0x7e9   : > { %17249 = vst [vmem:[#allocation181_spill] sm:$0xff] %v13660_v51  ;;  %v13669_v16 = vpack.c.bf16 %v13663_v56, %v13660_v51  ;;  %v17258_v56 = vld [vmem:[#allocation199_spill] sm:$0xff] }
 0x7ea   : > { %5895 = vperm.xlu0 %8457, %v5854_v60   ;;  %5681 = vperm.xlu1 %8456, %v5654_v38   ;;  %v6035_v38 = vunpack.c.l.b16 %v13657_v10  ;;  %v17252_v60 = vld [vmem:[#allocation203_spill] sm:$0xff]  ;;  %v13687_v51 = vmul.f32 %v8723_v5, %v17258_v56  ;;  %v5664_v56 = vunpack.c.h.b16 %v13547_v19 }
 0x7eb   : > { %v13672_v33 = vmul.f32 %v8723_v5, %v17252_v60 }
 0x7ec   : > { %17259 = vst [vmem:[#allocation231_spill] sm:$0xff] %v13687_v51 }
 0x7ed   : > { %17253 = vst [vmem:[#allocation227_spill] sm:$0xff] %v13672_v33  ;;  %v13681_v44 = vpack.c.bf16 %v13675_v41, %v13672_v33  ;;  %v17261_v41 = vld [vmem:[#allocation18_spill] sm:$0xff] }
 0x7ee   : > { %5901 = vperm.xlu0 %8457, %v5856_v27   ;;  %5687 = vperm.xlu1 %8456, %v5656_v32   ;;  %v6037_v32 = vunpack.c.l.b16 %v13669_v16  ;;  %v17256_v27 = vld [vmem:[#allocation16_spill] sm:$0xff]  ;;  %v13698_v33 = vmul.f32 %v8723_v5, %v17261_v41 }
 0x7ef   : > { %v13684_v49 = vmul.f32 %v8723_v5, %v17256_v27  ;;  %v6039_v47 = vunpack.c.l.b16 %v13681_v44  ;;  %v17263_v27 = vld [vmem:[#allocation71_spill] sm:$0xff] }
 0x7f0   : > { %17262 = vst [vmem:[#allocation151_spill] sm:$0xff] %v13698_v33  ;;  %v13701_v12 = vmul.f32 %v8723_v5, %v17263_v27 }
 0x7f1   : > { %17257 = vst [vmem:[#allocation269_spill] sm:$0xff] %v13684_v49  ;;  %v13695_v60 = vpack.c.bf16 %v13687_v51, %v13684_v49  ;;  %v17267_v51 = vld [vmem:[#allocation75_spill] sm:$0xff] }
 0x7f2   : > { %6052 = vperm.xlu0 %8457, %v6035_v38   ;;  %5693 = vperm.xlu1 %8456, %v5658_v58   ;;  %v4974_v38 = vrot.slane %v13253_v21, %v17260_v50  ;;  %v5662_v58 = vunpack.c.h.b16 %v13535_v7  ;;  %17264 = vst [vmem:[#allocation209_spill] sm:$0xff] %v13701_v12  ;;  %v13707_v7 = vpack.c.bf16 %v13701_v12, %v13698_v33  ;;  %v17271_v12 = vld [vmem:[#allocation37_spill] sm:$0xff] }
 0x7f3   : > { %v13713_v41 = vmul.f32 %v8723_v5, %v17267_v51  ;;  %v13725_v33 = vmul.f32 %v8723_v5, %v17271_v12  ;;  %v5845_v51 = vunpack.c.h.b16 %v13571_v52  ;;  %v5847_v12 = vunpack.c.h.b16 %v13583_v20 }
 0x7f4   : > { %8724 = vrcp.f32 %v4974_v38  ;;  %v6043_v38 = vunpack.c.l.b16 %v13707_v7  ;;  %v5849_v20 = vunpack.c.h.b16 %v13597_v28  ;;  %v5851_v28 = vunpack.c.h.b16 %v13609_v61 }
 0x7f5   : > { %17268 = vst [vmem:[#allocation211_spill] sm:$0xff] %v13713_v41  ;;  %17272 = vst [vmem:[#allocation155_spill] sm:$0xff] %v13725_v33  ;;  %v5853_v61 = vunpack.c.h.b16 %v13621_v25  ;;  %v17293_v25 = vld [vmem:[#allocation216_spill] sm:$0xff] }
 0x7f6   : > { %6058 = vperm.xlu0 %8457, %v6037_v32   ;;  %5699 = vperm.xlu1 %8456, %v5660_v55   ;;  %v6041_v55 = vunpack.c.l.b16 %v13695_v60  ;;  %v17265_v32 = vld [vmem:[#allocation17_spill] sm:$0xff] }
 0x7f7   : > { %v13710_v50 = vmul.f32 %v8723_v5, %v17265_v32 }
 0x7f9   : > { %17266 = vst [vmem:[#allocation270_spill] sm:$0xff] %v13710_v50  ;;  %v13719_v19 = vpack.c.bf16 %v13713_v41, %v13710_v50  ;;  %v17275_v41 = vld [vmem:[#allocation85_spill] sm:$0xff] }
 0x7fa   : > { %6064 = vperm.xlu0 %8457, %v6039_v47   ;;  %5705 = vperm.xlu1 %8456, %v5662_v58   ;;  %v5843_v47 = vunpack.c.h.b16 %v13559_v63  ;;  %v17269_v58 = vld [vmem:[#allocation19_spill] sm:$0xff]  ;;  %v13737_v50 = vmul.f32 %v8723_v5, %v17275_v41 }
 0x7fb   : > { %v13722_v27 = vmul.f32 %v8723_v5, %v17269_v58 }
 0x7fc   : > { %17276 = vst [vmem:[#allocation190_spill] sm:$0xff] %v13737_v50 }
 0x7fd   : > { %17270 = vst [vmem:[#allocation222_spill] sm:$0xff] %v13722_v27  ;;  %v13731_v63 = vpack.c.bf16 %v13725_v33, %v13722_v27 }
 0x7fe   : > { %6070 = vperm.xlu0 %8457, %v6041_v55   ;;  %5711 = vperm.xlu1 %8456, %v5664_v56   ;;  %v6045_v56 = vunpack.c.l.b16 %v13719_v19  ;;  %v17273_v55 = vld [vmem:[#allocation21_spill] sm:$0xff]  ;;  %v13739_v58 = vpop.eup %8724 }
 0x7ff   : > { %v13734_v32 = vmul.f32 %v8723_v5, %v17273_v55  ;;  %v6047_v52 = vunpack.c.l.b16 %v13731_v63  ;;  %v17279_v55 = vld [vmem:[#allocation44_spill] sm:$0xff]  ;;  %v13827_v59 = vmul.f32 %v13739_v58, %v17296_v2  ;;  %v17300_v2 = vld [vmem:[#allocation70_spill] sm:$0xff] }
 0x800   : > { %v13753_v5 = vmul.f32 %v13739_v58, %v17279_v55  ;;  %v17283_v55 = vld [vmem:[#allocation91_spill] sm:$0xff]  ;;  %v13845_v9 = vmul.f32 %v13739_v58, %v17300_v2 }
 0x801   : > { %17274 = vst [vmem:[#allocation213_spill] sm:$0xff] %v13734_v32  ;;  %v13771_v27 = vmul.f32 %v13739_v58, %v17283_v55  ;;  %v17287_v55 = vld [vmem:[#allocation54_spill] sm:$0xff]  ;;  %17297 = vst [vmem:[#allocation8_spill] sm:$0xff] %v13827_v59 }
 0x802   : > { %6076 = vperm.xlu0 %8457, %v6043_v38   ;;  %5862 = vperm.xlu1 %8456, %v5843_v47   ;;  %v13745_v47 = vpack.c.bf16 %v13737_v50, %v13734_v32  ;;  %v17277_v38 = vld [vmem:[#allocation41_spill] sm:$0xff]  ;;  %17280 = vst [vmem:[#allocation11_spill] sm:$0xff] %v13753_v5  ;;  %v13789_v22 = vmul.f32 %v13739_v58, %v17287_v55  ;;  %17301 = vst [vmem:[#allocation201_spill] sm:$0xff] %v13845_v9 }
 0x803   : > { %v13749_v33 = vmul.f32 %v13739_v58, %v17277_v38  ;;  %v17281_v38 = vld [vmem:[#allocation43_spill] sm:$0xff]  ;;  %17284 = vst [vmem:[#allocation286_spill] sm:$0xff] %v13771_v27  ;;  %v17291_v55 = vld [vmem:[#allocation117_spill] sm:$0xff] }
 0x804   : > { %v13767_v32 = vmul.f32 %v13739_v58, %v17281_v38  ;;  %v17285_v38 = vld [vmem:[#allocation45_spill] sm:$0xff]  ;;  %17288 = vst [vmem:[#allocation141_spill] sm:$0xff] %v13789_v22  ;;  %v13807_v23 = vmul.f32 %v13739_v58, %v17291_v55  ;;  %v13823_v55 = vmul.f32 %v13739_v58, %v17294_v36  ;;  %v17298_v36 = vld [vmem:[#allocation55_spill] sm:$0xff] }
 0x805   : > { %17278 = vst [vmem:[#allocation285_spill] sm:$0xff] %v13749_v33  ;;  %v13763_v50 = vpack.c.bf16 %v13753_v5, %v13749_v33  ;;  %v13785_v33 = vmul.f32 %v13739_v58, %v17285_v38  ;;  %v17289_v38 = vld [vmem:[#allocation47_spill] sm:$0xff] }
 0x806   : > { %6082 = vperm.xlu0 %8457, %v6045_v56   ;;  %5868 = vperm.xlu1 %8456, %v5845_v51   ;;  %v6049_v51 = vunpack.c.l.b16 %v13745_v47  ;;  %17282 = vst [vmem:[#allocation161_spill] sm:$0xff] %v13767_v32  ;;  %v13781_v5 = vpack.c.bf16 %v13771_v27, %v13767_v32  ;;  %v13803_v32 = vmul.f32 %v13739_v58, %v17289_v38  ;;  %17292 = vst [vmem:[#allocation287_spill] sm:$0xff] %v13807_v23 }
 0x807   : > { %17286 = vst [vmem:[#allocation215_spill] sm:$0xff] %v13785_v33  ;;  %v13799_v27 = vpack.c.bf16 %v13789_v22, %v13785_v33  ;;  %v5855_v22 = vunpack.c.h.b16 %v13633_v14  ;;  %17295 = vst [vmem:[#allocation266_spill] sm:$0xff] %v13823_v55  ;;  %v5857_v14 = vunpack.c.h.b16 %v13645_v45  ;;  %v6036_v45 = vunpack.c.h.b16 %v13657_v10 }
 0x808   : > { %17290 = vst [vmem:[#allocation265_spill] sm:$0xff] %v13803_v32  ;;  %v13819_v38 = vpack.c.bf16 %v13807_v23, %v13803_v32  ;;  %v13837_v23 = vpack.c.bf16 %v13827_v59, %v13823_v55  ;;  %v13841_v32 = vmul.f32 %v13739_v58, %v17298_v36  ;;  %v17302_v59 = vld [vmem:[#allocation61_spill] sm:$0xff]  ;;  %v17304_v55 = vld [vmem:[#allocation206_spill] sm:$0xff]  ;;  %v6038_v10 = vunpack.c.h.b16 %v13669_v16 }
 0x809   : > { %v13755_v41 = vpop.permute.xlu0 %5304  ;;  %v13757_v56 = vpop.permute.xlu1 %5280  ;;  %v6232_v33 = vunpack.c.l.b16 %v13799_v27  ;;  %v13857_v36 = vmul.f32 %v13739_v58, %v17302_v59  ;;  %v13861_v2 = vmul.f32 %v13739_v58, %v17304_v55  ;;  %v13877_v55 = vmul.f32 %v13739_v58, %v17308_v62  ;;  %v17312_v62 = vld [vmem:[#allocation214_spill] sm:$0xff] }
 0x80a   : > { %6088 = vperm.xlu0 %8457, %v6047_v52   ;;  %5874 = vperm.xlu1 %8456, %v5847_v12   ;;  %v6228_v12 = vunpack.c.l.b16 %v13763_v50  ;;  %17299 = vst [vmem:[#allocation256_spill] sm:$0xff] %v13841_v32  ;;  %v6040_v16 = vunpack.c.h.b16 %v13681_v44  ;;  %v5330_v35 = vrot.slane %v13757_v56, %v11488_v31  ;;  %v6044_v56 = vunpack.c.h.b16 %v13707_v7 }
 0x80b   : > { %17303 = vst [vmem:[#allocation219_spill] sm:$0xff] %v13857_v36  ;;  %17305 = vst [vmem:[#allocation280_spill] sm:$0xff] %v13861_v2 }
 0x80c   : > { %17309 = vst [vmem:[#allocation131_spill] sm:$0xff] %v13877_v55 }
 0x80d   : > { %v13773_v49 = vpop.permute.xlu0 %5322  ;;  %v13775_v52 = vpop.permute.xlu1 %5283 }
 0x80e   : > { %6094 = vperm.xlu0 %8457, %v6049_v51   ;;  %5880 = vperm.xlu1 %8456, %v5849_v20   ;;  %v6230_v20 = vunpack.c.l.b16 %v13781_v5  ;;  %v5334_v44 = vrot.slane %v13775_v52, %v11481_v53 }
 0x811   : > { %v13791_v37 = vpop.permute.xlu0 %5473  ;;  %v13793_v51 = vpop.permute.xlu1 %5286 }
 0x812   : > { %6245 = vperm.xlu0 %8457, %v6228_v12   ;;  %5886 = vperm.xlu1 %8456, %v5851_v28   ;;  %v4978_v28 = vrot.slane %v13253_v21, %v17293_v25  ;;  %v6234_v25 = vunpack.c.l.b16 %v13819_v38 }
 0x814   : > { %8726 = vrcp.f32 %v4978_v28  ;;  %v13853_v28 = vpack.c.bf16 %v13845_v9, %v13841_v32  ;;  %v13869_v9 = vpack.c.bf16 %v13861_v2, %v13857_v36  ;;  %v17306_v32 = vld [vmem:[#allocation198_spill] sm:$0xff] }
 0x815   : > { %v13809_v4 = vpop.permute.xlu0 %5479  ;;  %v13811_v12 = vpop.permute.xlu1 %5289  ;;  %v13873_v59 = vmul.f32 %v13739_v58, %v17306_v32  ;;  %v17310_v32 = vld [vmem:[#allocation32_spill] sm:$0xff] }
 0x816   : > { %6251 = vperm.xlu0 %8457, %v6230_v20   ;;  %5892 = vperm.xlu1 %8456, %v5853_v61   ;;  %v6240_v2 = vunpack.c.l.b16 %v13869_v9  ;;  %v5344_v52 = vrot.slane %v13811_v12, %v11502_v39 }
 0x817   : > { %17307 = vst [vmem:[#allocation267_spill] sm:$0xff] %v13873_v59  ;;  %v13887_v36 = vpack.c.bf16 %v13877_v55, %v13873_v59  ;;  %v6042_v55 = vunpack.c.h.b16 %v13695_v60  ;;  %v17314_v59 = vld [vmem:[#allocation34_spill] sm:$0xff] }
 0x819   : > { %v13829_v61 = vpop.permute.xlu0 %5485  ;;  %v13831_v20 = vpop.permute.xlu1 %5292 }
 0x81a   : > { %6257 = vperm.xlu0 %8457, %v6232_v33   ;;  %5898 = vperm.xlu1 %8456, %v5855_v22   ;;  %v6236_v33 = vunpack.c.l.b16 %v13837_v23  ;;  %v5349_v60 = vrot.slane %v13831_v20, %v11506_v57  ;;  %v17318_v20 = vld [vmem:[#allocation228_spill] sm:$0xff] }
 0x81d   : > { %v13847_v1 = vpop.permute.xlu0 %5491  ;;  %v5296_v22 = vpop.permute.xlu1 %5295 }
 0x81e   : > { %6263 = vperm.xlu0 %8457, %v6234_v25   ;;  %5904 = vperm.xlu1 %8456, %v5857_v14   ;;  %v6238_v14 = vunpack.c.l.b16 %v13853_v28  ;;  %v13879_v26 = vpop.eup %8726  ;;  %v5354_v42 = vrot.slane %v5296_v22, %v11515_v6 }
 0x81f   : > { %v13891_v11 = vmul.f32 %v13879_v26, %v17310_v32  ;;  %v13895_v58 = vmul.f32 %v13879_v26, %v17312_v62  ;;  %v13906_v32 = vmul.f32 %v13879_v26, %v17314_v59  ;;  %v13910_v62 = vmul.f32 %v13879_v26, %v17315_v15 }
 0x820   : > { %v5335_v15 = vsel %vm2701_vm3, %v5334_v44, %v5330_v35  ;;  %v13936_v40 = vmul.f32 %v13879_v26, %v17318_v20 }
 0x821   : > { %v13863_v13 = vpop.permute.xlu0 %5497  ;;  %v5299_v25 = vpop.permute.xlu1 %5298  ;;  %17311 = vst [vmem:[#allocation281_spill] sm:$0xff] %v13891_v11  ;;  %17313 = vst [vmem:[#allocation289_spill] sm:$0xff] %v13895_v58  ;;  %v13943_v7 = vpack.c.bf16 %v13910_v62, %v13906_v32 }
 0x822   : > { %6269 = vperm.xlu0 %8457, %v6236_v33   ;;  %6055 = vperm.xlu1 %8456, %v6036_v45   ;;  %17316 = vst [vmem:[#allocation268_spill] sm:$0xff] %v13910_v62  ;;  %v5359_v43 = vrot.slane %v5299_v25, %v11518_v46  ;;  %17319 = vst [vmem:[#allocation92_spill] sm:$0xff] %v13936_v40 }
 0x825   : > { %v13881_v33 = vpop.permute.xlu0 %5503  ;;  %v5302_v45 = vpop.permute.xlu1 %5301 }
 0x826   : > { %6275 = vperm.xlu0 %8457, %v6238_v14   ;;  %6061 = vperm.xlu1 %8456, %v6038_v10   ;;  %v5339_v10 = vrot.slane %v13793_v51, %v11493_v24  ;;  %v13919_v51 = vpack.c.bf16 %v13895_v58, %v13891_v11  ;;  %v17317_v58 = vld [vmem:[#allocation81_spill] sm:$0xff]  ;;  %v5364_v22 = vrot.slane %v5302_v45, %v11526_v0 }
 0x827   : > { %v13932_v11 = vmul.f32 %v13879_v26, %v17317_v58 }
 0x828   : > { %v5340_v12 = vsel %vm2708_vm4, %v5339_v10, %v5335_v15  ;;  %v17323_v15 = vld [vmem:[#allocation40_spill] sm:$0xff] }
 0x829   : > { %v13897_v30 = vpop.permute.xlu0 %5509  ;;  %v5308_v14 = vpop.permute.xlu1 %5307  ;;  %v5345_v35 = vsel %vm2715_vm5, %v5344_v52, %v5340_v12  ;;  %v6046_v52 = vunpack.c.h.b16 %v13719_v19  ;;  %v13953_v45 = vpack.c.bf16 %v13936_v40, %v13932_v11  ;;  %v13957_v12 = vmul.f32 %v13879_v26, %v17323_v15  ;;  %v17328_v40 = vld [vmem:[#allocation87_spill] sm:$0xff] }
 0x82a   : > { %6281 = vperm.xlu0 %8457, %v6240_v2   ;;  %6067 = vperm.xlu1 %8456, %v6040_v16   ;;  %v6242_v2 = vunpack.c.l.b16 %v13887_v36  ;;  %v5350_v25 = vsel %vm17320_vm12, %v5349_v60, %v5345_v35  ;;  %v5374_v20 = vrot.slane %v5308_v14, %v11536_v8  ;;  %v17324_v35 = vld [vmem:[#allocation116_spill] sm:$0xff]  ;;  %vm17333_vm12 = vcmask 720512  }
 0x82b   : > { %v5355_v10 = vsel %vm17321_vm10, %v5354_v42, %v5350_v25  ;;  %v6423_v42 = vunpack.c.l.b16 %v13943_v7  ;;  %v6425_v62 = vunpack.c.l.b16 %v13953_v45  ;;  %vm17347_vm10 = vmmov 0  }
 0x82d   : > { %v13923_v59 = vpop.permute.xlu0 %5515  ;;  %v5311_v16 = vpop.permute.xlu1 %5310 }
 0x82e   : > { %6287 = vperm.xlu0 %8457, %v6242_v2   ;;  %6073 = vperm.xlu1 %8456, %v6042_v55   ;;  %v6421_v55 = vunpack.c.l.b16 %v13919_v51  ;;  %v5360_v2 = vsel %vm17322_vm11, %v5359_v43, %v5355_v10  ;;  %v5369_v43 = vrot.slane %v13755_v41, %v11529_v18  ;;  %v5379_v19 = vrot.slane %v5311_v16, %v11539_v54  ;;  %v17326_v10 = vld [vmem:[#allocation224_spill] sm:$0xff] }
 0x82f   : > { %v5365_v60 = vsel %vm2743_vm9, %v5364_v22, %v5360_v2  ;;  %v4982_v15 = vrot.slane %v13253_v21, %v17326_v10  ;;  %v13979_v41 = vmul.f32 %v13879_v26, %v17328_v40  ;;  %v17334_v10 = vld [vmem:[#allocation89_spill] sm:$0xff]  ;;  %vm17352_vm11 = vcmask 326912  }
 0x830   : > { %v5370_v14 = vsel %vm17327_vm0, %v5369_v43, %v5365_v60  ;;  %vm17355_vm0 = vcmask 392512  }
 0x831   : > { %v13946_v44 = vpop.permute.xlu0 %5666  ;;  %v5314_v58 = vpop.permute.xlu1 %5313  ;;  %17329 = vst [vmem:[#allocation223_spill] sm:$0xff] %v13979_v41  ;;  %v5375_v16 = vsel %vm17330_vm6, %v5374_v20, %v5370_v14  ;;  %8728 = vrcp.f32 %v4982_v15  ;;  %v14000_v14 = vmul.f32 %v13879_v26, %v17334_v10  ;;  %v17338_v10 = vld [vmem:[#allocation50_spill] sm:$0xff]  ;;  %vm17357_vm6 = vcmask 458112  }
 0x832   : > { %6438 = vperm.xlu0 %8457, %v6421_v55   ;;  %6079 = vperm.xlu1 %8456, %v6044_v56   ;;  %v13964_v56 = vmul.f32 %v13879_v26, %v17324_v35  ;;  %v5384_v22 = vrot.slane %v5314_v58, %v11542_v29  ;;  %v6048_v35 = vunpack.c.h.b16 %v13731_v63  ;;  %v17331_v58 = vld [vmem:[#allocation200_spill] sm:$0xff]  ;;  %v5380_v60 = vsel %vm17333_vm12, %v5379_v19, %v5375_v16  ;;  %v17336_v16 = vld [vmem:[#allocation130_spill] sm:$0xff] }
 0x833   : > { %17335 = vst [vmem:[#allocation277_spill] sm:$0xff] %v14000_v14  ;;  %vm17361_vm12 = vcmask 589312  }
 0x834   : > { %17325 = vst [vmem:[#allocation282_spill] sm:$0xff] %v13964_v56  ;;  %v13985_v21 = vpack.c.bf16 %v13964_v56, %v13957_v12  ;;  %v5385_v40 = vsel %vm2771_vm13, %v5384_v22, %v5380_v60  ;;  %v8731_v60 = vld [vmem:[%s9076_s24 + $0x108] sm:$0xff] }
 0x835   : > { %v13969_v55 = vpop.permute.xlu0 %5672  ;;  %v5317_v25 = vpop.permute.xlu1 %5316  ;;  %v17342_v56 = vld [vmem:[#allocation105_spill] sm:$0xff] }
 0x836   : > { %6444 = vperm.xlu0 %8457, %v6423_v42   ;;  %6085 = vperm.xlu1 %8456, %v6046_v52   ;;  %v5389_v2 = vrot.slane %v5317_v25, %v11552_v17  ;;  %v13989_v52 = vmul.f32 %v13879_v26, %v17331_v58  ;;  %v6050_v25 = vunpack.c.h.b16 %v13745_v47  ;;  %v6427_v15 = vunpack.c.l.b16 %v13985_v21 }
 0x838   : > { %17332 = vst [vmem:[#allocation135_spill] sm:$0xff] %v13989_v52  ;;  %v5390_v43 = vsel %vm2778_vm14, %v5389_v2, %v5385_v40  ;;  %v14006_v22 = vpack.c.bf16 %v13989_v52, %v13979_v41  ;;  %v5399_v2 = vrot.slane %v13773_v49, %v17027_v48 }
 0x839   : > { %v13992_v42 = vpop.permute.xlu0 %5678  ;;  %v5320_v63 = vpop.permute.xlu1 %5319 }
 0x83a   : > { %v5394_v20 = vrot.slane %v5320_v63, %v17021_v34  ;;  %6450 = vperm.xlu0 %8457, %v6425_v62   ;;  %6091 = vperm.xlu1 %8456, %v6048_v35   ;;  %v14010_v62 = vmul.f32 %v13879_v26, %v17336_v16  ;;  %v8732_v63 = vld [vmem:[%s9076_s24 + $0x100] sm:$0xff]  ;;  %v14023_v16 = vmul.f32 %v13879_v26, %v17338_v10  ;;  %v6429_v52 = vunpack.c.l.b16 %v14006_v22 }
 0x83b   : > { %v5207_v40 = vpack.c.bf16 %v8731_v60, %v8732_v63 }
 0x83c   : > { %v5395_v19 = vsel %vm2785_vm15, %v5394_v20, %v5390_v43  ;;  %17337 = vst [vmem:[#allocation12_spill] sm:$0xff] %v14010_v62  ;;  %v6229_v43 = vunpack.c.h.b16 %v13763_v50  ;;  %17339 = vst [vmem:[#allocation257_spill] sm:$0xff] %v14023_v16 }
 0x83d   : > { %v14014_v47 = vpop.permute.xlu0 %5684  ;;  %v5326_v35 = vpop.permute.xlu1 %5325  ;;  %v5400_v20 = vsel %vm2792_vm1, %v5399_v2, %v5395_v19  ;;  %v5523_v2 = vrot.slane %v13791_v37, %v11488_v31 }
 0x83e   : > { %v5404_v58 = vrot.slane %v5326_v35, %v17030_v3  ;;  %6456 = vperm.xlu0 %8457, %v6427_v15   ;;  %6097 = vperm.xlu1 %8456, %v6050_v25   ;;  %v14029_v25 = vpack.c.bf16 %v14010_v62, %v14000_v14  ;;  %v17340_v15 = vld [vmem:[#allocation192_spill] sm:$0xff]  ;;  %v6231_v62 = vunpack.c.h.b16 %v13781_v5  ;;  %v17346_v5 = vmov 0.0  }
 0x83f   : > { %v14033_v35 = vmul.f32 %v13879_v26, %v17340_v15  ;;  %v14047_v15 = vpop.eup %8728 }
 0x840   : > { %v5405_v49 = vsel %vm2799_vm2, %v5404_v58, %v5400_v20  ;;  %v8733_v58 = vld [vmem:[%s9076_s24 + $0x118] sm:$0xff]  ;;  %v8734_v20 = vld [vmem:[%s9076_s24 + $0x110] sm:$0xff] }
 0x841   : > { %17341 = vst [vmem:[#allocation125_spill] sm:$0xff] %v14033_v35  ;;  %v5406_v60 = vpack.c.b16 %v5405_v49, %v5405_v49  ;;  %v14035_v19 = vpop.permute.xlu0 %5690  ;;  %v5477_v50 = vpop.permute.xlu1 %5476  ;;  %v5208_v10 = vpack.c.bf16 %v8733_v58, %v8734_v20  ;;  %v14045_v49 = vmul.f32 %v13879_v26, %v17342_v56  ;;  %v5532_v56 = vrot.slane %v13809_v4, %v11493_v24  ;;  %v8735_v20 = vld [vmem:[%s9076_s24 + $0x128] sm:$0xff] }
 0x842   : > { %v5527_v63 = vrot.slane %v5477_v50, %v11481_v53  ;;  %6462 = vperm.xlu0 %8457, %v6429_v52   ;;  %6248 = vperm.xlu1 %8456, %v6229_v43   ;;  %v6431_v50 = vunpack.c.l.b16 %v14029_v25  ;;  %v14053_v52 = vpack.c.bf16 %v14033_v35, %v14023_v16  ;;  %v17344_v43 = vld [vmem:[#allocation144_spill] sm:$0xff] }
 0x843   : > { %8265 = vmatmul.mubr.bf16.vlgmr.msra.gmra.mrb[4].mxu0 %v5406_v60  ;;  %17343 = vst [vmem:[#allocation283_spill] sm:$0xff] %v14045_v49  ;;  %v14057_v60 = vmul.f32 %v13879_v26, %v17344_v43  ;;  %v8736_v35 = vld [vmem:[%s9076_s24 + $0x120] sm:$0xff]  ;;  %v6233_v43 = vunpack.c.h.b16 %v13799_v27  ;;  %v5542_v27 = vrot.slane %v13829_v61, %v11506_v57 }
 0x844   : > { %v5528_v37 = vsel %vm2701_vm3, %v5527_v63, %v5523_v2  ;;  %8289 = vmatpush3.bf16.msra.mxu0 %v5207_v40  ;;  %8304 = vmatprep.mubr.msk.bf16.mxu0 %vm17347_vm10, %v17346_v5  ;;  %v5209_v26 = vpack.c.bf16 %v8735_v20, %v8736_v35  ;;  %v17348_v16 = vld [vmem:[#allocation64_spill] sm:$0xff]  ;;  %v6433_v41 = vunpack.c.l.b16 %v14053_v52 }
 0x845   : > { %17345 = vst [vmem:[#allocation279_spill] sm:$0xff] %v14057_v60  ;;  %v14063_v58 = vpop.permute.xlu0 %5696  ;;  %v5483_v2 = vpop.permute.xlu1 %5482  ;;  %8290 = vmatprep.subr.bf16.mxu0 %v17346_v5  ;;  %v5533_v40 = vsel %vm2708_vm4, %v5532_v56, %v5528_v37  ;;  %v14073_v4 = vmul.f32 %v14047_v15, %v17348_v16 }
 0x846   : > { %v5537_v63 = vrot.slane %v5483_v2, %v11502_v39  ;;  %6468 = vperm.xlu0 %8457, %v6431_v50   ;;  %6254 = vperm.xlu1 %8456, %v6231_v62   ;;  %v14079_v62 = vpack.c.bf16 %v14057_v60, %v14045_v49  ;;  %v17350_v50 = vld [vmem:[#allocation239_spill] sm:$0xff] }
 0x847   : > { %17349 = vst [vmem:[#allocation284_spill] sm:$0xff] %v14073_v4  ;;  %v14083_v35 = vmul.f32 %v14047_v15, %v17350_v50  ;;  %v8737_v2 = vld [vmem:[%s9076_s24 + $0x138] sm:$0xff]  ;;  %v17353_v50 = vld [vmem:[#allocation65_spill] sm:$0xff] }
 0x848   : > { %v5538_v14 = vsel %vm2715_vm5, %v5537_v63, %v5533_v40  ;;  %8291 = vmatpush3.bf16.msra.mxu0 %v5208_v10  ;;  %v8738_v63 = vld [vmem:[%s9076_s24 + $0x130] sm:$0xff]  ;;  %v6235_v10 = vunpack.c.h.b16 %v13819_v38  ;;  %v14097_v61 = vmul.f32 %v14047_v15, %v17353_v50  ;;  %v6435_v49 = vunpack.c.l.b16 %v14079_v62 }
 0x849   : > { %17351 = vst [vmem:[#allocation22_spill] sm:$0xff] %v14083_v35  ;;  %v14087_v37 = vpop.permute.xlu0 %5702  ;;  %v5489_v16 = vpop.permute.xlu1 %5488  ;;  %8292 = vmatprep.subr.bf16.mxu0 %v17346_v5  ;;  %v5210_v20 = vpack.c.bf16 %v8737_v2, %v8738_v63  ;;  %v5543_v40 = vsel %vm17352_vm11, %v5542_v27, %v5538_v14  ;;  %v5552_v38 = vrot.slane %v13847_v1, %v11518_v46  ;;  %v8739_v2 = vld [vmem:[%s9076_s24 + $0x148] sm:$0xff]  ;;  %v8740_v63 = vld [vmem:[%s9076_s24 + $0x140] sm:$0xff]  ;;  %vm17364_vm11 = vcmask 654912   ;;  %s8747_s24 = scalar_lea.vmem %s8746_s22, 256 }
 0x84a   : > { %v5547_v56 = vrot.slane %v5489_v16, %v11515_v6  ;;  %6474 = vperm.xlu0 %8457, %v6433_v41   ;;  %6260 = vperm.xlu1 %8456, %v6233_v43   ;;  %17354 = vst [vmem:[#allocation104_spill] sm:$0xff] %v14097_v61  ;;  %v14103_v41 = vpack.c.bf16 %v14083_v35, %v14073_v4  ;;  %v17356_v43 = vld [vmem:[#allocation241_spill] sm:$0xff]  ;;  %p8749_p2 = scmp.lt.s32.totalorder %s8747_s24, %s8741_s20 }
 0x84b   : > { %v14107_v16 = vmul.f32 %v14047_v15, %v17356_v43  ;;  %v6237_v43 = vunpack.c.h.b16 %v13837_v23  ;;  %v5562_v23 = vrot.slane %v13863_v13, %v11529_v18 }
 0x84c   : > { %v5548_v60 = vsel %vm17355_vm0, %v5547_v56, %v5543_v40  ;;  %8293 = vmatpush3.bf16.msra.mxu0 %v5209_v26  ;;  %v5211_v40 = vpack.c.bf16 %v8739_v2, %v8740_v63  ;;  %v17358_v26 = vld [vmem:[#allocation204_spill] sm:$0xff]  ;;  %v6614_v35 = vunpack.c.l.b16 %v14103_v41  ;;  %v6239_v63 = vunpack.c.h.b16 %v13853_v28  ;;  %p8750_p3 = por %p8749_p2, %p8748_p1 }
 0x84d   : > { %v14111_v14 = vpop.permute.xlu0 %5708  ;;  %v5495_v27 = vpop.permute.xlu1 %5494  ;;  %8294 = vmatprep.subr.bf16.mxu0 %v17346_v5  ;;  %v5553_v50 = vsel %vm17357_vm6, %v5552_v38, %v5548_v60  ;;  %v14121_v4 = vmul.f32 %v14047_v15, %v17358_v26  ;;  %v5572_v28 = vrot.slane %v13881_v33, %v11539_v54  ;;  %vm17367_vm0 = vcmask 720512  }
 0x84e   : > { %v5557_v56 = vrot.slane %v5495_v27, %v11526_v0  ;;  %6480 = vperm.xlu0 %8457, %v6435_v49   ;;  %6266 = vperm.xlu1 %8456, %v6235_v10   ;;  %v14127_v27 = vpack.c.bf16 %v14107_v16, %v14097_v61  ;;  %v17360_v49 = vld [vmem:[#allocation164_spill] sm:$0xff]  ;;  %v17365_v61 = vld [vmem:[#allocation170_spill] sm:$0xff]  ;;  %vm17397_vm6 = vcmask 326912   ;;  %p8751_p4 = pnand %p8750_p3, %p8744_p0 }
 0x84f   : > { %17359 = vst [vmem:[#allocation31_spill] sm:$0xff] %v14121_v4  ;;  %v14131_v10 = vmul.f32 %v14047_v15, %v17360_v49 }
 0x850   : > { %v5558_v1 = vsel %vm2743_vm9, %v5557_v56, %v5553_v50  ;;  %8295 = vmatpush3.bf16.msra.mxu0 %v5210_v20  ;;  %v17362_v50 = vld [vmem:[#allocation208_spill] sm:$0xff]  ;;  %v6616_v13 = vunpack.c.l.b16 %v14127_v27 }
 0x851   : > { %v14135_v60 = vpop.permute.xlu0 %5859  ;;  %v5501_v38 = vpop.permute.xlu1 %5500  ;;  %8296 = vmatprep.subr.bf16.mxu0 %v17346_v5  ;;  %v5563_v2 = vsel %vm17361_vm12, %v5562_v23, %v5558_v1  ;;  %v14143_v26 = vmul.f32 %v14047_v15, %v17362_v50  ;;  %v14149_v49 = vpack.c.bf16 %v14131_v10, %v14121_v4  ;;  %v17370_v4 = vld [vmem:[#allocation174_spill] sm:$0xff]  ;;  %vm17398_vm12 = vcmask 392512  }
 0x852   : > { %v5567_v56 = vrot.slane %v5501_v38, %v11536_v8  ;;  %6631 = vperm.xlu0 %8457, %v6614_v35   ;;  %6272 = vperm.xlu1 %8456, %v6237_v43   ;;  %v14153_v35 = vmul.f32 %v14047_v15, %v17365_v61 }
 0x853   : > { %17363 = vst [vmem:[#allocation271_spill] sm:$0xff] %v14143_v26  ;;  %v6618_v33 = vunpack.c.l.b16 %v14149_v49 }
 0x854   : > { %v5568_v20 = vsel %vm17364_vm11, %v5567_v56, %v5563_v2  ;;  %17366 = vst [vmem:[#allocation33_spill] sm:$0xff] %v14153_v35  ;;  %8297 = vmatpush3.bf16.msra.mxu0 %v5211_v40  ;;  %v6241_v56 = vunpack.c.h.b16 %v13869_v9  ;;  %v17368_v2 = vld [vmem:[#allocation212_spill] sm:$0xff]  ;;  %v14171_v50 = vpack.c.bf16 %v14153_v35, %v14143_v26  ;;  %v5582_v9 = vrot.slane %v13897_v30, %v11552_v17  ;;  %v17376_v35 = vld [vmem:[#allocation255_spill] sm:$0xff] }
 0x855   : > { %v14157_v43 = vpop.permute.xlu0 %5865  ;;  %v5507_v1 = vpop.permute.xlu1 %5506  ;;  %8298 = vmatprep.subr.bf16.mxu0 %v17346_v5  ;;  %v5573_v38 = vsel %vm17367_vm0, %v5572_v28, %v5568_v20  ;;  %v14165_v61 = vmul.f32 %v14047_v15, %v17368_v2  ;;  %v17373_v20 = vld [vmem:[#allocation49_spill] sm:$0xff]  ;;  %v17375_v26 = vld [vmem:[#allocation88_spill] sm:$0xff]  ;;  %vm17402_vm11 = vcmask 458112   ;;  %vm17407_vm0 = vcmask 589312  }
 0x856   : > { %v5577_v23 = vrot.slane %v5507_v1, %v11542_v29  ;;  %6637 = vperm.xlu0 %8457, %v6616_v13   ;;  %6278 = vperm.xlu1 %8456, %v6239_v63   ;;  %v14175_v13 = vmul.f32 %v14047_v15, %v17370_v4  ;;  %v17372_v63 = vld [vmem:[#allocation48_spill] sm:$0xff]  ;;  %v6243_v4 = vunpack.c.h.b16 %v13887_v36  ;;  %v6620_v30 = vunpack.c.l.b16 %v14171_v50 }
 0x857   : > { %17369 = vst [vmem:[#allocation272_spill] sm:$0xff] %v14165_v61  ;;  %v17374_v28 = vpack.c.bf16 %v17372_v63, %v17373_v20  ;;  %v14190_v63 = vmul.f32 %v14047_v15, %v17375_v26  ;;  %v5592_v36 = vrot.slane %v13923_v59, %v17027_v48 }
 0x858   : > { %v5578_v40 = vsel %vm2771_vm13, %v5577_v23, %v5573_v38  ;;  %17371 = vst [vmem:[#allocation195_spill] sm:$0xff] %v14175_v13 }
 0x859   : > { %8299 = vmatpush3.bf16.msra.mxu0 %v17374_v28  ;;  %v14182_v1 = vpop.permute.xlu0 %5871  ;;  %v5513_v23 = vpop.permute.xlu1 %5512  ;;  %v5583_v2 = vsel %vm2778_vm14, %v5582_v9, %v5578_v40  ;;  %v14196_v28 = vpack.c.bf16 %v14175_v13, %v14165_v61  ;;  %v17379_v40 = vld [vmem:[#allocation53_spill] sm:$0xff]  ;;  %v17381_v61 = vld [vmem:[#allocation226_spill] sm:$0xff]  ;;  %v17383_v13 = vld [vmem:[#allocation184_spill] sm:$0xff] }
 0x85a   : > { %8300 = vmatprep.subr.bf16.mxu0 %v17346_v5  ;;  %v5587_v38 = vrot.slane %v5513_v23, %v17021_v34  ;;  %6643 = vperm.xlu0 %8457, %v6618_v33   ;;  %v14200_v33 = vmul.f32 %v14047_v15, %v17376_v35  ;;  %v6422_v35 = vunpack.c.h.b16 %v13919_v51 }
 0x85b   : > { %6284 = vperm.xlu1 %8456, %v6241_v56   ;;  %v17378_v56 = vld [vmem:[#allocation52_spill] sm:$0xff]  ;;  %v6622_v59 = vunpack.c.l.b16 %v14196_v28 }
 0x85c   : > { %v5588_v20 = vsel %vm2785_vm15, %v5587_v38, %v5583_v2  ;;  %17377 = vst [vmem:[#allocation273_spill] sm:$0xff] %v14200_v33  ;;  %v17380_v9 = vpack.c.bf16 %v17378_v56, %v17379_v40  ;;  %v14215_v56 = vmul.f32 %v14047_v15, %v17381_v61 }
 0x85d   : > { %v14207_v26 = vpop.permute.xlu0 %5877  ;;  %v5519_v23 = vpop.permute.xlu1 %5518  ;;  %v5593_v2 = vsel %vm2792_vm1, %v5592_v36, %v5588_v20  ;;  %v17386_v20 = vld [vmem:[#allocation57_spill] sm:$0xff] }
 0x85e   : > { %8301 = vmatpush3.bf16.msra.mxu0 %v17380_v9  ;;  %v5597_v38 = vrot.slane %v5519_v23, %v17030_v3  ;;  %6649 = vperm.xlu0 %8457, %v6620_v30   ;;  %17382 = vst [vmem:[#allocation196_spill] sm:$0xff] %v14215_v56  ;;  %v14221_v9 = vpack.c.bf16 %v14200_v33, %v14190_v63  ;;  %v17388_v33 = vld [vmem:[#allocation220_spill] sm:$0xff] }
 0x85f   : > { %8302 = vmatprep.subr.bf16.mxu0 %v17346_v5  ;;  %6290 = vperm.xlu1 %8456, %v6243_v4   ;;  %v14225_v30 = vmul.f32 %v14047_v15, %v17383_v13  ;;  %v17385_v4 = vld [vmem:[#allocation56_spill] sm:$0xff]  ;;  %v6424_v13 = vunpack.c.h.b16 %v13943_v7  ;;  %v5725_v7 = vrot.slane %v13969_v55, %v11493_v24 }
 0x860   : > { %v5598_v40 = vsel %vm2799_vm2, %v5597_v38, %v5593_v2  ;;  %v17387_v36 = vpack.c.bf16 %v17385_v4, %v17386_v20  ;;  %v5716_v38 = vrot.slane %v13946_v44, %v11488_v31  ;;  %v14239_v4 = vmul.f32 %v14047_v15, %v17388_v33  ;;  %v17389_v44 = vld [vmem:[#allocation262_spill] sm:$0xff] }
 0x861   : > { %17384 = vst [vmem:[#allocation288_spill] sm:$0xff] %v14225_v30  ;;  %v5599_v51 = vpack.c.b16 %v5598_v40, %v5598_v40  ;;  %v14230_v23 = vpop.permute.xlu0 %5883  ;;  %v5670_v61 = vpop.permute.xlu1 %5669  ;;  %v6624_v20 = vunpack.c.l.b16 %v14221_v9 }
 0x862   : > { %8303 = vmatpush3.bf16.msra.mxu0 %v17387_v36  ;;  %v5720_v2 = vrot.slane %v5670_v61, %v11481_v53  ;;  %6655 = vperm.xlu0 %8457, %v6622_v59   ;;  %v14245_v36 = vpack.c.bf16 %v14225_v30, %v14215_v56  ;;  %v14249_v61 = vmul.f32 %v14047_v15, %v17389_v44  ;;  %v17392_v59 = vld [vmem:[#allocation97_spill] sm:$0xff]  ;;  %v17395_v30 = vld [vmem:[#allocation99_spill] sm:$0xff] }
 0x863   : > { %8328 = vmatprep.subr.bf16.mxu0 %v17346_v5  ;;  %6441 = vperm.xlu1 %8456, %v6422_v35   ;;  %v17391_v35 = vld [vmem:[#allocation96_spill] sm:$0xff] }
 0x864   : > { %8285 = vmatmul.mubr.bf16.vlgmr.msra.gmra.mrb[4].mxu1 %v5599_v51  ;;  %v5721_v40 = vsel %vm2701_vm3, %v5720_v2, %v5716_v38  ;;  %17390 = vst [vmem:[#allocation20_spill] sm:$0xff] %v14249_v61  ;;  %v17393_v51 = vpack.c.bf16 %v17391_v35, %v17392_v59  ;;  %v6626_v35 = vunpack.c.l.b16 %v14245_v36  ;;  %v6426_v59 = vunpack.c.h.b16 %v13953_v45 }
 0x865   : > { %8324 = vmatprep.mubr.msk.bf16.mxu1 %vm17347_vm10, %v17346_v5  ;;  %v14258_v33 = vpop.permute.xlu0 %5889  ;;  %v5676_v38 = vpop.permute.xlu1 %5675  ;;  %v5726_v15 = vsel %vm2708_vm4, %v5725_v7, %v5721_v40  ;;  %v14268_v55 = vpack.c.bf16 %v14249_v61, %v14239_v4 }
 0x866   : > { %8309 = vmatpush3.bf16.msra.mxu1 %v17393_v51  ;;  %v5730_v2 = vrot.slane %v5676_v38, %v11502_v39  ;;  %6661 = vperm.xlu0 %8457, %v6624_v20   ;;  %v17394_v51 = vld [vmem:[#allocation98_spill] sm:$0xff]  ;;  %v5735_v20 = vrot.slane %v13992_v42, %v11506_v57 }
 0x867   : > { %8310 = vmatprep.subr.bf16.mxu1 %v17346_v5  ;;  %6447 = vperm.xlu1 %8456, %v6424_v13   ;;  %v17396_v56 = vpack.c.bf16 %v17394_v51, %v17395_v30  ;;  %v17399_v30 = vld [vmem:[#allocation100_spill] sm:$0xff]  ;;  %v5745_v51 = vrot.slane %v14014_v47, %v11518_v46  ;;  %v5755_v47 = vrot.slane %v14035_v19, %v11529_v18 }
 0x868   : > { %v5731_v44 = vsel %vm2715_vm5, %v5730_v2, %v5726_v15  ;;  %v6628_v2 = vunpack.c.l.b16 %v14268_v55  ;;  %v17400_v15 = vld [vmem:[#allocation101_spill] sm:$0xff]  ;;  %v5765_v19 = vrot.slane %v14063_v58, %v11539_v54  ;;  %v5775_v58 = vrot.slane %v14087_v37, %v11552_v17 }
 0x869   : > { %v14275_v13 = vpop.permute.xlu0 %5895  ;;  %v5682_v40 = vpop.permute.xlu1 %5681  ;;  %v5736_v45 = vsel %vm17397_vm6, %v5735_v20, %v5731_v44  ;;  %v17401_v42 = vpack.c.bf16 %v17399_v30, %v17400_v15  ;;  %v17403_v20 = vld [vmem:[#allocation102_spill] sm:$0xff]  ;;  %vm17408_vm6 = vcmask 654912   ;;  %v5785_v37 = vrot.slane %v14111_v14, %v17027_v48 }
 0x86a   : > { %8311 = vmatpush3.bf16.msra.mxu1 %v17396_v56  ;;  %v5740_v7 = vrot.slane %v5682_v40, %v11515_v6  ;;  %6667 = vperm.xlu0 %8457, %v6626_v35   ;;  %v6428_v56 = vunpack.c.h.b16 %v13985_v21 }
 0x86b   : > { %8312 = vmatprep.subr.bf16.mxu1 %v17346_v5  ;;  %6453 = vperm.xlu1 %8456, %v6426_v59   ;;  %v6430_v59 = vunpack.c.h.b16 %v14006_v22 }
 0x86c   : > { %v5741_v38 = vsel %vm17398_vm12, %v5740_v7, %v5736_v45  ;;  %v17404_v7 = vld [vmem:[#allocation103_spill] sm:$0xff]  ;;  %vm17413_vm12 = vcmask 720512  }
 0x86d   : > { %v14288_v61 = vpop.permute.xlu0 %5901  ;;  %v5688_v40 = vpop.permute.xlu1 %5687  ;;  %v5746_v35 = vsel %vm17402_vm11, %v5745_v51, %v5741_v38  ;;  %v17405_v45 = vpack.c.bf16 %v17403_v20, %v17404_v7  ;;  %v17409_v51 = vld [vmem:[#allocation106_spill] sm:$0xff]  ;;  %v17412_v7 = vld [vmem:[#allocation205_spill] sm:$0xff]  ;;  %vm17434_vm11 = vcmask 326912  }
 0x86e   : > { %8313 = vmatpush3.bf16.msra.mxu1 %v17401_v42  ;;  %v5750_v44 = vrot.slane %v5688_v40, %v11526_v0  ;;  %6673 = vperm.xlu0 %8457, %v6628_v2   ;;  %v6432_v42 = vunpack.c.h.b16 %v14029_v25  ;;  %v17410_v40 = vld [vmem:[#allocation107_spill] sm:$0xff] }
 0x86f   : > { %8314 = vmatprep.subr.bf16.mxu1 %v17346_v5  ;;  %6459 = vperm.xlu1 %8456, %v6428_v56   ;;  %v17406_v56 = vld [vmem:[#allocation202_spill] sm:$0xff] }
 0x870   : > { %v5751_v21 = vsel %vm2743_vm9, %v5750_v44, %v5746_v35  ;;  %v17411_v44 = vpack.c.bf16 %v17409_v51, %v17410_v40  ;;  %v17417_v51 = vld [vmem:[#allocation140_spill] sm:$0xff]  ;;  %v6436_v40 = vunpack.c.h.b16 %v14079_v62 }
 0x871   : > { %v14300_v30 = vpop.permute.xlu0 %6052  ;;  %v5694_v15 = vpop.permute.xlu1 %5693  ;;  %v5756_v38 = vsel %vm17407_vm0, %v5755_v47, %v5751_v21  ;;  %v17414_v47 = vld [vmem:[#allocation108_spill] sm:$0xff]  ;;  %vm17435_vm0 = vcmask 392512  }
 0x872   : > { %8315 = vmatpush3.bf16.msra.mxu1 %v17405_v45  ;;  %v5760_v2 = vrot.slane %v5694_v15, %v11536_v8  ;;  %6952 = vperm.xlu0 %8457, %v17406_v56   ;;  %v6434_v45 = vunpack.c.h.b16 %v14053_v52  ;;  %v17415_v15 = vld [vmem:[#allocation109_spill] sm:$0xff] }
 0x873   : > { %8316 = vmatprep.subr.bf16.mxu1 %v17346_v5  ;;  %6465 = vperm.xlu1 %8456, %v6430_v59  }
 0x874   : > { %v5761_v22 = vsel %vm17408_vm6, %v5760_v2, %v5756_v38  ;;  %v17416_v2 = vpack.c.bf16 %v17414_v47, %v17415_v15  ;;  %v6615_v47 = vunpack.c.h.b16 %v14103_v41  ;;  %v17422_v15 = vld [vmem:[#allocation112_spill] sm:$0xff]  ;;  %vm17440_vm6 = vcmask 458112  }
 0x875   : > { %v14313_v35 = vpop.permute.xlu0 %6058  ;;  %v5700_v20 = vpop.permute.xlu1 %5699  ;;  %v5766_v21 = vsel %vm17413_vm12, %v5765_v19, %v5761_v22  ;;  %v17419_v19 = vld [vmem:[#allocation111_spill] sm:$0xff]  ;;  %vm17445_vm12 = vcmask 589312  }
 0x876   : > { %8317 = vmatpush3.bf16.msra.mxu1 %v17411_v44  ;;  %v5770_v59 = vrot.slane %v5700_v20, %v11542_v29  ;;  %6958 = vperm.xlu0 %8457, %v17412_v7   ;;  %v17418_v44 = vld [vmem:[#allocation110_spill] sm:$0xff] }
 0x877   : > { %8318 = vmatprep.subr.bf16.mxu1 %v17346_v5  ;;  %6471 = vperm.xlu1 %8456, %v6432_v42   ;;  %v17420_v20 = vpack.c.bf16 %v17418_v44, %v17419_v19  ;;  %v17426_v44 = vld [vmem:[#allocation58_spill] sm:$0xff]  ;;  %v17427_v19 = vld [vmem:[#allocation59_spill] sm:$0xff] }
 0x878   : > { %v5771_v25 = vsel %vm2771_vm13, %v5770_v59, %v5766_v21 }
 0x879   : > { %v14326_v56 = vpop.permute.xlu0 %6064  ;;  %v5706_v38 = vpop.permute.xlu1 %5705  ;;  %v5776_v22 = vsel %vm2778_vm14, %v5775_v58, %v5771_v25 }
 0x87a   : > { %8319 = vmatpush3.bf16.msra.mxu1 %v17416_v2  ;;  %v5780_v42 = vrot.slane %v5706_v38, %v17021_v34  ;;  %6964 = vperm.xlu0 %8457, %v17417_v51   ;;  %v17423_v2 = vld [vmem:[#allocation113_spill] sm:$0xff]  ;;  %v5909_v51 = vrot.slane %v14135_v60, %v11488_v31  ;;  %v5918_v60 = vrot.slane %v14157_v43, %v11493_v24 }
 0x87b   : > { %8320 = vmatprep.subr.bf16.mxu1 %v17346_v5  ;;  %6477 = vperm.xlu1 %8456, %v6434_v45   ;;  %v17421_v45 = vld [vmem:[#allocation86_spill] sm:$0xff]  ;;  %v17424_v58 = vpack.c.bf16 %v17422_v15, %v17423_v2  ;;  %v17431_v15 = vld [vmem:[#allocation63_spill] sm:$0xff]  ;;  %v5928_v43 = vrot.slane %v14182_v1, %v11506_v57  ;;  %v5938_v1 = vrot.slane %v14207_v26, %v11518_v46 }
 0x87c   : > { %v5781_v52 = vsel %vm2785_vm15, %v5780_v42, %v5776_v22  ;;  %v5948_v26 = vrot.slane %v14230_v23, %v11529_v18  ;;  %v5958_v23 = vrot.slane %v14258_v33, %v11539_v54  ;;  %v5968_v33 = vrot.slane %v14275_v13, %v11552_v17 }
 0x87d   : > { %v14339_v59 = vpop.permute.xlu0 %6070  ;;  %v5712_v7 = vpop.permute.xlu1 %5711  ;;  %v5786_v25 = vsel %vm2792_vm1, %v5785_v37, %v5781_v52  ;;  %v17425_v52 = vld [vmem:[#allocation160_spill] sm:$0xff]  ;;  %v5978_v13 = vrot.slane %v14288_v61, %v17027_v48 }
 0x87e   : > { %8321 = vmatpush3.bf16.msra.mxu1 %v17420_v20  ;;  %v5790_v21 = vrot.slane %v5712_v7, %v17030_v3  ;;  %6970 = vperm.xlu0 %8457, %v17421_v45   ;;  %v17428_v20 = vpack.c.bf16 %v17426_v44, %v17427_v19  ;;  %v17429_v45 = vld [vmem:[#allocation237_spill] sm:$0xff] }
 0x87f   : > { %8322 = vmatprep.subr.bf16.mxu1 %v17346_v5  ;;  %6483 = vperm.xlu1 %8456, %v6436_v40   ;;  %v6617_v40 = vunpack.c.h.b16 %v14127_v27 }
 0x880   : > { %v5791_v62 = vsel %vm2799_vm2, %v5790_v21, %v5786_v25 }
 0x881   : > { %v5792_v14 = vpack.c.b16 %v5791_v62, %v5791_v62  ;;  %v14350_v38 = vpop.permute.xlu0 %6076  ;;  %v5863_v42 = vpop.permute.xlu1 %5862  ;;  %v6619_v62 = vunpack.c.h.b16 %v14149_v49 }
 0x882   : > { %8323 = vmatpush3.bf16.msra.mxu1 %v17424_v58  ;;  %v5913_v22 = vrot.slane %v5863_v42, %v11481_v53  ;;  %6976 = vperm.xlu0 %8457, %v17425_v52   ;;  %v6621_v52 = vunpack.c.h.b16 %v14171_v50 }
 0x883   : > { %8348 = vmatprep.subr.bf16.mxu1 %v17346_v5  ;;  %6634 = vperm.xlu1 %8456, %v6615_v47   ;;  %v17430_v47 = vld [vmem:[#allocation62_spill] sm:$0xff] }
 0x884   : > { %8305 = vmatmul.mubr.bf16.vlgmr.msra.gmra.mrb[8].mxu0 %v5792_v14  ;;  %v5914_v41 = vsel %vm2701_vm3, %v5913_v22, %v5909_v51  ;;  %v17432_v2 = vpack.c.bf16 %v17430_v47, %v17431_v15  ;;  %v17433_v51 = vld [vmem:[#allocation244_spill] sm:$0xff] }
 0x885   : > { %8329 = vmatpush3.bf16.msra.mxu0 %v17428_v20  ;;  %8344 = vmatprep.mubr.msk.bf16.mxu0 %vm17347_vm10, %v17346_v5  ;;  %v14366_v37 = vpop.permute.xlu0 %6082  ;;  %v5869_v7 = vpop.permute.xlu1 %5868  ;;  %v5919_v27 = vsel %vm2708_vm4, %v5918_v60, %v5914_v41  ;;  %v17436_v41 = vld [vmem:[#allocation66_spill] sm:$0xff] }
 0x886   : > { %8330 = vmatprep.subr.bf16.mxu0 %v17346_v5  ;;  %v5923_v21 = vrot.slane %v5869_v7, %v11502_v39  ;;  %6982 = vperm.xlu0 %8457, %v17429_v45   ;;  %v17439_v7 = vld [vmem:[#allocation83_spill] sm:$0xff]  ;;  %v6623_v45 = vunpack.c.h.b16 %v14196_v28 }
 0x887   : > { %6640 = vperm.xlu1 %8456, %v6617_v40   ;;  %v17437_v40 = vld [vmem:[#allocation67_spill] sm:$0xff] }
 0x888   : > { %v5924_v25 = vsel %vm2715_vm5, %v5923_v21, %v5919_v27  ;;  %v17438_v44 = vpack.c.bf16 %v17436_v41, %v17437_v40  ;;  %v17441_v27 = vld [vmem:[#allocation68_spill] sm:$0xff] }
 0x889   : > { %8331 = vmatpush3.bf16.msra.mxu0 %v17432_v2  ;;  %v14379_v58 = vpop.permute.xlu0 %6088  ;;  %v5875_v14 = vpop.permute.xlu1 %5874  ;;  %v5929_v22 = vsel %vm17434_vm11, %v5928_v43, %v5924_v25  ;;  %v17442_v25 = vld [vmem:[#allocation69_spill] sm:$0xff]  ;;  %v17444_v43 = vld [vmem:[#allocation191_spill] sm:$0xff]  ;;  %vm17446_vm11 = vcmask 654912  }
 0x88a   : > { %8332 = vmatprep.subr.bf16.mxu0 %v17346_v5  ;;  %v5933_v42 = vrot.slane %v5875_v14, %v11515_v6  ;;  %6988 = vperm.xlu0 %8457, %v17433_v51   ;;  %v17447_v51 = vld [vmem:[#allocation72_spill] sm:$0xff] }
 0x88b   : > { %6646 = vperm.xlu1 %8456, %v6619_v62   ;;  %v17443_v62 = vpack.c.bf16 %v17441_v27, %v17442_v25  ;;  %v17455_v25 = vld [vmem:[#allocation42_spill] sm:$0xff] }
 0x88c   : > { %v5934_v49 = vsel %vm17435_vm0, %v5933_v42, %v5929_v22  ;;  %v6625_v42 = vunpack.c.h.b16 %v14221_v9  ;;  %v17448_v22 = vld [vmem:[#allocation73_spill] sm:$0xff]  ;;  %vm17451_vm0 = vcmask 720512  }
 0x88d   : > { %8333 = vmatpush3.bf16.msra.mxu0 %v17438_v44  ;;  %v14392_v19 = vpop.permute.xlu0 %6094  ;;  %v5881_v20 = vpop.permute.xlu1 %5880  ;;  %v5939_v21 = vsel %vm17440_vm6, %v5938_v1, %v5934_v49  ;;  %v17449_v49 = vpack.c.bf16 %v17447_v51, %v17448_v22  ;;  %v17450_v44 = vld [vmem:[#allocation74_spill] sm:$0xff]  ;;  %v17459_v51 = vld [vmem:[#allocation93_spill] sm:$0xff]  ;;  %vm17475_vm6 = vcmask 326912  }
 0x88e   : > { %8334 = vmatprep.subr.bf16.mxu0 %v17346_v5  ;;  %v5943_v60 = vrot.slane %v5881_v20, %v11526_v0  ;;  %6994 = vperm.xlu0 %8457, %v17439_v7   ;;  %v6627_v20 = vunpack.c.h.b16 %v14245_v36  ;;  %v17453_v7 = vld [vmem:[#allocation77_spill] sm:$0xff] }
 0x88f   : > { %6652 = vperm.xlu1 %8456, %v6621_v52  }
 0x890   : > { %v5944_v50 = vsel %vm2743_vm9, %v5943_v60, %v5939_v21  ;;  %v17452_v60 = vld [vmem:[#allocation76_spill] sm:$0xff] }
 0x891   : > { %8335 = vmatpush3.bf16.msra.mxu0 %v17443_v62  ;;  %v14405_v47 = vpop.permute.xlu0 %6245  ;;  %v5887_v15 = vpop.permute.xlu1 %5886  ;;  %v5949_v14 = vsel %vm17445_vm12, %v5948_v26, %v5944_v50  ;;  %v17454_v21 = vpack.c.bf16 %v17452_v60, %v17453_v7  ;;  %v6629_v26 = vunpack.c.h.b16 %v14268_v55  ;;  %v17464_v60 = vld [vmem:[#allocation171_spill] sm:$0xff]  ;;  %vm17476_vm12 = vcmask 392512  }
 0x892   : > { %8336 = vmatprep.subr.bf16.mxu0 %v17346_v5  ;;  %v5953_v2 = vrot.slane %v5887_v15, %v11536_v8  ;;  %7000 = vperm.xlu0 %8457, %v17444_v43   ;;  %v17456_v15 = vld [vmem:[#allocation78_spill] sm:$0xff] }
 0x893   : > { %6658 = vperm.xlu1 %8456, %v6623_v45  }
 0x894   : > { %v5954_v28 = vsel %vm17446_vm11, %v5953_v2, %v5949_v14  ;;  %v17457_v2 = vld [vmem:[#allocation79_spill] sm:$0xff]  ;;  %vm17482_vm11 = vcmask 458112  }
 0x895   : > { %8337 = vmatpush3.bf16.msra.mxu0 %v17449_v49  ;;  %v14418_v52 = vpop.permute.xlu0 %6251  ;;  %v5893_v41 = vpop.permute.xlu1 %5892  ;;  %v5959_v1 = vsel %vm17451_vm0, %v5958_v23, %v5954_v28  ;;  %v17458_v43 = vpack.c.bf16 %v17456_v15, %v17457_v2  ;;  %v17460_v49 = vld [vmem:[#allocation94_spill] sm:$0xff]  ;;  %v17461_v23 = vld [vmem:[#allocation95_spill] sm:$0xff]  ;;  %vm17488_vm0 = vcmask 589312  }
 0x896   : > { %8338 = vmatprep.subr.bf16.mxu0 %v17346_v5  ;;  %v5963_v40 = vrot.slane %v5893_v41, %v11542_v29  ;;  %7006 = vperm.xlu0 %8457, %v17450_v44   ;;  %v17462_v41 = vpack.c.bf16 %v17460_v49, %v17461_v23  ;;  %v17474_v49 = vld [vmem:[#allocation30_spill] sm:$0xff] }
 0x897   : > { %6664 = vperm.xlu1 %8456, %v6625_v42  }
 0x898   : > { %v5964_v9 = vsel %vm2771_vm13, %v5963_v40, %v5959_v1  ;;  %v6102_v1 = vrot.slane %v14300_v30, %v11488_v31 }
 0x899   : > { %8339 = vmatpush3.bf16.msra.mxu0 %v17454_v21  ;;  %v14431_v50 = vpop.permute.xlu0 %6257  ;;  %v5899_v45 = vpop.permute.xlu1 %5898  ;;  %v5969_v62 = vsel %vm2778_vm14, %v5968_v33, %v5964_v9  ;;  %v17465_v21 = vld [vmem:[#allocation114_spill] sm:$0xff]  ;;  %v17466_v33 = vld [vmem:[#allocation115_spill] sm:$0xff] }
 0x89a   : > { %8340 = vmatprep.subr.bf16.mxu0 %v17346_v5  ;;  %v5973_v27 = vrot.slane %v5899_v45, %v17021_v34  ;;  %7012 = vperm.xlu0 %8457, %v17455_v25   ;;  %v17467_v45 = vpack.c.bf16 %v17465_v21, %v17466_v33  ;;  %v17481_v21 = vld [vmem:[#allocation165_spill] sm:$0xff] }
 0x89b   : > { %6670 = vperm.xlu1 %8456, %v6627_v20   ;;  %v17463_v20 = vld [vmem:[#allocation60_spill] sm:$0xff] }
 0x89c   : > { %v5974_v36 = vsel %vm2785_vm15, %v5973_v27, %v5969_v62  ;;  %v6111_v27 = vrot.slane %v14313_v35, %v11493_v24  ;;  %v6121_v35 = vrot.slane %v14326_v56, %v11506_v57  ;;  %v6131_v56 = vrot.slane %v14339_v59, %v11518_v46 }
 0x89d   : > { %8341 = vmatpush3.bf16.msra.mxu0 %v17458_v43  ;;  %v14444_v14 = vpop.permute.xlu0 %6263  ;;  %v5905_v28 = vpop.permute.xlu1 %5904  ;;  %v5979_v22 = vsel %vm2792_vm1, %v5978_v13, %v5974_v36  ;;  %v17468_v36 = vld [vmem:[#allocation218_spill] sm:$0xff]  ;;  %v17471_v13 = vld [vmem:[#allocation119_spill] sm:$0xff]  ;;  %v6141_v59 = vrot.slane %v14350_v38, %v11529_v18  ;;  %v6151_v38 = vrot.slane %v14366_v37, %v11539_v54  ;;  %v6161_v37 = vrot.slane %v14379_v58, %v11552_v17 }
 0x89e   : > { %8342 = vmatprep.subr.bf16.mxu0 %v17346_v5  ;;  %v5983_v42 = vrot.slane %v5905_v28, %v17030_v3  ;;  %7018 = vperm.xlu0 %8457, %v17459_v51   ;;  %v17470_v43 = vld [vmem:[#allocation118_spill] sm:$0xff]  ;;  %v6171_v58 = vrot.slane %v14392_v19, %v17027_v48 }
 0x89f   : > { %6676 = vperm.xlu1 %8456, %v6629_v26   ;;  %v17469_v26 = vld [vmem:[#allocation197_spill] sm:$0xff]  ;;  %v17472_v28 = vpack.c.bf16 %v17470_v43, %v17471_v13  ;;  %v17487_v43 = vld [vmem:[#allocation35_spill] sm:$0xff] }
 0x8a0   : > { %v5984_v55 = vsel %vm2799_vm2, %v5983_v42, %v5979_v22 }
 0x8a1   : > { %8343 = vmatpush3.bf16.msra.mxu0 %v17462_v41  ;;  %v5985_v40 = vpack.c.b16 %v5984_v55, %v5984_v55  ;;  %v14454_v61 = vpop.permute.xlu0 %6269  ;;  %v6056_v44 = vpop.permute.xlu1 %6055  ;;  %v17473_v55 = vld [vmem:[#allocation232_spill] sm:$0xff] }
 0x8a2   : > { %8368 = vmatprep.subr.bf16.mxu0 %v17346_v5  ;;  %v6106_v9 = vrot.slane %v6056_v44, %v11481_v53  ;;  %7024 = vperm.xlu0 %8457, %v17463_v20   ;;  %v17478_v44 = vld [vmem:[#allocation121_spill] sm:$0xff] }
 0x8a3   : > { %6955 = vperm.xlu1 %8456, %v17464_v60   ;;  %8325 = vmatmul.mubr.bf16.vlgmr.msra.gmra.mrb[8].mxu1 %v5985_v40  ;;  %v17477_v40 = vld [vmem:[#allocation120_spill] sm:$0xff] }
 0x8a4   : > { %v6107_v7 = vsel %vm2701_vm3, %v6106_v9, %v6102_v1  ;;  %8349 = vmatpush3.bf16.msra.mxu1 %v17467_v45  ;;  %8364 = vmatprep.mubr.msk.bf16.mxu1 %vm17347_vm10, %v17346_v5  ;;  %v17479_v1 = vpack.c.bf16 %v17477_v40, %v17478_v44  ;;  %v17494_v40 = vld [vmem:[#allocation150_spill] sm:$0xff] }
 0x8a5   : > { %v14470_v30 = vpop.permute.xlu0 %6275  ;;  %v6062_v25 = vpop.permute.xlu1 %6061  ;;  %8350 = vmatprep.subr.bf16.mxu1 %v17346_v5  ;;  %v6112_v15 = vsel %vm2708_vm4, %v6111_v27, %v6107_v7  ;;  %v17480_v7 = vld [vmem:[#allocation233_spill] sm:$0xff]  ;;  %v17483_v27 = vld [vmem:[#allocation122_spill] sm:$0xff] }
 0x8a6   : > { %v6116_v62 = vrot.slane %v6062_v25, %v11502_v39  ;;  %7030 = vperm.xlu0 %8457, %v17468_v36   ;;  %v17484_v25 = vld [vmem:[#allocation123_spill] sm:$0xff] }
 0x8a7   : > { %6961 = vperm.xlu1 %8456, %v17469_v26  }
 0x8a8   : > { %v6117_v2 = vsel %vm2715_vm5, %v6116_v62, %v6112_v15  ;;  %8351 = vmatpush3.bf16.msra.mxu1 %v17472_v28  ;;  %v17485_v62 = vpack.c.bf16 %v17483_v27, %v17484_v25  ;;  %v17500_v27 = vld [vmem:[#allocation243_spill] sm:$0xff] }
 0x8a9   : > { %v14483_v42 = vpop.permute.xlu0 %6281  ;;  %v6068_v51 = vpop.permute.xlu1 %6067  ;;  %8352 = vmatprep.subr.bf16.mxu1 %v17346_v5  ;;  %v6122_v23 = vsel %vm17475_vm6, %v6121_v35, %v6117_v2  ;;  %v17486_v2 = vld [vmem:[#allocation154_spill] sm:$0xff]  ;;  %vm17489_vm6 = vcmask 654912  }
 0x8aa   : > { %v6126_v22 = vrot.slane %v6068_v51, %v11515_v6  ;;  %7036 = vperm.xlu0 %8457, %v17473_v55   ;;  %v17490_v35 = vld [vmem:[#allocation126_spill] sm:$0xff]  ;;  %v17491_v51 = vld [vmem:[#allocation127_spill] sm:$0xff] }
 0x8ab   : > { %6967 = vperm.xlu1 %8456, %v17474_v49  }
 0x8ac   : > { %v6127_v41 = vsel %vm17476_vm12, %v6126_v22, %v6122_v23  ;;  %8353 = vmatpush3.bf16.msra.mxu1 %v17479_v1  ;;  %v17492_v22 = vpack.c.bf16 %v17490_v35, %v17491_v51  ;;  %vm17495_vm12 = vcmask 720512   ;;  %v17505_v35 = vld [vmem:[#allocation80_spill] sm:$0xff] }
 0x8ad   : > { %v14496_v9 = vpop.permute.xlu0 %6287  ;;  %v6074_v20 = vpop.permute.xlu1 %6073  ;;  %8354 = vmatprep.subr.bf16.mxu1 %v17346_v5  ;;  %v6132_v33 = vsel %vm17482_vm11, %v6131_v56, %v6127_v41  ;;  %v17493_v41 = vld [vmem:[#allocation180_spill] sm:$0xff]  ;;  %vm17521_vm11 = vcmask 326912  }
 0x8ae   : > { %v6136_v60 = vrot.slane %v6074_v20, %v11526_v0  ;;  %7042 = vperm.xlu0 %8457, %v17480_v7   ;;  %v17496_v56 = vld [vmem:[#allocation128_spill] sm:$0xff]  ;;  %v17497_v20 = vld [vmem:[#allocation129_spill] sm:$0xff] }
 0x8af   : > { %6973 = vperm.xlu1 %8456, %v17481_v21  }
 0x8b0   : > { %v6137_v45 = vsel %vm2743_vm9, %v6136_v60, %v6132_v33  ;;  %8355 = vmatpush3.bf16.msra.mxu1 %v17485_v62  ;;  %v17498_v60 = vpack.c.bf16 %v17496_v56, %v17497_v20  ;;  %v17509_v56 = vld [vmem:[#allocation260_spill] sm:$0xff]  ;;  %v17510_v20 = vld [vmem:[#allocation46_spill] sm:$0xff] }
 0x8b1   : > { %v14509_v36 = vpop.permute.xlu0 %6438  ;;  %v6080_v26 = vpop.permute.xlu1 %6079  ;;  %8356 = vmatprep.subr.bf16.mxu1 %v17346_v5  ;;  %v6142_v13 = vsel %vm17488_vm0, %v6141_v59, %v6137_v45  ;;  %v17499_v45 = vld [vmem:[#allocation251_spill] sm:$0xff]  ;;  %v17501_v59 = vld [vmem:[#allocation132_spill] sm:$0xff]  ;;  %vm17522_vm0 = vcmask 392512  }
 0x8b2   : > { %v6146_v15 = vrot.slane %v6080_v26, %v11536_v8  ;;  %7048 = vperm.xlu0 %8457, %v17486_v2   ;;  %v17502_v26 = vld [vmem:[#allocation133_spill] sm:$0xff] }
 0x8b3   : > { %6979 = vperm.xlu1 %8456, %v17487_v43  }
 0x8b4   : > { %v6147_v28 = vsel %vm17489_vm6, %v6146_v15, %v6142_v13  ;;  %8357 = vmatpush3.bf16.msra.mxu1 %v17492_v22  ;;  %v17503_v15 = vpack.c.bf16 %v17501_v59, %v17502_v26  ;;  %v17515_v59 = vld [vmem:[#allocation175_spill] sm:$0xff]  ;;  %vm17528_vm6 = vcmask 458112  }
 0x8b5   : > { %v14522_v55 = vpop.permute.xlu0 %6444  ;;  %v6086_v49 = vpop.permute.xlu1 %6085  ;;  %8358 = vmatprep.subr.bf16.mxu1 %v17346_v5  ;;  %v6152_v44 = vsel %vm17495_vm12, %v6151_v38, %v6147_v28  ;;  %v17504_v28 = vld [vmem:[#allocation259_spill] sm:$0xff]  ;;  %v17506_v38 = vld [vmem:[#allocation136_spill] sm:$0xff]  ;;  %vm17534_vm12 = vcmask 589312  }
 0x8b6   : > { %v6156_v23 = vrot.slane %v6086_v49, %v11542_v29  ;;  %7054 = vperm.xlu0 %8457, %v17493_v41   ;;  %v17507_v49 = vld [vmem:[#allocation137_spill] sm:$0xff] }
 0x8b7   : > { %6985 = vperm.xlu1 %8456, %v17494_v40  }
 0x8b8   : > { %v6157_v1 = vsel %vm2771_vm13, %v6156_v23, %v6152_v44  ;;  %8359 = vmatpush3.bf16.msra.mxu1 %v17498_v60  ;;  %v17508_v23 = vpack.c.bf16 %v17506_v38, %v17507_v49  ;;  %v6295_v44 = vrot.slane %v14405_v47, %v11488_v31  ;;  %v17520_v38 = vld [vmem:[#allocation84_spill] sm:$0xff] }
 0x8b9   : > { %v14535_v7 = vpop.permute.xlu0 %6450  ;;  %v6092_v21 = vpop.permute.xlu1 %6091  ;;  %8360 = vmatprep.subr.bf16.mxu1 %v17346_v5  ;;  %v6162_v25 = vsel %vm2778_vm14, %v6161_v37, %v6157_v1  ;;  %v17511_v37 = vld [vmem:[#allocation138_spill] sm:$0xff] }
 0x8ba   : > { %v6166_v33 = vrot.slane %v6092_v21, %v17021_v34  ;;  %7060 = vperm.xlu0 %8457, %v17499_v45   ;;  %v17512_v21 = vld [vmem:[#allocation139_spill] sm:$0xff]  ;;  %v6304_v45 = vrot.slane %v14418_v52, %v11493_v24  ;;  %v6314_v52 = vrot.slane %v14431_v50, %v11506_v57  ;;  %v6324_v50 = vrot.slane %v14444_v14, %v11518_v46 }
 0x8bb   : > { %6991 = vperm.xlu1 %8456, %v17500_v27   ;;  %v6334_v14 = vrot.slane %v14454_v61, %v11529_v18  ;;  %v6344_v61 = vrot.slane %v14470_v30, %v11539_v54  ;;  %v6354_v30 = vrot.slane %v14483_v42, %v11552_v17  ;;  %v6364_v42 = vrot.slane %v14496_v9, %v17027_v48 }
 0x8bc   : > { %v6167_v62 = vsel %vm2785_vm15, %v6166_v33, %v6162_v25  ;;  %8361 = vmatpush3.bf16.msra.mxu1 %v17503_v15  ;;  %v17513_v33 = vpack.c.bf16 %v17511_v37, %v17512_v21  ;;  %v17527_v37 = vld [vmem:[#allocation82_spill] sm:$0xff] }
 0x8bd   : > { %v14548_v2 = vpop.permute.xlu0 %6456  ;;  %v6098_v43 = vpop.permute.xlu1 %6097  ;;  %8362 = vmatprep.subr.bf16.mxu1 %v17346_v5  ;;  %v6172_v51 = vsel %vm2792_vm1, %v6171_v58, %v6167_v62  ;;  %v17514_v62 = vld [vmem:[#allocation245_spill] sm:$0xff]  ;;  %v17516_v58 = vld [vmem:[#allocation142_spill] sm:$0xff] }
 0x8be   : > { %v6176_v13 = vrot.slane %v6098_v43, %v17030_v3  ;;  %7066 = vperm.xlu0 %8457, %v17504_v28   ;;  %v17517_v43 = vld [vmem:[#allocation143_spill] sm:$0xff] }
 0x8bf   : > { %6997 = vperm.xlu1 %8456, %v17505_v35  }
 0x8c0   : > { %v6177_v22 = vsel %vm2799_vm2, %v6176_v13, %v6172_v51  ;;  %8363 = vmatpush3.bf16.msra.mxu1 %v17508_v23  ;;  %v17518_v13 = vpack.c.bf16 %v17516_v58, %v17517_v43  ;;  %v17533_v58 = vld [vmem:[#allocation194_spill] sm:$0xff] }
 0x8c1   : > { %v6178_v19 = vpack.c.b16 %v6177_v22, %v6177_v22  ;;  %v14559_v41 = vpop.permute.xlu0 %6462  ;;  %v6249_v40 = vpop.permute.xlu1 %6248  ;;  %8388 = vmatprep.subr.bf16.mxu1 %v17346_v5  ;;  %v17519_v22 = vld [vmem:[#allocation263_spill] sm:$0xff] }
 0x8c2   : > { %v6299_v1 = vrot.slane %v6249_v40, %v11481_v53  ;;  %7072 = vperm.xlu0 %8457, %v17509_v56   ;;  %v17524_v40 = vld [vmem:[#allocation147_spill] sm:$0xff] }
 0x8c3   : > { %7003 = vperm.xlu1 %8456, %v17510_v20   ;;  %8345 = vmatmul.mubr.bf16.vlgmr.msra.gmra.mrb[12].mxu0 %v6178_v19  ;;  %v17523_v19 = vld [vmem:[#allocation146_spill] sm:$0xff] }
 0x8c4   : > { %v6300_v60 = vsel %vm2701_vm3, %v6299_v1, %v6295_v44  ;;  %8369 = vmatpush3.bf16.msra.mxu0 %v17513_v33  ;;  %8384 = vmatprep.mubr.msk.bf16.mxu0 %vm17347_vm10, %v17346_v5  ;;  %v17525_v44 = vpack.c.bf16 %v17523_v19, %v17524_v40  ;;  %v17540_v19 = vld [vmem:[#allocation230_spill] sm:$0xff] }
 0x8c5   : > { %v14575_v47 = vpop.permute.xlu0 %6468  ;;  %v6255_v27 = vpop.permute.xlu1 %6254  ;;  %8370 = vmatprep.subr.bf16.mxu0 %v17346_v5  ;;  %v6305_v26 = vsel %vm2708_vm4, %v6304_v45, %v6300_v60  ;;  %v17526_v60 = vld [vmem:[#allocation261_spill] sm:$0xff]  ;;  %v17529_v45 = vld [vmem:[#allocation148_spill] sm:$0xff] }
 0x8c6   : > { %v6309_v25 = vrot.slane %v6255_v27, %v11502_v39  ;;  %7078 = vperm.xlu0 %8457, %v17514_v62   ;;  %v17530_v27 = vld [vmem:[#allocation149_spill] sm:$0xff] }
 0x8c7   : > { %7009 = vperm.xlu1 %8456, %v17515_v59  }
 0x8c8   : > { %v6310_v15 = vsel %vm2715_vm5, %v6309_v25, %v6305_v26  ;;  %8371 = vmatpush3.bf16.msra.mxu0 %v17518_v13  ;;  %v17531_v25 = vpack.c.bf16 %v17529_v45, %v17530_v27  ;;  %v17546_v45 = vld [vmem:[#allocation264_spill] sm:$0xff] }
 0x8c9   : > { %v14588_v28 = vpop.permute.xlu0 %6474  ;;  %v6261_v35 = vpop.permute.xlu1 %6260  ;;  %8372 = vmatprep.subr.bf16.mxu0 %v17346_v5  ;;  %v6315_v49 = vsel %vm17521_vm11, %v6314_v52, %v6310_v15  ;;  %v17532_v15 = vld [vmem:[#allocation238_spill] sm:$0xff]  ;;  %vm17535_vm11 = vcmask 654912   ;;  %v17536_v52 = vld [vmem:[#allocation152_spill] sm:$0xff] }
 0x8ca   : > { %v6319_v51 = vrot.slane %v6261_v35, %v11515_v6  ;;  %7084 = vperm.xlu0 %8457, %v17519_v22   ;;  %v17537_v35 = vld [vmem:[#allocation153_spill] sm:$0xff] }
 0x8cb   : > { %7015 = vperm.xlu1 %8456, %v17520_v38  }
 0x8cc   : > { %v6320_v23 = vsel %vm17522_vm0, %v6319_v51, %v6315_v49  ;;  %8373 = vmatpush3.bf16.msra.mxu0 %v17525_v44  ;;  %v17538_v51 = vpack.c.bf16 %v17536_v52, %v17537_v35  ;;  %vm17541_vm0 = vcmask 720512   ;;  %v17551_v52 = vld [vmem:[#allocation134_spill] sm:$0xff] }
 0x8cd   : > { %v14601_v1 = vpop.permute.xlu0 %6480  ;;  %v6267_v56 = vpop.permute.xlu1 %6266  ;;  %8374 = vmatprep.subr.bf16.mxu0 %v17346_v5  ;;  %v6325_v21 = vsel %vm17528_vm6, %v6324_v50, %v6320_v23  ;;  %v17539_v23 = vld [vmem:[#allocation193_spill] sm:$0xff]  ;;  %v17542_v50 = vld [vmem:[#allocation156_spill] sm:$0xff]  ;;  %vm17568_vm6 = vcmask 392512  }
 0x8ce   : > { %v6329_v20 = vrot.slane %v6267_v56, %v11526_v0  ;;  %7090 = vperm.xlu0 %8457, %v17526_v60   ;;  %v17543_v56 = vld [vmem:[#allocation157_spill] sm:$0xff] }
 0x8cf   : > { %7021 = vperm.xlu1 %8456, %v17527_v37  }
 0x8d0   : > { %v6330_v33 = vsel %vm2743_vm9, %v6329_v20, %v6325_v21  ;;  %8375 = vmatpush3.bf16.msra.mxu0 %v17531_v25  ;;  %v17544_v20 = vpack.c.bf16 %v17542_v50, %v17543_v56  ;;  %v17555_v50 = vld [vmem:[#allocation249_spill] sm:$0xff] }
 0x8d1   : > { %v14614_v62 = vpop.permute.xlu0 %6631  ;;  %v6273_v59 = vpop.permute.xlu1 %6272  ;;  %8376 = vmatprep.subr.bf16.mxu0 %v17346_v5  ;;  %v6335_v43 = vsel %vm17534_vm12, %v6334_v14, %v6330_v33  ;;  %v17545_v33 = vld [vmem:[#allocation246_spill] sm:$0xff]  ;;  %v17556_v56 = vld [vmem:[#allocation253_spill] sm:$0xff]  ;;  %vm17574_vm12 = vcmask 458112  }
 0x8d2   : > { %v6339_v26 = vrot.slane %v6273_v59, %v11536_v8  ;;  %7096 = vperm.xlu0 %8457, %v17532_v15   ;;  %v17547_v14 = vld [vmem:[#allocation158_spill] sm:$0xff]  ;;  %v17548_v59 = vld [vmem:[#allocation159_spill] sm:$0xff] }
 0x8d3   : > { %7027 = vperm.xlu1 %8456, %v17533_v58  }
 0x8d4   : > { %v6340_v13 = vsel %vm17535_vm11, %v6339_v26, %v6335_v43  ;;  %8377 = vmatpush3.bf16.msra.mxu0 %v17538_v51  ;;  %v17549_v26 = vpack.c.bf16 %v17547_v14, %v17548_v59  ;;  %v17561_v14 = vld [vmem:[#allocation217_spill] sm:$0xff]  ;;  %vm17580_vm11 = vcmask 589312  }
 0x8d5   : > { %v14627_v22 = vpop.permute.xlu0 %6637  ;;  %v6279_v38 = vpop.permute.xlu1 %6278  ;;  %8378 = vmatprep.subr.bf16.mxu0 %v17346_v5  ;;  %v6345_v40 = vsel %vm17541_vm0, %v6344_v61, %v6340_v13  ;;  %v17550_v13 = vld [vmem:[#allocation242_spill] sm:$0xff]  ;;  %vm17581_vm0 = vcmask 654912  }
 0x8d6   : > { %v6349_v49 = vrot.slane %v6279_v38, %v11542_v29  ;;  %7102 = vperm.xlu0 %8457, %v17539_v23   ;;  %v17552_v61 = vld [vmem:[#allocation162_spill] sm:$0xff]  ;;  %v17553_v38 = vld [vmem:[#allocation163_spill] sm:$0xff] }
 0x8d7   : > { %7033 = vperm.xlu1 %8456, %v17540_v19  }
 0x8d8   : > { %v6350_v44 = vsel %vm2771_vm13, %v6349_v49, %v6345_v40  ;;  %8379 = vmatpush3.bf16.msra.mxu0 %v17544_v20  ;;  %v17554_v49 = vpack.c.bf16 %v17552_v61, %v17553_v38  ;;  %v6488_v40 = vrot.slane %v14509_v36, %v11488_v31  ;;  %v17566_v61 = vld [vmem:[#allocation258_spill] sm:$0xff] }
 0x8d9   : > { %v14640_v60 = vpop.permute.xlu0 %6643  ;;  %8380 = vmatprep.subr.bf16.mxu0 %v17346_v5  ;;  %v6355_v27 = vsel %vm2778_vm14, %v6354_v30, %v6350_v44  ;;  %v17557_v30 = vld [vmem:[#allocation166_spill] sm:$0xff] }
 0x8da   : > { %v6285_v37 = vpop.permute.xlu1 %6284  ;;  %7108 = vperm.xlu0 %8457, %v17545_v33   ;;  %v6497_v33 = vrot.slane %v14522_v55, %v11493_v24  ;;  %v6507_v55 = vrot.slane %v14535_v7, %v11506_v57  ;;  %v6517_v7 = vrot.slane %v14548_v2, %v11518_v46  ;;  %v6527_v2 = vrot.slane %v14559_v41, %v11529_v18 }
 0x8db   : > { %v6359_v21 = vrot.slane %v6285_v37, %v17021_v34  ;;  %7039 = vperm.xlu1 %8456, %v17546_v45   ;;  %v17558_v37 = vld [vmem:[#allocation167_spill] sm:$0xff]  ;;  %v6537_v41 = vrot.slane %v14575_v47, %v11539_v54  ;;  %v6547_v47 = vrot.slane %v14588_v28, %v11552_v17  ;;  %v6557_v28 = vrot.slane %v14601_v1, %v17027_v48 }
 0x8dc   : > { %8381 = vmatpush3.bf16.msra.mxu0 %v17549_v26 }
 0x8dd   : > { %v6360_v25 = vsel %vm2785_vm15, %v6359_v21, %v6355_v27  ;;  %v14653_v15 = vpop.permute.xlu0 %6649  ;;  %8382 = vmatprep.subr.bf16.mxu0 %v17346_v5  ;;  %v17559_v21 = vpack.c.bf16 %v17557_v30, %v17558_v37  ;;  %v17573_v30 = vld [vmem:[#allocation39_spill] sm:$0xff] }
 0x8de   : > { %v6291_v58 = vpop.permute.xlu1 %6290  ;;  %7114 = vperm.xlu0 %8457, %v17550_v13   ;;  %v6365_v35 = vsel %vm2792_vm1, %v6364_v42, %v6360_v25  ;;  %v17560_v25 = vld [vmem:[#allocation252_spill] sm:$0xff] }
 0x8df   : > { %v6369_v43 = vrot.slane %v6291_v58, %v17030_v3  ;;  %7045 = vperm.xlu1 %8456, %v17551_v52   ;;  %v17562_v42 = vld [vmem:[#allocation168_spill] sm:$0xff]  ;;  %v17563_v58 = vld [vmem:[#allocation169_spill] sm:$0xff] }
 0x8e0   : > { %8383 = vmatpush3.bf16.msra.mxu0 %v17554_v49 }
 0x8e1   : > { %v6370_v51 = vsel %vm2799_vm2, %v6369_v43, %v6365_v35  ;;  %v14664_v23 = vpop.permute.xlu0 %6655  ;;  %v17564_v43 = vpack.c.bf16 %v17562_v42, %v17563_v58  ;;  %v17579_v42 = vld [vmem:[#allocation185_spill] sm:$0xff] }
 0x8e2   : > { %v6371_v9 = vpack.c.b16 %v6370_v51, %v6370_v51  ;;  %v6442_v19 = vpop.permute.xlu1 %6441  ;;  %7120 = vperm.xlu0 %8457, %v17555_v50   ;;  %v17565_v51 = vld [vmem:[#allocation250_spill] sm:$0xff] }
 0x8e3   : > { %v6492_v44 = vrot.slane %v6442_v19, %v11481_v53  ;;  %7051 = vperm.xlu1 %8456, %v17556_v56   ;;  %v17570_v19 = vld [vmem:[#allocation173_spill] sm:$0xff] }
 0x8e4   : > { %8365 = vmatmul.mubr.bf16.vlgmr.msra.gmra.mrb[12].mxu1 %v6371_v9  ;;  %v17569_v9 = vld [vmem:[#allocation172_spill] sm:$0xff] }
 0x8e5   : > { %v6493_v20 = vsel %vm2701_vm3, %v6492_v44, %v6488_v40  ;;  %8389 = vmatpush3.bf16.msra.mxu1 %v17559_v21  ;;  %8404 = vmatprep.mubr.msk.bf16.mxu1 %vm17347_vm10, %v17346_v5  ;;  %v14679_v36 = vpop.permute.xlu0 %6661  ;;  %vm17567_vm10 = vcmask 326912   ;;  %v17571_v40 = vpack.c.bf16 %v17569_v9, %v17570_v19  ;;  %v17586_v9 = vld [vmem:[#allocation236_spill] sm:$0xff] }
 0x8e6   : > { %v6448_v45 = vpop.permute.xlu1 %6447  ;;  %8390 = vmatprep.subr.bf16.mxu1 %v17346_v5  ;;  %7126 = vperm.xlu0 %8457, %v17560_v25   ;;  %v6498_v59 = vsel %vm2708_vm4, %v6497_v33, %v6493_v20  ;;  %v17572_v20 = vld [vmem:[#allocation10_spill] sm:$0xff]  ;;  %v17575_v33 = vld [vmem:[#allocation176_spill] sm:$0xff] }
 0x8e7   : > { %v6502_v27 = vrot.slane %v6448_v45, %v11502_v39  ;;  %7057 = vperm.xlu1 %8456, %v17561_v14   ;;  %v17576_v45 = vld [vmem:[#allocation177_spill] sm:$0xff] }
 0x8e9   : > { %v6503_v26 = vsel %vm2715_vm5, %v6502_v27, %v6498_v59  ;;  %8391 = vmatpush3.bf16.msra.mxu1 %v17564_v43  ;;  %v14692_v13 = vpop.permute.xlu0 %6667  ;;  %v17577_v27 = vpack.c.bf16 %v17575_v33, %v17576_v45  ;;  %v17592_v33 = vld [vmem:[#allocation235_spill] sm:$0xff] }
 0x8ea   : > { %v6454_v52 = vpop.permute.xlu1 %6453  ;;  %8392 = vmatprep.subr.bf16.mxu1 %v17346_v5  ;;  %7132 = vperm.xlu0 %8457, %v17565_v51   ;;  %v6508_v38 = vsel %vm17567_vm10, %v6507_v55, %v6503_v26  ;;  %v17578_v26 = vld [vmem:[#allocation90_spill] sm:$0xff]  ;;  %vm17587_vm10 = vcmask 720512  }
 0x8eb   : > { %v6512_v35 = vrot.slane %v6454_v52, %v11515_v6  ;;  %7063 = vperm.xlu1 %8456, %v17566_v61   ;;  %v17582_v55 = vld [vmem:[#allocation178_spill] sm:$0xff]  ;;  %v17583_v52 = vld [vmem:[#allocation179_spill] sm:$0xff] }
 0x8ed   : > { %v6513_v49 = vsel %vm17568_vm6, %v6512_v35, %v6508_v38  ;;  %8393 = vmatpush3.bf16.msra.mxu1 %v17571_v40  ;;  %v14705_v44 = vpop.permute.xlu0 %6673  ;;  %v17584_v35 = vpack.c.bf16 %v17582_v55, %v17583_v52  ;;  %v17597_v55 = vld [vmem:[#allocation38_spill] sm:$0xff]  ;;  %vm17607_vm6 = vcmask 326912  }
 0x8ee   : > { %v6460_v50 = vpop.permute.xlu1 %6459  ;;  %8394 = vmatprep.subr.bf16.mxu1 %v17346_v5  ;;  %7138 = vperm.xlu0 %8457, %v17572_v20   ;;  %v6518_v37 = vsel %vm17574_vm12, %v6517_v7, %v6513_v49  ;;  %v17585_v49 = vld [vmem:[#allocation181_spill] sm:$0xff]  ;;  %v17588_v7 = vld [vmem:[#allocation182_spill] sm:$0xff]  ;;  %vm17608_vm12 = vcmask 392512  }
 0x8ef   : > { %v6522_v56 = vrot.slane %v6460_v50, %v11526_v0  ;;  %7069 = vperm.xlu1 %8456, %v17573_v30   ;;  %v17589_v50 = vld [vmem:[#allocation183_spill] sm:$0xff] }
 0x8f1   : > { %v6523_v21 = vsel %vm2743_vm9, %v6522_v56, %v6518_v37  ;;  %8395 = vmatpush3.bf16.msra.mxu1 %v17577_v27  ;;  %v14718_v25 = vpop.permute.xlu0 %6952  ;;  %v17590_v56 = vpack.c.bf16 %v17588_v7, %v17589_v50  ;;  %v17602_v7 = vld [vmem:[#allocation36_spill] sm:$0xff] }
 0x8f2   : > { %v6466_v14 = vpop.permute.xlu1 %6465  ;;  %8396 = vmatprep.subr.bf16.mxu1 %v17346_v5  ;;  %7144 = vperm.xlu0 %8457, %v17578_v26   ;;  %v6528_v58 = vsel %vm17580_vm11, %v6527_v2, %v6523_v21  ;;  %v17591_v21 = vld [vmem:[#allocation227_spill] sm:$0xff]  ;;  %v17593_v2 = vld [vmem:[#allocation186_spill] sm:$0xff]  ;;  %vm17611_vm11 = vcmask 458112  }
 0x8f3   : > { %v6532_v59 = vrot.slane %v6466_v14, %v11536_v8  ;;  %7075 = vperm.xlu1 %8456, %v17579_v42   ;;  %v17594_v14 = vld [vmem:[#allocation187_spill] sm:$0xff] }
 0x8f5   : > { %v6533_v43 = vsel %vm17581_vm0, %v6532_v59, %v6528_v58  ;;  %8397 = vmatpush3.bf16.msra.mxu1 %v17584_v35  ;;  %v14731_v51 = vpop.permute.xlu0 %6958  ;;  %v17595_v59 = vpack.c.bf16 %v17593_v2, %v17594_v14  ;;  %vm17614_vm0 = vcmask 589312  }
 0x8f6   : > { %v6472_v61 = vpop.permute.xlu1 %6471  ;;  %8398 = vmatprep.subr.bf16.mxu1 %v17346_v5  ;;  %7150 = vperm.xlu0 %8457, %v17585_v49   ;;  %v6538_v19 = vsel %vm17587_vm10, %v6537_v41, %v6533_v43  ;;  %v17596_v43 = vld [vmem:[#allocation269_spill] sm:$0xff]  ;;  %v17598_v41 = vld [vmem:[#allocation188_spill] sm:$0xff]  ;;  %vm17615_vm10 = vcmask 654912  }
 0x8f7   : > { %v6542_v38 = vrot.slane %v6472_v61, %v11542_v29  ;;  %7081 = vperm.xlu1 %8456, %v17586_v9   ;;  %v17599_v61 = vld [vmem:[#allocation189_spill] sm:$0xff] }
 0x8f9   : > { %v6543_v40 = vsel %vm2771_vm13, %v6542_v38, %v6538_v19  ;;  %8399 = vmatpush3.bf16.msra.mxu1 %v17590_v56  ;;  %v14744_v20 = vpop.permute.xlu0 %6964  ;;  %v17600_v38 = vpack.c.bf16 %v17598_v41, %v17599_v61  ;;  %v6690_v56 = vrot.slane %v14627_v22, %v11493_v24  ;;  %v17610_v41 = vld [vmem:[#allocation248_spill] sm:$0xff] }
 0x8fa   : > { %v6478_v30 = vpop.permute.xlu1 %6477  ;;  %8400 = vmatprep.subr.bf16.mxu1 %v17346_v5  ;;  %7156 = vperm.xlu0 %8457, %v17591_v21   ;;  %v6548_v45 = vsel %vm2778_vm14, %v6547_v47, %v6543_v40  ;;  %v17601_v40 = vld [vmem:[#allocation151_spill] sm:$0xff]  ;;  %v17603_v21 = vld [vmem:[#allocation270_spill] sm:$0xff] }
 0x8fb   : > { %v6552_v37 = vrot.slane %v6478_v30, %v17021_v34  ;;  %7087 = vperm.xlu1 %8456, %v17592_v33  }
 0x8fd   : > { %v6553_v27 = vsel %vm2785_vm15, %v6552_v37, %v6548_v45  ;;  %8401 = vmatpush3.bf16.msra.mxu1 %v17595_v59  ;;  %v14757_v26 = vpop.permute.xlu0 %6970  ;;  %v17605_v59 = vld [vmem:[#allocation222_spill] sm:$0xff] }
 0x8fe   : > { %v6484_v42 = vpop.permute.xlu1 %6483  ;;  %8402 = vmatprep.subr.bf16.mxu1 %v17346_v5  ;;  %7162 = vperm.xlu0 %8457, %v17596_v43   ;;  %v6558_v52 = vsel %vm2792_vm1, %v6557_v28, %v6553_v27  ;;  %v6681_v5 = vrot.slane %v14614_v62, %v11488_v31  ;;  %v17604_v62 = vld [vmem:[#allocation240_spill] sm:$0xff]  ;;  %v6700_v27 = vrot.slane %v14640_v60, %v11506_v57  ;;  %v17606_v28 = vld [vmem:[#allocation247_spill] sm:$0xff] }
 0x8ff   : > { %v6562_v58 = vrot.slane %v6484_v42, %v17030_v3  ;;  %7093 = vperm.xlu1 %8456, %v17597_v55   ;;  %v6710_v43 = vrot.slane %v14653_v15, %v11518_v46 }
 0x901   : > { %v6563_v35 = vsel %vm2799_vm2, %v6562_v58, %v6558_v52  ;;  %8403 = vmatpush3.bf16.msra.mxu1 %v17600_v38  ;;  %v14768_v49 = vpop.permute.xlu0 %6976 }
 0x902   : > { %v6564_v1 = vpack.c.b16 %v6563_v35, %v6563_v35  ;;  %v6635_v9 = vpop.permute.xlu1 %6634  ;;  %7168 = vperm.xlu0 %8457, %v17601_v40   ;;  %v17609_v35 = vld [vmem:[#allocation213_spill] sm:$0xff]  ;;  %v17613_v40 = vld [vmem:[#allocation234_spill] sm:$0xff] }
 0x903   : > { %v6685_v19 = vrot.slane %v6635_v9, %v11481_v53  ;;  %7099 = vperm.xlu1 %8456, %v17602_v7  }
 0x904   : > { %8385 = vmatmul.mubr.bf16.vlgmr.msra.gmra.mrb[16].mxu0 %v6564_v1  ;;  %v6720_v1 = vrot.slane %v14664_v23, %v11529_v18 }
 0x905   : > { %v6686_v50 = vsel %vm2701_vm3, %v6685_v19, %v6681_v5  ;;  %v14778_v47 = vpop.permute.xlu0 %6982  ;;  %v17612_v19 = vld [vmem:[#allocation285_spill] sm:$0xff] }
 0x906   : > { %v6641_v30 = vpop.permute.xlu1 %6640  ;;  %7174 = vperm.xlu0 %8457, %v17603_v21   ;;  %v6691_v33 = vsel %vm2708_vm4, %v6690_v56, %v6686_v50  ;;  %v6730_v56 = vrot.slane %v14679_v36, %v11539_v54  ;;  %v17616_v21 = vld [vmem:[#allocation161_spill] sm:$0xff] }
 0x907   : > { %v6695_v37 = vrot.slane %v6641_v30, %v11502_v39  ;;  %7105 = vperm.xlu1 %8456, %v17604_v62   ;;  %v17617_v62 = vld [vmem:[#allocation290_spill] sm:$0xff] }
 0x909   : > { %v6696_v45 = vsel %vm2715_vm5, %v6695_v37, %v6691_v33  ;;  %v14787_v2 = vpop.permute.xlu0 %6988 }
 0x90a   : > { %v6647_v14 = vpop.permute.xlu1 %6646  ;;  %7180 = vperm.xlu0 %8457, %v17605_v59   ;;  %v6701_v42 = vsel %vm17607_vm6, %v6700_v27, %v6696_v45  ;;  %vm17618_vm6 = vcmask 720512   ;;  %v6740_v59 = vrot.slane %v14692_v13, %v11552_v17 }
 0x90b   : > { %v6705_v22 = vrot.slane %v6647_v14, %v11515_v6  ;;  %7111 = vperm.xlu1 %8456, %v17606_v28  }
 0x90d   : > { %v6706_v58 = vsel %vm17608_vm12, %v6705_v22, %v6701_v42  ;;  %v14796_v55 = vpop.permute.xlu0 %6994  ;;  %vm17634_vm12 = vcmask 1041409  }
 0x90e   : > { %v6653_v52 = vpop.permute.xlu1 %6652  ;;  %7186 = vperm.xlu0 %8457, %v17609_v35   ;;  %v6711_v61 = vsel %vm17611_vm11, %v6710_v43, %v6706_v58  ;;  %v17619_v43 = vld [vmem:[#allocation215_spill] sm:$0xff]  ;;  %vm17643_vm11 = vcmask 326912  }
 0x90f   : > { %v6715_v60 = vrot.slane %v6653_v52, %v11526_v0  ;;  %7117 = vperm.xlu1 %8456, %v17610_v41   ;;  %v17620_v52 = vld [vmem:[#allocation9_spill] sm:$0xff]  ;;  %v6750_v41 = vrot.slane %v14705_v44, %v17027_v48 }
 0x910   : > { %v17624_v44 = vld [vmem:[#allocation229_spill] sm:$0xff] }
 0x911   : > { %v6716_v38 = vsel %vm2743_vm9, %v6715_v60, %v6711_v61  ;;  %v14805_v9 = vpop.permute.xlu0 %7000 }
 0x912   : > { %v6659_v5 = vpop.permute.xlu1 %6658  ;;  %7192 = vperm.xlu0 %8457, %v17612_v19   ;;  %v6721_v7 = vsel %vm17614_vm0, %v6720_v1, %v6716_v38  ;;  %v17621_v1 = vld [vmem:[#allocation265_spill] sm:$0xff]  ;;  %vm17644_vm0 = vcmask 392512  }
 0x913   : > { %v6725_v15 = vrot.slane %v6659_v5, %v11536_v8  ;;  %7123 = vperm.xlu1 %8456, %v17613_v40   ;;  %v17622_v5 = vld [vmem:[#allocation254_spill] sm:$0xff] }
 0x915   : > { %v6726_v50 = vsel %vm17615_vm10, %v6725_v15, %v6721_v7  ;;  %v14814_v30 = vpop.permute.xlu0 %7006  ;;  %vm17646_vm10 = vcmask 458112  }
 0x916   : > { %v6665_v37 = vpop.permute.xlu1 %6664  ;;  %7198 = vperm.xlu0 %8457, %v17616_v21   ;;  %v5442_v33 = vpop.f32.mrb[4].mxu0  ;;  %v6731_v45 = vsel %vm17618_vm6, %v6730_v56, %v6726_v50  ;;  %v17623_v56 = vld [vmem:[#allocation266_spill] sm:$0xff]  ;;  %v17625_v21 = vld [vmem:[#allocation256_spill] sm:$0xff]  ;;  %vm17648_vm6 = vcmask 589312  }
 0x917   : > { %v6735_v23 = vrot.slane %v6665_v37, %v11542_v29  ;;  %7129 = vperm.xlu1 %8456, %v17617_v62   ;;  %v8266_v27 = vpop.f32.mrb[5].mxu0  ;;  %v17626_v62 = vld [vmem:[#allocation207_spill] sm:$0xff] }
 0x918   : > { %v5445_v22 = vpop.f32.mrb[6].mxu0 }
 0x919   : > { %v6736_v14 = vsel %vm2771_vm13, %v6735_v23, %v6731_v45  ;;  %v14823_v36 = vpop.permute.xlu0 %7012  ;;  %v8267_v58 = vpop.f32.mrb[7].mxu0  ;;  %v17628_v22 = vld [vmem:[#allocation145_spill] sm:$0xff] }
 0x91a   : > { %v6671_v28 = vpop.permute.xlu1 %6670  ;;  %7204 = vperm.xlu0 %8457, %v17619_v43   ;;  %v6741_v60 = vsel %vm2778_vm14, %v6740_v59, %v6736_v14  ;;  %v17627_v14 = vld [vmem:[#allocation219_spill] sm:$0xff] }
 0x91b   : > { %v6745_v42 = vrot.slane %v6671_v28, %v17021_v34  ;;  %7135 = vperm.xlu1 %8456, %v17620_v52   ;;  %v17630_v58 = vld [vmem:[#allocation231_spill] sm:$0xff] }
 0x91d   : > { %v6746_v35 = vsel %vm2785_vm15, %v6745_v42, %v6741_v60  ;;  %v14832_v61 = vpop.permute.xlu0 %7018  ;;  %v17629_v42 = vld [vmem:[#allocation267_spill] sm:$0xff]  ;;  %v17631_v60 = vld [vmem:[#allocation281_spill] sm:$0xff] }
 0x91e   : > { %v6677_v13 = vpop.permute.xlu1 %6676  ;;  %7210 = vperm.xlu0 %8457, %v17621_v1   ;;  %v6751_v15 = vsel %vm2792_vm1, %v6750_v41, %v6746_v35  ;;  %v17632_v35 = vld [vmem:[#allocation209_spill] sm:$0xff] }
 0x91f   : > { %v6755_v38 = vrot.slane %v6677_v13, %v17030_v3  ;;  %7141 = vperm.xlu1 %8456, %v17622_v5  }
 0x921   : > { %v6756_v19 = vsel %vm2799_vm2, %v6755_v38, %v6751_v15  ;;  %v14839_v7 = vpop.permute.xlu0 %7024  ;;  %v17633_v38 = vld [vmem:[#allocation211_spill] sm:$0xff] }
 0x922   : > { %v6757_v40 = vpack.c.b16 %v6756_v19, %v6756_v19  ;;  %v14841_v50 = vpop.permute.xlu1 %6955  ;;  %7216 = vperm.xlu0 %8457, %v17623_v56  }
 0x923   : > { %7147 = vperm.xlu1 %8456, %v17624_v44  }
 0x924   : > { %8405 = vmatmul.mubr.bf16.vlgmr.msra.gmra.mrb[16].mxu1 %v6757_v40 }
 0x925   : > { %v14845_v37 = vpop.permute.xlu0 %7030 }
 0x926   : > { %v14847_v23 = vpop.permute.xlu1 %6961  ;;  %7222 = vperm.xlu0 %8457, %v17625_v21  }
 0x927   : > { %7153 = vperm.xlu1 %8456, %v17626_v62   ;;  %v17635_v62 = vld [vmem:[#allocation155_spill] sm:$0xff] }
 0x929   : > { %v14851_v45 = vpop.permute.xlu0 %7036 }
 0x92a   : > { %v14853_v27 = vpop.permute.xlu1 %6967  ;;  %7228 = vperm.xlu0 %8457, %v17627_v14  }
 0x92b   : > { %7159 = vperm.xlu1 %8456, %v17628_v22   ;;  %v17636_v22 = vld [vmem:[#allocation190_spill] sm:$0xff] }
 0x92d   : > { %v14857_v59 = vpop.permute.xlu0 %7042 }
 0x92e   : > { %v14859_v28 = vpop.permute.xlu1 %6973  ;;  %7234 = vperm.xlu0 %8457, %v17629_v42  }
 0x92f   : > { %7165 = vperm.xlu1 %8456, %v17630_v58   ;;  %v7417_v58 = vrot.slane %v14805_v9, %v11488_v31 }
 0x931   : > { %v14863_v43 = vpop.permute.xlu0 %7048 }
 0x932   : > { %v14865_v52 = vpop.permute.xlu1 %6979  ;;  %7240 = vperm.xlu0 %8457, %v17631_v60  }
 0x933   : > { %7171 = vperm.xlu1 %8456, %v17632_v35   ;;  %v17637_v35 = vld [vmem:[#allocation223_spill] sm:$0xff] }
 0x935   : > { %v14869_v41 = vpop.permute.xlu0 %7054 }
 0x936   : > { %v14871_v13 = vpop.permute.xlu1 %6985  ;;  %7246 = vperm.xlu0 %8457, %v13906_v32  }
 0x937   : > { %7177 = vperm.xlu1 %8456, %v17633_v38   ;;  %v5635_v1 = vpop.f32.mrb[4].mxu1 }
 0x938   : > { %v6807_v5 = vrot.slane %v5635_v1, 7  ;;  %v8286_v15 = vpop.f32.mrb[5].mxu1  ;;  %v7426_v1 = vrot.slane %v14814_v30, %v11493_v24 }
 0x939   : > { %v5638_v19 = vpop.f32.mrb[6].mxu1  ;;  %v14878_v56 = vpop.permute.xlu0 %7060 }
 0x93a   : > { %v14876_v40 = vsel %vm17634_vm12, %v6807_v5, %v5442_v33  ;;  %v14880_v44 = vpop.permute.xlu1 %6991  ;;  %v8287_v21 = vpop.f32.mrb[7].mxu1  ;;  %7252 = vperm.xlu0 %8457, %v13932_v11   ;;  %v17638_v11 = vld [vmem:[#allocation11_spill] sm:$0xff]  ;;  %v17639_v19 = vld [vmem:[#allocation277_spill] sm:$0xff]  ;;  %vm17649_vm12 = vcmask 654912  }
 0x93b   : > { %7183 = vperm.xlu1 %8456, %v17635_v62   ;;  %v17640_v21 = vld [vmem:[#allocation286_spill] sm:$0xff] }
 0x93d   : > { %v14884_v14 = vpop.permute.xlu0 %7066 }
 0x93e   : > { %v14886_v32 = vpop.permute.xlu1 %6997  ;;  %7258 = vperm.xlu0 %8457, %v13957_v12  }
 0x93f   : > { %7189 = vperm.xlu1 %8456, %v17636_v22   ;;  %v7436_v22 = vrot.slane %v14823_v36, %v11506_v57 }
 0x941   : > { %v14890_v42 = vpop.permute.xlu0 %7072 }
 0x942   : > { %v7004_v33 = vpop.permute.xlu1 %7003  ;;  %7264 = vperm.xlu0 %8457, %v17637_v35   ;;  %v17642_v35 = vld [vmem:[#allocation141_spill] sm:$0xff] }
 0x943   : > { %v7421_v60 = vrot.slane %v7004_v33, %v11481_v53  ;;  %7195 = vperm.xlu1 %8456, %v17638_v11  }
 0x945   : > { %v7422_v38 = vsel %vm2701_vm3, %v7421_v60, %v7417_v58  ;;  %v14900_v12 = vpop.permute.xlu0 %7078  ;;  %v17641_v60 = vld [vmem:[#allocation22_spill] sm:$0xff] }
 0x946   : > { %v7010_v5 = vpop.permute.xlu1 %7009  ;;  %7270 = vperm.xlu0 %8457, %v17639_v19   ;;  %v7427_v9 = vsel %vm2708_vm4, %v7426_v1, %v7422_v38  ;;  %v7446_v38 = vrot.slane %v14832_v61, %v11518_v46  ;;  %v17645_v19 = vld [vmem:[#allocation287_spill] sm:$0xff] }
 0x947   : > { %v7431_v15 = vrot.slane %v7010_v5, %v11502_v39  ;;  %7201 = vperm.xlu1 %8456, %v17640_v21  }
 0x949   : > { %v7432_v62 = vsel %vm2715_vm5, %v7431_v15, %v7427_v9  ;;  %v14909_v33 = vpop.permute.xlu0 %7084 }
 0x94a   : > { %v7016_v58 = vpop.permute.xlu1 %7015  ;;  %7291 = vperm.xlu0 %8457, %v17641_v60   ;;  %v7437_v11 = vsel %vm17643_vm11, %v7436_v22, %v7432_v62  ;;  %v7456_v62 = vrot.slane %v14839_v7, %v11529_v18  ;;  %vm17652_vm11 = vcmask 720512  }
 0x94b   : > { %v7441_v30 = vrot.slane %v7016_v58, %v11515_v6  ;;  %7207 = vperm.xlu1 %8456, %v17642_v35   ;;  %v7466_v35 = vrot.slane %v14845_v37, %v11539_v54  ;;  %v7476_v37 = vrot.slane %v14851_v45, %v11552_v17  ;;  %v7486_v45 = vrot.slane %v14857_v59, %v17027_v48 }
 0x94c   : > { %v7338_v59 = vrot.slane %v14718_v25, %v11488_v31  ;;  %v7505_v25 = vrot.slane %v14869_v41, %v11493_v24 }
 0x94d   : > { %v7442_v5 = vsel %vm17644_vm0, %v7441_v30, %v7437_v11  ;;  %v14918_v1 = vpop.permute.xlu0 %7090  ;;  %v17647_v30 = vld [vmem:[#allocation8_spill] sm:$0xff]  ;;  %vm17660_vm0 = vcmask 326912  }
 0x94e   : > { %v7022_v15 = vpop.permute.xlu1 %7021  ;;  %7297 = vperm.xlu0 %8457, %v14107_v16   ;;  %v7447_v21 = vsel %vm17646_vm10, %v7446_v38, %v7442_v5  ;;  %v17650_v38 = vld [vmem:[#allocation33_spill] sm:$0xff]  ;;  %vm17661_vm10 = vmmov %vm17660_vm0 }
 0x94f   : > { %v7451_v36 = vrot.slane %v7022_v15, %v11526_v0  ;;  %7213 = vperm.xlu1 %8456, %v17645_v19   ;;  %v17651_v15 = vld [vmem:[#allocation201_spill] sm:$0xff] }
 0x951   : > { %v7452_v9 = vsel %vm2743_vm9, %v7451_v36, %v7447_v21  ;;  %v14927_v22 = vpop.permute.xlu0 %7096 }
 0x952   : > { %v7028_v58 = vpop.permute.xlu1 %7027  ;;  %7303 = vperm.xlu0 %8457, %v14131_v10   ;;  %v7457_v16 = vsel %vm17648_vm6, %v7456_v62, %v7452_v9  ;;  %vm17664_vm6 = vcmask 392512  }
 0x953   : > { %v7461_v61 = vrot.slane %v7028_v58, %v11536_v8  ;;  %7219 = vperm.xlu1 %8456, %v17647_v30  }
 0x955   : > { %v7462_v60 = vsel %vm17649_vm12, %v7461_v61, %v7457_v16  ;;  %v14936_v11 = vpop.permute.xlu0 %7102  ;;  %vm17665_vm12 = vmmov %vm17664_vm6 }
 0x956   : > { %v7034_v5 = vpop.permute.xlu1 %7033  ;;  %7309 = vperm.xlu0 %8457, %v17650_v38   ;;  %v7467_v10 = vsel %vm17652_vm11, %v7466_v35, %v7462_v60  ;;  %v17653_v38 = vld [vmem:[#allocation195_spill] sm:$0xff]  ;;  %v17654_v60 = vld [vmem:[#allocation280_spill] sm:$0xff]  ;;  %vm17666_vm11 = vcmask 458112  }
 0x957   : > { %v7471_v7 = vrot.slane %v7034_v5, %v11542_v29  ;;  %7225 = vperm.xlu1 %8456, %v17651_v15   ;;  %v5828_v36 = vpop.f32.mrb[8].mxu0 }
 0x958   : > { %v6809_v19 = vrot.slane %v5828_v36, 6  ;;  %v8306_v21 = vpop.f32.mrb[9].mxu0 }
 0x959   : > { %v7472_v9 = vsel %vm2771_vm13, %v7471_v7, %v7467_v10  ;;  %v5831_v62 = vpop.f32.mrb[10].mxu0  ;;  %v14949_v61 = vpop.permute.xlu0 %7108  ;;  %v17655_v10 = vld [vmem:[#allocation131_spill] sm:$0xff] }
 0x95a   : > { %v14947_v58 = vsel %vm3356_vm7, %v6809_v19, %v14876_v40  ;;  %v7040_v30 = vpop.permute.xlu1 %7039  ;;  %v8307_v5 = vpop.f32.mrb[11].mxu0  ;;  %7315 = vperm.xlu0 %8457, %v17653_v38   ;;  %v7477_v35 = vsel %vm2778_vm14, %v7476_v37, %v7472_v9  ;;  %v7342_v19 = vrot.slane %v14841_v50, %v11481_v53  ;;  %v7352_v38 = vrot.slane %v14847_v23, %v11502_v39  ;;  %v17659_v23 = vld [vmem:[#allocation268_spill] sm:$0xff] }
 0x95b   : > { %v7481_v16 = vrot.slane %v7040_v30, %v17021_v34  ;;  %7231 = vperm.xlu1 %8456, %v17654_v60   ;;  %v7496_v30 = vrot.slane %v14863_v43, %v11488_v31  ;;  %v17657_v5 = vld [vmem:[#allocation289_spill] sm:$0xff]  ;;  %v7347_v60 = vrot.slane %v14731_v51, %v11493_v24  ;;  %v7362_v51 = vrot.slane %v14853_v27, %v11515_v6  ;;  %v17663_v27 = vld [vmem:[#allocation92_spill] sm:$0xff] }
 0x95c   : > { %v7343_v50 = vsel %vm2701_vm3, %v7342_v19, %v7338_v59  ;;  %v7515_v19 = vrot.slane %v14878_v56, %v11506_v57 }
 0x95d   : > { %v7482_v7 = vsel %vm2785_vm15, %v7481_v16, %v7477_v35  ;;  %v14958_v15 = vpop.permute.xlu0 %7114  ;;  %v17656_v16 = vld [vmem:[#allocation273_spill] sm:$0xff] }
 0x95e   : > { %v7046_v40 = vpop.permute.xlu1 %7045  ;;  %7318 = vperm.xlu0 %8457, %v14190_v63   ;;  %v7487_v21 = vsel %vm2792_vm1, %v7486_v45, %v7482_v7 }
 0x95f   : > { %v7491_v36 = vrot.slane %v7046_v40, %v17030_v3  ;;  %7237 = vperm.xlu1 %8456, %v17655_v10   ;;  %v7348_v40 = vsel %vm2708_vm4, %v7347_v60, %v7343_v50  ;;  %v17658_v10 = vld [vmem:[#allocation196_spill] sm:$0xff] }
 0x960   : > { %v7353_v41 = vsel %vm2715_vm5, %v7352_v38, %v7348_v40  ;;  %v17662_v50 = vld [vmem:[#allocation288_spill] sm:$0xff]  ;;  %v7525_v38 = vrot.slane %v14884_v14, %v11518_v46 }
 0x961   : > { %v14967_v9 = vsel %vm2799_vm2, %v7491_v36, %v7487_v21  ;;  %v14971_v62 = vpop.permute.xlu0 %7120  ;;  %v7357_v21 = vrot.slane %v14744_v20, %v11506_v57  ;;  %v7372_v20 = vrot.slane %v14859_v28, %v11526_v0  ;;  %v17668_v28 = vld [vmem:[#allocation282_spill] sm:$0xff] }
 0x962   : > { %v7052_v37 = vpop.permute.xlu1 %7051  ;;  %7321 = vperm.xlu0 %8457, %v17656_v16  }
 0x963   : > { %v7500_v63 = vrot.slane %v7052_v37, %v11481_v53  ;;  %7243 = vperm.xlu1 %8456, %v17657_v5   ;;  %v7358_v16 = vsel %vm17661_vm10, %v7357_v21, %v7353_v41  ;;  %vm17669_vm10 = vcmask 589312  }
 0x964   : > { %v7363_v56 = vsel %vm17664_vm6, %v7362_v51, %v7358_v16  ;;  %vm17670_vm6 = vmmov %vm17669_vm10 }
 0x965   : > { %v7501_v35 = vsel %vm2701_vm3, %v7500_v63, %v7496_v30  ;;  %v14986_v43 = vpop.permute.xlu0 %7126 }
 0x966   : > { %v7506_v7 = vsel %vm2708_vm4, %v7505_v25, %v7501_v35  ;;  %v7058_v45 = vpop.permute.xlu1 %7057  ;;  %7324 = vperm.xlu0 %8457, %v17658_v10   ;;  %v7367_v25 = vrot.slane %v14757_v26, %v11518_v46  ;;  %v7382_v26 = vrot.slane %v14865_v52, %v11536_v8  ;;  %v7535_v10 = vrot.slane %v14890_v42, %v11529_v18 }
 0x967   : > { %v7510_v36 = vrot.slane %v7058_v45, %v11502_v39  ;;  %7249 = vperm.xlu1 %8456, %v17659_v23   ;;  %v7377_v23 = vrot.slane %v14768_v49, %v11529_v18  ;;  %v7392_v42 = vrot.slane %v14871_v13, %v11542_v29  ;;  %v7545_v49 = vrot.slane %v14900_v12, %v11539_v54 }
 0x968   : > { %v7402_v12 = vrot.slane %v14880_v44, %v17021_v34 }
 0x969   : > { %v7511_v59 = vsel %vm2715_vm5, %v7510_v36, %v7506_v7  ;;  %v15001_v37 = vpop.permute.xlu0 %7132 }
 0x96a   : > { %v7516_v30 = vsel %vm17660_vm0, %v7515_v19, %v7511_v59  ;;  %v7064_v63 = vpop.permute.xlu1 %7063  ;;  %7327 = vperm.xlu0 %8457, %v17662_v50   ;;  %vm17667_vm0 = vmmov %vm17666_vm11 }
 0x96b   : > { %v7520_v5 = vrot.slane %v7064_v63, %v11515_v6  ;;  %7255 = vperm.xlu1 %8456, %v17663_v27   ;;  %v7368_v40 = vsel %vm17667_vm0, %v7367_v25, %v7363_v56  ;;  %v7387_v63 = vrot.slane %v14778_v47, %v11539_v54  ;;  %vm17674_vm0 = vcmask 720512  }
 0x96c   : > { %v7373_v14 = vsel %vm2743_vm9, %v7372_v20, %v7368_v40  ;;  %v7555_v47 = vrot.slane %v14909_v33, %v11552_v17 }
 0x96d   : > { %v7521_v60 = vsel %vm17665_vm12, %v7520_v5, %v7516_v30  ;;  %v15016_v35 = vpop.permute.xlu0 %7138  ;;  %v7378_v21 = vsel %vm17670_vm6, %v7377_v23, %v7373_v14  ;;  %v17671_v30 = vld [vmem:[#allocation135_spill] sm:$0xff]  ;;  %vm17672_vm12 = vcmask 654912   ;;  %vm17679_vm6 = vcmask 1041409  }
 0x96e   : > { %v7526_v7 = vsel %vm17666_vm11, %v7525_v38, %v7521_v60  ;;  %v7070_v45 = vpop.permute.xlu1 %7069  ;;  %7330 = vperm.xlu0 %8457, %v14239_v4   ;;  %v7383_v52 = vsel %vm17672_vm12, %v7382_v26, %v7378_v21  ;;  %vm17673_vm11 = vmmov %vm17672_vm12  ;;  %v17676_v38 = vld [vmem:[#allocation284_spill] sm:$0xff]  ;;  %vm17684_vm12 = vcmask 392512  }
 0x96f   : > { %v7530_v36 = vrot.slane %v7070_v45, %v11526_v0  ;;  %7261 = vperm.xlu1 %8456, %v17668_v28   ;;  %v7397_v45 = vrot.slane %v14787_v2, %v11552_v17 }
 0x971   : > { %v7531_v41 = vsel %vm2743_vm9, %v7530_v36, %v7526_v7  ;;  %v15031_v51 = vpop.permute.xlu0 %7144 }
 0x972   : > { %v7536_v19 = vsel %vm17669_vm10, %v7535_v10, %v7531_v41  ;;  %v7076_v4 = vpop.permute.xlu1 %7075  ;;  %vm17675_vm10 = vmmov %vm17674_vm0  ;;  %v17677_v41 = vld [vmem:[#allocation104_spill] sm:$0xff] }
 0x973   : > { %v7540_v59 = vrot.slane %v7076_v4, %v11536_v8  ;;  %7267 = vperm.xlu1 %8456, %v17671_v30   ;;  %v7388_v56 = vsel %vm17675_vm10, %v7387_v63, %v7383_v52  ;;  %v7407_v4 = vrot.slane %v14796_v55, %v17027_v48  ;;  %v17678_v63 = vld [vmem:[#allocation31_spill] sm:$0xff]  ;;  %vm17689_vm10 = vcmask 654912  }
 0x974   : > { %v7393_v25 = vsel %vm2771_vm13, %v7392_v42, %v7388_v56  ;;  %v7575_v56 = vrot.slane %v14927_v22, %v11488_v31  ;;  %v7594_v22 = vrot.slane %v14949_v61, %v11506_v57 }
 0x975   : > { %v7541_v16 = vsel %vm17673_vm11, %v7540_v59, %v7536_v19  ;;  %v15045_v5 = vpop.permute.xlu0 %7150  ;;  %v7398_v10 = vsel %vm2778_vm14, %v7397_v45, %v7393_v25  ;;  %v7412_v19 = vrot.slane %v14886_v32, %v17030_v3  ;;  %vm17685_vm11 = vcmask 458112  }
 0x976   : > { %v7546_v50 = vsel %vm17674_vm0, %v7545_v49, %v7541_v16  ;;  %v7082_v27 = vpop.permute.xlu1 %7081  ;;  %v6021_v13 = vpop.f32.mrb[8].mxu1  ;;  %v7403_v2 = vsel %vm2785_vm15, %v7402_v12, %v7398_v10  ;;  %v7604_v10 = vrot.slane %v14958_v15, %v11518_v46  ;;  %vm17687_vm0 = vcmask 589312  }
 0x977   : > { %v7550_v20 = vrot.slane %v7082_v27, %v11542_v29  ;;  %7288 = vperm.xlu1 %8456, %v17676_v38   ;;  %v6811_v60 = vrot.slane %v6021_v13, 5  ;;  %v8326_v7 = vpop.f32.mrb[9].mxu1  ;;  %v7408_v42 = vsel %vm2792_vm1, %v7407_v4, %v7403_v2  ;;  %v17680_v38 = vld [vmem:[#allocation271_spill] sm:$0xff]  ;;  %v7584_v13 = vrot.slane %v14936_v11, %v11493_v24 }
 0x978   : > { %v6024_v36 = vpop.f32.mrb[10].mxu1  ;;  %v7413_v32 = vsel %vm2799_vm2, %v7412_v19, %v7408_v42  ;;  %v17681_v7 = vld [vmem:[#allocation272_spill] sm:$0xff]  ;;  %v17686_v19 = vld [vmem:[#allocation257_spill] sm:$0xff] }
 0x979   : > { %v7551_v40 = vsel %vm2771_vm13, %v7550_v20, %v7546_v50  ;;  %v15061_v28 = vsel %vm3358_vm8, %v6811_v60, %v14947_v58  ;;  %v15063_v14 = vpop.permute.xlu0 %7156  ;;  %v8327_v23 = vpop.f32.mrb[11].mxu1  ;;  %v7565_v58 = vrot.slane %v14918_v1, %v17027_v48  ;;  %v7967_v1 = vsel %vm17679_vm6, %v14967_v9, %v7413_v32  ;;  %v17688_v42 = vld [vmem:[#allocation125_spill] sm:$0xff] }
 0x97a   : > { %v7556_v26 = vsel %vm2778_vm14, %v7555_v47, %v7551_v40  ;;  %v7088_v44 = vpop.permute.xlu1 %7087  ;;  %vm17690_vm6 = vcmask 720512  }
 0x97b   : > { %v7560_v33 = vrot.slane %v7088_v44, %v17021_v34  ;;  %7294 = vperm.xlu1 %8456, %v17677_v41   ;;  %v17683_v44 = vld [vmem:[#allocation12_spill] sm:$0xff] }
 0x97d   : > { %v7561_v21 = vsel %vm2785_vm15, %v7560_v33, %v7556_v26  ;;  %v15077_v59 = vpop.permute.xlu0 %7162 }
 0x97e   : > { %v7566_v30 = vsel %vm2792_vm1, %v7565_v58, %v7561_v21  ;;  %v7094_v52 = vpop.permute.xlu1 %7093  ;;  %v7614_v58 = vrot.slane %v14971_v62, %v11529_v18 }
 0x97f   : > { %v7570_v49 = vrot.slane %v7094_v52, %v17030_v3  ;;  %7300 = vperm.xlu1 %8456, %v17678_v63  }
 0x981   : > { %v7571_v55 = vsel %vm2799_vm2, %v7570_v49, %v7566_v30  ;;  %v15088_v50 = vpop.permute.xlu0 %7168  ;;  %v7624_v49 = vrot.slane %v14986_v43, %v11539_v54 }
 0x982   : > { %v7968_v16 = vsel %vm3356_vm7, %v7571_v55, %v7967_v1  ;;  %v7100_v27 = vpop.permute.xlu1 %7099  ;;  %vm17682_vm7 = vcmask 326912  }
 0x983   : > { %v7579_v20 = vrot.slane %v7100_v27, %v11481_v53  ;;  %7306 = vperm.xlu1 %8456, %v17680_v38   ;;  %v17691_v27 = vld [vmem:[#allocation283_spill] sm:$0xff] }
 0x985   : > { %v7580_v25 = vsel %vm2701_vm3, %v7579_v20, %v7575_v56  ;;  %v15097_v9 = vpop.permute.xlu0 %7174  ;;  %v7634_v20 = vrot.slane %v15001_v37, %v11552_v17 }
 0x986   : > { %v7585_v12 = vsel %vm2708_vm4, %v7584_v13, %v7580_v25  ;;  %v7106_v47 = vpop.permute.xlu1 %7105 }
 0x987   : > { %v7589_v60 = vrot.slane %v7106_v47, %v11502_v39  ;;  %7312 = vperm.xlu1 %8456, %v17681_v7  }
 0x989   : > { %v7590_v45 = vsel %vm2715_vm5, %v7589_v60, %v7585_v12  ;;  %v15105_v40 = vpop.permute.xlu0 %7180 }
 0x98a   : > { %v7595_v11 = vsel %vm17682_vm7, %v7594_v22, %v7590_v45  ;;  %v7112_v36 = vpop.permute.xlu1 %7111  ;;  %vm17692_vm7 = vcmask 1044484   ;;  %v17693_v45 = vld [vmem:[#allocation279_spill] sm:$0xff] }
 0x98b   : > { %v7599_v26 = vrot.slane %v7112_v36, %v11515_v6  ;;  %7273 = vperm.xlu1 %8456, %v17683_v44  }
 0x98d   : > { %v7600_v33 = vsel %vm17684_vm12, %v7599_v26, %v7595_v11  ;;  %v15113_v23 = vpop.permute.xlu0 %7186  ;;  %v7644_v11 = vrot.slane %v15016_v35, %v17027_v48 }
 0x98e   : > { %v7605_v61 = vsel %vm17685_vm11, %v7604_v10, %v7600_v33  ;;  %v7118_v41 = vpop.permute.xlu1 %7117  ;;  %v17694_v10 = vld [vmem:[#allocation20_spill] sm:$0xff] }
 0x98f   : > { %v7609_v2 = vrot.slane %v7118_v41, %v11526_v0  ;;  %7276 = vperm.xlu1 %8456, %v17686_v19  }
 0x991   : > { %v7610_v4 = vsel %vm2743_vm9, %v7609_v2, %v7605_v61  ;;  %v15121_v21 = vpop.permute.xlu0 %7192  ;;  %v7654_v2 = vrot.slane %v15031_v51, %v11488_v31 }
 0x992   : > { %v7615_v15 = vsel %vm17687_vm0, %v7614_v58, %v7610_v4  ;;  %v7124_v30 = vpop.permute.xlu1 %7123  ;;  %v7663_v58 = vrot.slane %v15045_v5, %v11493_v24  ;;  %v7683_v5 = vrot.slane %v15077_v59, %v11518_v46  ;;  %v7703_v59 = vrot.slane %v15097_v9, %v11539_v54 }
 0x993   : > { %v7619_v52 = vrot.slane %v7124_v30, %v11536_v8  ;;  %7279 = vperm.xlu1 %8456, %v17688_v42  }
 0x995   : > { %v7620_v63 = vsel %vm17689_vm10, %v7619_v52, %v7615_v15  ;;  %v15130_v62 = vpop.permute.xlu0 %7198 }
 0x996   : > { %v7625_v32 = vsel %vm17690_vm6, %v7624_v49, %v7620_v63  ;;  %v7130_v1 = vpop.permute.xlu1 %7129  ;;  %v6214_v56 = vpop.f32.mrb[12].mxu0 }
 0x997   : > { %v7629_v55 = vrot.slane %v7130_v1, %v11542_v29  ;;  %7282 = vperm.xlu1 %8456, %v17691_v27   ;;  %v6813_v38 = vrot.slane %v6214_v56, 4  ;;  %v8346_v13 = vpop.f32.mrb[13].mxu0 }
 0x998   : > { %v6217_v43 = vpop.f32.mrb[14].mxu0 }
 0x999   : > { %v7630_v25 = vsel %vm2771_vm13, %v7629_v55, %v7625_v32  ;;  %v6814_v12 = vsel %vm17692_vm7, %v6813_v38, %v15061_v28  ;;  %v8347_v22 = vpop.f32.mrb[15].mxu0  ;;  %v15144_v37 = vpop.permute.xlu0 %7204  ;;  %vm17696_vm7 = vcmask 1045509  }
 0x99a   : > { %v7635_v47 = vsel %vm2778_vm14, %v7634_v20, %v7630_v25  ;;  %v7136_v60 = vpop.permute.xlu1 %7135  ;;  %v7693_v20 = vrot.slane %v15088_v50, %v11529_v18 }
 0x99b   : > { %v7639_v7 = vrot.slane %v7136_v60, %v17021_v34  ;;  %7285 = vperm.xlu1 %8456, %v17693_v45  }
 0x99d   : > { %v7640_v36 = vsel %vm2785_vm15, %v7639_v7, %v7635_v47  ;;  %v15154_v35 = vpop.permute.xlu0 %7210 }
 0x99e   : > { %v7645_v26 = vsel %vm2792_vm1, %v7644_v11, %v7640_v36  ;;  %v7142_v44 = vpop.permute.xlu1 %7141  ;;  %v7713_v11 = vrot.slane %v15105_v40, %v11552_v17 }
 0x99f   : > { %v7649_v28 = vrot.slane %v7142_v44, %v17030_v3  ;;  %7333 = vperm.xlu1 %8456, %v17694_v10  }
 0x9a1   : > { %v7650_v33 = vsel %vm2799_vm2, %v7649_v28, %v7645_v26  ;;  %v15164_v42 = vpop.permute.xlu0 %7216 }
 0x9a2   : > { %v7969_v61 = vsel %vm3358_vm8, %v7650_v33, %v7968_v16  ;;  %v7148_v41 = vpop.permute.xlu1 %7147  ;;  %v7673_v16 = vrot.slane %v15063_v14, %v11506_v57  ;;  %vm17695_vm8 = vcmask 326912  }
 0x9a3   : > { %v7658_v19 = vrot.slane %v7148_v41, %v11481_v53 }
 0x9a5   : > { %v7659_v4 = vsel %vm2701_vm3, %v7658_v19, %v7654_v2  ;;  %v15173_v56 = vpop.permute.xlu0 %7222 }
 0x9a6   : > { %v7664_v15 = vsel %vm2708_vm4, %v7663_v58, %v7659_v4  ;;  %v7154_v30 = vpop.permute.xlu1 %7153  ;;  %v7723_v58 = vrot.slane %v15113_v23, %v17027_v48  ;;  %v7742_v23 = vrot.slane %v15130_v62, %v11493_v24  ;;  %v7762_v62 = vrot.slane %v15154_v35, %v11518_v46 }
 0x9a7   : > { %v7668_v52 = vrot.slane %v7154_v30, %v11502_v39 }
 0x9a9   : > { %v7669_v51 = vsel %vm2715_vm5, %v7668_v52, %v7664_v15  ;;  %v15183_v47 = vpop.permute.xlu0 %7228 }
 0x9aa   : > { %v7674_v49 = vsel %vm17695_vm8, %v7673_v16, %v7669_v51  ;;  %v7160_v63 = vpop.permute.xlu1 %7159  ;;  %vm17697_vm8 = vcmask 1044484  }
 0x9ab   : > { %v7678_v32 = vrot.slane %v7160_v63, %v11515_v6 }
 0x9ad   : > { %v7679_v1 = vsel %vm17684_vm12, %v7678_v32, %v7674_v49  ;;  %v7235_v41 = vpop.permute.xlu0 %7234  ;;  %v7733_v49 = vrot.slane %v15121_v21, %v11488_v31  ;;  %vm17698_vm12 = vcmask 326912  }
 0x9ae   : > { %v7684_v55 = vsel %vm17685_vm11, %v7683_v5, %v7679_v1  ;;  %v7166_v27 = vpop.permute.xlu1 %7165  ;;  %vm17699_vm11 = vcmask 392512  }
 0x9af   : > { %v7688_v14 = vrot.slane %v7166_v27, %v11526_v0 }
 0x9b1   : > { %v7689_v38 = vsel %vm2743_vm9, %v7688_v14, %v7684_v55  ;;  %v15199_v52 = vpop.permute.xlu0 %7240 }
 0x9b2   : > { %v7694_v13 = vsel %vm17687_vm0, %v7693_v20, %v7689_v38  ;;  %v7172_v25 = vpop.permute.xlu1 %7171  ;;  %vm17700_vm0 = vcmask 458112  }
 0x9b3   : > { %v7698_v43 = vrot.slane %v7172_v25, %v11536_v8 }
 0x9b5   : > { %v7699_v60 = vsel %vm17689_vm10, %v7698_v43, %v7694_v13  ;;  %v15210_v55 = vpop.permute.xlu0 %7246  ;;  %vm17701_vm10 = vcmask 589312  }
 0x9b6   : > { %v7704_v7 = vsel %vm17690_vm6, %v7703_v59, %v7699_v60  ;;  %v7178_v22 = vpop.permute.xlu1 %7177  ;;  %vm17702_vm6 = vcmask 654912  }
 0x9b7   : > { %v7708_v45 = vrot.slane %v7178_v22, %v11542_v29  ;;  %v6407_v50 = vpop.f32.mrb[12].mxu1 }
 0x9b8   : > { %v6815_v36 = vrot.slane %v6407_v50, 3  ;;  %v8366_v26 = vpop.f32.mrb[13].mxu1 }
 0x9b9   : > { %v7709_v44 = vsel %vm2771_vm13, %v7708_v45, %v7704_v7  ;;  %v6410_v28 = vpop.f32.mrb[14].mxu1  ;;  %v15220_v13 = vpop.permute.xlu0 %7252 }
 0x9ba   : > { %v6816_v9 = vsel %vm17696_vm7, %v6815_v36, %v6814_v12  ;;  %v7714_v10 = vsel %vm2778_vm14, %v7713_v11, %v7709_v44  ;;  %v7184_v33 = vpop.permute.xlu1 %7183  ;;  %v8367_v19 = vpop.f32.mrb[15].mxu1  ;;  %v7782_v11 = vrot.slane %v15173_v56, %v11539_v54  ;;  %vm17703_vm7 = vcmask 720512  }
 0x9bb   : > { %v7718_v2 = vrot.slane %v7184_v33, %v17021_v34 }
 0x9bd   : > { %v7719_v4 = vsel %vm2785_vm15, %v7718_v2, %v7714_v10  ;;  %v15229_v50 = vpop.permute.xlu0 %7258  ;;  %v7792_v10 = vrot.slane %v15183_v47, %v11552_v17  ;;  %v7802_v47 = vrot.slane %v7235_v41, %v17027_v48 }
 0x9be   : > { %v7724_v40 = vsel %vm2792_vm1, %v7723_v58, %v7719_v4  ;;  %v7190_v15 = vpop.permute.xlu1 %7189 }
 0x9bf   : > { %v7728_v30 = vrot.slane %v7190_v15, %v17030_v3 }
 0x9c1   : > { %v7729_v12 = vsel %vm2799_vm2, %v7728_v30, %v7724_v40  ;;  %v15239_v19 = vpop.permute.xlu0 %7264 }
 0x9c2   : > { %v7970_v16 = vsel %vm17697_vm8, %v7729_v12, %v7969_v61  ;;  %v7196_v51 = vpop.permute.xlu1 %7195  ;;  %v7752_v61 = vrot.slane %v15144_v37, %v11506_v57  ;;  %v7772_v37 = vrot.slane %v15164_v42, %v11529_v18  ;;  %vm17704_vm8 = vcmask 1046534  }
 0x9c3   : > { %v7737_v63 = vrot.slane %v7196_v51, %v11481_v53 }
 0x9c5   : > { %v7738_v32 = vsel %vm2701_vm3, %v7737_v63, %v7733_v49  ;;  %v15247_v63 = vpop.permute.xlu0 %7270 }
 0x9c6   : > { %v7743_v5 = vsel %vm2708_vm4, %v7742_v23, %v7738_v32  ;;  %v7202_v1 = vpop.permute.xlu1 %7201 }
 0x9c7   : > { %v7747_v27 = vrot.slane %v7202_v1, %v11502_v39 }
 0x9c9   : > { %v7748_v14 = vsel %vm2715_vm5, %v7747_v27, %v7743_v5  ;;  %v7292_v27 = vpop.permute.xlu0 %7291 }
 0x9ca   : > { %v7753_v21 = vsel %vm17698_vm12, %v7752_v61, %v7748_v14  ;;  %v7208_v20 = vpop.permute.xlu1 %7207  ;;  %vm17705_vm12 = vcmask 1045509  }
 0x9cb   : > { %v7757_v38 = vrot.slane %v7208_v20, %v11515_v6 }
 0x9cd   : > { %v7758_v25 = vsel %vm17699_vm11, %v7757_v38, %v7753_v21  ;;  %v15261_v41 = vpop.permute.xlu0 %7297  ;;  %vm17706_vm11 = vcmask 1047559  }
 0x9ce   : > { %v7763_v43 = vsel %vm17700_vm0, %v7762_v62, %v7758_v25  ;;  %v7214_v59 = vpop.permute.xlu1 %7213  ;;  %vm17707_vm0 = vcmask 523264  }
 0x9cf   : > { %v7767_v60 = vrot.slane %v7214_v59, %v11526_v0 }
 0x9d1   : > { %v7768_v7 = vsel %vm2743_vm9, %v7767_v60, %v7763_v43  ;;  %v15268_v20 = vpop.permute.xlu0 %7303 }
 0x9d2   : > { %v7773_v22 = vsel %vm17701_vm10, %v7772_v37, %v7768_v7  ;;  %v7220_v45 = vpop.permute.xlu1 %7219 }
 0x9d3   : > { %v7777_v35 = vrot.slane %v7220_v45, %v11536_v8 }
 0x9d5   : > { %v7778_v36 = vsel %vm17702_vm6, %v7777_v35, %v7773_v22  ;;  %v15276_v62 = vpop.permute.xlu0 %7309 }
 0x9d6   : > { %v7783_v26 = vsel %vm17703_vm7, %v7782_v11, %v7778_v36  ;;  %v7226_v44 = vpop.permute.xlu1 %7225 }
 0x9d7   : > { %v7787_v28 = vrot.slane %v7226_v44, %v11542_v29  ;;  %v6600_v42 = vpop.f32.mrb[16].mxu0 }
 0x9d8   : > { %v6817_v33 = vrot.slane %v6600_v42, 2  ;;  %v8386_v2 = vpop.f32.mrb[17].mxu0 }
 0x9d9   : > { %v7788_v58 = vsel %vm2771_vm13, %v7787_v28, %v7783_v26  ;;  %v6603_v4 = vpop.f32.mrb[18].mxu0 }
 0x9da   : > { %v6818_v56 = vsel %vm17704_vm8, %v6817_v33, %v6816_v9  ;;  %v7793_v40 = vsel %vm2778_vm14, %v7792_v10, %v7788_v58  ;;  %v7232_v15 = vpop.permute.xlu1 %7231  ;;  %v8387_v12 = vpop.f32.mrb[19].mxu0 }
 0x9db   : > { %v7797_v30 = vrot.slane %v7232_v15, %v17021_v34 }
 0x9dd   : > { %v7798_v51 = vsel %vm2785_vm15, %v7797_v30, %v7793_v40 }
 0x9de   : > { %v7238_v49 = vpop.permute.xlu1 %7237  ;;  %v7803_v32 = vsel %vm2792_vm1, %v7802_v47, %v7798_v51 }
 0x9df   : > { %v7807_v23 = vrot.slane %v7238_v49, %v17030_v3 }
 0x9e1   : > { %v7808_v9 = vsel %vm2799_vm2, %v7807_v23, %v7803_v32 }
 0x9e2   : > { %v15253_v5 = vsel %vm17705_vm12, %v7808_v9, %v7970_v16  ;;  %v15255_v1 = vpop.permute.xlu1 %7243 }
 0x9e6   : > { %v15257_v61 = vpop.permute.xlu1 %7249 }
 0x9ea   : > { %v15259_v14 = vpop.permute.xlu1 %7255 }
 0x9ee   : > { %v15263_v21 = vpop.permute.xlu1 %7261 }
 0x9f2   : > { %v15270_v16 = vpop.permute.xlu1 %7267 }
 0x9f6   : > { %v7289_v38 = vpop.permute.xlu1 %7288 }
 0x9f7   : > { %v6793_v25 = vpop.f32.mrb[16].mxu1 }
 0x9f8   : > { %v6819_v43 = vrot.slane %v6793_v25, 1  ;;  %v8406_v59 = vpop.f32.mrb[17].mxu1 }
 0x9f9   : > { %v6796_v60 = vpop.f32.mrb[18].mxu1 }
 0x9fa   : > { %v6820_v37 = vsel %vm17706_vm11, %v6819_v43, %v6818_v56  ;;  %v7295_v7 = vpop.permute.xlu1 %7294  ;;  %v8407_v22 = vpop.f32.mrb[19].mxu1 }
 0x9fb   : > { %6822 = vst.msk [vmem:[%s331_s10] sm:$0xff] %vm17707_vm0, %v6820_v37 }
 0x9fc   : > { %8754 = shalt.err (!%p8751_p4)
}
 0x9fd   : > { %s8755_s10 = scalar_lea.hbm %s15283_s18, 128  ;;  %s8759_s21 = scalar_lea.hbm %s15447_s7, 256 }
 0x9fe   : > { %p8756_p7 = scmp.ne.s32.totalorder %s15283_s18, %s8755_s10  ;;  %p8760_p10 = scmp.lt.u32.totalorder %s15283_s18, %s15447_s7 }
 0x9ff   : > { %p8761_p11 = scmp.lt.u32.totalorder %s8759_s21, %s8755_s10  ;;  %p8763_p13 = scmp.lt.u32.totalorder %s8755_s10, %s15283_s18 }
 0xa00   : > { %p8757_p8 = pnand %p8756_p7, %p8926_p5 }
 0xa01   : > { %p8762_p12 = por %p8761_p11, %p8760_p10 }
 0xa02   : > { %p8758_p9 = pneg %p8757_p8 }
 0xa03   : > { %p8764_p0 = por %p8763_p13, %p8762_p12 }
 0xa05   : > { %p8765_p1 = pnand %p8764_p0, %p8758_p9 }
 0xa07   : > { %8768 = shalt.err (!%p8765_p1)
}
 0xa08   : > { %8408 = dma.vmem_to_hbm [thread:$0]  (%p8926_p5), %s15285_s12, 128, %s15283_s18, %s7977_s19   ;;  %v7316_v45 = vpop.permute.xlu0 %7315  ;;  %v7891_v35 = vrot.slane %v7289_v38, %v11488_v31  ;;  %v7900_v11 = vrot.slane %v7295_v7, %v11493_v24  ;;  %v7301_v36 = vpop.permute.xlu1 %7300  ;;  %v7895_v26 = vrot.slane %v7292_v27, %v11481_v53  ;;  %v7816_v28 = vrot.slane %v15255_v1, %v11481_v53 }
 0xa09   : > { %v7910_v10 = vrot.slane %v7301_v36, %v11506_v57  ;;  %v7905_v2 = vrot.slane %v15261_v41, %v11502_v39  ;;  %v7812_v4 = vrot.slane %v15199_v52, %v11488_v31  ;;  %v7826_v15 = vrot.slane %v15257_v61, %v11502_v39  ;;  %s338_s26 = scalar_lea.vmem [#allocation4], %s8127_s25  ;;  %s17721_s18 = sshll.u32 %s8909_s9, 7 }
 0xa0a   : > { %v7896_v44 = vsel %vm2701_vm3, %v7895_v26, %v7891_v35  ;;  %vm17708_vm10 = vcmask 326912   ;;  %v7821_v51 = vrot.slane %v15210_v55, %v11493_v24  ;;  %v7915_v47 = vrot.slane %v15268_v20, %v11515_v6  ;;  %s8008_s12 = sshll.u32 %s338_s26, 4  ;;  %s15396_s24 = scalar_lea.hbm %s15448_s8, %s17721_s18  ;;  %s15398_s12 = int_to_ptr.vmem [resolvable:$true] %s8008_s12 }
 0xa0b   : > { %v7901_v42 = vsel %vm2708_vm4, %v7900_v11, %v7896_v44  ;;  %v7817_v40 = vsel %vm2701_vm3, %v7816_v28, %v7812_v4  ;;  %vm17709_vm6 = vcmask 392512   ;;  %v7836_v39 = vrot.slane %v15259_v14, %v11515_v6  ;;  %vm17711_vm7 = vmmov %vm17708_vm10  ;;  %s7982_s25 = scalar_lea.sflag [#allocation5], %s15266_s23  ;;  %s8769_s10 = scalar_lea.vmem %s15398_s12, 128 }
 0xa0c   : > { %v7307_v33 = vpop.permute.xlu1 %7306  ;;  %v7319_v58 = vpop.permute.xlu0 %7318  ;;  %v7906_v56 = vsel %vm2715_vm5, %v7905_v2, %v7901_v42  ;;  %v7822_v31 = vsel %vm2708_vm4, %v7821_v51, %v7817_v40  ;;  %vm17710_vm3 = vcmask 458112   ;;  %v7831_v24 = vrot.slane %v15220_v13, %v11506_v57  ;;  %vm17712_vm4 = vmmov %vm17709_vm6  ;;  %p8770_p2 = scmp.ne.s32.totalorder %s15398_s12, %s8769_s10  ;;  %s8842_s9 = smov [#allocation4]  }
 0xa0d   : > { %v7911_v53 = vsel %vm17708_vm10, %v7910_v10, %v7906_v56  ;;  %v7920_v30 = vrot.slane %v7307_v33, %v11518_v46  ;;  %v7827_v23 = vsel %vm2715_vm5, %v7826_v15, %v7822_v31  ;;  %v7925_v55 = vrot.slane %v15276_v62, %v11526_v0  ;;  %vm17714_vm8 = vmmov %vm17710_vm3  ;;  %s8773_s13 = sshll.u32 %s8842_s9, 4  ;;  %s8774_s13 = int_to_ptr.vmem [resolvable:$false] %s8773_s13 }
 0xa0e   : > { %v7916_v52 = vsel %vm17709_vm6, %v7915_v47, %v7911_v53  ;;  %v7832_v27 = vsel %vm17711_vm7, %v7831_v24, %v7827_v23  ;;  %v7846_v6 = vrot.slane %v15263_v21, %v11526_v0  ;;  %vm17713_vm5 = vcmask 589312   ;;  %p8771_p3 = pnand %p8770_p2, %p8926_p5  ;;  %s8775_s17 = scalar_lea.vmem %s8774_s13, 256 }
 0xa0f   : > { %v7921_v32 = vsel %vm17710_vm3, %v7920_v30, %v7916_v52  ;;  %v7837_v41 = vsel %vm17712_vm4, %v7836_v39, %v7832_v27  ;;  %v7841_v38 = vrot.slane %v15229_v50, %v11518_v46  ;;  %v7935_v57 = vrot.slane %v7316_v45, %v11536_v8  ;;  %vm17717_vm0 = vmmov %vm17713_vm5  ;;  %p8776_p7 = scmp.lt.s32.totalorder %s15398_s12, %s8774_s13  ;;  %p8777_p8 = scmp.lt.s32.totalorder %s8775_s17, %s8769_s10 }
 0xa10   : > { %v7313_v12 = vpop.permute.xlu1 %7312  ;;  %v7322_v49 = vpop.permute.xlu0 %7321  ;;  %v7926_v61 = vsel %vm2743_vm9, %v7925_v55, %v7921_v32  ;;  %vm17715_vm12 = vcmask 654912   ;;  %v7940_v43 = vrot.slane %v7319_v58, %v11539_v54  ;;  %v7856_v0 = vrot.slane %v15270_v16, %v11536_v8  ;;  %p8772_p4 = pneg %p8771_p3 }
 0xa11   : > { %v7930_v9 = vrot.slane %v7313_v12, %v11529_v18  ;;  %v7842_v62 = vsel %vm17714_vm8, %v7841_v38, %v7837_v41  ;;  %v7851_v60 = vrot.slane %v15239_v19, %v11529_v18  ;;  %vm17716_vm11 = vcmask 720512   ;;  %vm17718_vm10 = vmmov %vm17715_vm12  ;;  %p8778_p9 = por %p8777_p8, %p8776_p7 }
 0xa12   : > { %v7847_v59 = vsel %vm2743_vm9, %v7846_v6, %v7842_v62  ;;  %v7945_v50 = vrot.slane %v7322_v49, %v11542_v29  ;;  %v7861_v11 = vrot.slane %v15247_v63, %v11539_v54  ;;  %vm17719_vm9 = vmmov %vm17716_vm11 }
 0xa13   : > { %v7931_v14 = vsel %vm17713_vm5, %v7930_v9, %v7926_v61  ;;  %v7852_v7 = vsel %vm17717_vm0, %v7851_v60, %v7847_v59  ;;  %p8779_p10 = pnand %p8778_p9, %p8772_p4 }
 0xa14   : > { %v7274_v1 = vpop.permute.xlu1 %7273  ;;  %v7325_v13 = vpop.permute.xlu0 %7324  ;;  %v7936_v25 = vsel %vm17715_vm12, %v7935_v57, %v7931_v14  ;;  %v7857_v22 = vsel %vm17718_vm10, %v7856_v0, %v7852_v7 }
 0xa15   : > { %v7941_v46 = vsel %vm17716_vm11, %v7940_v43, %v7936_v25  ;;  %v7866_v45 = vrot.slane %v7274_v1, %v11542_v29  ;;  %v7950_v18 = vrot.slane %v7325_v13, %v11552_v17  ;;  %v7862_v36 = vsel %vm17719_vm9, %v7861_v11, %v7857_v22 }
 0xa16   : > { %v7946_v8 = vsel %vm2771_vm13, %v7945_v50, %v7941_v46 }
 0xa17   : > { %v7867_v44 = vsel %vm2771_vm13, %v7866_v45, %v7862_v36  ;;  %v7951_v28 = vsel %vm2778_vm14, %v7950_v18, %v7946_v8  ;;  %vm17720_vm13 = vcmask 1046534  }
 0xa18   : > { %v7277_v20 = vpop.permute.xlu1 %7276  ;;  %v7328_v37 = vpop.permute.xlu0 %7327 }
 0xa19   : > { %v7871_v16 = vrot.slane %v7277_v20, %v11552_v17  ;;  %v7955_v54 = vrot.slane %v7328_v37, %v17021_v34 }
 0xa1b   : > { %v7872_v42 = vsel %vm2778_vm14, %v7871_v16, %v7867_v44  ;;  %v7956_v2 = vsel %vm2785_vm15, %v7955_v54, %v7951_v28  ;;  %vm17722_vm14 = vcmask 1047559  }
 0xa1c   : > { %v7280_v21 = vpop.permute.xlu1 %7279  ;;  %v7331_v63 = vpop.permute.xlu0 %7330 }
 0xa1d   : > { %v7876_v19 = vrot.slane %v7280_v21, %v17021_v34  ;;  %v7960_v58 = vrot.slane %v7331_v63, %v17027_v48 }
 0xa1f   : > { %v7877_v10 = vsel %vm2785_vm15, %v7876_v19, %v7872_v42  ;;  %v7961_v40 = vsel %vm2792_vm1, %v7960_v58, %v7956_v2 }
 0xa20   : > { %v7283_v35 = vpop.permute.xlu1 %7282 }
 0xa21   : > { %v7881_v26 = vrot.slane %v7283_v35, %v17027_v48 }
 0xa23   : > { %v7882_v33 = vsel %vm2792_vm1, %v7881_v26, %v7877_v10 }
 0xa24   : > { %v7286_v29 = vpop.permute.xlu1 %7285 }
 0xa25   : > { %v7886_v17 = vrot.slane %v7286_v29, %v17030_v3 }
 0xa27   : > { %v7887_v4 = vsel %vm2799_vm2, %v7886_v17, %v7882_v33 }
 0xa28   : > { %v7334_v56 = vpop.permute.xlu1 %7333  ;;  %v7972_v53 = vsel %vm17720_vm13, %v7887_v4, %v15253_v5 }
 0xa29   : > { %v7965_v34 = vrot.slane %v7334_v56, %v17030_v3 }
 0xa2b   : > { %v7966_v15 = vsel %vm2799_vm2, %v7965_v34, %v7961_v40 }
 0xa2c   : > { %v7973_v48 = vsel %vm17722_vm14, %v7966_v15, %v7972_v53 }
 0xa2d   : > { %7975 = vst [vmem:[%s338_s26] sm:$0xff] %v7973_v48 }
 0xa2e   : > { %8782 = shalt.err (!%p8779_p10)
}
 0xa2f   : > { %s8783_s23 = scalar_lea.hbm %s15396_s24, 128  ;;  %s8787_s26 = scalar_lea.hbm %s15448_s8, 256 }
 0xa30   : > { %p8784_p11 = scmp.ne.s32.totalorder %s15396_s24, %s8783_s23  ;;  %p8788_p0 = scmp.lt.u32.totalorder %s15396_s24, %s15448_s8 }
 0xa31   : > { %p8789_p1 = scmp.lt.u32.totalorder %s8787_s26, %s8783_s23  ;;  %p8791_p3 = scmp.lt.u32.totalorder %s8783_s23, %s15396_s24 }
 0xa32   : > { %p8785_p12 = pnand %p8784_p11, %p8926_p5 }
 0xa33   : > { %p8790_p2 = por %p8789_p1, %p8788_p0 }
 0xa34   : > { %p8786_p13 = pneg %p8785_p12 }
 0xa35   : > { %p8792_p4 = por %p8791_p3, %p8790_p2 }
 0xa37   : > { %p8793_p7 = pnand %p8792_p4, %p8786_p13 }
 0xa39   : > { %8796 = shalt.err (!%p8793_p7)
}
 0xa3a   : > { %8409 = dma.vmem_to_hbm [thread:$0]  (%p8926_p5), %s15398_s12, 128, %s15396_s24, %s7982_s25  }
 0xa3b PF: > { %p8419_p8 = scmp.ge.s32.totalorder %s8835_s30, 2  ;;  %s8020_s20 = sand.u32 1, %s8823_s27  }
 0xa3c   : > { %s8021_s10 = scalar_lea.sflag [#allocation3], %s8020_s20 }
 0xa3d   : > { %p8413_p9 = pnand %p8419_p8, %p8930_p6 }
 0xa3f   : > { %8814 = dma.done.wait (!%p8413_p9), %s8021_s10, 128  }
 0xa40   : > { %8816 = vsyncadd (!%p8413_p9), %s8021_s10, 4294967168  ;;  %s8030_s9 = scalar_lea.sflag [#allocation5], %s8020_s20 }
 0xa41   : > { %8818 = dma.done.wait (!%p8413_p9), %s8030_s9, 128  }
 0xa42   : > { %8820 = vsyncadd (!%p8413_p9), %s8030_s9, 4294967168  ;;  %p22_p5 = scmp.ge.s32.totalorder %s8913_s11, 4   ;;  %s17723_s27 = smov %s8827_s28 }
 0xa43   : > { %s17724_s28 = smov %s8831_s29  ;;  %s17725_s29 = smov %s8924_s14 }
 0xa44   : > { %s17726_s30 = smov %s8913_s11  ;;  %24 = sbr.rel (!%p22_p5) target bundleno = 5 (0x5), region = 106 }
 0xa4b   :  { %8035 = vsyncpa [#allocation3], 1 }
 0xa4c   :  { %8037 = vsyncpa [#allocation3 + $0x1], 1 }
 0xa4d   :  { %8038 = vsyncpa [#allocation5], 1 }
 0xa4e   :  { %8040 = vsyncpa [#allocation5 + $0x1], 1 }

</bundles_post_ra>
